<compile_context>
chip_gen: v7x
topology: tpu7x:2x2x1
jax: 0.10.0
libtpu: 0.0.40
codegen_flags: <defaults>
</compile_context>

<pallas_src>
import functools
import math

import jax
import jax.numpy as jnp
from jax.experimental import pallas as pl
from jax.experimental.pallas import tpu as pltpu

_PREC = jax.lax.Precision.HIGHEST
_LANE = 128
_VMEM_SPEC = pl.BlockSpec(memory_space=pltpu.MemorySpace.VMEM)


# ----------------------------------------------------------------------------
# Fused Pallas kernel: [double] LSTM stack + ReLU + FC, all in VMEM
# ----------------------------------------------------------------------------
def _make_fused_kernel(T, B, H, n_lstm, num_passes):
    """Builds the fused kernel for static (T, B, H, n_lstm, num_passes).

    Ref layout (inputs, outputs, scratch):
      x_ref      : (T, B, I)         time-major input
      h0_ref     : (n_lstm, B, H)    initial hidden
      c0_ref     : (n_lstm, B, H)    initial cell
      per layer  : wih_t (I_l, 4H), whh_t (H, 4H), b (1, 4H)
      wfc_ref    : (H, O_pad)        FC weight, lane-padded
      bfc_ref    : (1, O_pad)        FC bias, lane-padded
      q_ref      : (T*B, O_pad)      lane-dense output (time-major rows)
      hn_ref     : (n_lstm, B, H)    final hidden
      cn_ref     : (n_lstm, B, H)    final cell
      ybuf0/1    : (T, B, H)         ping-pong scratch for inter-layer activations
    """

    def kernel(*refs):
        x_ref, h0_ref, c0_ref = refs[0], refs[1], refs[2]
        lw = refs[3:3 + 3 * n_lstm]
        wfc_ref = refs[3 + 3 * n_lstm]
        bfc_ref = refs[4 + 3 * n_lstm]
        q_ref = refs[5 + 3 * n_lstm]
        hn_ref = refs[6 + 3 * n_lstm]
        cn_ref = refs[7 + 3 * n_lstm]
        ybufs = refs[8 + 3 * n_lstm: 10 + 3 * n_lstm]

        def run_layer(x2d, h, c, wih, whh, b, y_out):
            # Hoisted input projection: one big matmul for the whole sequence.
            xg = jnp.dot(x2d, wih, preferred_element_type=jnp.float32,
                         precision=_PREC) + b                      # (T*B, 4H)
            # Fully unrolled recurrence; h/c stay in vregs.
            for t in range(T):
                g = xg[t * B:(t + 1) * B, :] + jnp.dot(
                    h, whh, preferred_element_type=jnp.float32, precision=_PREC)
                sig = jax.nn.sigmoid(g)      # full-width EUP transcendental
                th = jnp.tanh(g)             # full-width EUP transcendental
                i_g = sig[:, 0:H]
                f_g = sig[:, H:2 * H]
                g_g = th[:, 2 * H:3 * H]
                o_g = sig[:, 3 * H:4 * H]
                c = f_g * c + i_g * g_g
                h = o_g * jnp.tanh(c)
                y_out[t] = h                 # per-step output (off the h/c chain)
            return h, c

        hs = [h0_ref[l] for l in range(n_lstm)]
        cs = [c0_ref[l] for l in range(n_lstm)]
        cur2d = x_ref[...].reshape(T * B, x_ref.shape[-1])

        buf = 0
        for _ in range(num_passes):
            new_h, new_c = [], []
            for l in range(n_lstm):
                wih = lw[3 * l][...]
                whh = lw[3 * l + 1][...]
                b = lw[3 * l + 2][...]
                hT, cT = run_layer(cur2d, hs[l], cs[l], wih, whh, b, ybufs[buf])
                new_h.append(hT)
                new_c.append(cT)
                cur2d = ybufs[buf][...].reshape(T * B, H)
                buf = 1 - buf
            hs, cs = new_h, new_c

        # Fused ReLU + FC epilogue; lane-dense (O padded to 128) output.
        act = jnp.maximum(cur2d, 0.0)
        q_ref[...] = jnp.dot(act, wfc_ref[...], preferred_element_type=jnp.float32,
                             precision=_PREC) + bfc_ref[...]
        for l in range(n_lstm):
            hn_ref[l] = hs[l]
            cn_ref[l] = cs[l]

    return kernel


# ----------------------------------------------------------------------------
# Parameter construction (deterministic, PyTorch-default-like uniform init)
# ----------------------------------------------------------------------------
def init_params(key, input_size, hidden, n_lstm, out_shape):
    k = 1.0 / math.sqrt(hidden)
    params = {"lstm": [], "fc": None}
    for layer in range(n_lstm):
        in_sz = input_size if layer == 0 else hidden
        key, k1, k2, k3, k4 = jax.random.split(key, 5)
        w_ih = jax.random.uniform(k1, (4 * hidden, in_sz), jnp.float32, -k, k)
        w_hh = jax.random.uniform(k2, (4 * hidden, hidden), jnp.float32, -k, k)
        b_ih = jax.random.uniform(k3, (4 * hidden,), jnp.float32, -k, k)
        b_hh = jax.random.uniform(k4, (4 * hidden,), jnp.float32, -k, k)
        params["lstm"].append({
            "w_ih_t": w_ih.T,                    # (in, 4H)
            "w_hh_t": w_hh.T,                    # (H, 4H)
            "b": (b_ih + b_hh)[None, :],         # (1, 4H) combined bias
        })
    key, k1, k2 = jax.random.split(key, 3)
    w_fc = jax.random.uniform(k1, (out_shape, hidden), jnp.float32, -k, k)
    b_fc = jax.random.uniform(k2, (out_shape,), jnp.float32, -k, k)
    o_pad = max(_LANE, ((out_shape + _LANE - 1) // _LANE) * _LANE)
    w_pad = jnp.zeros((hidden, o_pad), jnp.float32).at[:, :out_shape].set(w_fc.T)
    b_pad = jnp.zeros((1, o_pad), jnp.float32).at[:, :out_shape].set(b_fc)
    params["fc"] = {"w_pad": w_pad, "b_pad": b_pad, "out_shape": out_shape}
    return params


# ----------------------------------------------------------------------------
# BaseAgent forward (mirrors NetAgent.forward control flow)
# ----------------------------------------------------------------------------
def base_agent_forward(params, x, hidden=None):
    """x: (B, T, I) batch_first; hidden = None or (h0, c0) each (n_lstm, B, H)."""
    B, T, _ = x.shape
    n_lstm = len(params["lstm"])
    H = params["lstm"][0]["w_hh_t"].shape[0]
    O = params["fc"]["out_shape"]
    O_pad = params["fc"]["w_pad"].shape[-1]

    num_passes = 2 if hidden is None else 1   # PyTorch applies the LSTM twice if h is None
    if hidden is None:
        h0 = jnp.zeros((n_lstm, B, H), jnp.float32)
        c0 = jnp.zeros((n_lstm, B, H), jnp.float32)
    else:
        h0, c0 = hidden

    x_tm = jnp.transpose(x, (1, 0, 2)).astype(jnp.float32)   # (T, B, I) time-major

    inputs = [x_tm, h0, c0]
    for p in params["lstm"]:
        inputs += [p["w_ih_t"], p["w_hh_t"], p["b"]]
    inputs += [params["fc"]["w_pad"], params["fc"]["b_pad"]]

    kernel = _make_fused_kernel(T, B, H, n_lstm, num_passes)
    q_pad, h_n, c_n = pl.pallas_call(
        kernel,
        out_shape=(
            jax.ShapeDtypeStruct((T * B, O_pad), jnp.float32),
            jax.ShapeDtypeStruct((n_lstm, B, H), jnp.float32),
            jax.ShapeDtypeStruct((n_lstm, B, H), jnp.float32),
        ),
        in_specs=[_VMEM_SPEC] * len(inputs),
        out_specs=(_VMEM_SPEC, _VMEM_SPEC, _VMEM_SPEC),
        scratch_shapes=[pltpu.VMEM((T, B, H), jnp.float32),
                        pltpu.VMEM((T, B, H), jnp.float32)],
    )(*inputs)

    q = q_pad.reshape(T, B, O_pad).transpose(1, 0, 2)[:, :, :O]   # (B, T, O)
    return q, (h_n, c_n)


def sample_action_from_q(q_values, stoch=False):
    if stoch:
        # TODO(synk): torch.distributions.Categorical stochastic path not ported.
        raise NotImplementedError
    return jnp.argmax(q_values, axis=2)


# ----------------------------------------------------------------------------
if __name__ == "__main__":
    # input_size == hidden so the double-LSTM pass (hidden=None branch) is
    # shape-consistent, exactly as required by the PyTorch module.
    B, T = 2, 8
    INPUT_SIZE = 32
    HIDDEN = 32
    N_LSTM = 2
    OUT_SHAPE = 4

    key = jax.random.PRNGKey(0)
    key, pkey, xkey = jax.random.split(key, 3)
    params = init_params(pkey, INPUT_SIZE, HIDDEN, N_LSTM, OUT_SHAPE)
    x = jax.random.normal(xkey, (B, T, INPUT_SIZE), jnp.float32)

    fwd = functools.partial(base_agent_forward, params)

    # hidden=None path: LSTM stack applied twice inside one fused kernel.
    q_values, (h_n, c_n) = fwd(x, hidden=None)
    q_values = jax.block_until_ready(q_values)
    h_n = jax.block_until_ready(h_n)
    c_n = jax.block_until_ready(c_n)
    assert q_values.shape == (B, T, OUT_SHAPE)
    assert h_n.shape == (N_LSTM, B, HIDDEN)
    assert c_n.shape == (N_LSTM, B, HIDDEN)
    assert bool(jnp.all(jnp.isfinite(q_values)))

    # hidden provided path: single pass through the stack.
    q2, (h2, c2) = fwd(x, hidden=(h_n, c_n))
    q2 = jax.block_until_ready(q2)
    assert q2.shape == (B, T, OUT_SHAPE)
    assert h2.shape == (N_LSTM, B, HIDDEN)
    assert c2.shape == (N_LSTM, B, HIDDEN)

    # greedy action sampling (sample_action with stoch=False), glue-level argmax
    act_idx = jax.block_until_ready(sample_action_from_q(q_values, stoch=False))
    assert act_idx.shape == (B, T)

    print("KERNEL_OK")
</pallas_src>

<mosaic_0001>
module attributes {stable_mosaic.version = 11 : i64} {
  func.func @kernel(%arg0: memref<8x2x32xf32, #tpu.memory_space<vmem>>, %arg1: memref<2x2x32xf32, #tpu.memory_space<vmem>>, %arg2: memref<2x2x32xf32, #tpu.memory_space<vmem>>, %arg3: memref<32x128xf32, #tpu.memory_space<vmem>>, %arg4: memref<32x128xf32, #tpu.memory_space<vmem>>, %arg5: memref<1x128xf32, #tpu.memory_space<vmem>>, %arg6: memref<32x128xf32, #tpu.memory_space<vmem>>, %arg7: memref<32x128xf32, #tpu.memory_space<vmem>>, %arg8: memref<1x128xf32, #tpu.memory_space<vmem>>, %arg9: memref<32x128xf32, #tpu.memory_space<vmem>>, %arg10: memref<1x128xf32, #tpu.memory_space<vmem>>, %arg11: memref<16x128xf32, #tpu.memory_space<vmem>>, %arg12: memref<2x2x32xf32, #tpu.memory_space<vmem>>, %arg13: memref<2x2x32xf32, #tpu.memory_space<vmem>>, %arg14: memref<8x2x32xf32, #tpu.memory_space<vmem>>, %arg15: memref<8x2x32xf32, #tpu.memory_space<vmem>>) attributes {dimension_semantics = [], scalar_prefetch = 0 : i64, scratch_operands = 2 : i64, tpu.core_type = #tpu.core_type<tc>} {
    %c0 = arith.constant 0 : index
    %c0_0 = arith.constant 0 : index
    %c0_1 = arith.constant 0 : index
    %0 = vector.load %arg1[%c0, %c0_0, %c0_1] : memref<2x2x32xf32, #tpu.memory_space<vmem>>, vector<1x2x32xf32>
    %1 = vector.shape_cast %0 : vector<1x2x32xf32> to vector<2x32xf32>
    %c1 = arith.constant 1 : index
    %c0_2 = arith.constant 0 : index
    %c0_3 = arith.constant 0 : index
    %2 = vector.load %arg1[%c1, %c0_2, %c0_3] : memref<2x2x32xf32, #tpu.memory_space<vmem>>, vector<1x2x32xf32>
    %3 = vector.shape_cast %2 : vector<1x2x32xf32> to vector<2x32xf32>
    %c0_4 = arith.constant 0 : index
    %c0_5 = arith.constant 0 : index
    %c0_6 = arith.constant 0 : index
    %4 = vector.load %arg2[%c0_4, %c0_5, %c0_6] : memref<2x2x32xf32, #tpu.memory_space<vmem>>, vector<1x2x32xf32>
    %5 = vector.shape_cast %4 : vector<1x2x32xf32> to vector<2x32xf32>
    %c1_7 = arith.constant 1 : index
    %c0_8 = arith.constant 0 : index
    %c0_9 = arith.constant 0 : index
    %6 = vector.load %arg2[%c1_7, %c0_8, %c0_9] : memref<2x2x32xf32, #tpu.memory_space<vmem>>, vector<1x2x32xf32>
    %7 = vector.shape_cast %6 : vector<1x2x32xf32> to vector<2x32xf32>
    %c0_10 = arith.constant 0 : index
    %c0_11 = arith.constant 0 : index
    %c0_12 = arith.constant 0 : index
    %8 = vector.load %arg0[%c0_10, %c0_11, %c0_12] : memref<8x2x32xf32, #tpu.memory_space<vmem>>, vector<8x2x32xf32>
    %9 = vector.shape_cast %8 : vector<8x2x32xf32> to vector<16x32xf32>
    %c0_13 = arith.constant 0 : index
    %c0_14 = arith.constant 0 : index
    %10 = vector.load %arg3[%c0_13, %c0_14] : memref<32x128xf32, #tpu.memory_space<vmem>>, vector<32x128xf32>
    %c0_15 = arith.constant 0 : index
    %c0_16 = arith.constant 0 : index
    %11 = vector.load %arg4[%c0_15, %c0_16] : memref<32x128xf32, #tpu.memory_space<vmem>>, vector<32x128xf32>
    %c0_17 = arith.constant 0 : index
    %c0_18 = arith.constant 0 : index
    %12 = vector.load %arg5[%c0_17, %c0_18] : memref<1x128xf32, #tpu.memory_space<vmem>>, vector<1x128xf32>
    %cst = arith.constant dense<0.000000e+00> : vector<16x128xf32>
    %13 = tpu.matmul %9, %10, %cst {dimension_numbers = #tpu.dot_dimension_numbers<[1], [0], [0], [1], [0, 0, 1, 1], [], []>, precision = #tpu.contract_precision<fp32>} : vector<16x32xf32>, vector<32x128xf32>, vector<16x128xf32> -> vector<16x128xf32>
    %14 = vector.broadcast %12 : vector<1x128xf32> to vector<16x128xf32>
    %15 = arith.addf %13, %14 : vector<16x128xf32>
    %16 = vector.extract_strided_slice %15 {offsets = [0, 0], sizes = [2, 128], strides = [1, 1]} : vector<16x128xf32> to vector<2x128xf32>
    %cst_19 = arith.constant dense<0.000000e+00> : vector<2x128xf32>
    %17 = tpu.matmul %1, %11, %cst_19 {dimension_numbers = #tpu.dot_dimension_numbers<[1], [0], [0], [1], [0, 0, 1, 1], [], []>, precision = #tpu.contract_precision<fp32>} : vector<2x32xf32>, vector<32x128xf32>, vector<2x128xf32> -> vector<2x128xf32>
    %18 = arith.addf %16, %17 : vector<2x128xf32>
    %19 = arith.negf %18 : vector<2x128xf32>
    %20 = math.exp %19 : vector<2x128xf32>
    %cst_20 = arith.constant 1.000000e+00 : f32
    %21 = vector.broadcast %cst_20 : f32 to vector<2x128xf32>
    %22 = arith.addf %21, %20 : vector<2x128xf32>
    %23 = arith.divf %21, %22 : vector<2x128xf32>
    %24 = math.tanh %18 : vector<2x128xf32>
    %25 = vector.extract_strided_slice %23 {offsets = [0, 0], sizes = [2, 32], strides = [1, 1]} : vector<2x128xf32> to vector<2x32xf32>
    %26 = vector.extract_strided_slice %23 {offsets = [0, 32], sizes = [2, 32], strides = [1, 1]} : vector<2x128xf32> to vector<2x32xf32>
    %27 = vector.extract_strided_slice %24 {offsets = [0, 64], sizes = [2, 32], strides = [1, 1]} : vector<2x128xf32> to vector<2x32xf32>
    %28 = vector.extract_strided_slice %23 {offsets = [0, 96], sizes = [2, 32], strides = [1, 1]} : vector<2x128xf32> to vector<2x32xf32>
    %29 = arith.mulf %26, %5 : vector<2x32xf32>
    %30 = arith.mulf %25, %27 : vector<2x32xf32>
    %31 = arith.addf %29, %30 : vector<2x32xf32>
    %32 = math.tanh %31 : vector<2x32xf32>
    %33 = arith.mulf %28, %32 : vector<2x32xf32>
    %c0_21 = arith.constant 0 : index
    %c0_22 = arith.constant 0 : index
    %c0_23 = arith.constant 0 : index
    %34 = vector.load %arg14[%c0_21, %c0_22, %c0_23] : memref<8x2x32xf32, #tpu.memory_space<vmem>>, vector<1x2x32xf32>
    %35 = vector.shape_cast %34 : vector<1x2x32xf32> to vector<2x32xf32>
    %36 = vector.shape_cast %33 : vector<2x32xf32> to vector<1x2x32xf32>
    tpu.vector_store %arg14[%c0_21, %c0_22, %c0_23], %36 {strides = array<i32>} : memref<8x2x32xf32, #tpu.memory_space<vmem>>, vector<1x2x32xf32>,
    %37 = vector.extract_strided_slice %15 {offsets = [2, 0], sizes = [2, 128], strides = [1, 1]} : vector<16x128xf32> to vector<2x128xf32>
    %cst_24 = arith.constant dense<0.000000e+00> : vector<2x128xf32>
    %38 = tpu.matmul %33, %11, %cst_24 {dimension_numbers = #tpu.dot_dimension_numbers<[1], [0], [0], [1], [0, 0, 1, 1], [], []>, precision = #tpu.contract_precision<fp32>} : vector<2x32xf32>, vector<32x128xf32>, vector<2x128xf32> -> vector<2x128xf32>
    %39 = arith.addf %37, %38 : vector<2x128xf32>
    %40 = arith.negf %39 : vector<2x128xf32>
    %41 = math.exp %40 : vector<2x128xf32>
    %cst_25 = arith.constant 1.000000e+00 : f32
    %42 = vector.broadcast %cst_25 : f32 to vector<2x128xf32>
    %43 = arith.addf %42, %41 : vector<2x128xf32>
    %44 = arith.divf %42, %43 : vector<2x128xf32>
    %45 = math.tanh %39 : vector<2x128xf32>
    %46 = vector.extract_strided_slice %44 {offsets = [0, 0], sizes = [2, 32], strides = [1, 1]} : vector<2x128xf32> to vector<2x32xf32>
    %47 = vector.extract_strided_slice %44 {offsets = [0, 32], sizes = [2, 32], strides = [1, 1]} : vector<2x128xf32> to vector<2x32xf32>
    %48 = vector.extract_strided_slice %45 {offsets = [0, 64], sizes = [2, 32], strides = [1, 1]} : vector<2x128xf32> to vector<2x32xf32>
    %49 = vector.extract_strided_slice %44 {offsets = [0, 96], sizes = [2, 32], strides = [1, 1]} : vector<2x128xf32> to vector<2x32xf32>
    %50 = arith.mulf %47, %31 : vector<2x32xf32>
    %51 = arith.mulf %46, %48 : vector<2x32xf32>
    %52 = arith.addf %50, %51 : vector<2x32xf32>
    %53 = math.tanh %52 : vector<2x32xf32>
    %54 = arith.mulf %49, %53 : vector<2x32xf32>
    %c1_26 = arith.constant 1 : index
    %c0_27 = arith.constant 0 : index
    %c0_28 = arith.constant 0 : index
    %55 = vector.load %arg14[%c1_26, %c0_27, %c0_28] : memref<8x2x32xf32, #tpu.memory_space<vmem>>, vector<1x2x32xf32>
    %56 = vector.shape_cast %55 : vector<1x2x32xf32> to vector<2x32xf32>
    %57 = vector.shape_cast %54 : vector<2x32xf32> to vector<1x2x32xf32>
    tpu.vector_store %arg14[%c1_26, %c0_27, %c0_28], %57 {strides = array<i32>} : memref<8x2x32xf32, #tpu.memory_space<vmem>>, vector<1x2x32xf32>,
    %58 = vector.extract_strided_slice %15 {offsets = [4, 0], sizes = [2, 128], strides = [1, 1]} : vector<16x128xf32> to vector<2x128xf32>
    %cst_29 = arith.constant dense<0.000000e+00> : vector<2x128xf32>
    %59 = tpu.matmul %54, %11, %cst_29 {dimension_numbers = #tpu.dot_dimension_numbers<[1], [0], [0], [1], [0, 0, 1, 1], [], []>, precision = #tpu.contract_precision<fp32>} : vector<2x32xf32>, vector<32x128xf32>, vector<2x128xf32> -> vector<2x128xf32>
    %60 = arith.addf %58, %59 : vector<2x128xf32>
    %61 = arith.negf %60 : vector<2x128xf32>
    %62 = math.exp %61 : vector<2x128xf32>
    %cst_30 = arith.constant 1.000000e+00 : f32
    %63 = vector.broadcast %cst_30 : f32 to vector<2x128xf32>
    %64 = arith.addf %63, %62 : vector<2x128xf32>
    %65 = arith.divf %63, %64 : vector<2x128xf32>
    %66 = math.tanh %60 : vector<2x128xf32>
    %67 = vector.extract_strided_slice %65 {offsets = [0, 0], sizes = [2, 32], strides = [1, 1]} : vector<2x128xf32> to vector<2x32xf32>
    %68 = vector.extract_strided_slice %65 {offsets = [0, 32], sizes = [2, 32], strides = [1, 1]} : vector<2x128xf32> to vector<2x32xf32>
    %69 = vector.extract_strided_slice %66 {offsets = [0, 64], sizes = [2, 32], strides = [1, 1]} : vector<2x128xf32> to vector<2x32xf32>
    %70 = vector.extract_strided_slice %65 {offsets = [0, 96], sizes = [2, 32], strides = [1, 1]} : vector<2x128xf32> to vector<2x32xf32>
    %71 = arith.mulf %68, %52 : vector<2x32xf32>
    %72 = arith.mulf %67, %69 : vector<2x32xf32>
    %73 = arith.addf %71, %72 : vector<2x32xf32>
    %74 = math.tanh %73 : vector<2x32xf32>
    %75 = arith.mulf %70, %74 : vector<2x32xf32>
    %c2 = arith.constant 2 : index
    %c0_31 = arith.constant 0 : index
    %c0_32 = arith.constant 0 : index
    %76 = vector.load %arg14[%c2, %c0_31, %c0_32] : memref<8x2x32xf32, #tpu.memory_space<vmem>>, vector<1x2x32xf32>
    %77 = vector.shape_cast %76 : vector<1x2x32xf32> to vector<2x32xf32>
    %78 = vector.shape_cast %75 : vector<2x32xf32> to vector<1x2x32xf32>
    tpu.vector_store %arg14[%c2, %c0_31, %c0_32], %78 {strides = array<i32>} : memref<8x2x32xf32, #tpu.memory_space<vmem>>, vector<1x2x32xf32>,
    %79 = vector.extract_strided_slice %15 {offsets = [6, 0], sizes = [2, 128], strides = [1, 1]} : vector<16x128xf32> to vector<2x128xf32>
    %cst_33 = arith.constant dense<0.000000e+00> : vector<2x128xf32>
    %80 = tpu.matmul %75, %11, %cst_33 {dimension_numbers = #tpu.dot_dimension_numbers<[1], [0], [0], [1], [0, 0, 1, 1], [], []>, precision = #tpu.contract_precision<fp32>} : vector<2x32xf32>, vector<32x128xf32>, vector<2x128xf32> -> vector<2x128xf32>
    %81 = arith.addf %79, %80 : vector<2x128xf32>
    %82 = arith.negf %81 : vector<2x128xf32>
    %83 = math.exp %82 : vector<2x128xf32>
    %cst_34 = arith.constant 1.000000e+00 : f32
    %84 = vector.broadcast %cst_34 : f32 to vector<2x128xf32>
    %85 = arith.addf %84, %83 : vector<2x128xf32>
    %86 = arith.divf %84, %85 : vector<2x128xf32>
    %87 = math.tanh %81 : vector<2x128xf32>
    %88 = vector.extract_strided_slice %86 {offsets = [0, 0], sizes = [2, 32], strides = [1, 1]} : vector<2x128xf32> to vector<2x32xf32>
    %89 = vector.extract_strided_slice %86 {offsets = [0, 32], sizes = [2, 32], strides = [1, 1]} : vector<2x128xf32> to vector<2x32xf32>
    %90 = vector.extract_strided_slice %87 {offsets = [0, 64], sizes = [2, 32], strides = [1, 1]} : vector<2x128xf32> to vector<2x32xf32>
    %91 = vector.extract_strided_slice %86 {offsets = [0, 96], sizes = [2, 32], strides = [1, 1]} : vector<2x128xf32> to vector<2x32xf32>
    %92 = arith.mulf %89, %73 : vector<2x32xf32>
    %93 = arith.mulf %88, %90 : vector<2x32xf32>
    %94 = arith.addf %92, %93 : vector<2x32xf32>
    %95 = math.tanh %94 : vector<2x32xf32>
    %96 = arith.mulf %91, %95 : vector<2x32xf32>
    %c3 = arith.constant 3 : index
    %c0_35 = arith.constant 0 : index
    %c0_36 = arith.constant 0 : index
    %97 = vector.load %arg14[%c3, %c0_35, %c0_36] : memref<8x2x32xf32, #tpu.memory_space<vmem>>, vector<1x2x32xf32>
    %98 = vector.shape_cast %97 : vector<1x2x32xf32> to vector<2x32xf32>
    %99 = vector.shape_cast %96 : vector<2x32xf32> to vector<1x2x32xf32>
    tpu.vector_store %arg14[%c3, %c0_35, %c0_36], %99 {strides = array<i32>} : memref<8x2x32xf32, #tpu.memory_space<vmem>>, vector<1x2x32xf32>,
    %100 = vector.extract_strided_slice %15 {offsets = [8, 0], sizes = [2, 128], strides = [1, 1]} : vector<16x128xf32> to vector<2x128xf32>
    %cst_37 = arith.constant dense<0.000000e+00> : vector<2x128xf32>
    %101 = tpu.matmul %96, %11, %cst_37 {dimension_numbers = #tpu.dot_dimension_numbers<[1], [0], [0], [1], [0, 0, 1, 1], [], []>, precision = #tpu.contract_precision<fp32>} : vector<2x32xf32>, vector<32x128xf32>, vector<2x128xf32> -> vector<2x128xf32>
    %102 = arith.addf %100, %101 : vector<2x128xf32>
    %103 = arith.negf %102 : vector<2x128xf32>
    %104 = math.exp %103 : vector<2x128xf32>
    %cst_38 = arith.constant 1.000000e+00 : f32
    %105 = vector.broadcast %cst_38 : f32 to vector<2x128xf32>
    %106 = arith.addf %105, %104 : vector<2x128xf32>
    %107 = arith.divf %105, %106 : vector<2x128xf32>
    %108 = math.tanh %102 : vector<2x128xf32>
    %109 = vector.extract_strided_slice %107 {offsets = [0, 0], sizes = [2, 32], strides = [1, 1]} : vector<2x128xf32> to vector<2x32xf32>
    %110 = vector.extract_strided_slice %107 {offsets = [0, 32], sizes = [2, 32], strides = [1, 1]} : vector<2x128xf32> to vector<2x32xf32>
    %111 = vector.extract_strided_slice %108 {offsets = [0, 64], sizes = [2, 32], strides = [1, 1]} : vector<2x128xf32> to vector<2x32xf32>
    %112 = vector.extract_strided_slice %107 {offsets = [0, 96], sizes = [2, 32], strides = [1, 1]} : vector<2x128xf32> to vector<2x32xf32>
    %113 = arith.mulf %110, %94 : vector<2x32xf32>
    %114 = arith.mulf %109, %111 : vector<2x32xf32>
    %115 = arith.addf %113, %114 : vector<2x32xf32>
    %116 = math.tanh %115 : vector<2x32xf32>
    %117 = arith.mulf %112, %116 : vector<2x32xf32>
    %c4 = arith.constant 4 : index
    %c0_39 = arith.constant 0 : index
    %c0_40 = arith.constant 0 : index
    %118 = vector.load %arg14[%c4, %c0_39, %c0_40] : memref<8x2x32xf32, #tpu.memory_space<vmem>>, vector<1x2x32xf32>
    %119 = vector.shape_cast %118 : vector<1x2x32xf32> to vector<2x32xf32>
    %120 = vector.shape_cast %117 : vector<2x32xf32> to vector<1x2x32xf32>
    tpu.vector_store %arg14[%c4, %c0_39, %c0_40], %120 {strides = array<i32>} : memref<8x2x32xf32, #tpu.memory_space<vmem>>, vector<1x2x32xf32>,
    %121 = vector.extract_strided_slice %15 {offsets = [10, 0], sizes = [2, 128], strides = [1, 1]} : vector<16x128xf32> to vector<2x128xf32>
    %cst_41 = arith.constant dense<0.000000e+00> : vector<2x128xf32>
    %122 = tpu.matmul %117, %11, %cst_41 {dimension_numbers = #tpu.dot_dimension_numbers<[1], [0], [0], [1], [0, 0, 1, 1], [], []>, precision = #tpu.contract_precision<fp32>} : vector<2x32xf32>, vector<32x128xf32>, vector<2x128xf32> -> vector<2x128xf32>
    %123 = arith.addf %121, %122 : vector<2x128xf32>
    %124 = arith.negf %123 : vector<2x128xf32>
    %125 = math.exp %124 : vector<2x128xf32>
    %cst_42 = arith.constant 1.000000e+00 : f32
    %126 = vector.broadcast %cst_42 : f32 to vector<2x128xf32>
    %127 = arith.addf %126, %125 : vector<2x128xf32>
    %128 = arith.divf %126, %127 : vector<2x128xf32>
    %129 = math.tanh %123 : vector<2x128xf32>
    %130 = vector.extract_strided_slice %128 {offsets = [0, 0], sizes = [2, 32], strides = [1, 1]} : vector<2x128xf32> to vector<2x32xf32>
    %131 = vector.extract_strided_slice %128 {offsets = [0, 32], sizes = [2, 32], strides = [1, 1]} : vector<2x128xf32> to vector<2x32xf32>
    %132 = vector.extract_strided_slice %129 {offsets = [0, 64], sizes = [2, 32], strides = [1, 1]} : vector<2x128xf32> to vector<2x32xf32>
    %133 = vector.extract_strided_slice %128 {offsets = [0, 96], sizes = [2, 32], strides = [1, 1]} : vector<2x128xf32> to vector<2x32xf32>
    %134 = arith.mulf %131, %115 : vector<2x32xf32>
    %135 = arith.mulf %130, %132 : vector<2x32xf32>
    %136 = arith.addf %134, %135 : vector<2x32xf32>
    %137 = math.tanh %136 : vector<2x32xf32>
    %138 = arith.mulf %133, %137 : vector<2x32xf32>
    %c5 = arith.constant 5 : index
    %c0_43 = arith.constant 0 : index
    %c0_44 = arith.constant 0 : index
    %139 = vector.load %arg14[%c5, %c0_43, %c0_44] : memref<8x2x32xf32, #tpu.memory_space<vmem>>, vector<1x2x32xf32>
    %140 = vector.shape_cast %139 : vector<1x2x32xf32> to vector<2x32xf32>
    %141 = vector.shape_cast %138 : vector<2x32xf32> to vector<1x2x32xf32>
    tpu.vector_store %arg14[%c5, %c0_43, %c0_44], %141 {strides = array<i32>} : memref<8x2x32xf32, #tpu.memory_space<vmem>>, vector<1x2x32xf32>,
    %142 = vector.extract_strided_slice %15 {offsets = [12, 0], sizes = [2, 128], strides = [1, 1]} : vector<16x128xf32> to vector<2x128xf32>
    %cst_45 = arith.constant dense<0.000000e+00> : vector<2x128xf32>
    %143 = tpu.matmul %138, %11, %cst_45 {dimension_numbers = #tpu.dot_dimension_numbers<[1], [0], [0], [1], [0, 0, 1, 1], [], []>, precision = #tpu.contract_precision<fp32>} : vector<2x32xf32>, vector<32x128xf32>, vector<2x128xf32> -> vector<2x128xf32>
    %144 = arith.addf %142, %143 : vector<2x128xf32>
    %145 = arith.negf %144 : vector<2x128xf32>
    %146 = math.exp %145 : vector<2x128xf32>
    %cst_46 = arith.constant 1.000000e+00 : f32
    %147 = vector.broadcast %cst_46 : f32 to vector<2x128xf32>
    %148 = arith.addf %147, %146 : vector<2x128xf32>
    %149 = arith.divf %147, %148 : vector<2x128xf32>
    %150 = math.tanh %144 : vector<2x128xf32>
    %151 = vector.extract_strided_slice %149 {offsets = [0, 0], sizes = [2, 32], strides = [1, 1]} : vector<2x128xf32> to vector<2x32xf32>
    %152 = vector.extract_strided_slice %149 {offsets = [0, 32], sizes = [2, 32], strides = [1, 1]} : vector<2x128xf32> to vector<2x32xf32>
    %153 = vector.extract_strided_slice %150 {offsets = [0, 64], sizes = [2, 32], strides = [1, 1]} : vector<2x128xf32> to vector<2x32xf32>
    %154 = vector.extract_strided_slice %149 {offsets = [0, 96], sizes = [2, 32], strides = [1, 1]} : vector<2x128xf32> to vector<2x32xf32>
    %155 = arith.mulf %152, %136 : vector<2x32xf32>
    %156 = arith.mulf %151, %153 : vector<2x32xf32>
    %157 = arith.addf %155, %156 : vector<2x32xf32>
    %158 = math.tanh %157 : vector<2x32xf32>
    %159 = arith.mulf %154, %158 : vector<2x32xf32>
    %c6 = arith.constant 6 : index
    %c0_47 = arith.constant 0 : index
    %c0_48 = arith.constant 0 : index
    %160 = vector.load %arg14[%c6, %c0_47, %c0_48] : memref<8x2x32xf32, #tpu.memory_space<vmem>>, vector<1x2x32xf32>
    %161 = vector.shape_cast %160 : vector<1x2x32xf32> to vector<2x32xf32>
    %162 = vector.shape_cast %159 : vector<2x32xf32> to vector<1x2x32xf32>
    tpu.vector_store %arg14[%c6, %c0_47, %c0_48], %162 {strides = array<i32>} : memref<8x2x32xf32, #tpu.memory_space<vmem>>, vector<1x2x32xf32>,
    %163 = vector.extract_strided_slice %15 {offsets = [14, 0], sizes = [2, 128], strides = [1, 1]} : vector<16x128xf32> to vector<2x128xf32>
    %cst_49 = arith.constant dense<0.000000e+00> : vector<2x128xf32>
    %164 = tpu.matmul %159, %11, %cst_49 {dimension_numbers = #tpu.dot_dimension_numbers<[1], [0], [0], [1], [0, 0, 1, 1], [], []>, precision = #tpu.contract_precision<fp32>} : vector<2x32xf32>, vector<32x128xf32>, vector<2x128xf32> -> vector<2x128xf32>
    %165 = arith.addf %163, %164 : vector<2x128xf32>
    %166 = arith.negf %165 : vector<2x128xf32>
    %167 = math.exp %166 : vector<2x128xf32>
    %cst_50 = arith.constant 1.000000e+00 : f32
    %168 = vector.broadcast %cst_50 : f32 to vector<2x128xf32>
    %169 = arith.addf %168, %167 : vector<2x128xf32>
    %170 = arith.divf %168, %169 : vector<2x128xf32>
    %171 = math.tanh %165 : vector<2x128xf32>
    %172 = vector.extract_strided_slice %170 {offsets = [0, 0], sizes = [2, 32], strides = [1, 1]} : vector<2x128xf32> to vector<2x32xf32>
    %173 = vector.extract_strided_slice %170 {offsets = [0, 32], sizes = [2, 32], strides = [1, 1]} : vector<2x128xf32> to vector<2x32xf32>
    %174 = vector.extract_strided_slice %171 {offsets = [0, 64], sizes = [2, 32], strides = [1, 1]} : vector<2x128xf32> to vector<2x32xf32>
    %175 = vector.extract_strided_slice %170 {offsets = [0, 96], sizes = [2, 32], strides = [1, 1]} : vector<2x128xf32> to vector<2x32xf32>
    %176 = arith.mulf %173, %157 : vector<2x32xf32>
    %177 = arith.mulf %172, %174 : vector<2x32xf32>
    %178 = arith.addf %176, %177 : vector<2x32xf32>
    %179 = math.tanh %178 : vector<2x32xf32>
    %180 = arith.mulf %175, %179 : vector<2x32xf32>
    %c7 = arith.constant 7 : index
    %c0_51 = arith.constant 0 : index
    %c0_52 = arith.constant 0 : index
    %181 = vector.load %arg14[%c7, %c0_51, %c0_52] : memref<8x2x32xf32, #tpu.memory_space<vmem>>, vector<1x2x32xf32>
    %182 = vector.shape_cast %181 : vector<1x2x32xf32> to vector<2x32xf32>
    %183 = vector.shape_cast %180 : vector<2x32xf32> to vector<1x2x32xf32>
    tpu.vector_store %arg14[%c7, %c0_51, %c0_52], %183 {strides = array<i32>} : memref<8x2x32xf32, #tpu.memory_space<vmem>>, vector<1x2x32xf32>,
    %c0_53 = arith.constant 0 : index
    %c0_54 = arith.constant 0 : index
    %c0_55 = arith.constant 0 : index
    %184 = vector.load %arg14[%c0_53, %c0_54, %c0_55] : memref<8x2x32xf32, #tpu.memory_space<vmem>>, vector<8x2x32xf32>
    %185 = vector.shape_cast %184 : vector<8x2x32xf32> to vector<16x32xf32>
    %c0_56 = arith.constant 0 : index
    %c0_57 = arith.constant 0 : index
    %186 = vector.load %arg6[%c0_56, %c0_57] : memref<32x128xf32, #tpu.memory_space<vmem>>, vector<32x128xf32>
    %c0_58 = arith.constant 0 : index
    %c0_59 = arith.constant 0 : index
    %187 = vector.load %arg7[%c0_58, %c0_59] : memref<32x128xf32, #tpu.memory_space<vmem>>, vector<32x128xf32>
    %c0_60 = arith.constant 0 : index
    %c0_61 = arith.constant 0 : index
    %188 = vector.load %arg8[%c0_60, %c0_61] : memref<1x128xf32, #tpu.memory_space<vmem>>, vector<1x128xf32>
    %cst_62 = arith.constant dense<0.000000e+00> : vector<16x128xf32>
    %189 = tpu.matmul %185, %186, %cst_62 {dimension_numbers = #tpu.dot_dimension_numbers<[1], [0], [0], [1], [0, 0, 1, 1], [], []>, precision = #tpu.contract_precision<fp32>} : vector<16x32xf32>, vector<32x128xf32>, vector<16x128xf32> -> vector<16x128xf32>
    %190 = vector.broadcast %188 : vector<1x128xf32> to vector<16x128xf32>
    %191 = arith.addf %189, %190 : vector<16x128xf32>
    %192 = vector.extract_strided_slice %191 {offsets = [0, 0], sizes = [2, 128], strides = [1, 1]} : vector<16x128xf32> to vector<2x128xf32>
    %cst_63 = arith.constant dense<0.000000e+00> : vector<2x128xf32>
    %193 = tpu.matmul %3, %187, %cst_63 {dimension_numbers = #tpu.dot_dimension_numbers<[1], [0], [0], [1], [0, 0, 1, 1], [], []>, precision = #tpu.contract_precision<fp32>} : vector<2x32xf32>, vector<32x128xf32>, vector<2x128xf32> -> vector<2x128xf32>
    %194 = arith.addf %192, %193 : vector<2x128xf32>
    %195 = arith.negf %194 : vector<2x128xf32>
    %196 = math.exp %195 : vector<2x128xf32>
    %cst_64 = arith.constant 1.000000e+00 : f32
    %197 = vector.broadcast %cst_64 : f32 to vector<2x128xf32>
    %198 = arith.addf %197, %196 : vector<2x128xf32>
    %199 = arith.divf %197, %198 : vector<2x128xf32>
    %200 = math.tanh %194 : vector<2x128xf32>
    %201 = vector.extract_strided_slice %199 {offsets = [0, 0], sizes = [2, 32], strides = [1, 1]} : vector<2x128xf32> to vector<2x32xf32>
    %202 = vector.extract_strided_slice %199 {offsets = [0, 32], sizes = [2, 32], strides = [1, 1]} : vector<2x128xf32> to vector<2x32xf32>
    %203 = vector.extract_strided_slice %200 {offsets = [0, 64], sizes = [2, 32], strides = [1, 1]} : vector<2x128xf32> to vector<2x32xf32>
    %204 = vector.extract_strided_slice %199 {offsets = [0, 96], sizes = [2, 32], strides = [1, 1]} : vector<2x128xf32> to vector<2x32xf32>
    %205 = arith.mulf %202, %7 : vector<2x32xf32>
    %206 = arith.mulf %201, %203 : vector<2x32xf32>
    %207 = arith.addf %205, %206 : vector<2x32xf32>
    %208 = math.tanh %207 : vector<2x32xf32>
    %209 = arith.mulf %204, %208 : vector<2x32xf32>
    %c0_65 = arith.constant 0 : index
    %c0_66 = arith.constant 0 : index
    %c0_67 = arith.constant 0 : index
    %210 = vector.load %arg15[%c0_65, %c0_66, %c0_67] : memref<8x2x32xf32, #tpu.memory_space<vmem>>, vector<1x2x32xf32>
    %211 = vector.shape_cast %210 : vector<1x2x32xf32> to vector<2x32xf32>
    %212 = vector.shape_cast %209 : vector<2x32xf32> to vector<1x2x32xf32>
    tpu.vector_store %arg15[%c0_65, %c0_66, %c0_67], %212 {strides = array<i32>} : memref<8x2x32xf32, #tpu.memory_space<vmem>>, vector<1x2x32xf32>,
    %213 = vector.extract_strided_slice %191 {offsets = [2, 0], sizes = [2, 128], strides = [1, 1]} : vector<16x128xf32> to vector<2x128xf32>
    %cst_68 = arith.constant dense<0.000000e+00> : vector<2x128xf32>
    %214 = tpu.matmul %209, %187, %cst_68 {dimension_numbers = #tpu.dot_dimension_numbers<[1], [0], [0], [1], [0, 0, 1, 1], [], []>, precision = #tpu.contract_precision<fp32>} : vector<2x32xf32>, vector<32x128xf32>, vector<2x128xf32> -> vector<2x128xf32>
    %215 = arith.addf %213, %214 : vector<2x128xf32>
    %216 = arith.negf %215 : vector<2x128xf32>
    %217 = math.exp %216 : vector<2x128xf32>
    %cst_69 = arith.constant 1.000000e+00 : f32
    %218 = vector.broadcast %cst_69 : f32 to vector<2x128xf32>
    %219 = arith.addf %218, %217 : vector<2x128xf32>
    %220 = arith.divf %218, %219 : vector<2x128xf32>
    %221 = math.tanh %215 : vector<2x128xf32>
    %222 = vector.extract_strided_slice %220 {offsets = [0, 0], sizes = [2, 32], strides = [1, 1]} : vector<2x128xf32> to vector<2x32xf32>
    %223 = vector.extract_strided_slice %220 {offsets = [0, 32], sizes = [2, 32], strides = [1, 1]} : vector<2x128xf32> to vector<2x32xf32>
    %224 = vector.extract_strided_slice %221 {offsets = [0, 64], sizes = [2, 32], strides = [1, 1]} : vector<2x128xf32> to vector<2x32xf32>
    %225 = vector.extract_strided_slice %220 {offsets = [0, 96], sizes = [2, 32], strides = [1, 1]} : vector<2x128xf32> to vector<2x32xf32>
    %226 = arith.mulf %223, %207 : vector<2x32xf32>
    %227 = arith.mulf %222, %224 : vector<2x32xf32>
    %228 = arith.addf %226, %227 : vector<2x32xf32>
    %229 = math.tanh %228 : vector<2x32xf32>
    %230 = arith.mulf %225, %229 : vector<2x32xf32>
    %c1_70 = arith.constant 1 : index
    %c0_71 = arith.constant 0 : index
    %c0_72 = arith.constant 0 : index
    %231 = vector.load %arg15[%c1_70, %c0_71, %c0_72] : memref<8x2x32xf32, #tpu.memory_space<vmem>>, vector<1x2x32xf32>
    %232 = vector.shape_cast %231 : vector<1x2x32xf32> to vector<2x32xf32>
    %233 = vector.shape_cast %230 : vector<2x32xf32> to vector<1x2x32xf32>
    tpu.vector_store %arg15[%c1_70, %c0_71, %c0_72], %233 {strides = array<i32>} : memref<8x2x32xf32, #tpu.memory_space<vmem>>, vector<1x2x32xf32>,
    %234 = vector.extract_strided_slice %191 {offsets = [4, 0], sizes = [2, 128], strides = [1, 1]} : vector<16x128xf32> to vector<2x128xf32>
    %cst_73 = arith.constant dense<0.000000e+00> : vector<2x128xf32>
    %235 = tpu.matmul %230, %187, %cst_73 {dimension_numbers = #tpu.dot_dimension_numbers<[1], [0], [0], [1], [0, 0, 1, 1], [], []>, precision = #tpu.contract_precision<fp32>} : vector<2x32xf32>, vector<32x128xf32>, vector<2x128xf32> -> vector<2x128xf32>
    %236 = arith.addf %234, %235 : vector<2x128xf32>
    %237 = arith.negf %236 : vector<2x128xf32>
    %238 = math.exp %237 : vector<2x128xf32>
    %cst_74 = arith.constant 1.000000e+00 : f32
    %239 = vector.broadcast %cst_74 : f32 to vector<2x128xf32>
    %240 = arith.addf %239, %238 : vector<2x128xf32>
    %241 = arith.divf %239, %240 : vector<2x128xf32>
    %242 = math.tanh %236 : vector<2x128xf32>
    %243 = vector.extract_strided_slice %241 {offsets = [0, 0], sizes = [2, 32], strides = [1, 1]} : vector<2x128xf32> to vector<2x32xf32>
    %244 = vector.extract_strided_slice %241 {offsets = [0, 32], sizes = [2, 32], strides = [1, 1]} : vector<2x128xf32> to vector<2x32xf32>
    %245 = vector.extract_strided_slice %242 {offsets = [0, 64], sizes = [2, 32], strides = [1, 1]} : vector<2x128xf32> to vector<2x32xf32>
    %246 = vector.extract_strided_slice %241 {offsets = [0, 96], sizes = [2, 32], strides = [1, 1]} : vector<2x128xf32> to vector<2x32xf32>
    %247 = arith.mulf %244, %228 : vector<2x32xf32>
    %248 = arith.mulf %243, %245 : vector<2x32xf32>
    %249 = arith.addf %247, %248 : vector<2x32xf32>
    %250 = math.tanh %249 : vector<2x32xf32>
    %251 = arith.mulf %246, %250 : vector<2x32xf32>
    %c2_75 = arith.constant 2 : index
    %c0_76 = arith.constant 0 : index
    %c0_77 = arith.constant 0 : index
    %252 = vector.load %arg15[%c2_75, %c0_76, %c0_77] : memref<8x2x32xf32, #tpu.memory_space<vmem>>, vector<1x2x32xf32>
    %253 = vector.shape_cast %252 : vector<1x2x32xf32> to vector<2x32xf32>
    %254 = vector.shape_cast %251 : vector<2x32xf32> to vector<1x2x32xf32>
    tpu.vector_store %arg15[%c2_75, %c0_76, %c0_77], %254 {strides = array<i32>} : memref<8x2x32xf32, #tpu.memory_space<vmem>>, vector<1x2x32xf32>,
    %255 = vector.extract_strided_slice %191 {offsets = [6, 0], sizes = [2, 128], strides = [1, 1]} : vector<16x128xf32> to vector<2x128xf32>
    %cst_78 = arith.constant dense<0.000000e+00> : vector<2x128xf32>
    %256 = tpu.matmul %251, %187, %cst_78 {dimension_numbers = #tpu.dot_dimension_numbers<[1], [0], [0], [1], [0, 0, 1, 1], [], []>, precision = #tpu.contract_precision<fp32>} : vector<2x32xf32>, vector<32x128xf32>, vector<2x128xf32> -> vector<2x128xf32>
    %257 = arith.addf %255, %256 : vector<2x128xf32>
    %258 = arith.negf %257 : vector<2x128xf32>
    %259 = math.exp %258 : vector<2x128xf32>
    %cst_79 = arith.constant 1.000000e+00 : f32
    %260 = vector.broadcast %cst_79 : f32 to vector<2x128xf32>
    %261 = arith.addf %260, %259 : vector<2x128xf32>
    %262 = arith.divf %260, %261 : vector<2x128xf32>
    %263 = math.tanh %257 : vector<2x128xf32>
    %264 = vector.extract_strided_slice %262 {offsets = [0, 0], sizes = [2, 32], strides = [1, 1]} : vector<2x128xf32> to vector<2x32xf32>
    %265 = vector.extract_strided_slice %262 {offsets = [0, 32], sizes = [2, 32], strides = [1, 1]} : vector<2x128xf32> to vector<2x32xf32>
    %266 = vector.extract_strided_slice %263 {offsets = [0, 64], sizes = [2, 32], strides = [1, 1]} : vector<2x128xf32> to vector<2x32xf32>
    %267 = vector.extract_strided_slice %262 {offsets = [0, 96], sizes = [2, 32], strides = [1, 1]} : vector<2x128xf32> to vector<2x32xf32>
    %268 = arith.mulf %265, %249 : vector<2x32xf32>
    %269 = arith.mulf %264, %266 : vector<2x32xf32>
    %270 = arith.addf %268, %269 : vector<2x32xf32>
    %271 = math.tanh %270 : vector<2x32xf32>
    %272 = arith.mulf %267, %271 : vector<2x32xf32>
    %c3_80 = arith.constant 3 : index
    %c0_81 = arith.constant 0 : index
    %c0_82 = arith.constant 0 : index
    %273 = vector.load %arg15[%c3_80, %c0_81, %c0_82] : memref<8x2x32xf32, #tpu.memory_space<vmem>>, vector<1x2x32xf32>
    %274 = vector.shape_cast %273 : vector<1x2x32xf32> to vector<2x32xf32>
    %275 = vector.shape_cast %272 : vector<2x32xf32> to vector<1x2x32xf32>
    tpu.vector_store %arg15[%c3_80, %c0_81, %c0_82], %275 {strides = array<i32>} : memref<8x2x32xf32, #tpu.memory_space<vmem>>, vector<1x2x32xf32>,
    %276 = vector.extract_strided_slice %191 {offsets = [8, 0], sizes = [2, 128], strides = [1, 1]} : vector<16x128xf32> to vector<2x128xf32>
    %cst_83 = arith.constant dense<0.000000e+00> : vector<2x128xf32>
    %277 = tpu.matmul %272, %187, %cst_83 {dimension_numbers = #tpu.dot_dimension_numbers<[1], [0], [0], [1], [0, 0, 1, 1], [], []>, precision = #tpu.contract_precision<fp32>} : vector<2x32xf32>, vector<32x128xf32>, vector<2x128xf32> -> vector<2x128xf32>
    %278 = arith.addf %276, %277 : vector<2x128xf32>
    %279 = arith.negf %278 : vector<2x128xf32>
    %280 = math.exp %279 : vector<2x128xf32>
    %cst_84 = arith.constant 1.000000e+00 : f32
    %281 = vector.broadcast %cst_84 : f32 to vector<2x128xf32>
    %282 = arith.addf %281, %280 : vector<2x128xf32>
    %283 = arith.divf %281, %282 : vector<2x128xf32>
    %284 = math.tanh %278 : vector<2x128xf32>
    %285 = vector.extract_strided_slice %283 {offsets = [0, 0], sizes = [2, 32], strides = [1, 1]} : vector<2x128xf32> to vector<2x32xf32>
    %286 = vector.extract_strided_slice %283 {offsets = [0, 32], sizes = [2, 32], strides = [1, 1]} : vector<2x128xf32> to vector<2x32xf32>
    %287 = vector.extract_strided_slice %284 {offsets = [0, 64], sizes = [2, 32], strides = [1, 1]} : vector<2x128xf32> to vector<2x32xf32>
    %288 = vector.extract_strided_slice %283 {offsets = [0, 96], sizes = [2, 32], strides = [1, 1]} : vector<2x128xf32> to vector<2x32xf32>
    %289 = arith.mulf %286, %270 : vector<2x32xf32>
    %290 = arith.mulf %285, %287 : vector<2x32xf32>
    %291 = arith.addf %289, %290 : vector<2x32xf32>
    %292 = math.tanh %291 : vector<2x32xf32>
    %293 = arith.mulf %288, %292 : vector<2x32xf32>
    %c4_85 = arith.constant 4 : index
    %c0_86 = arith.constant 0 : index
    %c0_87 = arith.constant 0 : index
    %294 = vector.load %arg15[%c4_85, %c0_86, %c0_87] : memref<8x2x32xf32, #tpu.memory_space<vmem>>, vector<1x2x32xf32>
    %295 = vector.shape_cast %294 : vector<1x2x32xf32> to vector<2x32xf32>
    %296 = vector.shape_cast %293 : vector<2x32xf32> to vector<1x2x32xf32>
    tpu.vector_store %arg15[%c4_85, %c0_86, %c0_87], %296 {strides = array<i32>} : memref<8x2x32xf32, #tpu.memory_space<vmem>>, vector<1x2x32xf32>,
    %297 = vector.extract_strided_slice %191 {offsets = [10, 0], sizes = [2, 128], strides = [1, 1]} : vector<16x128xf32> to vector<2x128xf32>
    %cst_88 = arith.constant dense<0.000000e+00> : vector<2x128xf32>
    %298 = tpu.matmul %293, %187, %cst_88 {dimension_numbers = #tpu.dot_dimension_numbers<[1], [0], [0], [1], [0, 0, 1, 1], [], []>, precision = #tpu.contract_precision<fp32>} : vector<2x32xf32>, vector<32x128xf32>, vector<2x128xf32> -> vector<2x128xf32>
    %299 = arith.addf %297, %298 : vector<2x128xf32>
    %300 = arith.negf %299 : vector<2x128xf32>
    %301 = math.exp %300 : vector<2x128xf32>
    %cst_89 = arith.constant 1.000000e+00 : f32
    %302 = vector.broadcast %cst_89 : f32 to vector<2x128xf32>
    %303 = arith.addf %302, %301 : vector<2x128xf32>
    %304 = arith.divf %302, %303 : vector<2x128xf32>
    %305 = math.tanh %299 : vector<2x128xf32>
    %306 = vector.extract_strided_slice %304 {offsets = [0, 0], sizes = [2, 32], strides = [1, 1]} : vector<2x128xf32> to vector<2x32xf32>
    %307 = vector.extract_strided_slice %304 {offsets = [0, 32], sizes = [2, 32], strides = [1, 1]} : vector<2x128xf32> to vector<2x32xf32>
    %308 = vector.extract_strided_slice %305 {offsets = [0, 64], sizes = [2, 32], strides = [1, 1]} : vector<2x128xf32> to vector<2x32xf32>
    %309 = vector.extract_strided_slice %304 {offsets = [0, 96], sizes = [2, 32], strides = [1, 1]} : vector<2x128xf32> to vector<2x32xf32>
    %310 = arith.mulf %307, %291 : vector<2x32xf32>
    %311 = arith.mulf %306, %308 : vector<2x32xf32>
    %312 = arith.addf %310, %311 : vector<2x32xf32>
    %313 = math.tanh %312 : vector<2x32xf32>
    %314 = arith.mulf %309, %313 : vector<2x32xf32>
    %c5_90 = arith.constant 5 : index
    %c0_91 = arith.constant 0 : index
    %c0_92 = arith.constant 0 : index
    %315 = vector.load %arg15[%c5_90, %c0_91, %c0_92] : memref<8x2x32xf32, #tpu.memory_space<vmem>>, vector<1x2x32xf32>
    %316 = vector.shape_cast %315 : vector<1x2x32xf32> to vector<2x32xf32>
    %317 = vector.shape_cast %314 : vector<2x32xf32> to vector<1x2x32xf32>
    tpu.vector_store %arg15[%c5_90, %c0_91, %c0_92], %317 {strides = array<i32>} : memref<8x2x32xf32, #tpu.memory_space<vmem>>, vector<1x2x32xf32>,
    %318 = vector.extract_strided_slice %191 {offsets = [12, 0], sizes = [2, 128], strides = [1, 1]} : vector<16x128xf32> to vector<2x128xf32>
    %cst_93 = arith.constant dense<0.000000e+00> : vector<2x128xf32>
    %319 = tpu.matmul %314, %187, %cst_93 {dimension_numbers = #tpu.dot_dimension_numbers<[1], [0], [0], [1], [0, 0, 1, 1], [], []>, precision = #tpu.contract_precision<fp32>} : vector<2x32xf32>, vector<32x128xf32>, vector<2x128xf32> -> vector<2x128xf32>
    %320 = arith.addf %318, %319 : vector<2x128xf32>
    %321 = arith.negf %320 : vector<2x128xf32>
    %322 = math.exp %321 : vector<2x128xf32>
    %cst_94 = arith.constant 1.000000e+00 : f32
    %323 = vector.broadcast %cst_94 : f32 to vector<2x128xf32>
    %324 = arith.addf %323, %322 : vector<2x128xf32>
    %325 = arith.divf %323, %324 : vector<2x128xf32>
    %326 = math.tanh %320 : vector<2x128xf32>
    %327 = vector.extract_strided_slice %325 {offsets = [0, 0], sizes = [2, 32], strides = [1, 1]} : vector<2x128xf32> to vector<2x32xf32>
    %328 = vector.extract_strided_slice %325 {offsets = [0, 32], sizes = [2, 32], strides = [1, 1]} : vector<2x128xf32> to vector<2x32xf32>
    %329 = vector.extract_strided_slice %326 {offsets = [0, 64], sizes = [2, 32], strides = [1, 1]} : vector<2x128xf32> to vector<2x32xf32>
    %330 = vector.extract_strided_slice %325 {offsets = [0, 96], sizes = [2, 32], strides = [1, 1]} : vector<2x128xf32> to vector<2x32xf32>
    %331 = arith.mulf %328, %312 : vector<2x32xf32>
    %332 = arith.mulf %327, %329 : vector<2x32xf32>
    %333 = arith.addf %331, %332 : vector<2x32xf32>
    %334 = math.tanh %333 : vector<2x32xf32>
    %335 = arith.mulf %330, %334 : vector<2x32xf32>
    %c6_95 = arith.constant 6 : index
    %c0_96 = arith.constant 0 : index
    %c0_97 = arith.constant 0 : index
    %336 = vector.load %arg15[%c6_95, %c0_96, %c0_97] : memref<8x2x32xf32, #tpu.memory_space<vmem>>, vector<1x2x32xf32>
    %337 = vector.shape_cast %336 : vector<1x2x32xf32> to vector<2x32xf32>
    %338 = vector.shape_cast %335 : vector<2x32xf32> to vector<1x2x32xf32>
    tpu.vector_store %arg15[%c6_95, %c0_96, %c0_97], %338 {strides = array<i32>} : memref<8x2x32xf32, #tpu.memory_space<vmem>>, vector<1x2x32xf32>,
    %339 = vector.extract_strided_slice %191 {offsets = [14, 0], sizes = [2, 128], strides = [1, 1]} : vector<16x128xf32> to vector<2x128xf32>
    %cst_98 = arith.constant dense<0.000000e+00> : vector<2x128xf32>
    %340 = tpu.matmul %335, %187, %cst_98 {dimension_numbers = #tpu.dot_dimension_numbers<[1], [0], [0], [1], [0, 0, 1, 1], [], []>, precision = #tpu.contract_precision<fp32>} : vector<2x32xf32>, vector<32x128xf32>, vector<2x128xf32> -> vector<2x128xf32>
    %341 = arith.addf %339, %340 : vector<2x128xf32>
    %342 = arith.negf %341 : vector<2x128xf32>
    %343 = math.exp %342 : vector<2x128xf32>
    %cst_99 = arith.constant 1.000000e+00 : f32
    %344 = vector.broadcast %cst_99 : f32 to vector<2x128xf32>
    %345 = arith.addf %344, %343 : vector<2x128xf32>
    %346 = arith.divf %344, %345 : vector<2x128xf32>
    %347 = math.tanh %341 : vector<2x128xf32>
    %348 = vector.extract_strided_slice %346 {offsets = [0, 0], sizes = [2, 32], strides = [1, 1]} : vector<2x128xf32> to vector<2x32xf32>
    %349 = vector.extract_strided_slice %346 {offsets = [0, 32], sizes = [2, 32], strides = [1, 1]} : vector<2x128xf32> to vector<2x32xf32>
    %350 = vector.extract_strided_slice %347 {offsets = [0, 64], sizes = [2, 32], strides = [1, 1]} : vector<2x128xf32> to vector<2x32xf32>
    %351 = vector.extract_strided_slice %346 {offsets = [0, 96], sizes = [2, 32], strides = [1, 1]} : vector<2x128xf32> to vector<2x32xf32>
    %352 = arith.mulf %349, %333 : vector<2x32xf32>
    %353 = arith.mulf %348, %350 : vector<2x32xf32>
    %354 = arith.addf %352, %353 : vector<2x32xf32>
    %355 = math.tanh %354 : vector<2x32xf32>
    %356 = arith.mulf %351, %355 : vector<2x32xf32>
    %c7_100 = arith.constant 7 : index
    %c0_101 = arith.constant 0 : index
    %c0_102 = arith.constant 0 : index
    %357 = vector.load %arg15[%c7_100, %c0_101, %c0_102] : memref<8x2x32xf32, #tpu.memory_space<vmem>>, vector<1x2x32xf32>
    %358 = vector.shape_cast %357 : vector<1x2x32xf32> to vector<2x32xf32>
    %359 = vector.shape_cast %356 : vector<2x32xf32> to vector<1x2x32xf32>
    tpu.vector_store %arg15[%c7_100, %c0_101, %c0_102], %359 {strides = array<i32>} : memref<8x2x32xf32, #tpu.memory_space<vmem>>, vector<1x2x32xf32>,
    %c0_103 = arith.constant 0 : index
    %c0_104 = arith.constant 0 : index
    %c0_105 = arith.constant 0 : index
    %360 = vector.load %arg15[%c0_103, %c0_104, %c0_105] : memref<8x2x32xf32, #tpu.memory_space<vmem>>, vector<8x2x32xf32>
    %361 = vector.shape_cast %360 : vector<8x2x32xf32> to vector<16x32xf32>
    %c0_106 = arith.constant 0 : index
    %c0_107 = arith.constant 0 : index
    %362 = vector.load %arg3[%c0_106, %c0_107] : memref<32x128xf32, #tpu.memory_space<vmem>>, vector<32x128xf32>
    %c0_108 = arith.constant 0 : index
    %c0_109 = arith.constant 0 : index
    %363 = vector.load %arg4[%c0_108, %c0_109] : memref<32x128xf32, #tpu.memory_space<vmem>>, vector<32x128xf32>
    %c0_110 = arith.constant 0 : index
    %c0_111 = arith.constant 0 : index
    %364 = vector.load %arg5[%c0_110, %c0_111] : memref<1x128xf32, #tpu.memory_space<vmem>>, vector<1x128xf32>
    %cst_112 = arith.constant dense<0.000000e+00> : vector<16x128xf32>
    %365 = tpu.matmul %361, %362, %cst_112 {dimension_numbers = #tpu.dot_dimension_numbers<[1], [0], [0], [1], [0, 0, 1, 1], [], []>, precision = #tpu.contract_precision<fp32>} : vector<16x32xf32>, vector<32x128xf32>, vector<16x128xf32> -> vector<16x128xf32>
    %366 = vector.broadcast %364 : vector<1x128xf32> to vector<16x128xf32>
    %367 = arith.addf %365, %366 : vector<16x128xf32>
    %368 = vector.extract_strided_slice %367 {offsets = [0, 0], sizes = [2, 128], strides = [1, 1]} : vector<16x128xf32> to vector<2x128xf32>
    %cst_113 = arith.constant dense<0.000000e+00> : vector<2x128xf32>
    %369 = tpu.matmul %180, %363, %cst_113 {dimension_numbers = #tpu.dot_dimension_numbers<[1], [0], [0], [1], [0, 0, 1, 1], [], []>, precision = #tpu.contract_precision<fp32>} : vector<2x32xf32>, vector<32x128xf32>, vector<2x128xf32> -> vector<2x128xf32>
    %370 = arith.addf %368, %369 : vector<2x128xf32>
    %371 = arith.negf %370 : vector<2x128xf32>
    %372 = math.exp %371 : vector<2x128xf32>
    %cst_114 = arith.constant 1.000000e+00 : f32
    %373 = vector.broadcast %cst_114 : f32 to vector<2x128xf32>
    %374 = arith.addf %373, %372 : vector<2x128xf32>
    %375 = arith.divf %373, %374 : vector<2x128xf32>
    %376 = math.tanh %370 : vector<2x128xf32>
    %377 = vector.extract_strided_slice %375 {offsets = [0, 0], sizes = [2, 32], strides = [1, 1]} : vector<2x128xf32> to vector<2x32xf32>
    %378 = vector.extract_strided_slice %375 {offsets = [0, 32], sizes = [2, 32], strides = [1, 1]} : vector<2x128xf32> to vector<2x32xf32>
    %379 = vector.extract_strided_slice %376 {offsets = [0, 64], sizes = [2, 32], strides = [1, 1]} : vector<2x128xf32> to vector<2x32xf32>
    %380 = vector.extract_strided_slice %375 {offsets = [0, 96], sizes = [2, 32], strides = [1, 1]} : vector<2x128xf32> to vector<2x32xf32>
    %381 = arith.mulf %378, %178 : vector<2x32xf32>
    %382 = arith.mulf %377, %379 : vector<2x32xf32>
    %383 = arith.addf %381, %382 : vector<2x32xf32>
    %384 = math.tanh %383 : vector<2x32xf32>
    %385 = arith.mulf %380, %384 : vector<2x32xf32>
    %c0_115 = arith.constant 0 : index
    %c0_116 = arith.constant 0 : index
    %c0_117 = arith.constant 0 : index
    %386 = vector.load %arg14[%c0_115, %c0_116, %c0_117] : memref<8x2x32xf32, #tpu.memory_space<vmem>>, vector<1x2x32xf32>
    %387 = vector.shape_cast %386 : vector<1x2x32xf32> to vector<2x32xf32>
    %388 = vector.shape_cast %385 : vector<2x32xf32> to vector<1x2x32xf32>
    tpu.vector_store %arg14[%c0_115, %c0_116, %c0_117], %388 {strides = array<i32>} : memref<8x2x32xf32, #tpu.memory_space<vmem>>, vector<1x2x32xf32>,
    %389 = vector.extract_strided_slice %367 {offsets = [2, 0], sizes = [2, 128], strides = [1, 1]} : vector<16x128xf32> to vector<2x128xf32>
    %cst_118 = arith.constant dense<0.000000e+00> : vector<2x128xf32>
    %390 = tpu.matmul %385, %363, %cst_118 {dimension_numbers = #tpu.dot_dimension_numbers<[1], [0], [0], [1], [0, 0, 1, 1], [], []>, precision = #tpu.contract_precision<fp32>} : vector<2x32xf32>, vector<32x128xf32>, vector<2x128xf32> -> vector<2x128xf32>
    %391 = arith.addf %389, %390 : vector<2x128xf32>
    %392 = arith.negf %391 : vector<2x128xf32>
    %393 = math.exp %392 : vector<2x128xf32>
    %cst_119 = arith.constant 1.000000e+00 : f32
    %394 = vector.broadcast %cst_119 : f32 to vector<2x128xf32>
    %395 = arith.addf %394, %393 : vector<2x128xf32>
    %396 = arith.divf %394, %395 : vector<2x128xf32>
    %397 = math.tanh %391 : vector<2x128xf32>
    %398 = vector.extract_strided_slice %396 {offsets = [0, 0], sizes = [2, 32], strides = [1, 1]} : vector<2x128xf32> to vector<2x32xf32>
    %399 = vector.extract_strided_slice %396 {offsets = [0, 32], sizes = [2, 32], strides = [1, 1]} : vector<2x128xf32> to vector<2x32xf32>
    %400 = vector.extract_strided_slice %397 {offsets = [0, 64], sizes = [2, 32], strides = [1, 1]} : vector<2x128xf32> to vector<2x32xf32>
    %401 = vector.extract_strided_slice %396 {offsets = [0, 96], sizes = [2, 32], strides = [1, 1]} : vector<2x128xf32> to vector<2x32xf32>
    %402 = arith.mulf %399, %383 : vector<2x32xf32>
    %403 = arith.mulf %398, %400 : vector<2x32xf32>
    %404 = arith.addf %402, %403 : vector<2x32xf32>
    %405 = math.tanh %404 : vector<2x32xf32>
    %406 = arith.mulf %401, %405 : vector<2x32xf32>
    %c1_120 = arith.constant 1 : index
    %c0_121 = arith.constant 0 : index
    %c0_122 = arith.constant 0 : index
    %407 = vector.load %arg14[%c1_120, %c0_121, %c0_122] : memref<8x2x32xf32, #tpu.memory_space<vmem>>, vector<1x2x32xf32>
    %408 = vector.shape_cast %407 : vector<1x2x32xf32> to vector<2x32xf32>
    %409 = vector.shape_cast %406 : vector<2x32xf32> to vector<1x2x32xf32>
    tpu.vector_store %arg14[%c1_120, %c0_121, %c0_122], %409 {strides = array<i32>} : memref<8x2x32xf32, #tpu.memory_space<vmem>>, vector<1x2x32xf32>,
    %410 = vector.extract_strided_slice %367 {offsets = [4, 0], sizes = [2, 128], strides = [1, 1]} : vector<16x128xf32> to vector<2x128xf32>
    %cst_123 = arith.constant dense<0.000000e+00> : vector<2x128xf32>
    %411 = tpu.matmul %406, %363, %cst_123 {dimension_numbers = #tpu.dot_dimension_numbers<[1], [0], [0], [1], [0, 0, 1, 1], [], []>, precision = #tpu.contract_precision<fp32>} : vector<2x32xf32>, vector<32x128xf32>, vector<2x128xf32> -> vector<2x128xf32>
    %412 = arith.addf %410, %411 : vector<2x128xf32>
    %413 = arith.negf %412 : vector<2x128xf32>
    %414 = math.exp %413 : vector<2x128xf32>
    %cst_124 = arith.constant 1.000000e+00 : f32
    %415 = vector.broadcast %cst_124 : f32 to vector<2x128xf32>
    %416 = arith.addf %415, %414 : vector<2x128xf32>
    %417 = arith.divf %415, %416 : vector<2x128xf32>
    %418 = math.tanh %412 : vector<2x128xf32>
    %419 = vector.extract_strided_slice %417 {offsets = [0, 0], sizes = [2, 32], strides = [1, 1]} : vector<2x128xf32> to vector<2x32xf32>
    %420 = vector.extract_strided_slice %417 {offsets = [0, 32], sizes = [2, 32], strides = [1, 1]} : vector<2x128xf32> to vector<2x32xf32>
    %421 = vector.extract_strided_slice %418 {offsets = [0, 64], sizes = [2, 32], strides = [1, 1]} : vector<2x128xf32> to vector<2x32xf32>
    %422 = vector.extract_strided_slice %417 {offsets = [0, 96], sizes = [2, 32], strides = [1, 1]} : vector<2x128xf32> to vector<2x32xf32>
    %423 = arith.mulf %420, %404 : vector<2x32xf32>
    %424 = arith.mulf %419, %421 : vector<2x32xf32>
    %425 = arith.addf %423, %424 : vector<2x32xf32>
    %426 = math.tanh %425 : vector<2x32xf32>
    %427 = arith.mulf %422, %426 : vector<2x32xf32>
    %c2_125 = arith.constant 2 : index
    %c0_126 = arith.constant 0 : index
    %c0_127 = arith.constant 0 : index
    %428 = vector.load %arg14[%c2_125, %c0_126, %c0_127] : memref<8x2x32xf32, #tpu.memory_space<vmem>>, vector<1x2x32xf32>
    %429 = vector.shape_cast %428 : vector<1x2x32xf32> to vector<2x32xf32>
    %430 = vector.shape_cast %427 : vector<2x32xf32> to vector<1x2x32xf32>
    tpu.vector_store %arg14[%c2_125, %c0_126, %c0_127], %430 {strides = array<i32>} : memref<8x2x32xf32, #tpu.memory_space<vmem>>, vector<1x2x32xf32>,
    %431 = vector.extract_strided_slice %367 {offsets = [6, 0], sizes = [2, 128], strides = [1, 1]} : vector<16x128xf32> to vector<2x128xf32>
    %cst_128 = arith.constant dense<0.000000e+00> : vector<2x128xf32>
    %432 = tpu.matmul %427, %363, %cst_128 {dimension_numbers = #tpu.dot_dimension_numbers<[1], [0], [0], [1], [0, 0, 1, 1], [], []>, precision = #tpu.contract_precision<fp32>} : vector<2x32xf32>, vector<32x128xf32>, vector<2x128xf32> -> vector<2x128xf32>
    %433 = arith.addf %431, %432 : vector<2x128xf32>
    %434 = arith.negf %433 : vector<2x128xf32>
    %435 = math.exp %434 : vector<2x128xf32>
    %cst_129 = arith.constant 1.000000e+00 : f32
    %436 = vector.broadcast %cst_129 : f32 to vector<2x128xf32>
    %437 = arith.addf %436, %435 : vector<2x128xf32>
    %438 = arith.divf %436, %437 : vector<2x128xf32>
    %439 = math.tanh %433 : vector<2x128xf32>
    %440 = vector.extract_strided_slice %438 {offsets = [0, 0], sizes = [2, 32], strides = [1, 1]} : vector<2x128xf32> to vector<2x32xf32>
    %441 = vector.extract_strided_slice %438 {offsets = [0, 32], sizes = [2, 32], strides = [1, 1]} : vector<2x128xf32> to vector<2x32xf32>
    %442 = vector.extract_strided_slice %439 {offsets = [0, 64], sizes = [2, 32], strides = [1, 1]} : vector<2x128xf32> to vector<2x32xf32>
    %443 = vector.extract_strided_slice %438 {offsets = [0, 96], sizes = [2, 32], strides = [1, 1]} : vector<2x128xf32> to vector<2x32xf32>
    %444 = arith.mulf %441, %425 : vector<2x32xf32>
    %445 = arith.mulf %440, %442 : vector<2x32xf32>
    %446 = arith.addf %444, %445 : vector<2x32xf32>
    %447 = math.tanh %446 : vector<2x32xf32>
    %448 = arith.mulf %443, %447 : vector<2x32xf32>
    %c3_130 = arith.constant 3 : index
    %c0_131 = arith.constant 0 : index
    %c0_132 = arith.constant 0 : index
    %449 = vector.load %arg14[%c3_130, %c0_131, %c0_132] : memref<8x2x32xf32, #tpu.memory_space<vmem>>, vector<1x2x32xf32>
    %450 = vector.shape_cast %449 : vector<1x2x32xf32> to vector<2x32xf32>
    %451 = vector.shape_cast %448 : vector<2x32xf32> to vector<1x2x32xf32>
    tpu.vector_store %arg14[%c3_130, %c0_131, %c0_132], %451 {strides = array<i32>} : memref<8x2x32xf32, #tpu.memory_space<vmem>>, vector<1x2x32xf32>,
    %452 = vector.extract_strided_slice %367 {offsets = [8, 0], sizes = [2, 128], strides = [1, 1]} : vector<16x128xf32> to vector<2x128xf32>
    %cst_133 = arith.constant dense<0.000000e+00> : vector<2x128xf32>
    %453 = tpu.matmul %448, %363, %cst_133 {dimension_numbers = #tpu.dot_dimension_numbers<[1], [0], [0], [1], [0, 0, 1, 1], [], []>, precision = #tpu.contract_precision<fp32>} : vector<2x32xf32>, vector<32x128xf32>, vector<2x128xf32> -> vector<2x128xf32>
    %454 = arith.addf %452, %453 : vector<2x128xf32>
    %455 = arith.negf %454 : vector<2x128xf32>
    %456 = math.exp %455 : vector<2x128xf32>
    %cst_134 = arith.constant 1.000000e+00 : f32
    %457 = vector.broadcast %cst_134 : f32 to vector<2x128xf32>
    %458 = arith.addf %457, %456 : vector<2x128xf32>
    %459 = arith.divf %457, %458 : vector<2x128xf32>
    %460 = math.tanh %454 : vector<2x128xf32>
    %461 = vector.extract_strided_slice %459 {offsets = [0, 0], sizes = [2, 32], strides = [1, 1]} : vector<2x128xf32> to vector<2x32xf32>
    %462 = vector.extract_strided_slice %459 {offsets = [0, 32], sizes = [2, 32], strides = [1, 1]} : vector<2x128xf32> to vector<2x32xf32>
    %463 = vector.extract_strided_slice %460 {offsets = [0, 64], sizes = [2, 32], strides = [1, 1]} : vector<2x128xf32> to vector<2x32xf32>
    %464 = vector.extract_strided_slice %459 {offsets = [0, 96], sizes = [2, 32], strides = [1, 1]} : vector<2x128xf32> to vector<2x32xf32>
    %465 = arith.mulf %462, %446 : vector<2x32xf32>
    %466 = arith.mulf %461, %463 : vector<2x32xf32>
    %467 = arith.addf %465, %466 : vector<2x32xf32>
    %468 = math.tanh %467 : vector<2x32xf32>
    %469 = arith.mulf %464, %468 : vector<2x32xf32>
    %c4_135 = arith.constant 4 : index
    %c0_136 = arith.constant 0 : index
    %c0_137 = arith.constant 0 : index
    %470 = vector.load %arg14[%c4_135, %c0_136, %c0_137] : memref<8x2x32xf32, #tpu.memory_space<vmem>>, vector<1x2x32xf32>
    %471 = vector.shape_cast %470 : vector<1x2x32xf32> to vector<2x32xf32>
    %472 = vector.shape_cast %469 : vector<2x32xf32> to vector<1x2x32xf32>
    tpu.vector_store %arg14[%c4_135, %c0_136, %c0_137], %472 {strides = array<i32>} : memref<8x2x32xf32, #tpu.memory_space<vmem>>, vector<1x2x32xf32>,
    %473 = vector.extract_strided_slice %367 {offsets = [10, 0], sizes = [2, 128], strides = [1, 1]} : vector<16x128xf32> to vector<2x128xf32>
    %cst_138 = arith.constant dense<0.000000e+00> : vector<2x128xf32>
    %474 = tpu.matmul %469, %363, %cst_138 {dimension_numbers = #tpu.dot_dimension_numbers<[1], [0], [0], [1], [0, 0, 1, 1], [], []>, precision = #tpu.contract_precision<fp32>} : vector<2x32xf32>, vector<32x128xf32>, vector<2x128xf32> -> vector<2x128xf32>
    %475 = arith.addf %473, %474 : vector<2x128xf32>
    %476 = arith.negf %475 : vector<2x128xf32>
    %477 = math.exp %476 : vector<2x128xf32>
    %cst_139 = arith.constant 1.000000e+00 : f32
    %478 = vector.broadcast %cst_139 : f32 to vector<2x128xf32>
    %479 = arith.addf %478, %477 : vector<2x128xf32>
    %480 = arith.divf %478, %479 : vector<2x128xf32>
    %481 = math.tanh %475 : vector<2x128xf32>
    %482 = vector.extract_strided_slice %480 {offsets = [0, 0], sizes = [2, 32], strides = [1, 1]} : vector<2x128xf32> to vector<2x32xf32>
    %483 = vector.extract_strided_slice %480 {offsets = [0, 32], sizes = [2, 32], strides = [1, 1]} : vector<2x128xf32> to vector<2x32xf32>
    %484 = vector.extract_strided_slice %481 {offsets = [0, 64], sizes = [2, 32], strides = [1, 1]} : vector<2x128xf32> to vector<2x32xf32>
    %485 = vector.extract_strided_slice %480 {offsets = [0, 96], sizes = [2, 32], strides = [1, 1]} : vector<2x128xf32> to vector<2x32xf32>
    %486 = arith.mulf %483, %467 : vector<2x32xf32>
    %487 = arith.mulf %482, %484 : vector<2x32xf32>
    %488 = arith.addf %486, %487 : vector<2x32xf32>
    %489 = math.tanh %488 : vector<2x32xf32>
    %490 = arith.mulf %485, %489 : vector<2x32xf32>
    %c5_140 = arith.constant 5 : index
    %c0_141 = arith.constant 0 : index
    %c0_142 = arith.constant 0 : index
    %491 = vector.load %arg14[%c5_140, %c0_141, %c0_142] : memref<8x2x32xf32, #tpu.memory_space<vmem>>, vector<1x2x32xf32>
    %492 = vector.shape_cast %491 : vector<1x2x32xf32> to vector<2x32xf32>
    %493 = vector.shape_cast %490 : vector<2x32xf32> to vector<1x2x32xf32>
    tpu.vector_store %arg14[%c5_140, %c0_141, %c0_142], %493 {strides = array<i32>} : memref<8x2x32xf32, #tpu.memory_space<vmem>>, vector<1x2x32xf32>,
    %494 = vector.extract_strided_slice %367 {offsets = [12, 0], sizes = [2, 128], strides = [1, 1]} : vector<16x128xf32> to vector<2x128xf32>
    %cst_143 = arith.constant dense<0.000000e+00> : vector<2x128xf32>
    %495 = tpu.matmul %490, %363, %cst_143 {dimension_numbers = #tpu.dot_dimension_numbers<[1], [0], [0], [1], [0, 0, 1, 1], [], []>, precision = #tpu.contract_precision<fp32>} : vector<2x32xf32>, vector<32x128xf32>, vector<2x128xf32> -> vector<2x128xf32>
    %496 = arith.addf %494, %495 : vector<2x128xf32>
    %497 = arith.negf %496 : vector<2x128xf32>
    %498 = math.exp %497 : vector<2x128xf32>
    %cst_144 = arith.constant 1.000000e+00 : f32
    %499 = vector.broadcast %cst_144 : f32 to vector<2x128xf32>
    %500 = arith.addf %499, %498 : vector<2x128xf32>
    %501 = arith.divf %499, %500 : vector<2x128xf32>
    %502 = math.tanh %496 : vector<2x128xf32>
    %503 = vector.extract_strided_slice %501 {offsets = [0, 0], sizes = [2, 32], strides = [1, 1]} : vector<2x128xf32> to vector<2x32xf32>
    %504 = vector.extract_strided_slice %501 {offsets = [0, 32], sizes = [2, 32], strides = [1, 1]} : vector<2x128xf32> to vector<2x32xf32>
    %505 = vector.extract_strided_slice %502 {offsets = [0, 64], sizes = [2, 32], strides = [1, 1]} : vector<2x128xf32> to vector<2x32xf32>
    %506 = vector.extract_strided_slice %501 {offsets = [0, 96], sizes = [2, 32], strides = [1, 1]} : vector<2x128xf32> to vector<2x32xf32>
    %507 = arith.mulf %504, %488 : vector<2x32xf32>
    %508 = arith.mulf %503, %505 : vector<2x32xf32>
    %509 = arith.addf %507, %508 : vector<2x32xf32>
    %510 = math.tanh %509 : vector<2x32xf32>
    %511 = arith.mulf %506, %510 : vector<2x32xf32>
    %c6_145 = arith.constant 6 : index
    %c0_146 = arith.constant 0 : index
    %c0_147 = arith.constant 0 : index
    %512 = vector.load %arg14[%c6_145, %c0_146, %c0_147] : memref<8x2x32xf32, #tpu.memory_space<vmem>>, vector<1x2x32xf32>
    %513 = vector.shape_cast %512 : vector<1x2x32xf32> to vector<2x32xf32>
    %514 = vector.shape_cast %511 : vector<2x32xf32> to vector<1x2x32xf32>
    tpu.vector_store %arg14[%c6_145, %c0_146, %c0_147], %514 {strides = array<i32>} : memref<8x2x32xf32, #tpu.memory_space<vmem>>, vector<1x2x32xf32>,
    %515 = vector.extract_strided_slice %367 {offsets = [14, 0], sizes = [2, 128], strides = [1, 1]} : vector<16x128xf32> to vector<2x128xf32>
    %cst_148 = arith.constant dense<0.000000e+00> : vector<2x128xf32>
    %516 = tpu.matmul %511, %363, %cst_148 {dimension_numbers = #tpu.dot_dimension_numbers<[1], [0], [0], [1], [0, 0, 1, 1], [], []>, precision = #tpu.contract_precision<fp32>} : vector<2x32xf32>, vector<32x128xf32>, vector<2x128xf32> -> vector<2x128xf32>
    %517 = arith.addf %515, %516 : vector<2x128xf32>
    %518 = arith.negf %517 : vector<2x128xf32>
    %519 = math.exp %518 : vector<2x128xf32>
    %cst_149 = arith.constant 1.000000e+00 : f32
    %520 = vector.broadcast %cst_149 : f32 to vector<2x128xf32>
    %521 = arith.addf %520, %519 : vector<2x128xf32>
    %522 = arith.divf %520, %521 : vector<2x128xf32>
    %523 = math.tanh %517 : vector<2x128xf32>
    %524 = vector.extract_strided_slice %522 {offsets = [0, 0], sizes = [2, 32], strides = [1, 1]} : vector<2x128xf32> to vector<2x32xf32>
    %525 = vector.extract_strided_slice %522 {offsets = [0, 32], sizes = [2, 32], strides = [1, 1]} : vector<2x128xf32> to vector<2x32xf32>
    %526 = vector.extract_strided_slice %523 {offsets = [0, 64], sizes = [2, 32], strides = [1, 1]} : vector<2x128xf32> to vector<2x32xf32>
    %527 = vector.extract_strided_slice %522 {offsets = [0, 96], sizes = [2, 32], strides = [1, 1]} : vector<2x128xf32> to vector<2x32xf32>
    %528 = arith.mulf %525, %509 : vector<2x32xf32>
    %529 = arith.mulf %524, %526 : vector<2x32xf32>
    %530 = arith.addf %528, %529 : vector<2x32xf32>
    %531 = math.tanh %530 : vector<2x32xf32>
    %532 = arith.mulf %527, %531 : vector<2x32xf32>
    %c7_150 = arith.constant 7 : index
    %c0_151 = arith.constant 0 : index
    %c0_152 = arith.constant 0 : index
    %533 = vector.load %arg14[%c7_150, %c0_151, %c0_152] : memref<8x2x32xf32, #tpu.memory_space<vmem>>, vector<1x2x32xf32>
    %534 = vector.shape_cast %533 : vector<1x2x32xf32> to vector<2x32xf32>
    %535 = vector.shape_cast %532 : vector<2x32xf32> to vector<1x2x32xf32>
    tpu.vector_store %arg14[%c7_150, %c0_151, %c0_152], %535 {strides = array<i32>} : memref<8x2x32xf32, #tpu.memory_space<vmem>>, vector<1x2x32xf32>,
    %c0_153 = arith.constant 0 : index
    %c0_154 = arith.constant 0 : index
    %c0_155 = arith.constant 0 : index
    %536 = vector.load %arg14[%c0_153, %c0_154, %c0_155] : memref<8x2x32xf32, #tpu.memory_space<vmem>>, vector<8x2x32xf32>
    %537 = vector.shape_cast %536 : vector<8x2x32xf32> to vector<16x32xf32>
    %c0_156 = arith.constant 0 : index
    %c0_157 = arith.constant 0 : index
    %538 = vector.load %arg6[%c0_156, %c0_157] : memref<32x128xf32, #tpu.memory_space<vmem>>, vector<32x128xf32>
    %c0_158 = arith.constant 0 : index
    %c0_159 = arith.constant 0 : index
    %539 = vector.load %arg7[%c0_158, %c0_159] : memref<32x128xf32, #tpu.memory_space<vmem>>, vector<32x128xf32>
    %c0_160 = arith.constant 0 : index
    %c0_161 = arith.constant 0 : index
    %540 = vector.load %arg8[%c0_160, %c0_161] : memref<1x128xf32, #tpu.memory_space<vmem>>, vector<1x128xf32>
    %cst_162 = arith.constant dense<0.000000e+00> : vector<16x128xf32>
    %541 = tpu.matmul %537, %538, %cst_162 {dimension_numbers = #tpu.dot_dimension_numbers<[1], [0], [0], [1], [0, 0, 1, 1], [], []>, precision = #tpu.contract_precision<fp32>} : vector<16x32xf32>, vector<32x128xf32>, vector<16x128xf32> -> vector<16x128xf32>
    %542 = vector.broadcast %540 : vector<1x128xf32> to vector<16x128xf32>
    %543 = arith.addf %541, %542 : vector<16x128xf32>
    %544 = vector.extract_strided_slice %543 {offsets = [0, 0], sizes = [2, 128], strides = [1, 1]} : vector<16x128xf32> to vector<2x128xf32>
    %cst_163 = arith.constant dense<0.000000e+00> : vector<2x128xf32>
    %545 = tpu.matmul %356, %539, %cst_163 {dimension_numbers = #tpu.dot_dimension_numbers<[1], [0], [0], [1], [0, 0, 1, 1], [], []>, precision = #tpu.contract_precision<fp32>} : vector<2x32xf32>, vector<32x128xf32>, vector<2x128xf32> -> vector<2x128xf32>
    %546 = arith.addf %544, %545 : vector<2x128xf32>
    %547 = arith.negf %546 : vector<2x128xf32>
    %548 = math.exp %547 : vector<2x128xf32>
    %cst_164 = arith.constant 1.000000e+00 : f32
    %549 = vector.broadcast %cst_164 : f32 to vector<2x128xf32>
    %550 = arith.addf %549, %548 : vector<2x128xf32>
    %551 = arith.divf %549, %550 : vector<2x128xf32>
    %552 = math.tanh %546 : vector<2x128xf32>
    %553 = vector.extract_strided_slice %551 {offsets = [0, 0], sizes = [2, 32], strides = [1, 1]} : vector<2x128xf32> to vector<2x32xf32>
    %554 = vector.extract_strided_slice %551 {offsets = [0, 32], sizes = [2, 32], strides = [1, 1]} : vector<2x128xf32> to vector<2x32xf32>
    %555 = vector.extract_strided_slice %552 {offsets = [0, 64], sizes = [2, 32], strides = [1, 1]} : vector<2x128xf32> to vector<2x32xf32>
    %556 = vector.extract_strided_slice %551 {offsets = [0, 96], sizes = [2, 32], strides = [1, 1]} : vector<2x128xf32> to vector<2x32xf32>
    %557 = arith.mulf %554, %354 : vector<2x32xf32>
    %558 = arith.mulf %553, %555 : vector<2x32xf32>
    %559 = arith.addf %557, %558 : vector<2x32xf32>
    %560 = math.tanh %559 : vector<2x32xf32>
    %561 = arith.mulf %556, %560 : vector<2x32xf32>
    %c0_165 = arith.constant 0 : index
    %c0_166 = arith.constant 0 : index
    %c0_167 = arith.constant 0 : index
    %562 = vector.load %arg15[%c0_165, %c0_166, %c0_167] : memref<8x2x32xf32, #tpu.memory_space<vmem>>, vector<1x2x32xf32>
    %563 = vector.shape_cast %562 : vector<1x2x32xf32> to vector<2x32xf32>
    %564 = vector.shape_cast %561 : vector<2x32xf32> to vector<1x2x32xf32>
    tpu.vector_store %arg15[%c0_165, %c0_166, %c0_167], %564 {strides = array<i32>} : memref<8x2x32xf32, #tpu.memory_space<vmem>>, vector<1x2x32xf32>,
    %565 = vector.extract_strided_slice %543 {offsets = [2, 0], sizes = [2, 128], strides = [1, 1]} : vector<16x128xf32> to vector<2x128xf32>
    %cst_168 = arith.constant dense<0.000000e+00> : vector<2x128xf32>
    %566 = tpu.matmul %561, %539, %cst_168 {dimension_numbers = #tpu.dot_dimension_numbers<[1], [0], [0], [1], [0, 0, 1, 1], [], []>, precision = #tpu.contract_precision<fp32>} : vector<2x32xf32>, vector<32x128xf32>, vector<2x128xf32> -> vector<2x128xf32>
    %567 = arith.addf %565, %566 : vector<2x128xf32>
    %568 = arith.negf %567 : vector<2x128xf32>
    %569 = math.exp %568 : vector<2x128xf32>
    %cst_169 = arith.constant 1.000000e+00 : f32
    %570 = vector.broadcast %cst_169 : f32 to vector<2x128xf32>
    %571 = arith.addf %570, %569 : vector<2x128xf32>
    %572 = arith.divf %570, %571 : vector<2x128xf32>
    %573 = math.tanh %567 : vector<2x128xf32>
    %574 = vector.extract_strided_slice %572 {offsets = [0, 0], sizes = [2, 32], strides = [1, 1]} : vector<2x128xf32> to vector<2x32xf32>
    %575 = vector.extract_strided_slice %572 {offsets = [0, 32], sizes = [2, 32], strides = [1, 1]} : vector<2x128xf32> to vector<2x32xf32>
    %576 = vector.extract_strided_slice %573 {offsets = [0, 64], sizes = [2, 32], strides = [1, 1]} : vector<2x128xf32> to vector<2x32xf32>
    %577 = vector.extract_strided_slice %572 {offsets = [0, 96], sizes = [2, 32], strides = [1, 1]} : vector<2x128xf32> to vector<2x32xf32>
    %578 = arith.mulf %575, %559 : vector<2x32xf32>
    %579 = arith.mulf %574, %576 : vector<2x32xf32>
    %580 = arith.addf %578, %579 : vector<2x32xf32>
    %581 = math.tanh %580 : vector<2x32xf32>
    %582 = arith.mulf %577, %581 : vector<2x32xf32>
    %c1_170 = arith.constant 1 : index
    %c0_171 = arith.constant 0 : index
    %c0_172 = arith.constant 0 : index
    %583 = vector.load %arg15[%c1_170, %c0_171, %c0_172] : memref<8x2x32xf32, #tpu.memory_space<vmem>>, vector<1x2x32xf32>
    %584 = vector.shape_cast %583 : vector<1x2x32xf32> to vector<2x32xf32>
    %585 = vector.shape_cast %582 : vector<2x32xf32> to vector<1x2x32xf32>
    tpu.vector_store %arg15[%c1_170, %c0_171, %c0_172], %585 {strides = array<i32>} : memref<8x2x32xf32, #tpu.memory_space<vmem>>, vector<1x2x32xf32>,
    %586 = vector.extract_strided_slice %543 {offsets = [4, 0], sizes = [2, 128], strides = [1, 1]} : vector<16x128xf32> to vector<2x128xf32>
    %cst_173 = arith.constant dense<0.000000e+00> : vector<2x128xf32>
    %587 = tpu.matmul %582, %539, %cst_173 {dimension_numbers = #tpu.dot_dimension_numbers<[1], [0], [0], [1], [0, 0, 1, 1], [], []>, precision = #tpu.contract_precision<fp32>} : vector<2x32xf32>, vector<32x128xf32>, vector<2x128xf32> -> vector<2x128xf32>
    %588 = arith.addf %586, %587 : vector<2x128xf32>
    %589 = arith.negf %588 : vector<2x128xf32>
    %590 = math.exp %589 : vector<2x128xf32>
    %cst_174 = arith.constant 1.000000e+00 : f32
    %591 = vector.broadcast %cst_174 : f32 to vector<2x128xf32>
    %592 = arith.addf %591, %590 : vector<2x128xf32>
    %593 = arith.divf %591, %592 : vector<2x128xf32>
    %594 = math.tanh %588 : vector<2x128xf32>
    %595 = vector.extract_strided_slice %593 {offsets = [0, 0], sizes = [2, 32], strides = [1, 1]} : vector<2x128xf32> to vector<2x32xf32>
    %596 = vector.extract_strided_slice %593 {offsets = [0, 32], sizes = [2, 32], strides = [1, 1]} : vector<2x128xf32> to vector<2x32xf32>
    %597 = vector.extract_strided_slice %594 {offsets = [0, 64], sizes = [2, 32], strides = [1, 1]} : vector<2x128xf32> to vector<2x32xf32>
    %598 = vector.extract_strided_slice %593 {offsets = [0, 96], sizes = [2, 32], strides = [1, 1]} : vector<2x128xf32> to vector<2x32xf32>
    %599 = arith.mulf %596, %580 : vector<2x32xf32>
    %600 = arith.mulf %595, %597 : vector<2x32xf32>
    %601 = arith.addf %599, %600 : vector<2x32xf32>
    %602 = math.tanh %601 : vector<2x32xf32>
    %603 = arith.mulf %598, %602 : vector<2x32xf32>
    %c2_175 = arith.constant 2 : index
    %c0_176 = arith.constant 0 : index
    %c0_177 = arith.constant 0 : index
    %604 = vector.load %arg15[%c2_175, %c0_176, %c0_177] : memref<8x2x32xf32, #tpu.memory_space<vmem>>, vector<1x2x32xf32>
    %605 = vector.shape_cast %604 : vector<1x2x32xf32> to vector<2x32xf32>
    %606 = vector.shape_cast %603 : vector<2x32xf32> to vector<1x2x32xf32>
    tpu.vector_store %arg15[%c2_175, %c0_176, %c0_177], %606 {strides = array<i32>} : memref<8x2x32xf32, #tpu.memory_space<vmem>>, vector<1x2x32xf32>,
    %607 = vector.extract_strided_slice %543 {offsets = [6, 0], sizes = [2, 128], strides = [1, 1]} : vector<16x128xf32> to vector<2x128xf32>
    %cst_178 = arith.constant dense<0.000000e+00> : vector<2x128xf32>
    %608 = tpu.matmul %603, %539, %cst_178 {dimension_numbers = #tpu.dot_dimension_numbers<[1], [0], [0], [1], [0, 0, 1, 1], [], []>, precision = #tpu.contract_precision<fp32>} : vector<2x32xf32>, vector<32x128xf32>, vector<2x128xf32> -> vector<2x128xf32>
    %609 = arith.addf %607, %608 : vector<2x128xf32>
    %610 = arith.negf %609 : vector<2x128xf32>
    %611 = math.exp %610 : vector<2x128xf32>
    %cst_179 = arith.constant 1.000000e+00 : f32
    %612 = vector.broadcast %cst_179 : f32 to vector<2x128xf32>
    %613 = arith.addf %612, %611 : vector<2x128xf32>
    %614 = arith.divf %612, %613 : vector<2x128xf32>
    %615 = math.tanh %609 : vector<2x128xf32>
    %616 = vector.extract_strided_slice %614 {offsets = [0, 0], sizes = [2, 32], strides = [1, 1]} : vector<2x128xf32> to vector<2x32xf32>
    %617 = vector.extract_strided_slice %614 {offsets = [0, 32], sizes = [2, 32], strides = [1, 1]} : vector<2x128xf32> to vector<2x32xf32>
    %618 = vector.extract_strided_slice %615 {offsets = [0, 64], sizes = [2, 32], strides = [1, 1]} : vector<2x128xf32> to vector<2x32xf32>
    %619 = vector.extract_strided_slice %614 {offsets = [0, 96], sizes = [2, 32], strides = [1, 1]} : vector<2x128xf32> to vector<2x32xf32>
    %620 = arith.mulf %617, %601 : vector<2x32xf32>
    %621 = arith.mulf %616, %618 : vector<2x32xf32>
    %622 = arith.addf %620, %621 : vector<2x32xf32>
    %623 = math.tanh %622 : vector<2x32xf32>
    %624 = arith.mulf %619, %623 : vector<2x32xf32>
    %c3_180 = arith.constant 3 : index
    %c0_181 = arith.constant 0 : index
    %c0_182 = arith.constant 0 : index
    %625 = vector.load %arg15[%c3_180, %c0_181, %c0_182] : memref<8x2x32xf32, #tpu.memory_space<vmem>>, vector<1x2x32xf32>
    %626 = vector.shape_cast %625 : vector<1x2x32xf32> to vector<2x32xf32>
    %627 = vector.shape_cast %624 : vector<2x32xf32> to vector<1x2x32xf32>
    tpu.vector_store %arg15[%c3_180, %c0_181, %c0_182], %627 {strides = array<i32>} : memref<8x2x32xf32, #tpu.memory_space<vmem>>, vector<1x2x32xf32>,
    %628 = vector.extract_strided_slice %543 {offsets = [8, 0], sizes = [2, 128], strides = [1, 1]} : vector<16x128xf32> to vector<2x128xf32>
    %cst_183 = arith.constant dense<0.000000e+00> : vector<2x128xf32>
    %629 = tpu.matmul %624, %539, %cst_183 {dimension_numbers = #tpu.dot_dimension_numbers<[1], [0], [0], [1], [0, 0, 1, 1], [], []>, precision = #tpu.contract_precision<fp32>} : vector<2x32xf32>, vector<32x128xf32>, vector<2x128xf32> -> vector<2x128xf32>
    %630 = arith.addf %628, %629 : vector<2x128xf32>
    %631 = arith.negf %630 : vector<2x128xf32>
    %632 = math.exp %631 : vector<2x128xf32>
    %cst_184 = arith.constant 1.000000e+00 : f32
    %633 = vector.broadcast %cst_184 : f32 to vector<2x128xf32>
    %634 = arith.addf %633, %632 : vector<2x128xf32>
    %635 = arith.divf %633, %634 : vector<2x128xf32>
    %636 = math.tanh %630 : vector<2x128xf32>
    %637 = vector.extract_strided_slice %635 {offsets = [0, 0], sizes = [2, 32], strides = [1, 1]} : vector<2x128xf32> to vector<2x32xf32>
    %638 = vector.extract_strided_slice %635 {offsets = [0, 32], sizes = [2, 32], strides = [1, 1]} : vector<2x128xf32> to vector<2x32xf32>
    %639 = vector.extract_strided_slice %636 {offsets = [0, 64], sizes = [2, 32], strides = [1, 1]} : vector<2x128xf32> to vector<2x32xf32>
    %640 = vector.extract_strided_slice %635 {offsets = [0, 96], sizes = [2, 32], strides = [1, 1]} : vector<2x128xf32> to vector<2x32xf32>
    %641 = arith.mulf %638, %622 : vector<2x32xf32>
    %642 = arith.mulf %637, %639 : vector<2x32xf32>
    %643 = arith.addf %641, %642 : vector<2x32xf32>
    %644 = math.tanh %643 : vector<2x32xf32>
    %645 = arith.mulf %640, %644 : vector<2x32xf32>
    %c4_185 = arith.constant 4 : index
    %c0_186 = arith.constant 0 : index
    %c0_187 = arith.constant 0 : index
    %646 = vector.load %arg15[%c4_185, %c0_186, %c0_187] : memref<8x2x32xf32, #tpu.memory_space<vmem>>, vector<1x2x32xf32>
    %647 = vector.shape_cast %646 : vector<1x2x32xf32> to vector<2x32xf32>
    %648 = vector.shape_cast %645 : vector<2x32xf32> to vector<1x2x32xf32>
    tpu.vector_store %arg15[%c4_185, %c0_186, %c0_187], %648 {strides = array<i32>} : memref<8x2x32xf32, #tpu.memory_space<vmem>>, vector<1x2x32xf32>,
    %649 = vector.extract_strided_slice %543 {offsets = [10, 0], sizes = [2, 128], strides = [1, 1]} : vector<16x128xf32> to vector<2x128xf32>
    %cst_188 = arith.constant dense<0.000000e+00> : vector<2x128xf32>
    %650 = tpu.matmul %645, %539, %cst_188 {dimension_numbers = #tpu.dot_dimension_numbers<[1], [0], [0], [1], [0, 0, 1, 1], [], []>, precision = #tpu.contract_precision<fp32>} : vector<2x32xf32>, vector<32x128xf32>, vector<2x128xf32> -> vector<2x128xf32>
    %651 = arith.addf %649, %650 : vector<2x128xf32>
    %652 = arith.negf %651 : vector<2x128xf32>
    %653 = math.exp %652 : vector<2x128xf32>
    %cst_189 = arith.constant 1.000000e+00 : f32
    %654 = vector.broadcast %cst_189 : f32 to vector<2x128xf32>
    %655 = arith.addf %654, %653 : vector<2x128xf32>
    %656 = arith.divf %654, %655 : vector<2x128xf32>
    %657 = math.tanh %651 : vector<2x128xf32>
    %658 = vector.extract_strided_slice %656 {offsets = [0, 0], sizes = [2, 32], strides = [1, 1]} : vector<2x128xf32> to vector<2x32xf32>
    %659 = vector.extract_strided_slice %656 {offsets = [0, 32], sizes = [2, 32], strides = [1, 1]} : vector<2x128xf32> to vector<2x32xf32>
    %660 = vector.extract_strided_slice %657 {offsets = [0, 64], sizes = [2, 32], strides = [1, 1]} : vector<2x128xf32> to vector<2x32xf32>
    %661 = vector.extract_strided_slice %656 {offsets = [0, 96], sizes = [2, 32], strides = [1, 1]} : vector<2x128xf32> to vector<2x32xf32>
    %662 = arith.mulf %659, %643 : vector<2x32xf32>
    %663 = arith.mulf %658, %660 : vector<2x32xf32>
    %664 = arith.addf %662, %663 : vector<2x32xf32>
    %665 = math.tanh %664 : vector<2x32xf32>
    %666 = arith.mulf %661, %665 : vector<2x32xf32>
    %c5_190 = arith.constant 5 : index
    %c0_191 = arith.constant 0 : index
    %c0_192 = arith.constant 0 : index
    %667 = vector.load %arg15[%c5_190, %c0_191, %c0_192] : memref<8x2x32xf32, #tpu.memory_space<vmem>>, vector<1x2x32xf32>
    %668 = vector.shape_cast %667 : vector<1x2x32xf32> to vector<2x32xf32>
    %669 = vector.shape_cast %666 : vector<2x32xf32> to vector<1x2x32xf32>
    tpu.vector_store %arg15[%c5_190, %c0_191, %c0_192], %669 {strides = array<i32>} : memref<8x2x32xf32, #tpu.memory_space<vmem>>, vector<1x2x32xf32>,
    %670 = vector.extract_strided_slice %543 {offsets = [12, 0], sizes = [2, 128], strides = [1, 1]} : vector<16x128xf32> to vector<2x128xf32>
    %cst_193 = arith.constant dense<0.000000e+00> : vector<2x128xf32>
    %671 = tpu.matmul %666, %539, %cst_193 {dimension_numbers = #tpu.dot_dimension_numbers<[1], [0], [0], [1], [0, 0, 1, 1], [], []>, precision = #tpu.contract_precision<fp32>} : vector<2x32xf32>, vector<32x128xf32>, vector<2x128xf32> -> vector<2x128xf32>
    %672 = arith.addf %670, %671 : vector<2x128xf32>
    %673 = arith.negf %672 : vector<2x128xf32>
    %674 = math.exp %673 : vector<2x128xf32>
    %cst_194 = arith.constant 1.000000e+00 : f32
    %675 = vector.broadcast %cst_194 : f32 to vector<2x128xf32>
    %676 = arith.addf %675, %674 : vector<2x128xf32>
    %677 = arith.divf %675, %676 : vector<2x128xf32>
    %678 = math.tanh %672 : vector<2x128xf32>
    %679 = vector.extract_strided_slice %677 {offsets = [0, 0], sizes = [2, 32], strides = [1, 1]} : vector<2x128xf32> to vector<2x32xf32>
    %680 = vector.extract_strided_slice %677 {offsets = [0, 32], sizes = [2, 32], strides = [1, 1]} : vector<2x128xf32> to vector<2x32xf32>
    %681 = vector.extract_strided_slice %678 {offsets = [0, 64], sizes = [2, 32], strides = [1, 1]} : vector<2x128xf32> to vector<2x32xf32>
    %682 = vector.extract_strided_slice %677 {offsets = [0, 96], sizes = [2, 32], strides = [1, 1]} : vector<2x128xf32> to vector<2x32xf32>
    %683 = arith.mulf %680, %664 : vector<2x32xf32>
    %684 = arith.mulf %679, %681 : vector<2x32xf32>
    %685 = arith.addf %683, %684 : vector<2x32xf32>
    %686 = math.tanh %685 : vector<2x32xf32>
    %687 = arith.mulf %682, %686 : vector<2x32xf32>
    %c6_195 = arith.constant 6 : index
    %c0_196 = arith.constant 0 : index
    %c0_197 = arith.constant 0 : index
    %688 = vector.load %arg15[%c6_195, %c0_196, %c0_197] : memref<8x2x32xf32, #tpu.memory_space<vmem>>, vector<1x2x32xf32>
    %689 = vector.shape_cast %688 : vector<1x2x32xf32> to vector<2x32xf32>
    %690 = vector.shape_cast %687 : vector<2x32xf32> to vector<1x2x32xf32>
    tpu.vector_store %arg15[%c6_195, %c0_196, %c0_197], %690 {strides = array<i32>} : memref<8x2x32xf32, #tpu.memory_space<vmem>>, vector<1x2x32xf32>,
    %691 = vector.extract_strided_slice %543 {offsets = [14, 0], sizes = [2, 128], strides = [1, 1]} : vector<16x128xf32> to vector<2x128xf32>
    %cst_198 = arith.constant dense<0.000000e+00> : vector<2x128xf32>
    %692 = tpu.matmul %687, %539, %cst_198 {dimension_numbers = #tpu.dot_dimension_numbers<[1], [0], [0], [1], [0, 0, 1, 1], [], []>, precision = #tpu.contract_precision<fp32>} : vector<2x32xf32>, vector<32x128xf32>, vector<2x128xf32> -> vector<2x128xf32>
    %693 = arith.addf %691, %692 : vector<2x128xf32>
    %694 = arith.negf %693 : vector<2x128xf32>
    %695 = math.exp %694 : vector<2x128xf32>
    %cst_199 = arith.constant 1.000000e+00 : f32
    %696 = vector.broadcast %cst_199 : f32 to vector<2x128xf32>
    %697 = arith.addf %696, %695 : vector<2x128xf32>
    %698 = arith.divf %696, %697 : vector<2x128xf32>
    %699 = math.tanh %693 : vector<2x128xf32>
    %700 = vector.extract_strided_slice %698 {offsets = [0, 0], sizes = [2, 32], strides = [1, 1]} : vector<2x128xf32> to vector<2x32xf32>
    %701 = vector.extract_strided_slice %698 {offsets = [0, 32], sizes = [2, 32], strides = [1, 1]} : vector<2x128xf32> to vector<2x32xf32>
    %702 = vector.extract_strided_slice %699 {offsets = [0, 64], sizes = [2, 32], strides = [1, 1]} : vector<2x128xf32> to vector<2x32xf32>
    %703 = vector.extract_strided_slice %698 {offsets = [0, 96], sizes = [2, 32], strides = [1, 1]} : vector<2x128xf32> to vector<2x32xf32>
    %704 = arith.mulf %701, %685 : vector<2x32xf32>
    %705 = arith.mulf %700, %702 : vector<2x32xf32>
    %706 = arith.addf %704, %705 : vector<2x32xf32>
    %707 = math.tanh %706 : vector<2x32xf32>
    %708 = arith.mulf %703, %707 : vector<2x32xf32>
    %c7_200 = arith.constant 7 : index
    %c0_201 = arith.constant 0 : index
    %c0_202 = arith.constant 0 : index
    %709 = vector.load %arg15[%c7_200, %c0_201, %c0_202] : memref<8x2x32xf32, #tpu.memory_space<vmem>>, vector<1x2x32xf32>
    %710 = vector.shape_cast %709 : vector<1x2x32xf32> to vector<2x32xf32>
    %711 = vector.shape_cast %708 : vector<2x32xf32> to vector<1x2x32xf32>
    tpu.vector_store %arg15[%c7_200, %c0_201, %c0_202], %711 {strides = array<i32>} : memref<8x2x32xf32, #tpu.memory_space<vmem>>, vector<1x2x32xf32>,
    %c0_203 = arith.constant 0 : index
    %c0_204 = arith.constant 0 : index
    %c0_205 = arith.constant 0 : index
    %712 = vector.load %arg15[%c0_203, %c0_204, %c0_205] : memref<8x2x32xf32, #tpu.memory_space<vmem>>, vector<8x2x32xf32>
    %713 = vector.shape_cast %712 : vector<8x2x32xf32> to vector<16x32xf32>
    %cst_206 = arith.constant 0.000000e+00 : f32
    %714 = vector.broadcast %cst_206 : f32 to vector<16x32xf32>
    %715 = arith.maximumf %713, %714 : vector<16x32xf32>
    %c0_207 = arith.constant 0 : index
    %c0_208 = arith.constant 0 : index
    %716 = vector.load %arg9[%c0_207, %c0_208] : memref<32x128xf32, #tpu.memory_space<vmem>>, vector<32x128xf32>
    %cst_209 = arith.constant dense<0.000000e+00> : vector<16x128xf32>
    %717 = tpu.matmul %715, %716, %cst_209 {dimension_numbers = #tpu.dot_dimension_numbers<[1], [0], [0], [1], [0, 0, 1, 1], [], []>, precision = #tpu.contract_precision<fp32>} : vector<16x32xf32>, vector<32x128xf32>, vector<16x128xf32> -> vector<16x128xf32>
    %c0_210 = arith.constant 0 : index
    %c0_211 = arith.constant 0 : index
    %718 = vector.load %arg10[%c0_210, %c0_211] : memref<1x128xf32, #tpu.memory_space<vmem>>, vector<1x128xf32>
    %719 = vector.broadcast %718 : vector<1x128xf32> to vector<16x128xf32>
    %720 = arith.addf %717, %719 : vector<16x128xf32>
    %c0_212 = arith.constant 0 : index
    %c0_213 = arith.constant 0 : index
    %721 = vector.load %arg11[%c0_212, %c0_213] : memref<16x128xf32, #tpu.memory_space<vmem>>, vector<16x128xf32>
    tpu.vector_store %arg11[%c0_212, %c0_213], %720 {strides = array<i32>} : memref<16x128xf32, #tpu.memory_space<vmem>>, vector<16x128xf32>,
    %c0_214 = arith.constant 0 : index
    %c0_215 = arith.constant 0 : index
    %c0_216 = arith.constant 0 : index
    %722 = vector.load %arg12[%c0_214, %c0_215, %c0_216] : memref<2x2x32xf32, #tpu.memory_space<vmem>>, vector<1x2x32xf32>
    %723 = vector.shape_cast %722 : vector<1x2x32xf32> to vector<2x32xf32>
    %724 = vector.shape_cast %532 : vector<2x32xf32> to vector<1x2x32xf32>
    tpu.vector_store %arg12[%c0_214, %c0_215, %c0_216], %724 {strides = array<i32>} : memref<2x2x32xf32, #tpu.memory_space<vmem>>, vector<1x2x32xf32>,
    %c0_217 = arith.constant 0 : index
    %c0_218 = arith.constant 0 : index
    %c0_219 = arith.constant 0 : index
    %725 = vector.load %arg13[%c0_217, %c0_218, %c0_219] : memref<2x2x32xf32, #tpu.memory_space<vmem>>, vector<1x2x32xf32>
    %726 = vector.shape_cast %725 : vector<1x2x32xf32> to vector<2x32xf32>
    %727 = vector.shape_cast %530 : vector<2x32xf32> to vector<1x2x32xf32>
    tpu.vector_store %arg13[%c0_217, %c0_218, %c0_219], %727 {strides = array<i32>} : memref<2x2x32xf32, #tpu.memory_space<vmem>>, vector<1x2x32xf32>,
    %c1_220 = arith.constant 1 : index
    %c0_221 = arith.constant 0 : index
    %c0_222 = arith.constant 0 : index
    %728 = vector.load %arg12[%c1_220, %c0_221, %c0_222] : memref<2x2x32xf32, #tpu.memory_space<vmem>>, vector<1x2x32xf32>
    %729 = vector.shape_cast %728 : vector<1x2x32xf32> to vector<2x32xf32>
    %730 = vector.shape_cast %708 : vector<2x32xf32> to vector<1x2x32xf32>
    tpu.vector_store %arg12[%c1_220, %c0_221, %c0_222], %730 {strides = array<i32>} : memref<2x2x32xf32, #tpu.memory_space<vmem>>, vector<1x2x32xf32>,
    %c1_223 = arith.constant 1 : index
    %c0_224 = arith.constant 0 : index
    %c0_225 = arith.constant 0 : index
    %731 = vector.load %arg13[%c1_223, %c0_224, %c0_225] : memref<2x2x32xf32, #tpu.memory_space<vmem>>, vector<1x2x32xf32>
    %732 = vector.shape_cast %731 : vector<1x2x32xf32> to vector<2x32xf32>
    %733 = vector.shape_cast %706 : vector<2x32xf32> to vector<1x2x32xf32>
    tpu.vector_store %arg13[%c1_223, %c0_224, %c0_225], %733 {strides = array<i32>} : memref<2x2x32xf32, #tpu.memory_space<vmem>>, vector<1x2x32xf32>,
    return
  }
}

</mosaic_0001>

<bundles_post_ra>
// kernel: tpu_custom_call.1
= control target key start
LH: loop header
LB: loop body
LE: loop exit
PB: predicated region body
PF: predicated region fallthrough
CT: control target
= control target key end

     0   :  { %19 = vsyncpa [#allocation5], 0  ;;  %s28201_s0 = inlined_call_operand.hbm [shape: f32[8,2,32], index: 0, kind: input, shape index: {}]   ;;  %s28202_s1 = inlined_call_operand.hbm [shape: f32[2,2,32], index: 1, kind: input, shape index: {}]   ;;  %s28203_s2 = inlined_call_operand.hbm [shape: f32[2,2,32], index: 2, kind: input, shape index: {}]   ;;  %s28204_s3 = inlined_call_operand.hbm [shape: f32[32,128], index: 3, kind: input, shape index: {}]   ;;  %s28205_s4 = inlined_call_operand.hbm [shape: f32[32,128], index: 4, kind: input, shape index: {}]   ;;  %s28206_s5 = inlined_call_operand.vmem [shape: f32[1,128], index: 5, kind: input, shape index: {}]   ;;  %s28207_s6 = inlined_call_operand.hbm [shape: f32[32,128], index: 6, kind: input, shape index: {}]   ;;  %s28208_s7 = inlined_call_operand.hbm [shape: f32[32,128], index: 7, kind: input, shape index: {}]   ;;  %s28209_s8 = inlined_call_operand.vmem [shape: f32[1,128], index: 8, kind: input, shape index: {}]   ;;  %s28210_s9 = inlined_call_operand.vmem [shape: f32[32,128], index: 9, kind: input, shape index: {}]   ;;  %s28211_s10 = inlined_call_operand.vmem [shape: f32[1,128], index: 10, kind: input, shape index: {}]   ;;  %s28212_s11 = inlined_call_operand.hbm [shape: f32[16,128], index: 11, kind: output, shape index: {0}]   ;;  %s28213_s12 = inlined_call_operand.hbm [shape: f32[2,2,32], index: 12, kind: output, shape index: {1}]   ;;  %s28214_s13 = inlined_call_operand.hbm [shape: f32[2,2,32], index: 13, kind: output, shape index: {2}]  }
   0x1   :  { %20 = vsyncpa [#allocation8], 0 }
   0x2   :  { %21 = vsyncpa [#allocation11], 0 }
   0x3   :  { %22 = vsyncpa [#allocation14], 0 }
   0x4   :  { %23 = vsyncpa [#allocation6], 0 }
   0x5   :  { %24 = vsyncpa [#allocation18], 0  ;;  %s25820_s25 = smov [#allocation7]   ;;  %s25821_s27 = smov [#allocation10]  }
   0x6   :  { %s42_s26 = sshll.u32 %s25820_s25, 4  ;;  %s66_s28 = sshll.u32 %s25821_s27, 4  ;;  %s43_s26 = int_to_ptr.vmem [resolvable:$true] %s42_s26  ;;  %s25910_s28 = int_to_ptr.vmem [resolvable:$true] %s66_s28 }
   0x7   :  { %s25588_s14 = scalar_lea.hbm %s28202_s1, 64 }
   0x8   :  { %p25589_p0 = scmp.ne.s32.totalorder %s28202_s1, %s25588_s14  ;;  %p25592_p1 = scmp.lt.u32.totalorder %s25588_s14, %s28202_s1 }
   0xa   :  { %p25594_p2 = pnand %p25592_p1, %p25589_p0 }
   0xc   :  { %25597 = shalt.err (!%p25594_p2)
}
   0xd   :  { %s25598_s19 = scalar_lea.vmem %s43_s26, 64  ;;  %p25603_p4 = scmp.lt.s32.totalorder %s43_s26, %s43_s26 }
   0xe   :  { %p25599_p3 = scmp.ne.s32.totalorder %s43_s26, %s25598_s19  ;;  %p25604_p5 = scmp.lt.s32.totalorder %s25598_s19, %s25598_s19 }
  0x10   :  { %p25605_p6 = por %p25604_p5, %p25603_p4 }
  0x12   :  { %p25606_p7 = pnand %p25605_p6, %p25599_p3 }
  0x14   :  { %25609 = shalt.err (!%p25606_p7)
}
  0x15   :  { %s25822_s20 = smov 32   ;;  %s25823_s21 = smov 2  }
  0x16   :  { %48 = dma.hbm_to_vmem [thread:$0]  %s28202_s1, 64, %s43_s26, [#allocation8], %s25822_s20, %s25822_s20, %s25823_s21  }
  0x17   :  { %s25610_s27 = scalar_lea.hbm %s28204_s3, 512 }
  0x18   :  { %p25611_p8 = scmp.ne.s32.totalorder %s28204_s3, %s25610_s27  ;;  %p25614_p9 = scmp.lt.u32.totalorder %s25610_s27, %s28204_s3 }
  0x1a   :  { %p25616_p10 = pnand %p25614_p9, %p25611_p8 }
  0x1c   :  { %25619 = shalt.err (!%p25616_p10)
}
  0x1d   :  { %s25620_s16 = scalar_lea.vmem %s25910_s28, 512  ;;  %p25625_p12 = scmp.lt.s32.totalorder %s25910_s28, %s25910_s28 }
  0x1e   :  { %p25621_p11 = scmp.ne.s32.totalorder %s25910_s28, %s25620_s16  ;;  %p25626_p13 = scmp.lt.s32.totalorder %s25620_s16, %s25620_s16 }
  0x20   :  { %p25627_p0 = por %p25626_p13, %p25625_p12 }
  0x22   :  { %p25628_p1 = pnand %p25627_p0, %p25621_p11 }
  0x24   :  { %25631 = shalt.err (!%p25628_p1)
}
  0x25   :  { %s25824_s1 = smov 128   ;;  %s25825_s26 = smov 8  }
  0x26   :  { %72 = dma.hbm_to_vmem [thread:$0]  %s28204_s3, 512, %s25910_s28, [#allocation11], %s25824_s1, %s25824_s1, %s25825_s26  }
  0x27   :  { %s25826_s19 = smov [#allocation13]   ;;  %s25827_s23 = smov [#allocation4]  }
  0x28   :  { %s92_s22 = sshll.u32 %s25826_s19, 4  ;;  %s30_s24 = sshll.u32 %s25827_s23, 4  ;;  %s93_s22 = int_to_ptr.vmem [resolvable:$true] %s92_s22  ;;  %s25947_s24 = int_to_ptr.vmem [resolvable:$true] %s30_s24 }
  0x29   :  { %s25632_s29 = scalar_lea.hbm %s28207_s6, 512 }
  0x2a   :  { %p25633_p2 = scmp.ne.s32.totalorder %s28207_s6, %s25632_s29  ;;  %p25636_p3 = scmp.lt.u32.totalorder %s25632_s29, %s28207_s6 }
  0x2c   :  { %p25638_p4 = pnand %p25636_p3, %p25633_p2 }
  0x2e   :  { %25641 = shalt.err (!%p25638_p4)
}
  0x2f   :  { %s25642_s3 = scalar_lea.vmem %s93_s22, 512  ;;  %p25647_p6 = scmp.lt.s32.totalorder %s93_s22, %s93_s22 }
  0x30   :  { %p25643_p5 = scmp.ne.s32.totalorder %s93_s22, %s25642_s3  ;;  %p25648_p7 = scmp.lt.s32.totalorder %s25642_s3, %s25642_s3 }
  0x32   :  { %p25649_p8 = por %p25648_p7, %p25647_p6 }
  0x34   :  { %p25650_p9 = pnand %p25649_p8, %p25643_p5 }
  0x36   :  { %25653 = shalt.err (!%p25650_p9)
}
  0x37   :  { %98 = dma.hbm_to_vmem [thread:$0]  %s28207_s6, 512, %s93_s22, [#allocation14], %s25824_s1, %s25824_s1, %s25825_s26  }
  0x38   :  { %s25654_s23 = scalar_lea.hbm %s28201_s0, 256 }
  0x39   :  { %p25655_p10 = scmp.ne.s32.totalorder %s28201_s0, %s25654_s23  ;;  %p25658_p11 = scmp.lt.u32.totalorder %s25654_s23, %s28201_s0 }
  0x3b   :  { %p25660_p12 = pnand %p25658_p11, %p25655_p10 }
  0x3d   :  { %25663 = shalt.err (!%p25660_p12)
}
  0x3e   :  { %s25664_s14 = scalar_lea.vmem %s25947_s24, 256  ;;  %p25669_p0 = scmp.lt.s32.totalorder %s25947_s24, %s25947_s24 }
  0x3f   :  { %p25665_p13 = scmp.ne.s32.totalorder %s25947_s24, %s25664_s14  ;;  %p25670_p1 = scmp.lt.s32.totalorder %s25664_s14, %s25664_s14 }
  0x41   :  { %p25671_p2 = por %p25670_p1, %p25669_p0 }
  0x43   :  { %p25672_p3 = pnand %p25671_p2, %p25665_p13 }
  0x45   :  { %25675 = shalt.err (!%p25672_p3)
}
  0x46   :  { %36 = dma.hbm_to_vmem [thread:$0]  %s28201_s0, 256, %s25947_s24, [#allocation5], %s25822_s20, %s25822_s20, %s25823_s21  }
  0x47   :  { %s25828_s15 = smov [#allocation9]   ;;  %s25829_s3 = smov [#allocation12]  }
  0x48   :  { %s54_s16 = sshll.u32 %s25828_s15, 4  ;;  %s78_s28 = sshll.u32 %s25829_s3, 4  ;;  %s55_s16 = int_to_ptr.vmem [resolvable:$true] %s54_s16  ;;  %s25984_s28 = int_to_ptr.vmem [resolvable:$true] %s78_s28 }
  0x49   :  { %s25676_s19 = scalar_lea.hbm %s28203_s2, 64 }
  0x4a   :  { %p25677_p4 = scmp.ne.s32.totalorder %s28203_s2, %s25676_s19  ;;  %p25680_p5 = scmp.lt.u32.totalorder %s25676_s19, %s28203_s2 }
  0x4c   :  { %p25682_p6 = pnand %p25680_p5, %p25677_p4 }
  0x4e   :  { %25685 = shalt.err (!%p25682_p6)
}
  0x4f   :  { %s25686_s0 = scalar_lea.vmem %s55_s16, 64  ;;  %p25691_p8 = scmp.lt.s32.totalorder %s55_s16, %s55_s16 }
  0x50   :  { %p25687_p7 = scmp.ne.s32.totalorder %s55_s16, %s25686_s0  ;;  %p25692_p9 = scmp.lt.s32.totalorder %s25686_s0, %s25686_s0 }
  0x52   :  { %p25693_p10 = por %p25692_p9, %p25691_p8 }
  0x54   :  { %p25694_p11 = pnand %p25693_p10, %p25687_p7 }
  0x56   :  { %25697 = shalt.err (!%p25694_p11)
}
  0x57   :  { %60 = dma.hbm_to_vmem [thread:$0]  %s28203_s2, 64, %s55_s16, [#allocation8], %s25822_s20, %s25822_s20, %s25823_s21  }
  0x58   :  { %s25698_s22 = scalar_lea.hbm %s28205_s4, 512 }
  0x59   :  { %p25699_p12 = scmp.ne.s32.totalorder %s28205_s4, %s25698_s22  ;;  %p25702_p13 = scmp.lt.u32.totalorder %s25698_s22, %s28205_s4 }
  0x5b   :  { %p25704_p0 = pnand %p25702_p13, %p25699_p12 }
  0x5d   :  { %25707 = shalt.err (!%p25704_p0)
}
  0x5e   :  { %s25708_s19 = scalar_lea.vmem %s25984_s28, 512  ;;  %p25713_p2 = scmp.lt.s32.totalorder %s25984_s28, %s25984_s28 }
  0x5f   :  { %p25709_p1 = scmp.ne.s32.totalorder %s25984_s28, %s25708_s19  ;;  %p25714_p3 = scmp.lt.s32.totalorder %s25708_s19, %s25708_s19 }
  0x61   :  { %p25715_p4 = por %p25714_p3, %p25713_p2 }
  0x63   :  { %p25716_p5 = pnand %p25715_p4, %p25709_p1 }
  0x65   :  { %25719 = shalt.err (!%p25716_p5)
}
  0x66   :  { %84 = dma.hbm_to_vmem [thread:$0]  %s28205_s4, 512, %s25984_s28, [#allocation11], %s25824_s1, %s25824_s1, %s25825_s26  }
  0x67   :  { %s25830_s23 = smov [#allocation15]   ;;  %s25720_s0 = scalar_lea.hbm %s28208_s7, 512 }
  0x68   :  { %s104_s25 = sshll.u32 %s25830_s23, 4  ;;  %p25721_p6 = scmp.ne.s32.totalorder %s28208_s7, %s25720_s0  ;;  %s105_s25 = int_to_ptr.vmem [resolvable:$true] %s104_s25 }
  0x69   :  { %p25724_p7 = scmp.lt.u32.totalorder %s25720_s0, %s28208_s7 }
  0x6b   :  { %p25726_p8 = pnand %p25724_p7, %p25721_p6 }
  0x6d   :  { %25729 = shalt.err (!%p25726_p8)
}
  0x6e   :  { %s25730_s22 = scalar_lea.vmem %s105_s25, 512  ;;  %p25735_p10 = scmp.lt.s32.totalorder %s105_s25, %s105_s25 }
  0x6f   :  { %p25731_p9 = scmp.ne.s32.totalorder %s105_s25, %s25730_s22  ;;  %p25736_p11 = scmp.lt.s32.totalorder %s25730_s22, %s25730_s22 }
  0x71   :  { %p25737_p12 = por %p25736_p11, %p25735_p10 }
  0x73   :  { %p25738_p13 = pnand %p25737_p12, %p25731_p9 }
  0x75   :  { %25741 = shalt.err (!%p25738_p13)
}
  0x76   :  { %110 = dma.hbm_to_vmem [thread:$0]  %s28208_s7, 512, %s105_s25, [#allocation14], %s25824_s1, %s25824_s1, %s25825_s26  }
  0x77   :  { %25808 = dma.done.wait [#allocation5], 256  }
  0x78   :  { %25809 = vsyncadd [#allocation5], 4294967040 }
  0x79   :  { %25810 = dma.done.wait [#allocation8], 128  }
  0x7a   :  { %25811 = vsyncadd [#allocation8], 4294967168 }
  0x7b   :  { %25812 = dma.done.wait [#allocation11], 1024  }
  0x7c   :  { %25813 = vsyncadd [#allocation11], 4294966272 }
  0x7d   :  { %25814 = dma.done.wait [#allocation14], 1024  }
  0x7e   :  { %25815 = vsyncadd [#allocation14], 4294966272  ;;  %v25831_v0 = vmov 0.0|0.0   ;;  %vm25832_vm0 = vmmov 0   ;;  %v25833_v1 = vmov 0.0   ;;  %v180_v2 = vlaneseq  ;;  %v156_v7 = vld [vmem:[#allocation12] sm:$0xff] }
  0x7f   :  { %23668 = vmatprep.subr.bf16.mxu1 %v25831_v0  ;;  %21252 = vmatprep.mubr.msk.f32.mxu1 %vm25832_vm0, %v25833_v1  ;;  %v25834_v3 = vmov 1983009808   ;;  %v157_v8 = vld [vmem:[#allocation12 + $0x8] sm:$0xff]  ;;  %v158_v9 = vld [vmem:[#allocation12 + $0x10] sm:$0xff]  ;;  %vm209_vm1 = vcmask 261120   ;;  %v746_v10 = vand.u32 4294901760, %v156_v7 }
  0x80   :  { %v178_v4 = vunpack.c.l.s4 %v25834_v3  ;;  %v181_v6 = vshrl.u32 %v180_v2, 7  ;;  %v749_v11 = vand.u32 4294901760, %v157_v8  ;;  %v159_v12 = vld [vmem:[#allocation12 + $0x18] sm:$0xff]  ;;  %v752_v13 = vand.u32 4294901760, %v158_v9  ;;  %v152_v14 = vld [vmem:[#allocation10] sm:$0xff]  ;;  %v153_v15 = vld [vmem:[#allocation10 + $0x8] sm:$0xff] }
  0x81   :  { %v755_v16 = vand.u32 4294901760, %v159_v12  ;;  %v215_v17 = vand.u32 4294901760, %v152_v14  ;;  %v218_v18 = vand.u32 4294901760, %v153_v15  ;;  %v138_v19 = vld [vmem:[#allocation7] sm:$0x3]  ;;  %v26039_v20 = vld [vmem:[#allocation10 + $0x10] sm:$0xff]  ;;  %v26046_v24 = vsub.f32 %v156_v7, %v746_v10 }
  0x82   :  { %v179_v5 = vunpack.c.0.s8 %v178_v4  ;;  %v26043_v22 = vpack.c.bf16 %v749_v11, %v746_v10  ;;  %v743_v23 = vsel %vm209_vm1, %v138_v19, 0  ;;  %v26048_v25 = vsub.f32 %v157_v8, %v749_v11  ;;  %v26050_v26 = vld [vmem:[#allocation10 + $0x18] sm:$0xff]  ;;  %v144_v27 = vld [vmem:[#allocation4] sm:$0x3]  ;;  %v145_v28 = vld [vmem:[#allocation4 + $0x2] sm:$0x3] }
  0x83   :  { %v26052_v29 = vpack.c.bf16 %v755_v16, %v752_v13  ;;  %v26054_v30 = vpack.c.bf16 %v218_v18, %v215_v17  ;;  %v26056_v31 = vand.u32 4294901760, %v743_v23  ;;  %v221_v32 = vand.u32 4294901760, %v26039_v20  ;;  %v146_v33 = vld [vmem:[#allocation4 + $0x4] sm:$0x3]  ;;  %v147_v38 = vld [vmem:[#allocation4 + $0x6] sm:$0x3] }
  0x84   :  { %v26041_v21 = vsub.s32 %v179_v5, %v181_v6  ;;  %23670 = vmatpush3.bf16.msra.mxu1 %v26043_v22  ;;  %v827_v34 = vand.u32 4294901760, %v26046_v24  ;;  %v834_v35 = vand.u32 4294901760, %v26048_v25  ;;  %v224_v36 = vand.u32 4294901760, %v26050_v26  ;;  %v148_v50 = vld [vmem:[#allocation4 + $0x8] sm:$0x3]  ;;  %s25835_s3 = smov 64  }
  0x85   :  { %v26063_v37 = vsub.f32 %v158_v9, %v752_v13  ;;  %23671 = vmatprep.subr.bf16.mxu1 %v25831_v0  ;;  %23621 = vmatprep.subr.bf16.mxu0 %v26054_v30  ;;  %v26068_v39 = vsub.f32 %v743_v23, %v26056_v31  ;;  %v26070_v40 = vsub.f32 %v159_v12, %v755_v16  ;;  %v149_v51 = vld [vmem:[#allocation4 + $0xa] sm:$0x3]  ;;  %v150_v60 = vld [vmem:[#allocation4 + $0xc] sm:$0x3]  ;;  %v151_v61 = vld [vmem:[#allocation4 + $0xe] sm:$0x3] }
  0x86   :  { %v175_v41 = vcombine.low %v144_v27, %v145_v28  ;;  %23623 = vmatpush3.bf16.msra.mxu0 %v26054_v30  ;;  %v828_v42 = vsub.f32 %v26046_v24, %v827_v34  ;;  %v835_v43 = vsub.f32 %v26048_v25, %v834_v35  ;;  %v26079_v44 = vpack.c.bf16 %v224_v36, %v221_v32 }
  0x87   :  { %v841_v45 = vand.u32 4294901760, %v26063_v37  ;;  %v816_v46 = vand.u32 4294901760, %v26068_v39  ;;  %v848_v47 = vand.u32 4294901760, %v26070_v40  ;;  %v176_v48 = vcombine.low %v146_v33, %v147_v38 }
  0x88   :  { %v183_v49 = vrot.slane %v175_v41, %v26041_v21  ;;  %23673 = vmatpush3.bf16.msra.mxu1 %v26052_v29  ;;  %v829_v52 = vand.u32 4294901760, %v828_v42  ;;  %v836_v53 = vand.u32 4294901760, %v835_v43  ;;  %23625 = vmatprep.subr.bf16.mxu0 %v26079_v44  ;;  %v26090_v55 = vsub.f32 %v152_v14, %v215_v17 }
  0x89   :  { %v842_v54 = vsub.f32 %v26063_v37, %v841_v45  ;;  %23674 = vmatprep.subr.bf16.mxu1 %v25831_v0  ;;  %v817_v56 = vsub.f32 %v26068_v39, %v816_v46  ;;  %v849_v57 = vsub.f32 %v26070_v40, %v848_v47  ;;  %v190_v58 = vrot.slane %v176_v48, %v26041_v21 }
  0x8a   :  { %v26100_v59 = vsub.f32 %v153_v15, %v218_v18  ;;  %v26102_v62 = vpack.c.bf16 %v836_v53, %v829_v52  ;;  %23627 = vmatpush3.bf16.msra.mxu0 %v26079_v44  ;;  %v306_v2 = vand.u32 4294901760, %v26090_v55  ;;  %v192_v3 = vcombine.low %v148_v50, %v149_v51 }
  0x8b   :  { %v843_v63 = vand.u32 4294901760, %v842_v54  ;;  %v818_v4 = vand.u32 4294901760, %v817_v56  ;;  %v850_v5 = vand.u32 4294901760, %v849_v57  ;;  %v191_v6 = vcombine.low %v183_v49, %v190_v58 }
  0x8c   :  { %v313_v7 = vand.u32 4294901760, %v26100_v59  ;;  %v307_v8 = vsub.f32 %v26090_v55, %v306_v2  ;;  %v193_v9 = vcombine.low %v150_v60, %v151_v61  ;;  %v200_v10 = vrot.slane %v192_v3, %v26041_v21 }
  0x8d   :  { %21253 = vmatmul.mubr.f32.vlgmr.msra.gmra.mrb[0].mxu1 %v818_v4  ;;  %v26111_v11 = vpack.c.bf16 %v850_v5, %v843_v63  ;;  %v210_v12 = vsel %vm209_vm1, %v191_v6, 0  ;;  %v26118_v14 = vsub.f32 %v26039_v20, %v221_v32  ;;  %v26127_v18 = vsub.f32 %v26050_v26, %v224_v36  ;;  %v20001_v6 = vld [vmem:[%s28206_s5] ss:$0 sm:$0xff] }
  0x8e   :  { %v314_v13 = vsub.f32 %v26100_v59, %v313_v7  ;;  %23676 = vmatpush3.bf16.msra.mxu1 %v26102_v62  ;;  %v26121_v15 = vand.u32 4294901760, %v210_v12  ;;  %v308_v16 = vand.u32 4294901760, %v307_v8  ;;  %v207_v17 = vrot.slane %v193_v9, %v26041_v21  ;;  %21263 = vmatprep.mubr.msk.f32.mxu1 %vm25832_vm0, %v25833_v1 }
  0x8f   :  { %23677 = vmatprep.subr.bf16.mxu1 %v25831_v0  ;;  %v320_v23 = vand.u32 4294901760, %v26118_v14  ;;  %v327_v28 = vand.u32 4294901760, %v26127_v18  ;;  %v26137_v26 = vpack.c.bf16 %v26048_v25, %v26046_v24  ;;  %v26153_v50 = vpack.c.bf16 %v26070_v40, %v26063_v37 }
  0x90   :  { %v315_v19 = vand.u32 4294901760, %v314_v13  ;;  %v284_v20 = vsub.f32 %v210_v12, %v26121_v15  ;;  %v208_v27 = vcombine.low %v200_v10, %v207_v17  ;;  %v23636_v58 = vpack.c.bf16 %v26100_v59, %v26090_v55 }
  0x91   :  { %v321_v41 = vsub.f32 %v26118_v14, %v320_v23  ;;  %v328_v42 = vsub.f32 %v26127_v18, %v327_v28  ;;  %v23640_v60 = vpack.c.bf16 %v26127_v18, %v26118_v14  ;;  %v26176_v61 = vpack.c.bf16 %v834_v35, %v827_v34  ;;  %v141_v14 = vld [vmem:[#allocation9] sm:$0x3] }
  0x92   :  { %v23628_v32 = vpack.c.bf16 %v315_v19, %v308_v16  ;;  %23679 = vmatpush3.bf16.msra.mxu1 %v26111_v11  ;;  %v285_v33 = vand.u32 4294901760, %v284_v20  ;;  %v212_v38 = vsel %vm209_vm1, %v208_v27, 0  ;;  %v26186_v63 = vpack.c.bf16 %v848_v47, %v841_v45 }
  0x93   :  { %v26139_v36 = vand.u32 4294901760, %v212_v38  ;;  %23680 = vmatprep.subr.bf16.mxu1 %v25831_v0  ;;  %v322_v52 = vand.u32 4294901760, %v321_v41  ;;  %v329_v53 = vand.u32 4294901760, %v328_v42  ;;  %v23652_v24 = vpack.c.bf16 %v313_v7, %v306_v2 }
  0x94   :  { %23629 = vmatprep.subr.bf16.mxu0 %v23628_v32  ;;  %v286_v43 = vsub.f32 %v284_v20, %v285_v33  ;;  %v23656_v25 = vpack.c.bf16 %v327_v28, %v320_v23  ;;  %vm1263_vm2 = vcmask 254976   ;;  %vm1788_vm3 = vcmask 257026  }
  0x95   :  { %v294_v48 = vsub.f32 %v212_v38, %v26139_v36  ;;  %21264 = vmatmul.mubr.f32.vlgmr.msra.gmra.mrb[2].mxu1 %v26056_v31  ;;  %v23632_v57 = vpack.c.bf16 %v329_v53, %v322_v52  ;;  %vm2844_vm4 = vcmask 261126   ;;  %vm2316_vm5 = vcmask 259076  }
  0x96   :  { %v287_v49 = vand.u32 4294901760, %v286_v43  ;;  %23682 = vmatpush3.bf16.msra.mxu1 %v26137_v26  ;;  %21274 = vmatprep.mubr.msk.f32.mxu1 %vm25832_vm0, %v25833_v1 }
  0x97   :  { %v295_v51 = vand.u32 4294901760, %v294_v48  ;;  %23683 = vmatprep.subr.bf16.mxu1 %v25831_v0 }
  0x98   :  { %21186 = vmatprep.mubr.f32.mxu0 %v287_v49 }
  0x99   :  { %v296_v54 = vsub.f32 %v294_v48, %v295_v51 }
  0x9a   :  { %23685 = vmatpush3.bf16.msra.mxu1 %v26153_v50 }
  0x9b   :  { %v297_v56 = vand.u32 4294901760, %v296_v54  ;;  %23686 = vmatprep.subr.bf16.mxu1 %v25831_v0 }
  0x9d   :  { %21187 = vmatmul.mubr.f32.vlgmr.msra.gmra.mrb[0].mxu0 %v297_v56  ;;  %21275 = vmatmul.mubr.f32.vlgmr.msra.gmra.mrb[4].mxu1 %v26068_v39 }
  0x9e   :  { %23631 = vmatpush3.bf16.msra.mxu0 %v23628_v32  ;;  %21197 = vmatprep.mubr.f32.mxu0 %v26121_v15 }
  0x9f   :  { %23633 = vmatprep.subr.bf16.mxu0 %v23632_v57  ;;  %23688 = vmatpush3.bf16.msra.mxu1 %v26043_v22 }
  0xa0   :  { %23689 = vmatprep.subr.bf16.mxu1 %v25831_v0  ;;  %21285 = vmatprep.mubr.msk.f32.mxu1 %vm25832_vm0, %v25833_v1 }
  0xa2   :  { %23635 = vmatpush3.bf16.msra.mxu0 %v23632_v57 }
  0xa3   :  { %23637 = vmatprep.subr.bf16.mxu0 %v23636_v58  ;;  %23691 = vmatpush3.bf16.msra.mxu1 %v26052_v29 }
  0xa4   :  { %23692 = vmatprep.subr.bf16.mxu1 %v25831_v0 }
  0xa5   :  { %21198 = vmatmul.mubr.f32.vlgmr.msra.gmra.mrb[0].mxu0 %v26139_v36 }
  0xa6   :  { %23639 = vmatpush3.bf16.msra.mxu0 %v23636_v58  ;;  %21208 = vmatprep.mubr.f32.mxu0 %v284_v20 }
  0xa7   :  { %23641 = vmatprep.subr.bf16.mxu0 %v23640_v60  ;;  %21286 = vmatmul.mubr.f32.vlgmr.msra.gmra.mrb[6].mxu1 %v816_v46 }
  0xa8   :  { %23694 = vmatpush3.bf16.msra.mxu1 %v26176_v61  ;;  %21296 = vmatprep.mubr.msk.f32.mxu1 %vm25832_vm0, %v25833_v1 }
  0xa9   :  { %23695 = vmatprep.subr.bf16.mxu1 %v25831_v0 }
  0xaa   :  { %23643 = vmatpush3.bf16.msra.mxu0 %v23640_v60 }
  0xab   :  { %23645 = vmatprep.subr.bf16.mxu0 %v26054_v30 }
  0xac   :  { %23697 = vmatpush3.bf16.msra.mxu1 %v26186_v63 }
  0xad   :  { %21209 = vmatmul.mubr.f32.vlgmr.msra.gmra.mrb[0].mxu0 %v294_v48  ;;  %23698 = vmatprep.subr.bf16.mxu1 %v25831_v0 }
  0xae   :  { %23647 = vmatpush3.bf16.msra.mxu0 %v26054_v30  ;;  %21219 = vmatprep.mubr.f32.mxu0 %v285_v33 }
  0xaf   :  { %23649 = vmatprep.subr.bf16.mxu0 %v26079_v44  ;;  %21297 = vmatmul.mubr.f32.vlgmr.msra.gmra.mrb[8].mxu1 %v26056_v31 }
  0xb0   :  { %23700 = vmatpush3.bf16.msra.mxu1 %v26043_v22  ;;  %21307 = vmatprep.mubr.msk.f32.mxu1 %vm25832_vm0, %v25833_v1 }
  0xb1   :  { %23701 = vmatprep.subr.bf16.mxu1 %v25831_v0 }
  0xb2   :  { %23651 = vmatpush3.bf16.msra.mxu0 %v26079_v44 }
  0xb3   :  { %23653 = vmatprep.subr.bf16.mxu0 %v23652_v24 }
  0xb4   :  { %23703 = vmatpush3.bf16.msra.mxu1 %v26052_v29 }
  0xb5   :  { %21220 = vmatmul.mubr.f32.vlgmr.msra.gmra.mrb[0].mxu0 %v295_v51  ;;  %23740 = vmatprep.subr.bf16.mxu1 %v25831_v0 }
  0xb6   :  { %23655 = vmatpush3.bf16.msra.mxu0 %v23652_v24  ;;  %21230 = vmatprep.mubr.f32.mxu0 %v26121_v15 }
  0xb7   :  { %23657 = vmatprep.subr.bf16.mxu0 %v23656_v25  ;;  %21308 = vmatmul.mubr.f32.vlgmr.msra.gmra.mrb[10].mxu1 %v26056_v31 }
  0xb8   :  { %23742 = vmatpush3.bf16.msra.mxu1 %v26043_v22  ;;  %21384 = vmatprep.mubr.msk.f32.mxu1 %vm25832_vm0, %v25833_v1 }
  0xb9   :  { %23743 = vmatprep.subr.bf16.mxu1 %v25831_v0 }
  0xba   :  { %23659 = vmatpush3.bf16.msra.mxu0 %v23656_v25 }
  0xbb   :  { %23661 = vmatprep.subr.bf16.mxu0 %v26054_v30 }
  0xbc   :  { %23745 = vmatpush3.bf16.msra.mxu1 %v26052_v29 }
  0xbd   :  { %21231 = vmatmul.mubr.f32.vlgmr.msra.gmra.mrb[0].mxu0 %v26139_v36  ;;  %23746 = vmatprep.subr.bf16.mxu1 %v25831_v0 }
  0xbe   :  { %23663 = vmatpush3.bf16.msra.mxu0 %v26054_v30  ;;  %21241 = vmatprep.mubr.f32.mxu0 %v26121_v15 }
  0xbf   :  { %23665 = vmatprep.subr.bf16.mxu0 %v26079_v44 }
  0xc2   :  { %23667 = vmatpush3.bf16.msra.mxu0 %v26079_v44 }
  0xc3   :  { %23704 = vmatprep.subr.bf16.mxu0 %v25831_v0 }
  0xc5   :  { %21242 = vmatmul.mubr.f32.vlgmr.msra.gmra.mrb[0].mxu0 %v26139_v36 }
  0xc6   :  { %23706 = vmatpush3.bf16.msra.mxu0 %v26043_v22  ;;  %21318 = vmatprep.mubr.msk.f32.mxu0 %vm25832_vm0, %v25833_v1 }
  0xc7   :  { %23707 = vmatprep.subr.bf16.mxu0 %v25831_v0 }
  0xca   :  { %23709 = vmatpush3.bf16.msra.mxu0 %v26052_v29 }
  0xcb   :  { %23710 = vmatprep.subr.bf16.mxu0 %v25831_v0 }
 0x160   :  { %v820_v30 = vpop.f32.mrb[0].mxu1 }
 0x161   :  { %v21254_v31 = vpop.f32.mrb[1].mxu1 }
 0x168   :  { %v911_v34 = vpop.f32.mrb[2].mxu1 }
 0x169   :  { %v912_v35 = vadd.f32 %v911_v34, %v820_v30  ;;  %v21265_v37 = vpop.f32.mrb[3].mxu1 }
 0x170   :  { %v991_v39 = vpop.f32.mrb[4].mxu1 }
 0x171   :  { %v992_v40 = vadd.f32 %v991_v39, %v912_v35  ;;  %v21276_v44 = vpop.f32.mrb[5].mxu1 }
 0x17a   :  { %v1068_v45 = vpop.f32.mrb[6].mxu1 }
 0x17b   :  { %v1069_v46 = vadd.f32 %v1068_v45, %v992_v40  ;;  %v21287_v47 = vpop.f32.mrb[7].mxu1 }
 0x182   :  { %v1151_v55 = vpop.f32.mrb[8].mxu1 }
 0x183   :  { %v1152_v59 = vadd.f32 %v1151_v55, %v1069_v46  ;;  %v21298_v2 = vpop.f32.mrb[9].mxu1 }
 0x18a   :  { %v1226_v3 = vpop.f32.mrb[10].mxu1 }
 0x18b   :  { %v1227_v4 = vadd.f32 %v1226_v3, %v1152_v59  ;;  %v21309_v5 = vpop.f32.mrb[11].mxu1 }
 0x198   :  { %v21243_v7 = vpop.f32.mrb[0].mxu0 }
 0x199   :  { %v26237_v8 = vadd.f32 %v21243_v7, %v20001_v6  ;;  %v732_v9 = vpop.f32.mrb[1].mxu0 }
 0x19a   :  { %v26239_v10 = vadd.f32 %v20001_v6, %v732_v9 }
 0x19c   :  { %v1230_v12 = vadd.f32 %v26239_v10, %v1227_v4 }
 0x19e   :  { %25332 = vtanh.f32 %v1230_v12  ;;  %v20002_v15 = vmul.f32 -1.442695, %v1230_v12 }
 0x1a0   :  { %25334 = vpow2.f32 %v20002_v15 }
 0x1a8   :  { %v25333_v13 = vpop.eup %25332 }
 0x1a9   :  { %1244 = vrot.lane.b32.xlu0 %v25333_v13, %s25835_s3 }
 0x1aa   :  { %v25335_v16 = vpop.eup %25334 }
 0x1ab   :  { %v1234_v17 = vadd.f32 1.0, %v25335_v16 }
 0x1ad   :  { %1239 = vrot.lane.b32.xlu0 %v141_v14, %s25822_s20  ;;  %25336 = vrcp.f32 %v1234_v17 }
 0x1b7   :  { %v25337_v18 = vpop.eup %25336 }
 0x21b   :  { %v1245_v19 = vpop.permute.xlu0 %1244 }
 0x21c   :  { %v1247_v23 = vmul.f32 %v25337_v18, %v1245_v19 }
 0x21e   :  { %1249 = vrot.lane.b32.xlu1 %v1247_v23, %s25822_s20 }
 0x21f   :  { %v1240_v20 = vpop.permute.xlu0 %1239 }
 0x220   :  { %v1242_v27 = vmul.f32 %v25337_v18, %v1240_v20 }
 0x290   :  { %v1250_v28 = vpop.permute.xlu1 %1249 }
 0x291   :  { %v26245_v32 = vadd.f32 %v1250_v28, %v1242_v27 }
 0x293   :  { %25338 = vtanh.f32 %v26245_v32  ;;  %v1764_v35 = vrot.slane %v26245_v32, 6 }
 0x29d   :  { %v25339_v33 = vpop.eup %25338 }
 0x29e   :  { %1255 = vrot.lane.b32.xlu1 %v25339_v33, %s25835_s3 }
 0x310   :  { %v1256_v38 = vpop.permute.xlu1 %1255 }
 0x311   :  { %v1258_v36 = vmul.f32 %v25337_v18, %v1256_v38 }
 0x313   :  { %1260 = vrot.lane.b32.xlu0 %v1258_v36, %s25822_s20 }
 0x385   :  { %v1261_v41 = vpop.permute.xlu0 %1260 }
 0x386   :  { %1264 = vst.msk [vmem:[#allocation2] sm:$0x3] %vm1263_vm2, %v1261_v41  ;;  %v1265_v42 = vsel %vm209_vm1, %v1261_v41, 0 }
 0x387   :  { %v1336_v43 = vand.u32 4294901760, %v1265_v42 }
 0x389   :  { %v1337_v48 = vsub.f32 %v1265_v42, %v1336_v43 }
 0x38b   :  { %v1338_v49 = vand.u32 4294901760, %v1337_v48 }
 0x38d   :  { %v1339_v51 = vsub.f32 %v1337_v48, %v1338_v49 }
 0x38f   :  { %v1340_v52 = vand.u32 4294901760, %v1339_v51 }
 0x391   :  { %21319 = vmatmul.mubr.f32.vlgmr.msra.gmra.mrb[2].mxu0 %v1340_v52 }
 0x392   :  { %23712 = vmatpush3.bf16.msra.mxu0 %v26102_v62  ;;  %21329 = vmatprep.mubr.msk.f32.mxu0 %vm25832_vm0, %v25833_v1 }
 0x393   :  { %23713 = vmatprep.subr.bf16.mxu0 %v25831_v0 }
 0x396   :  { %23715 = vmatpush3.bf16.msra.mxu0 %v26111_v11 }
 0x397   :  { %23716 = vmatprep.subr.bf16.mxu0 %v25831_v0 }
 0x399   :  { %21330 = vmatmul.mubr.f32.vlgmr.msra.gmra.mrb[2].mxu0 %v1336_v43 }
 0x39a   :  { %23718 = vmatpush3.bf16.msra.mxu0 %v26137_v26  ;;  %21340 = vmatprep.mubr.msk.f32.mxu0 %vm25832_vm0, %v25833_v1 }
 0x39b   :  { %23719 = vmatprep.subr.bf16.mxu0 %v25831_v0 }
 0x39e   :  { %23721 = vmatpush3.bf16.msra.mxu0 %v26153_v50 }
 0x39f   :  { %23722 = vmatprep.subr.bf16.mxu0 %v25831_v0 }
 0x3a1   :  { %21341 = vmatmul.mubr.f32.vlgmr.msra.gmra.mrb[2].mxu0 %v1337_v48 }
 0x3a2   :  { %23724 = vmatpush3.bf16.msra.mxu0 %v26043_v22  ;;  %21351 = vmatprep.mubr.msk.f32.mxu0 %vm25832_vm0, %v25833_v1 }
 0x3a3   :  { %23725 = vmatprep.subr.bf16.mxu0 %v25831_v0 }
 0x3a6   :  { %23727 = vmatpush3.bf16.msra.mxu0 %v26052_v29 }
 0x3a7   :  { %23728 = vmatprep.subr.bf16.mxu0 %v25831_v0 }
 0x3a9   :  { %21352 = vmatmul.mubr.f32.vlgmr.msra.gmra.mrb[2].mxu0 %v1338_v49 }
 0x3aa   :  { %23730 = vmatpush3.bf16.msra.mxu0 %v26176_v61  ;;  %21362 = vmatprep.mubr.msk.f32.mxu0 %vm25832_vm0, %v25833_v1 }
 0x3ab   :  { %23731 = vmatprep.subr.bf16.mxu0 %v25831_v0 }
 0x3ae   :  { %23733 = vmatpush3.bf16.msra.mxu0 %v26186_v63 }
 0x3af   :  { %23734 = vmatprep.subr.bf16.mxu0 %v25831_v0 }
 0x3b1   :  { %21363 = vmatmul.mubr.f32.vlgmr.msra.gmra.mrb[2].mxu0 %v1336_v43 }
 0x3b2   :  { %23736 = vmatpush3.bf16.msra.mxu0 %v26043_v22  ;;  %21373 = vmatprep.mubr.msk.f32.mxu0 %vm25832_vm0, %v25833_v1 }
 0x3b3   :  { %23737 = vmatprep.subr.bf16.mxu0 %v25831_v0 }
 0x3b6   :  { %23739 = vmatpush3.bf16.msra.mxu0 %v26052_v29 }
 0x3b7   :  { %23776 = vmatprep.subr.bf16.mxu0 %v25831_v0 }
 0x3b9   :  { %21374 = vmatmul.mubr.f32.vlgmr.msra.gmra.mrb[2].mxu0 %v1336_v43 }
 0x3ba   :  { %23778 = vmatpush3.bf16.msra.mxu0 %v26043_v22  ;;  %21450 = vmatprep.mubr.msk.f32.mxu0 %vm25832_vm0, %v25833_v1 }
 0x3bb   :  { %23779 = vmatprep.subr.bf16.mxu0 %v25831_v0 }
 0x3be   :  { %23781 = vmatpush3.bf16.msra.mxu0 %v26052_v29 }
 0x3bf   :  { %23782 = vmatprep.subr.bf16.mxu0 %v25831_v0 }
 0x48c   :  { %v1748_v53 = vpop.f32.mrb[2].mxu0 }
 0x48d   :  { %v1753_v54 = vrot.slane %v1748_v53, 6  ;;  %v21375_v56 = vpop.f32.mrb[3].mxu0 }
 0x48f   :  { %v1755_v57 = vadd.f32 %v26239_v10, %v1753_v54 }
 0x491   :  { %25340 = vtanh.f32 %v1755_v57  ;;  %v20003_v60 = vmul.f32 -1.442695, %v1755_v57 }
 0x493   :  { %25342 = vpow2.f32 %v20003_v60 }
 0x49b   :  { %v25341_v58 = vpop.eup %25340 }
 0x49c   :  { %1768 = vrot.lane.b32.xlu1 %v25341_v58, %s25835_s3 }
 0x49d   :  { %v25343_v24 = vpop.eup %25342 }
 0x49e   :  { %v1759_v25 = vadd.f32 1.0, %v25343_v24 }
 0x4a0   :  { %25344 = vrcp.f32 %v1759_v25 }
 0x4aa   :  { %v25345_v30 = vpop.eup %25344 }
 0x4ab   :  { %v1766_v37 = vmul.f32 %v25345_v30, %v1764_v35 }
 0x50e   :  { %v1769_v31 = vpop.permute.xlu1 %1768 }
 0x50f   :  { %v1771_v34 = vmul.f32 %v25345_v30, %v1769_v31 }
 0x511   :  { %1773 = vrot.lane.b32.xlu0 %v1771_v34, %s25822_s20 }
 0x583   :  { %v1774_v39 = vpop.permute.xlu0 %1773 }
 0x584   :  { %v26292_v40 = vadd.f32 %v1774_v39, %v1766_v37 }
 0x586   :  { %25346 = vtanh.f32 %v26292_v40  ;;  %v2292_v20 = vrot.slane %v26292_v40, 6 }
 0x590   :  { %v25347_v44 = vpop.eup %25346 }
 0x591   :  { %1779 = vrot.lane.b32.xlu1 %v25347_v44, %s25835_s3 }
 0x603   :  { %v1780_v45 = vpop.permute.xlu1 %1779 }
 0x604   :  { %v26296_v46 = vmul.f32 %v25345_v30, %v1780_v45 }
 0x606   :  { %v1790_v47 = vrot.slane %v26296_v46, 2 }
 0x608   :  { %1791 = vrot.lane.b32.xlu0 %v1790_v47, %s25822_s20 }
 0x67a   :  { %v1792_v55 = vpop.permute.xlu0 %1791 }
 0x67b   :  { %v1793_v59 = vsel %vm209_vm1, %v1792_v55, 0 }
 0x67c   :  { %v1864_v2 = vand.u32 4294901760, %v1793_v59 }
 0x67e   :  { %v1865_v3 = vsub.f32 %v1793_v59, %v1864_v2 }
 0x680   :  { %v1866_v4 = vand.u32 4294901760, %v1865_v3 }
 0x682   :  { %v1867_v5 = vsub.f32 %v1865_v3, %v1866_v4 }
 0x684   :  { %v1868_v6 = vand.u32 4294901760, %v1867_v5 }
 0x686   :  { %21385 = vmatmul.mubr.f32.vlgmr.msra.gmra.mrb[12].mxu1 %v1868_v6 }
 0x687   :  { %23748 = vmatpush3.bf16.msra.mxu1 %v26102_v62  ;;  %21395 = vmatprep.mubr.msk.f32.mxu1 %vm25832_vm0, %v25833_v1 }
 0x688   :  { %23749 = vmatprep.subr.bf16.mxu1 %v25831_v0 }
 0x68b   :  { %23751 = vmatpush3.bf16.msra.mxu1 %v26111_v11 }
 0x68c   :  { %23752 = vmatprep.subr.bf16.mxu1 %v25831_v0 }
 0x68e   :  { %21396 = vmatmul.mubr.f32.vlgmr.msra.gmra.mrb[12].mxu1 %v1864_v2 }
 0x68f   :  { %23754 = vmatpush3.bf16.msra.mxu1 %v26137_v26  ;;  %21406 = vmatprep.mubr.msk.f32.mxu1 %vm25832_vm0, %v25833_v1 }
 0x690   :  { %23755 = vmatprep.subr.bf16.mxu1 %v25831_v0 }
 0x693   :  { %23757 = vmatpush3.bf16.msra.mxu1 %v26153_v50 }
 0x694   :  { %23758 = vmatprep.subr.bf16.mxu1 %v25831_v0 }
 0x696   :  { %21407 = vmatmul.mubr.f32.vlgmr.msra.gmra.mrb[12].mxu1 %v1865_v3 }
 0x697   :  { %23760 = vmatpush3.bf16.msra.mxu1 %v26043_v22  ;;  %21417 = vmatprep.mubr.msk.f32.mxu1 %vm25832_vm0, %v25833_v1 }
 0x698   :  { %23761 = vmatprep.subr.bf16.mxu1 %v25831_v0 }
 0x69b   :  { %23763 = vmatpush3.bf16.msra.mxu1 %v26052_v29 }
 0x69c   :  { %23764 = vmatprep.subr.bf16.mxu1 %v25831_v0 }
 0x69e   :  { %21418 = vmatmul.mubr.f32.vlgmr.msra.gmra.mrb[12].mxu1 %v1866_v4 }
 0x69f   :  { %23766 = vmatpush3.bf16.msra.mxu1 %v26176_v61  ;;  %21428 = vmatprep.mubr.msk.f32.mxu1 %vm25832_vm0, %v25833_v1 }
 0x6a0   :  { %23767 = vmatprep.subr.bf16.mxu1 %v25831_v0 }
 0x6a3   :  { %23769 = vmatpush3.bf16.msra.mxu1 %v26186_v63 }
 0x6a4   :  { %23770 = vmatprep.subr.bf16.mxu1 %v25831_v0 }
 0x6a6   :  { %21429 = vmatmul.mubr.f32.vlgmr.msra.gmra.mrb[12].mxu1 %v1864_v2 }
 0x6a7   :  { %23772 = vmatpush3.bf16.msra.mxu1 %v26043_v22  ;;  %21439 = vmatprep.mubr.msk.f32.mxu1 %vm25832_vm0, %v25833_v1 }
 0x6a8   :  { %23773 = vmatprep.subr.bf16.mxu1 %v25831_v0 }
 0x6ab   :  { %23775 = vmatpush3.bf16.msra.mxu1 %v26052_v29 }
 0x6ac   :  { %23812 = vmatprep.subr.bf16.mxu1 %v25831_v0 }
 0x6ae   :  { %21440 = vmatmul.mubr.f32.vlgmr.msra.gmra.mrb[12].mxu1 %v1864_v2 }
 0x6af   :  { %23814 = vmatpush3.bf16.msra.mxu1 %v26043_v22  ;;  %21516 = vmatprep.mubr.msk.f32.mxu1 %vm25832_vm0, %v25833_v1 }
 0x6b0   :  { %23815 = vmatprep.subr.bf16.mxu1 %v25831_v0 }
 0x6b3   :  { %23817 = vmatpush3.bf16.msra.mxu1 %v26052_v29 }
 0x6b4   :  { %23818 = vmatprep.subr.bf16.mxu1 %v25831_v0 }
 0x781   :  { %v2276_v7 = vpop.f32.mrb[12].mxu1 }
 0x782   :  { %v2281_v9 = vrot.slane %v2276_v7, 4  ;;  %v21441_v12 = vpop.f32.mrb[13].mxu1 }
 0x784   :  { %v2283_v13 = vadd.f32 %v26239_v10, %v2281_v9 }
 0x786   :  { %25348 = vtanh.f32 %v2283_v13  ;;  %v20004_v15 = vmul.f32 -1.442695, %v2283_v13 }
 0x788   :  { %25350 = vpow2.f32 %v20004_v15 }
 0x790   :  { %v25349_v14 = vpop.eup %25348 }
 0x791   :  { %2296 = vrot.lane.b32.xlu1 %v25349_v14, %s25835_s3 }
 0x792   :  { %v25351_v16 = vpop.eup %25350 }
 0x793   :  { %v2287_v17 = vadd.f32 1.0, %v25351_v16 }
 0x795   :  { %25352 = vrcp.f32 %v2287_v17 }
 0x79f   :  { %v25353_v18 = vpop.eup %25352 }
 0x7a0   :  { %v2294_v27 = vmul.f32 %v25353_v18, %v2292_v20 }
 0x803   :  { %v2297_v19 = vpop.permute.xlu1 %2296 }
 0x804   :  { %v2299_v23 = vmul.f32 %v25353_v18, %v2297_v19 }
 0x806   :  { %2301 = vrot.lane.b32.xlu0 %v2299_v23, %s25822_s20 }
 0x878   :  { %v2302_v28 = vpop.permute.xlu0 %2301 }
 0x879   :  { %v26341_v32 = vadd.f32 %v2302_v28, %v2294_v27 }
 0x87b   :  { %25354 = vtanh.f32 %v26341_v32  ;;  %v2820_v37 = vrot.slane %v26341_v32, 6 }
 0x885   :  { %v25355_v33 = vpop.eup %25354 }
 0x886   :  { %2307 = vrot.lane.b32.xlu1 %v25355_v33, %s25835_s3 }
 0x8f8   :  { %v2308_v38 = vpop.permute.xlu1 %2307 }
 0x8f9   :  { %v26345_v36 = vmul.f32 %v25353_v18, %v2308_v38 }
 0x8fb   :  { %v2318_v41 = vrot.slane %v26345_v36, 4 }
 0x8fd   :  { %2319 = vrot.lane.b32.xlu0 %v2318_v41, %s25822_s20 }
 0x96f   :  { %v2320_v42 = vpop.permute.xlu0 %2319 }
 0x970   :  { %v2321_v43 = vsel %vm209_vm1, %v2320_v42, 0 }
 0x971   :  { %v2392_v48 = vand.u32 4294901760, %v2321_v43 }
 0x973   :  { %v2393_v49 = vsub.f32 %v2321_v43, %v2392_v48 }
 0x975   :  { %v2394_v51 = vand.u32 4294901760, %v2393_v49 }
 0x977   :  { %v2395_v52 = vsub.f32 %v2393_v49, %v2394_v51 }
 0x979   :  { %v2396_v53 = vand.u32 4294901760, %v2395_v52 }
 0x97b   :  { %21451 = vmatmul.mubr.f32.vlgmr.msra.gmra.mrb[4].mxu0 %v2396_v53 }
 0x97c   :  { %23784 = vmatpush3.bf16.msra.mxu0 %v26102_v62  ;;  %21461 = vmatprep.mubr.msk.f32.mxu0 %vm25832_vm0, %v25833_v1 }
 0x97d   :  { %23785 = vmatprep.subr.bf16.mxu0 %v25831_v0 }
 0x980   :  { %23787 = vmatpush3.bf16.msra.mxu0 %v26111_v11 }
 0x981   :  { %23788 = vmatprep.subr.bf16.mxu0 %v25831_v0 }
 0x983   :  { %21462 = vmatmul.mubr.f32.vlgmr.msra.gmra.mrb[4].mxu0 %v2392_v48 }
 0x984   :  { %23790 = vmatpush3.bf16.msra.mxu0 %v26137_v26  ;;  %21472 = vmatprep.mubr.msk.f32.mxu0 %vm25832_vm0, %v25833_v1 }
 0x985   :  { %23791 = vmatprep.subr.bf16.mxu0 %v25831_v0 }
 0x988   :  { %23793 = vmatpush3.bf16.msra.mxu0 %v26153_v50 }
 0x989   :  { %23794 = vmatprep.subr.bf16.mxu0 %v25831_v0 }
 0x98b   :  { %21473 = vmatmul.mubr.f32.vlgmr.msra.gmra.mrb[4].mxu0 %v2393_v49 }
 0x98c   :  { %23796 = vmatpush3.bf16.msra.mxu0 %v26043_v22  ;;  %21483 = vmatprep.mubr.msk.f32.mxu0 %vm25832_vm0, %v25833_v1 }
 0x98d   :  { %23797 = vmatprep.subr.bf16.mxu0 %v25831_v0 }
 0x990   :  { %23799 = vmatpush3.bf16.msra.mxu0 %v26052_v29 }
 0x991   :  { %23800 = vmatprep.subr.bf16.mxu0 %v25831_v0 }
 0x993   :  { %21484 = vmatmul.mubr.f32.vlgmr.msra.gmra.mrb[4].mxu0 %v2394_v51 }
 0x994   :  { %23802 = vmatpush3.bf16.msra.mxu0 %v26176_v61  ;;  %21494 = vmatprep.mubr.msk.f32.mxu0 %vm25832_vm0, %v25833_v1 }
 0x995   :  { %23803 = vmatprep.subr.bf16.mxu0 %v25831_v0 }
 0x998   :  { %23805 = vmatpush3.bf16.msra.mxu0 %v26186_v63 }
 0x999   :  { %23806 = vmatprep.subr.bf16.mxu0 %v25831_v0 }
 0x99b   :  { %21495 = vmatmul.mubr.f32.vlgmr.msra.gmra.mrb[4].mxu0 %v2392_v48 }
 0x99c   :  { %23808 = vmatpush3.bf16.msra.mxu0 %v26043_v22  ;;  %21505 = vmatprep.mubr.msk.f32.mxu0 %vm25832_vm0, %v25833_v1 }
 0x99d   :  { %23809 = vmatprep.subr.bf16.mxu0 %v25831_v0 }
 0x9a0   :  { %23811 = vmatpush3.bf16.msra.mxu0 %v26052_v29 }
 0x9a1   :  { %23848 = vmatprep.subr.bf16.mxu0 %v25831_v0 }
 0x9a3   :  { %21506 = vmatmul.mubr.f32.vlgmr.msra.gmra.mrb[4].mxu0 %v2392_v48 }
 0x9a4   :  { %23850 = vmatpush3.bf16.msra.mxu0 %v26043_v22  ;;  %21582 = vmatprep.mubr.msk.f32.mxu0 %vm25832_vm0, %v25833_v1 }
 0x9a5   :  { %23851 = vmatprep.subr.bf16.mxu0 %v25831_v0 }
 0x9a8   :  { %23853 = vmatpush3.bf16.msra.mxu0 %v26052_v29 }
 0x9a9   :  { %23854 = vmatprep.subr.bf16.mxu0 %v25831_v0 }
 0xa76   :  { %v2804_v54 = vpop.f32.mrb[4].mxu0 }
 0xa77   :  { %v2809_v56 = vrot.slane %v2804_v54, 2  ;;  %v21507_v57 = vpop.f32.mrb[5].mxu0 }
 0xa79   :  { %v2811_v58 = vadd.f32 %v26239_v10, %v2809_v56 }
 0xa7b   :  { %25356 = vtanh.f32 %v2811_v58  ;;  %v20005_v24 = vmul.f32 -1.442695, %v2811_v58 }
 0xa7d   :  { %25358 = vpow2.f32 %v20005_v24 }
 0xa85   :  { %v25357_v60 = vpop.eup %25356 }
 0xa86   :  { %2824 = vrot.lane.b32.xlu1 %v25357_v60, %s25835_s3 }
 0xa87   :  { %v25359_v25 = vpop.eup %25358 }
 0xa88   :  { %v2815_v30 = vadd.f32 1.0, %v25359_v25 }
 0xa8a   :  { %25360 = vrcp.f32 %v2815_v30 }
 0xa94   :  { %v25361_v31 = vpop.eup %25360 }
 0xa95   :  { %v2822_v39 = vmul.f32 %v25361_v31, %v2820_v37 }
 0xaf8   :  { %v2825_v34 = vpop.permute.xlu1 %2824 }
 0xaf9   :  { %v2827_v35 = vmul.f32 %v25361_v31, %v2825_v34 }
 0xafb   :  { %2829 = vrot.lane.b32.xlu0 %v2827_v35, %s25822_s20 }
 0xb6d   :  { %v2830_v40 = vpop.permute.xlu0 %2829 }
 0xb6e   :  { %v26390_v44 = vadd.f32 %v2830_v40, %v2822_v39 }
 0xb70   :  { %25362 = vtanh.f32 %v26390_v44  ;;  %v3345_v56 = vrot.slane %v26390_v44, 6 }
 0xb7a   :  { %v25363_v10 = vpop.eup %25362 }
 0xb7b   :  { %2835 = vrot.lane.b32.xlu1 %v25363_v10, %s25835_s3 }
 0xbed   :  { %v2836_v45 = vpop.permute.xlu1 %2835 }
 0xbee   :  { %v26394_v47 = vmul.f32 %v25361_v31, %v2836_v45 }
 0xbf0   :  { %v2846_v55 = vrot.slane %v26394_v47, 6 }
 0xbf2   :  { %2847 = vrot.lane.b32.xlu0 %v2846_v55, %s25822_s20 }
 0xc64   :  { %v2848_v59 = vpop.permute.xlu0 %2847 }
 0xc65   :  { %v2849_v2 = vsel %vm209_vm1, %v2848_v59, 0 }
 0xc66   :  { %v2920_v3 = vand.u32 4294901760, %v2849_v2 }
 0xc68   :  { %v2921_v4 = vsub.f32 %v2849_v2, %v2920_v3 }
 0xc6a   :  { %v2922_v5 = vand.u32 4294901760, %v2921_v4 }
 0xc6c   :  { %v2923_v6 = vsub.f32 %v2921_v4, %v2922_v5 }
 0xc6e   :  { %v2924_v7 = vand.u32 4294901760, %v2923_v6 }
 0xc70   :  { %21517 = vmatmul.mubr.f32.vlgmr.msra.gmra.mrb[14].mxu1 %v2924_v7 }
 0xc71   :  { %23820 = vmatpush3.bf16.msra.mxu1 %v26102_v62  ;;  %21527 = vmatprep.mubr.msk.f32.mxu1 %vm25832_vm0, %v25833_v1 }
 0xc72   :  { %23821 = vmatprep.subr.bf16.mxu1 %v25831_v0 }
 0xc75   :  { %23823 = vmatpush3.bf16.msra.mxu1 %v26111_v11 }
 0xc76   :  { %23824 = vmatprep.subr.bf16.mxu1 %v25831_v0 }
 0xc78   :  { %21528 = vmatmul.mubr.f32.vlgmr.msra.gmra.mrb[16].mxu1 %v2920_v3 }
 0xc79   :  { %23826 = vmatpush3.bf16.msra.mxu1 %v26137_v26  ;;  %21538 = vmatprep.mubr.msk.f32.mxu1 %vm25832_vm0, %v25833_v1 }
 0xc7a   :  { %23827 = vmatprep.subr.bf16.mxu1 %v25831_v0 }
 0xc7d   :  { %23829 = vmatpush3.bf16.msra.mxu1 %v26153_v50 }
 0xc7e   :  { %23830 = vmatprep.subr.bf16.mxu1 %v25831_v0 }
 0xc80   :  { %21539 = vmatmul.mubr.f32.vlgmr.msra.gmra.mrb[18].mxu1 %v2921_v4 }
 0xc81   :  { %23832 = vmatpush3.bf16.msra.mxu1 %v26043_v22  ;;  %21549 = vmatprep.mubr.msk.f32.mxu1 %vm25832_vm0, %v25833_v1 }
 0xc82   :  { %23833 = vmatprep.subr.bf16.mxu1 %v25831_v0 }
 0xc85   :  { %23835 = vmatpush3.bf16.msra.mxu1 %v26052_v29 }
 0xc86   :  { %23836 = vmatprep.subr.bf16.mxu1 %v25831_v0 }
 0xc88   :  { %21550 = vmatmul.mubr.f32.vlgmr.msra.gmra.mrb[20].mxu1 %v2922_v5 }
 0xc89   :  { %23838 = vmatpush3.bf16.msra.mxu1 %v26176_v61  ;;  %21560 = vmatprep.mubr.msk.f32.mxu1 %vm25832_vm0, %v25833_v1 }
 0xc8a   :  { %23839 = vmatprep.subr.bf16.mxu1 %v25831_v0 }
 0xc8d   :  { %23841 = vmatpush3.bf16.msra.mxu1 %v26186_v63 }
 0xc8e   :  { %23842 = vmatprep.subr.bf16.mxu1 %v25831_v0 }
 0xc90   :  { %21561 = vmatmul.mubr.f32.vlgmr.msra.gmra.mrb[22].mxu1 %v2920_v3 }
 0xc91   :  { %23844 = vmatpush3.bf16.msra.mxu1 %v26043_v22  ;;  %21571 = vmatprep.mubr.msk.f32.mxu1 %vm25832_vm0, %v25833_v1 }
 0xc92   :  { %23845 = vmatprep.subr.bf16.mxu1 %v25831_v0 }
 0xc95   :  { %23847 = vmatpush3.bf16.msra.mxu1 %v26052_v29 }
 0xc96   :  { %23884 = vmatprep.subr.bf16.mxu1 %v25831_v0 }
 0xc98   :  { %21572 = vmatmul.mubr.f32.vlgmr.msra.gmra.mrb[24].mxu1 %v2920_v3 }
 0xc99   :  { %23886 = vmatpush3.bf16.msra.mxu1 %v26043_v22  ;;  %21648 = vmatprep.mubr.msk.f32.mxu1 %vm25832_vm0, %v25833_v1 }
 0xc9a   :  { %23887 = vmatprep.subr.bf16.mxu1 %v25831_v0 }
 0xc9d   :  { %23889 = vmatpush3.bf16.msra.mxu1 %v26052_v29 }
 0xc9e   :  { %23890 = vmatprep.subr.bf16.mxu1 %v25831_v0 }
 0xd43   :  { %v2926_v9 = vpop.f32.mrb[14].mxu1 }
 0xd44   :  { %v21518_v12 = vpop.f32.mrb[15].mxu1 }
 0xd4b   :  { %v3017_v13 = vpop.f32.mrb[16].mxu1 }
 0xd4c   :  { %v3018_v14 = vadd.f32 %v3017_v13, %v2926_v9  ;;  %v21529_v15 = vpop.f32.mrb[17].mxu1 }
 0xd53   :  { %v3097_v16 = vpop.f32.mrb[18].mxu1 }
 0xd54   :  { %v3098_v17 = vadd.f32 %v3097_v16, %v3018_v14  ;;  %v21540_v18 = vpop.f32.mrb[19].mxu1 }
 0xd5b   :  { %v3174_v19 = vpop.f32.mrb[20].mxu1 }
 0xd5c   :  { %v3175_v23 = vadd.f32 %v3174_v19, %v3098_v17  ;;  %v21551_v20 = vpop.f32.mrb[21].mxu1 }
 0xd63   :  { %v3257_v27 = vpop.f32.mrb[22].mxu1 }
 0xd64   :  { %v3258_v28 = vadd.f32 %v3257_v27, %v3175_v23  ;;  %v21562_v32 = vpop.f32.mrb[23].mxu1 }
 0xd6b   :  { %v3332_v33 = vpop.f32.mrb[24].mxu1 }
 0xd6c   :  { %v3333_v38 = vadd.f32 %v3332_v33, %v3258_v28  ;;  %v21573_v41 = vpop.f32.mrb[25].mxu1 }
 0xd6e   :  { %v3336_v42 = vadd.f32 %v26237_v8, %v3333_v38 }
 0xd70   :  { %25364 = vtanh.f32 %v3336_v42  ;;  %v20006_v48 = vmul.f32 -1.442695, %v3336_v42 }
 0xd72   :  { %25366 = vpow2.f32 %v20006_v48 }
 0xd7a   :  { %v25365_v43 = vpop.eup %25364 }
 0xd7b   :  { %3349 = vrot.lane.b32.xlu1 %v25365_v43, %s25835_s3 }
 0xd7c   :  { %v25367_v49 = vpop.eup %25366 }
 0xd7d   :  { %v3340_v51 = vadd.f32 1.0, %v25367_v49 }
 0xd7f   :  { %25368 = vrcp.f32 %v3340_v51 }
 0xd89   :  { %v25369_v52 = vpop.eup %25368 }
 0xd8a   :  { %v3347_v57 = vmul.f32 %v25369_v52, %v3345_v56 }
 0xded   :  { %v3350_v53 = vpop.permute.xlu1 %3349 }
 0xdee   :  { %v3352_v54 = vmul.f32 %v25369_v52, %v3350_v53 }
 0xdf0   :  { %3354 = vrot.lane.b32.xlu0 %v3352_v54, %s25822_s20 }
 0xe62   :  { %v3355_v58 = vpop.permute.xlu0 %3354 }
 0xe63   :  { %v26439_v60 = vadd.f32 %v3355_v58, %v3347_v57 }
 0xe65   :  { %25370 = vtanh.f32 %v26439_v60  ;;  %v3869_v12 = vrot.slane %v26439_v60, 6 }
 0xe6f   :  { %v25371_v24 = vpop.eup %25370 }
 0xe70   :  { %3360 = vrot.lane.b32.xlu1 %v25371_v24, %s25835_s3 }
 0xee2   :  { %v3361_v25 = vpop.permute.xlu1 %3360 }
 0xee3   :  { %v3363_v30 = vmul.f32 %v25369_v52, %v3361_v25 }
 0xee5   :  { %3365 = vrot.lane.b32.xlu0 %v3363_v30, %s25822_s20 }
 0xf57   :  { %v3366_v31 = vpop.permute.xlu0 %3365 }
 0xf58   :  { %3369 = vst.msk [vmem:[#allocation2 + $0x8] sm:$0x3] %vm1263_vm2, %v3366_v31  ;;  %v3370_v34 = vsel %vm209_vm1, %v3366_v31, 0 }
 0xf59   :  { %v3441_v35 = vand.u32 4294901760, %v3370_v34 }
 0xf5b   :  { %v3442_v37 = vsub.f32 %v3370_v34, %v3441_v35 }
 0xf5d   :  { %v3443_v39 = vand.u32 4294901760, %v3442_v37 }
 0xf5f   :  { %v3444_v40 = vsub.f32 %v3442_v37, %v3443_v39 }
 0xf61   :  { %v3445_v44 = vand.u32 4294901760, %v3444_v40 }
 0xf63   :  { %21583 = vmatmul.mubr.f32.vlgmr.msra.gmra.mrb[6].mxu0 %v3445_v44 }
 0xf64   :  { %23856 = vmatpush3.bf16.msra.mxu0 %v26102_v62  ;;  %21593 = vmatprep.mubr.msk.f32.mxu0 %vm25832_vm0, %v25833_v1 }
 0xf65   :  { %23857 = vmatprep.subr.bf16.mxu0 %v25831_v0 }
 0xf68   :  { %23859 = vmatpush3.bf16.msra.mxu0 %v26111_v11 }
 0xf69   :  { %23860 = vmatprep.subr.bf16.mxu0 %v25831_v0 }
 0xf6b   :  { %21594 = vmatmul.mubr.f32.vlgmr.msra.gmra.mrb[6].mxu0 %v3441_v35 }
 0xf6c   :  { %23862 = vmatpush3.bf16.msra.mxu0 %v26137_v26  ;;  %21604 = vmatprep.mubr.msk.f32.mxu0 %vm25832_vm0, %v25833_v1 }
 0xf6d   :  { %23863 = vmatprep.subr.bf16.mxu0 %v25831_v0 }
 0xf70   :  { %23865 = vmatpush3.bf16.msra.mxu0 %v26153_v50 }
 0xf71   :  { %23866 = vmatprep.subr.bf16.mxu0 %v25831_v0 }
 0xf73   :  { %21605 = vmatmul.mubr.f32.vlgmr.msra.gmra.mrb[6].mxu0 %v3442_v37 }
 0xf74   :  { %23868 = vmatpush3.bf16.msra.mxu0 %v26043_v22  ;;  %21615 = vmatprep.mubr.msk.f32.mxu0 %vm25832_vm0, %v25833_v1 }
 0xf75   :  { %23869 = vmatprep.subr.bf16.mxu0 %v25831_v0 }
 0xf78   :  { %23871 = vmatpush3.bf16.msra.mxu0 %v26052_v29 }
 0xf79   :  { %23872 = vmatprep.subr.bf16.mxu0 %v25831_v0 }
 0xf7b   :  { %21616 = vmatmul.mubr.f32.vlgmr.msra.gmra.mrb[6].mxu0 %v3443_v39 }
 0xf7c   :  { %23874 = vmatpush3.bf16.msra.mxu0 %v26176_v61  ;;  %21626 = vmatprep.mubr.msk.f32.mxu0 %vm25832_vm0, %v25833_v1 }
 0xf7d   :  { %23875 = vmatprep.subr.bf16.mxu0 %v25831_v0 }
 0xf80   :  { %23877 = vmatpush3.bf16.msra.mxu0 %v26186_v63 }
 0xf81   :  { %23878 = vmatprep.subr.bf16.mxu0 %v25831_v0 }
 0xf83   :  { %21627 = vmatmul.mubr.f32.vlgmr.msra.gmra.mrb[6].mxu0 %v3441_v35 }
 0xf84   :  { %23880 = vmatpush3.bf16.msra.mxu0 %v26043_v22  ;;  %21637 = vmatprep.mubr.msk.f32.mxu0 %vm25832_vm0, %v25833_v1 }
 0xf85   :  { %23881 = vmatprep.subr.bf16.mxu0 %v25831_v0 }
 0xf88   :  { %23883 = vmatpush3.bf16.msra.mxu0 %v26052_v29 }
 0xf89   :  { %23920 = vmatprep.subr.bf16.mxu0 %v25831_v0 }
 0xf8b   :  { %21638 = vmatmul.mubr.f32.vlgmr.msra.gmra.mrb[6].mxu0 %v3441_v35 }
 0xf8c   :  { %23922 = vmatpush3.bf16.msra.mxu0 %v26043_v22  ;;  %21714 = vmatprep.mubr.msk.f32.mxu0 %vm25832_vm0, %v25833_v1 }
 0xf8d   :  { %23923 = vmatprep.subr.bf16.mxu0 %v25831_v0 }
 0xf90   :  { %23925 = vmatpush3.bf16.msra.mxu0 %v26052_v29 }
 0xf91   :  { %23926 = vmatprep.subr.bf16.mxu0 %v25831_v0 }
0x105e   :  { %v3853_v10 = vpop.f32.mrb[6].mxu0 }
0x105f   :  { %v3858_v45 = vrot.slane %v3853_v10, 6  ;;  %v21639_v55 = vpop.f32.mrb[7].mxu0 }
0x1061   :  { %v3860_v59 = vadd.f32 %v26237_v8, %v3858_v45 }
0x1063   :  { %25372 = vtanh.f32 %v3860_v59  ;;  %v20007_v3 = vmul.f32 -1.442695, %v3860_v59 }
0x1065   :  { %25374 = vpow2.f32 %v20007_v3 }
0x106d   :  { %v25373_v2 = vpop.eup %25372 }
0x106e   :  { %3873 = vrot.lane.b32.xlu1 %v25373_v2, %s25835_s3 }
0x106f   :  { %v25375_v4 = vpop.eup %25374 }
0x1070   :  { %v3864_v5 = vadd.f32 1.0, %v25375_v4 }
0x1072   :  { %25376 = vrcp.f32 %v3864_v5 }
0x107c   :  { %v25377_v6 = vpop.eup %25376 }
0x107d   :  { %v3871_v13 = vmul.f32 %v25377_v6, %v3869_v12  ;;  %v4956_v12 = vld [vmem:[#allocation13] sm:$0xff] }
0x10e0   :  { %v3874_v7 = vpop.permute.xlu1 %3873 }
0x10e1   :  { %v3876_v9 = vmul.f32 %v25377_v6, %v3874_v7 }
0x10e3   :  { %3878 = vrot.lane.b32.xlu0 %v3876_v9, %s25822_s20 }
0x1155   :  { %v3879_v14 = vpop.permute.xlu0 %3878 }
0x1156   :  { %v26486_v15 = vadd.f32 %v3879_v14, %v3871_v13  ;;  %v4957_v13 = vld [vmem:[#allocation13 + $0x8] sm:$0xff]  ;;  %v4958_v14 = vld [vmem:[#allocation13 + $0x10] sm:$0xff] }
0x1158   :  { %25378 = vtanh.f32 %v26486_v15  ;;  %v4396_v58 = vrot.slane %v26486_v15, 6  ;;  %v5018_v15 = vand.u32 4294901760, %v4956_v12 }
0x1162   :  { %v25379_v16 = vpop.eup %25378 }
0x1163   :  { %3884 = vrot.lane.b32.xlu1 %v25379_v16, %s25835_s3  ;;  %v5021_v16 = vand.u32 4294901760, %v4957_v13 }
0x11d5   :  { %v3885_v17 = vpop.permute.xlu1 %3884 }
0x11d6   :  { %v26490_v18 = vmul.f32 %v25377_v6, %v3885_v17  ;;  %v4959_v17 = vld [vmem:[#allocation13 + $0x18] sm:$0xff] }
0x11d8   :  { %v3894_v19 = vrot.slane %v26490_v18, 2 }
0x11da   :  { %3895 = vrot.lane.b32.xlu0 %v3894_v19, %s25822_s20  ;;  %v5024_v19 = vand.u32 4294901760, %v4958_v14 }
0x124c   :  { %v3896_v23 = vpop.permute.xlu0 %3895 }
0x124d   :  { %v3897_v20 = vsel %vm209_vm1, %v3896_v23, 0  ;;  %v5027_v23 = vand.u32 4294901760, %v4959_v17 }
0x124e   :  { %v3968_v27 = vand.u32 4294901760, %v3897_v20 }
0x1250   :  { %v3969_v28 = vsub.f32 %v3897_v20, %v3968_v27  ;;  %v26586_v20 = vpack.c.bf16 %v5021_v16, %v5018_v15 }
0x1252   :  { %v3970_v32 = vand.u32 4294901760, %v3969_v28 }
0x1254   :  { %v3971_v33 = vsub.f32 %v3969_v28, %v3970_v32 }
0x1256   :  { %v3972_v38 = vand.u32 4294901760, %v3971_v33 }
0x1258   :  { %21649 = vmatmul.mubr.f32.vlgmr.msra.gmra.mrb[26].mxu1 %v3972_v38 }
0x1259   :  { %23892 = vmatpush3.bf16.msra.mxu1 %v26102_v62  ;;  %21659 = vmatprep.mubr.msk.f32.mxu1 %vm25832_vm0, %v25833_v1 }
0x125a   :  { %23893 = vmatprep.subr.bf16.mxu1 %v25831_v0 }
0x125d   :  { %23895 = vmatpush3.bf16.msra.mxu1 %v26111_v11 }
0x125e   :  { %23896 = vmatprep.subr.bf16.mxu1 %v25831_v0 }
0x1260   :  { %21660 = vmatmul.mubr.f32.vlgmr.msra.gmra.mrb[26].mxu1 %v3968_v27 }
0x1261   :  { %23898 = vmatpush3.bf16.msra.mxu1 %v26137_v26  ;;  %21670 = vmatprep.mubr.msk.f32.mxu1 %vm25832_vm0, %v25833_v1 }
0x1262   :  { %23899 = vmatprep.subr.bf16.mxu1 %v25831_v0 }
0x1265   :  { %23901 = vmatpush3.bf16.msra.mxu1 %v26153_v50 }
0x1266   :  { %23902 = vmatprep.subr.bf16.mxu1 %v25831_v0 }
0x1268   :  { %21671 = vmatmul.mubr.f32.vlgmr.msra.gmra.mrb[26].mxu1 %v3969_v28  ;;  %v5115_v28 = vsub.f32 %v4957_v13, %v5021_v16 }
0x1269   :  { %23904 = vmatpush3.bf16.msra.mxu1 %v26043_v22  ;;  %21681 = vmatprep.mubr.msk.f32.mxu1 %vm25832_vm0, %v25833_v1 }
0x126a   :  { %23905 = vmatprep.subr.bf16.mxu1 %v25831_v0  ;;  %v5116_v33 = vand.u32 4294901760, %v5115_v28 }
0x126c   :  { %v5117_v38 = vsub.f32 %v5115_v28, %v5116_v33 }
0x126d   :  { %23907 = vmatpush3.bf16.msra.mxu1 %v26052_v29 }
0x126e   :  { %23908 = vmatprep.subr.bf16.mxu1 %v25831_v0 }
0x1270   :  { %21682 = vmatmul.mubr.f32.vlgmr.msra.gmra.mrb[26].mxu1 %v3970_v32  ;;  %v26588_v32 = vpack.c.bf16 %v5027_v23, %v5024_v19 }
0x1271   :  { %23910 = vmatpush3.bf16.msra.mxu1 %v26176_v61  ;;  %21692 = vmatprep.mubr.msk.f32.mxu1 %vm25832_vm0, %v25833_v1 }
0x1272   :  { %23911 = vmatprep.subr.bf16.mxu1 %v25831_v0 }
0x1275   :  { %23913 = vmatpush3.bf16.msra.mxu1 %v26186_v63 }
0x1276   :  { %23914 = vmatprep.subr.bf16.mxu1 %v25831_v0 }
0x1278   :  { %21693 = vmatmul.mubr.f32.vlgmr.msra.gmra.mrb[26].mxu1 %v3968_v27 }
0x1279   :  { %23916 = vmatpush3.bf16.msra.mxu1 %v26043_v22  ;;  %21703 = vmatprep.mubr.msk.f32.mxu1 %vm25832_vm0, %v25833_v1 }
0x127a   :  { %23917 = vmatprep.subr.bf16.mxu1 %v25831_v0 }
0x127d   :  { %23919 = vmatpush3.bf16.msra.mxu1 %v26052_v29 }
0x127e   :  { %23957 = vmatprep.subr.bf16.mxu1 %v26586_v20 }
0x1280   :  { %21704 = vmatmul.mubr.f32.vlgmr.msra.gmra.mrb[26].mxu1 %v3968_v27  ;;  %v5108_v27 = vsub.f32 %v4956_v12, %v5018_v15 }
0x1281   :  { %23959 = vmatpush3.bf16.msra.mxu1 %v26586_v20 }
0x1282   :  { %23961 = vmatprep.subr.bf16.mxu1 %v26588_v32 }
0x1285   :  { %23963 = vmatpush3.bf16.msra.mxu1 %v26588_v32 }
0x1353   :  { %v4380_v41 = vpop.f32.mrb[26].mxu1 }
0x1354   :  { %v4385_v42 = vrot.slane %v4380_v41, 4  ;;  %v21705_v43 = vpop.f32.mrb[27].mxu1 }
0x1356   :  { %v4387_v48 = vadd.f32 %v26237_v8, %v4385_v42  ;;  %v5118_v42 = vand.u32 4294901760, %v5117_v38 }
0x1358   :  { %25380 = vtanh.f32 %v4387_v48  ;;  %v20008_v51 = vmul.f32 -1.442695, %v4387_v48 }
0x135a   :  { %25382 = vpow2.f32 %v20008_v51 }
0x1362   :  { %v25381_v49 = vpop.eup %25380 }
0x1363   :  { %4400 = vrot.lane.b32.xlu1 %v25381_v49, %s25835_s3 }
0x1364   :  { %v25383_v52 = vpop.eup %25382 }
0x1365   :  { %v4391_v53 = vadd.f32 1.0, %v25383_v52 }
0x1367   :  { %25384 = vrcp.f32 %v4391_v53 }
0x1371   :  { %v25385_v54 = vpop.eup %25384 }
0x1372   :  { %v4398_v60 = vmul.f32 %v25385_v54, %v4396_v58 }
0x13d5   :  { %v4401_v56 = vpop.permute.xlu1 %4400 }
0x13d6   :  { %v4403_v57 = vmul.f32 %v25385_v54, %v4401_v56  ;;  %v5129_v56 = vsub.f32 %v4959_v17, %v5027_v23 }
0x13d8   :  { %4405 = vrot.lane.b32.xlu0 %v4403_v57, %s25822_s20  ;;  %v4948_v57 = vld [vmem:[#allocation2] sm:$0x3] }
0x144a   :  { %v4406_v24 = vpop.permute.xlu0 %4405 }
0x144b   :  { %v26528_v25 = vadd.f32 %v4406_v24, %v4398_v60  ;;  %v5130_v24 = vand.u32 4294901760, %v5129_v56 }
0x144d   :  { %25386 = vtanh.f32 %v26528_v25 }
0x1457   :  { %v25387_v30 = vpop.eup %25386 }
0x1458   :  { %4411 = vrot.lane.b32.xlu1 %v25387_v30, %s25835_s3 }
0x14ca   :  { %v4412_v31 = vpop.permute.xlu1 %4411 }
0x14cb   :  { %v4414_v34 = vmul.f32 %v25385_v54, %v4412_v31  ;;  %v5122_v54 = vsub.f32 %v4958_v14, %v5024_v19 }
0x14cd   :  { %v4421_v35 = vrot.slane %v4414_v34, 4  ;;  %v5123_v60 = vand.u32 4294901760, %v5122_v54 }
0x14cf   :  { %4422 = vrot.lane.b32.xlu0 %v4421_v35, %s25822_s20  ;;  %v5131_v35 = vsub.f32 %v5129_v56, %v5130_v24 }
0x1541   :  { %v4423_v37 = vpop.permute.xlu0 %4422 }
0x1542   :  { %v4424_v39 = vsel %vm209_vm1, %v4423_v37, 0 }
0x1543   :  { %v4495_v40 = vand.u32 4294901760, %v4424_v39 }
0x1545   :  { %v4496_v44 = vsub.f32 %v4424_v39, %v4495_v40 }
0x1547   :  { %v4497_v10 = vand.u32 4294901760, %v4496_v44 }
0x1549   :  { %v4498_v45 = vsub.f32 %v4496_v44, %v4497_v10 }
0x154b   :  { %v4499_v55 = vand.u32 4294901760, %v4498_v45 }
0x154d   :  { %21715 = vmatmul.mubr.f32.vlgmr.msra.gmra.mrb[8].mxu0 %v4499_v55 }
0x154e   :  { %23928 = vmatpush3.bf16.msra.mxu0 %v26102_v62  ;;  %21725 = vmatprep.mubr.msk.f32.mxu0 %vm25832_vm0, %v25833_v1 }
0x154f   :  { %23929 = vmatprep.subr.bf16.mxu0 %v25831_v0 }
0x1552   :  { %23931 = vmatpush3.bf16.msra.mxu0 %v26111_v11 }
0x1553   :  { %23932 = vmatprep.subr.bf16.mxu0 %v25831_v0 }
0x1555   :  { %21726 = vmatmul.mubr.f32.vlgmr.msra.gmra.mrb[8].mxu0 %v4495_v40 }
0x1556   :  { %23934 = vmatpush3.bf16.msra.mxu0 %v26137_v26  ;;  %21736 = vmatprep.mubr.msk.f32.mxu0 %vm25832_vm0, %v25833_v1 }
0x1557   :  { %23935 = vmatprep.subr.bf16.mxu0 %v25831_v0 }
0x155a   :  { %23937 = vmatpush3.bf16.msra.mxu0 %v26153_v50 }
0x155b   :  { %23938 = vmatprep.subr.bf16.mxu0 %v25831_v0 }
0x155d   :  { %21737 = vmatmul.mubr.f32.vlgmr.msra.gmra.mrb[8].mxu0 %v4496_v44  ;;  %v5132_v44 = vand.u32 4294901760, %v5131_v35  ;;  %v143_v35 = vld [vmem:[#allocation9 + $0x2] sm:$0x3] }
0x155e   :  { %23940 = vmatpush3.bf16.msra.mxu0 %v26043_v22  ;;  %21747 = vmatprep.mubr.msk.f32.mxu0 %vm25832_vm0, %v25833_v1 }
0x155f   :  { %23941 = vmatprep.subr.bf16.mxu0 %v25831_v0 }
0x1562   :  { %23943 = vmatpush3.bf16.msra.mxu0 %v26052_v29 }
0x1563   :  { %23944 = vmatprep.subr.bf16.mxu0 %v25831_v0 }
0x1565   :  { %21748 = vmatmul.mubr.f32.vlgmr.msra.gmra.mrb[8].mxu0 %v4497_v10 }
0x1566   :  { %23946 = vmatpush3.bf16.msra.mxu0 %v26176_v61  ;;  %21758 = vmatprep.mubr.msk.f32.mxu0 %vm25832_vm0, %v25833_v1 }
0x1567   :  { %23947 = vmatprep.subr.bf16.mxu0 %v25831_v0 }
0x156a   :  { %23949 = vmatpush3.bf16.msra.mxu0 %v26186_v63 }
0x156b   :  { %23950 = vmatprep.subr.bf16.mxu0 %v25831_v0 }
0x156d   :  { %21759 = vmatmul.mubr.f32.vlgmr.msra.gmra.mrb[8].mxu0 %v4495_v40 }
0x156e   :  { %23952 = vmatpush3.bf16.msra.mxu0 %v26043_v22  ;;  %21769 = vmatprep.mubr.msk.f32.mxu0 %vm25832_vm0, %v25833_v1 }
0x156f   :  { %23953 = vmatprep.subr.bf16.mxu0 %v25831_v0 }
0x1572   :  { %23955 = vmatpush3.bf16.msra.mxu0 %v26052_v29 }
0x1573   :  { %24004 = vmatprep.subr.bf16.mxu0 %v25831_v0 }
0x1575   :  { %21770 = vmatmul.mubr.f32.vlgmr.msra.gmra.mrb[8].mxu0 %v4495_v40 }
0x1576   :  { %21846 = vmatprep.mubr.msk.f32.mxu0 %vm25832_vm0, %v25833_v1 }
0x1648   :  { %v4907_v62 = vpop.f32.mrb[8].mxu0 }
0x1649   :  { %v4912_v11 = vrot.slane %v4907_v62, 2  ;;  %v21771_v26 = vpop.f32.mrb[9].mxu0 }
0x164b   :  { %v4914_v50 = vadd.f32 %v26237_v8, %v4912_v11  ;;  %v4923_v8 = vrot.slane %v26528_v25, 6  ;;  %v26610_v11 = vpack.c.bf16 %v5115_v28, %v5108_v27 }
0x164d   :  { %25388 = vtanh.f32 %v4914_v50  ;;  %v20009_v61 = vmul.f32 -1.442695, %v4914_v50 }
0x164f   :  { %25390 = vpow2.f32 %v20009_v61 }
0x1657   :  { %v25389_v22 = vpop.eup %25388 }
0x1658   :  { %4927 = vrot.lane.b32.xlu1 %v25389_v22, %s25835_s3  ;;  %v26616_v22 = vpack.c.bf16 %v5129_v56, %v5122_v54 }
0x1659   :  { %v25391_v63 = vpop.eup %25390 }
0x165a   :  { %v4918_v59 = vadd.f32 1.0, %v25391_v63 }
0x165c   :  { %25392 = vrcp.f32 %v4918_v59 }
0x1666   :  { %v25393_v29 = vpop.eup %25392 }
0x1667   :  { %v4925_v4 = vmul.f32 %v25393_v29, %v4923_v8 }
0x16ca   :  { %v4928_v2 = vpop.permute.xlu1 %4927 }
0x16cb   :  { %v4930_v3 = vmul.f32 %v25393_v29, %v4928_v2  ;;  %v4960_v2 = vld [vmem:[#allocation15] sm:$0xff] }
0x16cc   :  { %v5549_v8 = vand.u32 4294901760, %v4960_v2 }
0x16cd   :  { %4932 = vrot.lane.b32.xlu0 %v4930_v3, %s25822_s20  ;;  %v4961_v3 = vld [vmem:[#allocation15 + $0x8] sm:$0xff] }
0x16d1   :  { %1784 = vrot.lane.b32.xlu0 %v26296_v46, %s25822_s20 }
0x16d5   :  { %2840 = vrot.lane.b32.xlu0 %v26394_v47, %s25822_s20 }
0x16d9   :  { %4416 = vrot.lane.b32.xlu0 %v4414_v34, %s25822_s20  ;;  %v5124_v34 = vsub.f32 %v5122_v54, %v5123_v60 }
0x16db   :  { %v5125_v40 = vand.u32 4294901760, %v5124_v34 }
0x16dd   :  { %v26605_v45 = vpack.c.bf16 %v5132_v44, %v5125_v40  ;;  %v4952_v40 = vld [vmem:[#allocation2 + $0x8] sm:$0x3] }
0x173f   :  { %v4933_v5 = vpop.permute.xlu0 %4932 }
0x1740   :  { %v26575_v6 = vadd.f32 %v4933_v5, %v4925_v4  ;;  %v5552_v4 = vand.u32 4294901760, %v4961_v3  ;;  %v5629_v5 = vsub.f32 %v4960_v2, %v5549_v8 }
0x1742   :  { %25394 = vtanh.f32 %v26575_v6  ;;  %v26626_v13 = vpack.c.bf16 %v5552_v4, %v5549_v8  ;;  %v5630_v16 = vand.u32 4294901760, %v5629_v5 }
0x1743   :  { %v1785_v7 = vpop.permute.xlu0 %1784 }
0x1744   :  { %1789 = vst.msk [vmem:[#allocation2] sm:$0xc] %vm1788_vm3, %v1785_v7  ;;  %v5636_v7 = vsub.f32 %v4961_v3, %v5552_v4  ;;  %24006 = vmatpush3.bf16.msra.mxu0 %v26626_v13  ;;  %v5631_v23 = vsub.f32 %v5629_v5, %v5630_v16 }
0x1745   :  { %24007 = vmatprep.subr.bf16.mxu0 %v25831_v0 }
0x1746   :  { %v5637_v17 = vand.u32 4294901760, %v5636_v7  ;;  %v5632_v38 = vand.u32 4294901760, %v5631_v23 }
0x1747   :  { %v2841_v9 = vpop.permute.xlu0 %2840 }
0x1748   :  { %2845 = vst.msk [vmem:[#allocation2] sm:$0xc0] %vm2844_vm4, %v2841_v9  ;;  %v140_v9 = vld [vmem:[#allocation7 + $0x2] sm:$0x3] }
0x1749   :  { %v5546_v12 = vsel %vm209_vm1, %v140_v9, 0 }
0x174a   :  { %v26628_v19 = vand.u32 4294901760, %v5546_v12 }
0x174b   :  { %v4417_v46 = vpop.permute.xlu0 %4416  ;;  %v4949_v53 = vld [vmem:[#allocation2 + $0x2] sm:$0x3] }
0x174c   :  { %v25395_v47 = vpop.eup %25394  ;;  %4420 = vst.msk [vmem:[#allocation2 + $0x8] sm:$0x30] %vm2316_vm5, %v4417_v46  ;;  %v4979_v58 = vcombine.low %v4948_v57, %v4949_v53  ;;  %v4962_v46 = vld [vmem:[#allocation15 + $0x10] sm:$0xff]  ;;  %v26645_v57 = vpack.c.bf16 %v5636_v7, %v5629_v5 }
0x174d   :  { %4938 = vrot.lane.b32.xlu1 %v25395_v47, %s25835_s3  ;;  %v4963_v47 = vld [vmem:[#allocation15 + $0x18] sm:$0xff]  ;;  %v5555_v14 = vand.u32 4294901760, %v4962_v46 }
0x174e   :  { %v4987_v37 = vrot.slane %v4979_v58, %v26041_v21  ;;  %v5558_v15 = vand.u32 4294901760, %v4963_v47 }
0x174f   :  { %v4951_v30 = vld [vmem:[#allocation2 + $0x6] sm:$0x3] }
0x1750   :  { %v5650_v28 = vsub.f32 %v4963_v47, %v5558_v15 }
0x1751   :  { %2312 = vrot.lane.b32.xlu1 %v26345_v36, %s25822_s20  ;;  %v5109_v36 = vand.u32 4294901760, %v5108_v27 }
0x1753   :  { %v26621_v59 = vpack.c.bf16 %v5116_v33, %v5109_v36  ;;  %v26633_v33 = vsub.f32 %v5546_v12, %v26628_v19 }
0x1755   :  { %3889 = vrot.lane.b32.xlu1 %v26490_v18, %s25822_s20  ;;  %v5110_v18 = vsub.f32 %v5108_v27, %v5109_v36  ;;  %v5643_v27 = vsub.f32 %v4962_v46, %v5555_v14  ;;  %v5638_v36 = vsub.f32 %v5636_v7, %v5637_v17 }
0x1757   :  { %v5111_v41 = vand.u32 4294901760, %v5110_v18  ;;  %v26635_v18 = vpack.c.bf16 %v5558_v15, %v5555_v14 }
0x1759   :  { %v26596_v49 = vpack.c.bf16 %v5118_v42, %v5111_v41  ;;  %v5644_v41 = vand.u32 4294901760, %v5643_v27  ;;  %v5651_v42 = vand.u32 4294901760, %v5650_v28  ;;  %24009 = vmatpush3.bf16.msra.mxu0 %v26635_v18 }
0x175a   :  { %24016 = vmatprep.subr.bf16.mxu0 %v25831_v0 }
0x175b   :  { %23965 = vmatprep.subr.bf16.mxu1 %v26596_v49  ;;  %v5652_v53 = vsub.f32 %v5650_v28, %v5651_v42  ;;  %v26661_v34 = vpack.c.bf16 %v5651_v42, %v5644_v41 }
0x17bf   :  { %v4939_v43 = vpop.permute.xlu1 %4938 }
0x17c0   :  { %v26594_v48 = vmul.f32 %v25393_v29, %v4939_v43  ;;  %v26623_v29 = vpack.c.bf16 %v5130_v24, %v5123_v60  ;;  %v5639_v43 = vand.u32 4294901760, %v5638_v36  ;;  %v5653_v60 = vand.u32 4294901760, %v5652_v53 }
0x17c2   :  { %4943 = vrot.lane.b32.xlu1 %v26594_v48, %s25822_s20  ;;  %v26639_v54 = vpack.c.bf16 %v5639_v43, %v5632_v38 }
0x17c3   :  { %v2313_v51 = vpop.permute.xlu1 %2312 }
0x17c4   :  { %2317 = vst.msk [vmem:[#allocation2] sm:$0x30] %vm2316_vm5, %v2313_v51  ;;  %v5619_v51 = vand.u32 4294901760, %v26633_v33 }
0x17c6   :  { %v5620_v56 = vsub.f32 %v26633_v33, %v5619_v51  ;;  %6042 = vrot.lane.b32.xlu1 %v143_v35, %s25822_s20 }
0x17c7   :  { %v3890_v52 = vpop.permute.xlu1 %3889 }
0x17c8   :  { %3893 = vst.msk [vmem:[#allocation2 + $0x8] sm:$0xc] %vm1788_vm3, %v3890_v52  ;;  %v5645_v52 = vsub.f32 %v5643_v27, %v5644_v41  ;;  %v5621_v24 = vand.u32 4294901760, %v5620_v56 }
0x17ca   :  { %v5646_v58 = vand.u32 4294901760, %v5645_v52  ;;  %21847 = vmatmul.mubr.f32.vlgmr.msra.gmra.mrb[10].mxu0 %v5621_v24 }
0x17cb   :  { %v4950_v25 = vld [vmem:[#allocation2 + $0x4] sm:$0x3]  ;;  %24018 = vmatpush3.bf16.msra.mxu0 %v26645_v57  ;;  %21868 = vmatprep.mubr.msk.f32.mxu0 %vm25832_vm0, %v25833_v1 }
0x17cc   :  { %v4980_v31 = vcombine.low %v4950_v25, %v4951_v30  ;;  %v26647_v25 = vpack.c.bf16 %v5653_v60, %v5646_v58  ;;  %v26650_v30 = vpack.c.bf16 %v5650_v28, %v5643_v27  ;;  %24019 = vmatprep.subr.bf16.mxu0 %v25831_v0 }
0x17ce   :  { %v4994_v39 = vrot.slane %v4980_v31, %v26041_v21  ;;  %v26656_v31 = vpack.c.bf16 %v5637_v17, %v5630_v16 }
0x17cf   :  { %24021 = vmatpush3.bf16.msra.mxu0 %v26650_v30 }
0x17d0   :  { %v4995_v10 = vcombine.low %v4987_v37, %v4994_v39  ;;  %24028 = vmatprep.subr.bf16.mxu0 %v25831_v0  ;;  %v4953_v39 = vld [vmem:[#allocation2 + $0xa] sm:$0x3] }
0x17d1   :  { %v4996_v44 = vcombine.low %v4952_v40, %v4953_v39 }
0x17d2   :  { %v5013_v55 = vsel %vm209_vm1, %v4995_v10, 0  ;;  %21869 = vmatmul.mubr.f32.vlgmr.msra.gmra.mrb[12].mxu0 %v26633_v33  ;;  %v4954_v10 = vld [vmem:[#allocation2 + $0xc] sm:$0x3] }
0x17d3   :  { %v26608_v62 = vand.u32 4294901760, %v5013_v55  ;;  %24030 = vmatpush3.bf16.msra.mxu0 %v26656_v31  ;;  %21890 = vmatprep.mubr.msk.f32.mxu0 %vm25832_vm0, %v25833_v1 }
0x17d4   :  { %24031 = vmatprep.subr.bf16.mxu0 %v25831_v0 }
0x17d5   :  { %v26613_v26 = vsub.f32 %v5013_v55, %v26608_v62 }
0x17d7   :  { %v5088_v50 = vand.u32 4294901760, %v26613_v26  ;;  %24033 = vmatpush3.bf16.msra.mxu0 %v26661_v34 }
0x17d8   :  { %24040 = vmatprep.subr.bf16.mxu0 %v25831_v0 }
0x17d9   :  { %v5089_v61 = vsub.f32 %v26613_v26, %v5088_v50 }
0x17da   :  { %21891 = vmatmul.mubr.f32.vlgmr.msra.gmra.mrb[14].mxu0 %v26628_v19 }
0x17db   :  { %v5090_v63 = vand.u32 4294901760, %v5089_v61  ;;  %24042 = vmatpush3.bf16.msra.mxu0 %v26626_v13  ;;  %21912 = vmatprep.mubr.msk.f32.mxu0 %vm25832_vm0, %v25833_v1 }
0x17dc   :  { %24043 = vmatprep.subr.bf16.mxu0 %v25831_v0 }
0x17dd   :  { %21780 = vmatprep.mubr.f32.mxu1 %v5090_v63  ;;  %v5004_v63 = vrot.slane %v4996_v44, %v26041_v21 }
0x17df   :  { %24045 = vmatpush3.bf16.msra.mxu0 %v26635_v18 }
0x17e0   :  { %24046 = vmatprep.subr.bf16.mxu0 %v25831_v0 }
0x1834   :  { %v4944_v37 = vpop.permute.xlu1 %4943 }
0x1835   :  { %4947 = vst.msk [vmem:[#allocation2 + $0x8] sm:$0xc0] %vm2844_vm4, %v4944_v37 }
0x1838   :  { %v6043_v56 = vpop.permute.xlu1 %6042 }
0x183c   :  { %v4955_v55 = vld [vmem:[#allocation2 + $0xe] sm:$0x3] }
0x183d   :  { %v4997_v61 = vcombine.low %v4954_v10, %v4955_v55 }
0x183f   :  { %v5011_v2 = vrot.slane %v4997_v61, %v26041_v21 }
0x1841   :  { %v5012_v3 = vcombine.low %v5004_v63, %v5011_v2 }
0x1843   :  { %v5015_v8 = vsel %vm209_vm1, %v5012_v3, 0 }
0x1844   :  { %v5096_v4 = vand.u32 4294901760, %v5015_v8 }
0x1846   :  { %v5097_v5 = vsub.f32 %v5015_v8, %v5096_v4 }
0x1848   :  { %v5098_v7 = vand.u32 4294901760, %v5097_v5 }
0x184a   :  { %v5099_v9 = vsub.f32 %v5097_v5, %v5098_v7 }
0x184c   :  { %v5100_v46 = vand.u32 4294901760, %v5099_v9 }
0x184e   :  { %21781 = vmatmul.mubr.f32.vlgmr.msra.gmra.mrb[28].mxu1 %v5100_v46 }
0x184f   :  { %23967 = vmatpush3.bf16.msra.mxu1 %v26596_v49  ;;  %21791 = vmatprep.mubr.f32.mxu1 %v26608_v62 }
0x1850   :  { %23969 = vmatprep.subr.bf16.mxu1 %v26605_v45 }
0x1853   :  { %23971 = vmatpush3.bf16.msra.mxu1 %v26605_v45 }
0x1854   :  { %23973 = vmatprep.subr.bf16.mxu1 %v26610_v11 }
0x1856   :  { %21792 = vmatmul.mubr.f32.vlgmr.msra.gmra.mrb[28].mxu1 %v5096_v4 }
0x1857   :  { %23975 = vmatpush3.bf16.msra.mxu1 %v26610_v11  ;;  %21802 = vmatprep.mubr.f32.mxu1 %v26613_v26  ;;  %v20010_v26 = vld [vmem:[%s28209_s8] ss:$0 sm:$0xff] }
0x1858   :  { %23977 = vmatprep.subr.bf16.mxu1 %v26616_v22 }
0x185b   :  { %23979 = vmatpush3.bf16.msra.mxu1 %v26616_v22 }
0x185c   :  { %23981 = vmatprep.subr.bf16.mxu1 %v26586_v20 }
0x185e   :  { %21803 = vmatmul.mubr.f32.vlgmr.msra.gmra.mrb[28].mxu1 %v5097_v5 }
0x185f   :  { %23983 = vmatpush3.bf16.msra.mxu1 %v26586_v20  ;;  %21813 = vmatprep.mubr.f32.mxu1 %v5088_v50 }
0x1860   :  { %23985 = vmatprep.subr.bf16.mxu1 %v26588_v32 }
0x1863   :  { %23987 = vmatpush3.bf16.msra.mxu1 %v26588_v32 }
0x1864   :  { %23989 = vmatprep.subr.bf16.mxu1 %v26621_v59 }
0x1866   :  { %21814 = vmatmul.mubr.f32.vlgmr.msra.gmra.mrb[28].mxu1 %v5098_v7 }
0x1867   :  { %23991 = vmatpush3.bf16.msra.mxu1 %v26621_v59  ;;  %21824 = vmatprep.mubr.f32.mxu1 %v26608_v62 }
0x1868   :  { %23993 = vmatprep.subr.bf16.mxu1 %v26623_v29 }
0x186b   :  { %23995 = vmatpush3.bf16.msra.mxu1 %v26623_v29 }
0x186c   :  { %23997 = vmatprep.subr.bf16.mxu1 %v26586_v20 }
0x186e   :  { %21825 = vmatmul.mubr.f32.vlgmr.msra.gmra.mrb[28].mxu1 %v5096_v4 }
0x186f   :  { %23999 = vmatpush3.bf16.msra.mxu1 %v26586_v20  ;;  %21835 = vmatprep.mubr.f32.mxu1 %v26608_v62 }
0x1870   :  { %24001 = vmatprep.subr.bf16.mxu1 %v26588_v32 }
0x1873   :  { %24003 = vmatpush3.bf16.msra.mxu1 %v26588_v32 }
0x1874   :  { %24010 = vmatprep.subr.bf16.mxu1 %v25831_v0 }
0x1876   :  { %21836 = vmatmul.mubr.f32.vlgmr.msra.gmra.mrb[28].mxu1 %v5096_v4 }
0x1877   :  { %24012 = vmatpush3.bf16.msra.mxu1 %v26639_v54  ;;  %21857 = vmatprep.mubr.msk.f32.mxu1 %vm25832_vm0, %v25833_v1 }
0x1878   :  { %24013 = vmatprep.subr.bf16.mxu1 %v25831_v0 }
0x187b   :  { %24015 = vmatpush3.bf16.msra.mxu1 %v26647_v25 }
0x187c   :  { %24022 = vmatprep.subr.bf16.mxu1 %v25831_v0 }
0x187e   :  { %21858 = vmatmul.mubr.f32.vlgmr.msra.gmra.mrb[30].mxu1 %v26628_v19 }
0x187f   :  { %24024 = vmatpush3.bf16.msra.mxu1 %v26626_v13  ;;  %21879 = vmatprep.mubr.msk.f32.mxu1 %vm25832_vm0, %v25833_v1 }
0x1880   :  { %24025 = vmatprep.subr.bf16.mxu1 %v25831_v0 }
0x1883   :  { %24027 = vmatpush3.bf16.msra.mxu1 %v26635_v18 }
0x1884   :  { %24034 = vmatprep.subr.bf16.mxu1 %v25831_v0 }
0x1886   :  { %21880 = vmatmul.mubr.f32.vlgmr.msra.gmra.mrb[32].mxu1 %v5619_v51 }
0x1887   :  { %24036 = vmatpush3.bf16.msra.mxu1 %v26626_v13  ;;  %21901 = vmatprep.mubr.msk.f32.mxu1 %vm25832_vm0, %v25833_v1 }
0x1888   :  { %24037 = vmatprep.subr.bf16.mxu1 %v25831_v0 }
0x188b   :  { %24039 = vmatpush3.bf16.msra.mxu1 %v26635_v18 }
0x188c   :  { %24076 = vmatprep.subr.bf16.mxu1 %v25831_v0 }
0x188e   :  { %21902 = vmatmul.mubr.f32.vlgmr.msra.gmra.mrb[34].mxu1 %v26628_v19 }
0x188f   :  { %24078 = vmatpush3.bf16.msra.mxu1 %v26626_v13  ;;  %21978 = vmatprep.mubr.msk.f32.mxu1 %vm25832_vm0, %v25833_v1 }
0x1890   :  { %24079 = vmatprep.subr.bf16.mxu1 %v25831_v0 }
0x1893   :  { %24081 = vmatpush3.bf16.msra.mxu1 %v26635_v18 }
0x1894   :  { %24082 = vmatprep.subr.bf16.mxu1 %v25831_v0 }
0x189d   :  { %v5623_v20 = vpop.f32.mrb[10].mxu0 }
0x189e   :  { %v21848_v32 = vpop.f32.mrb[11].mxu0 }
0x18a5   :  { %v5794_v49 = vpop.f32.mrb[12].mxu0 }
0x18a6   :  { %v21870_v45 = vpop.f32.mrb[13].mxu0 }
0x18ad   :  { %v5954_v62 = vpop.f32.mrb[14].mxu0 }
0x18ae   :  { %v21892_v11 = vpop.f32.mrb[15].mxu0 }
0x1949   :  { %v21837_v50 = vpop.f32.mrb[28].mxu1 }
0x194a   :  { %v26737_v22 = vadd.f32 %v21837_v50, %v20010_v26  ;;  %v5535_v59 = vpop.f32.mrb[29].mxu1 }
0x194b   :  { %v26739_v27 = vadd.f32 %v20010_v26, %v5535_v59 }
0x1951   :  { %v5714_v29 = vpop.f32.mrb[30].mxu1 }
0x1952   :  { %v5715_v47 = vadd.f32 %v5714_v29, %v5623_v20  ;;  %v21859_v12 = vpop.f32.mrb[31].mxu1 }
0x1954   :  { %v5795_v14 = vadd.f32 %v5794_v49, %v5715_v47 }
0x1959   :  { %v5871_v15 = vpop.f32.mrb[32].mxu1 }
0x195a   :  { %v5872_v16 = vadd.f32 %v5871_v15, %v5795_v14  ;;  %v21881_v17 = vpop.f32.mrb[33].mxu1 }
0x195c   :  { %v5955_v19 = vadd.f32 %v5954_v62, %v5872_v16 }
0x1961   :  { %v6029_v23 = vpop.f32.mrb[34].mxu1 }
0x1962   :  { %v6030_v28 = vadd.f32 %v6029_v23, %v5955_v19  ;;  %v21903_v36 = vpop.f32.mrb[35].mxu1 }
0x1964   :  { %v6033_v33 = vadd.f32 %v26739_v27, %v6030_v28 }
0x1966   :  { %25396 = vtanh.f32 %v6033_v33  ;;  %v20011_v41 = vmul.f32 -1.442695, %v6033_v33 }
0x1968   :  { %25398 = vpow2.f32 %v20011_v41 }
0x1970   :  { %v25397_v38 = vpop.eup %25396 }
0x1971   :  { %6047 = vrot.lane.b32.xlu0 %v25397_v38, %s25835_s3 }
0x1972   :  { %v25399_v42 = vpop.eup %25398 }
0x1973   :  { %v6037_v43 = vadd.f32 1.0, %v25399_v42 }
0x1975   :  { %25400 = vrcp.f32 %v6037_v43 }
0x197f   :  { %v25401_v51 = vpop.eup %25400 }
0x1980   :  { %v6045_v58 = vmul.f32 %v25401_v51, %v6043_v56 }
0x19e3   :  { %v6048_v52 = vpop.permute.xlu0 %6047 }
0x19e4   :  { %v6050_v53 = vmul.f32 %v25401_v51, %v6048_v52 }
0x19e6   :  { %6052 = vrot.lane.b32.xlu0 %v6050_v53, %s25822_s20 }
0x1a58   :  { %v6053_v60 = vpop.permute.xlu0 %6052 }
0x1a59   :  { %v26744_v24 = vadd.f32 %v6053_v60, %v6045_v58 }
0x1a5b   :  { %25402 = vtanh.f32 %v26744_v24  ;;  %v6566_v62 = vrot.slane %v26744_v24, 6 }
0x1a65   :  { %v25403_v35 = vpop.eup %25402 }
0x1a66   :  { %6058 = vrot.lane.b32.xlu1 %v25403_v35, %s25835_s3 }
0x1ad8   :  { %v6059_v37 = vpop.permute.xlu1 %6058 }
0x1ad9   :  { %v6061_v39 = vmul.f32 %v25401_v51, %v6059_v37 }
0x1adb   :  { %6063 = vrot.lane.b32.xlu0 %v6061_v39, %s25822_s20 }
0x1b4d   :  { %v6064_v40 = vpop.permute.xlu0 %6063 }
0x1b4e   :  { %6066 = vst.msk [vmem:[#allocation3] sm:$0x3] %vm1263_vm2, %v6064_v40  ;;  %v6067_v44 = vsel %vm209_vm1, %v6064_v40, 0 }
0x1b4f   :  { %v6138_v10 = vand.u32 4294901760, %v6067_v44 }
0x1b51   :  { %v6139_v55 = vsub.f32 %v6067_v44, %v6138_v10 }
0x1b53   :  { %v6140_v61 = vand.u32 4294901760, %v6139_v55 }
0x1b55   :  { %v6141_v63 = vsub.f32 %v6139_v55, %v6140_v61 }
0x1b57   :  { %v6142_v2 = vand.u32 4294901760, %v6141_v63 }
0x1b59   :  { %21913 = vmatmul.mubr.f32.vlgmr.msra.gmra.mrb[16].mxu0 %v6142_v2 }
0x1b5a   :  { %24048 = vmatpush3.bf16.msra.mxu0 %v26639_v54  ;;  %21923 = vmatprep.mubr.msk.f32.mxu0 %vm25832_vm0, %v25833_v1 }
0x1b5b   :  { %24049 = vmatprep.subr.bf16.mxu0 %v25831_v0 }
0x1b5e   :  { %24051 = vmatpush3.bf16.msra.mxu0 %v26647_v25 }
0x1b5f   :  { %24052 = vmatprep.subr.bf16.mxu0 %v25831_v0 }
0x1b61   :  { %21924 = vmatmul.mubr.f32.vlgmr.msra.gmra.mrb[16].mxu0 %v6138_v10 }
0x1b62   :  { %24054 = vmatpush3.bf16.msra.mxu0 %v26645_v57  ;;  %21934 = vmatprep.mubr.msk.f32.mxu0 %vm25832_vm0, %v25833_v1 }
0x1b63   :  { %24055 = vmatprep.subr.bf16.mxu0 %v25831_v0 }
0x1b66   :  { %24057 = vmatpush3.bf16.msra.mxu0 %v26650_v30 }
0x1b67   :  { %24058 = vmatprep.subr.bf16.mxu0 %v25831_v0 }
0x1b69   :  { %21935 = vmatmul.mubr.f32.vlgmr.msra.gmra.mrb[16].mxu0 %v6139_v55 }
0x1b6a   :  { %24060 = vmatpush3.bf16.msra.mxu0 %v26626_v13  ;;  %21945 = vmatprep.mubr.msk.f32.mxu0 %vm25832_vm0, %v25833_v1 }
0x1b6b   :  { %24061 = vmatprep.subr.bf16.mxu0 %v25831_v0 }
0x1b6e   :  { %24063 = vmatpush3.bf16.msra.mxu0 %v26635_v18 }
0x1b6f   :  { %24064 = vmatprep.subr.bf16.mxu0 %v25831_v0 }
0x1b71   :  { %21946 = vmatmul.mubr.f32.vlgmr.msra.gmra.mrb[16].mxu0 %v6140_v61 }
0x1b72   :  { %24066 = vmatpush3.bf16.msra.mxu0 %v26656_v31  ;;  %21956 = vmatprep.mubr.msk.f32.mxu0 %vm25832_vm0, %v25833_v1 }
0x1b73   :  { %24067 = vmatprep.subr.bf16.mxu0 %v25831_v0 }
0x1b76   :  { %24069 = vmatpush3.bf16.msra.mxu0 %v26661_v34 }
0x1b77   :  { %24070 = vmatprep.subr.bf16.mxu0 %v25831_v0 }
0x1b79   :  { %21957 = vmatmul.mubr.f32.vlgmr.msra.gmra.mrb[16].mxu0 %v6138_v10 }
0x1b7a   :  { %24072 = vmatpush3.bf16.msra.mxu0 %v26626_v13  ;;  %21967 = vmatprep.mubr.msk.f32.mxu0 %vm25832_vm0, %v25833_v1 }
0x1b7b   :  { %24073 = vmatprep.subr.bf16.mxu0 %v25831_v0 }
0x1b7e   :  { %24075 = vmatpush3.bf16.msra.mxu0 %v26635_v18 }
0x1b7f   :  { %24112 = vmatprep.subr.bf16.mxu0 %v25831_v0 }
0x1b81   :  { %21968 = vmatmul.mubr.f32.vlgmr.msra.gmra.mrb[16].mxu0 %v6138_v10 }
0x1b82   :  { %24114 = vmatpush3.bf16.msra.mxu0 %v26626_v13  ;;  %22044 = vmatprep.mubr.msk.f32.mxu0 %vm25832_vm0, %v25833_v1 }
0x1b83   :  { %24115 = vmatprep.subr.bf16.mxu0 %v25831_v0 }
0x1b86   :  { %24117 = vmatpush3.bf16.msra.mxu0 %v26635_v18 }
0x1b87   :  { %24118 = vmatprep.subr.bf16.mxu0 %v25831_v0 }
0x1c54   :  { %v6550_v3 = vpop.f32.mrb[16].mxu0 }
0x1c55   :  { %v6555_v8 = vrot.slane %v6550_v3, 6  ;;  %v21969_v4 = vpop.f32.mrb[17].mxu0 }
0x1c57   :  { %v6557_v5 = vadd.f32 %v26739_v27, %v6555_v8 }
0x1c59   :  { %25404 = vtanh.f32 %v6557_v5  ;;  %v20012_v9 = vmul.f32 -1.442695, %v6557_v5 }
0x1c5b   :  { %25406 = vpow2.f32 %v20012_v9 }
0x1c63   :  { %v25405_v7 = vpop.eup %25404 }
0x1c64   :  { %6570 = vrot.lane.b32.xlu1 %v25405_v7, %s25835_s3 }
0x1c65   :  { %v25407_v46 = vpop.eup %25406 }
0x1c66   :  { %v6561_v20 = vadd.f32 1.0, %v25407_v46 }
0x1c68   :  { %25408 = vrcp.f32 %v6561_v20 }
0x1c72   :  { %v25409_v32 = vpop.eup %25408 }
0x1c73   :  { %v6568_v11 = vmul.f32 %v25409_v32, %v6566_v62 }
0x1cd6   :  { %v6571_v49 = vpop.permute.xlu1 %6570 }
0x1cd7   :  { %v6573_v45 = vmul.f32 %v25409_v32, %v6571_v49 }
0x1cd9   :  { %6575 = vrot.lane.b32.xlu0 %v6573_v45, %s25822_s20 }
0x1d4b   :  { %v6576_v26 = vpop.permute.xlu0 %6575 }
0x1d4c   :  { %v26791_v50 = vadd.f32 %v6576_v26, %v6568_v11 }
0x1d4e   :  { %25410 = vtanh.f32 %v26791_v50  ;;  %v7093_v60 = vrot.slane %v26791_v50, 6 }
0x1d58   :  { %v25411_v59 = vpop.eup %25410 }
0x1d59   :  { %6581 = vrot.lane.b32.xlu1 %v25411_v59, %s25835_s3 }
0x1dcb   :  { %v6582_v29 = vpop.permute.xlu1 %6581 }
0x1dcc   :  { %v26795_v47 = vmul.f32 %v25409_v32, %v6582_v29 }
0x1dce   :  { %v6591_v12 = vrot.slane %v26795_v47, 2 }
0x1dd0   :  { %6592 = vrot.lane.b32.xlu0 %v6591_v12, %s25822_s20 }
0x1e42   :  { %v6593_v14 = vpop.permute.xlu0 %6592 }
0x1e43   :  { %v6594_v15 = vsel %vm209_vm1, %v6593_v14, 0 }
0x1e44   :  { %v6665_v16 = vand.u32 4294901760, %v6594_v15 }
0x1e46   :  { %v6666_v17 = vsub.f32 %v6594_v15, %v6665_v16 }
0x1e48   :  { %v6667_v19 = vand.u32 4294901760, %v6666_v17 }
0x1e4a   :  { %v6668_v23 = vsub.f32 %v6666_v17, %v6667_v19 }
0x1e4c   :  { %v6669_v28 = vand.u32 4294901760, %v6668_v23 }
0x1e4e   :  { %21979 = vmatmul.mubr.f32.vlgmr.msra.gmra.mrb[36].mxu1 %v6669_v28 }
0x1e4f   :  { %24084 = vmatpush3.bf16.msra.mxu1 %v26639_v54  ;;  %21989 = vmatprep.mubr.msk.f32.mxu1 %vm25832_vm0, %v25833_v1 }
0x1e50   :  { %24085 = vmatprep.subr.bf16.mxu1 %v25831_v0 }
0x1e53   :  { %24087 = vmatpush3.bf16.msra.mxu1 %v26647_v25 }
0x1e54   :  { %24088 = vmatprep.subr.bf16.mxu1 %v25831_v0 }
0x1e56   :  { %21990 = vmatmul.mubr.f32.vlgmr.msra.gmra.mrb[36].mxu1 %v6665_v16 }
0x1e57   :  { %24090 = vmatpush3.bf16.msra.mxu1 %v26645_v57  ;;  %22000 = vmatprep.mubr.msk.f32.mxu1 %vm25832_vm0, %v25833_v1 }
0x1e58   :  { %24091 = vmatprep.subr.bf16.mxu1 %v25831_v0 }
0x1e5b   :  { %24093 = vmatpush3.bf16.msra.mxu1 %v26650_v30 }
0x1e5c   :  { %24094 = vmatprep.subr.bf16.mxu1 %v25831_v0 }
0x1e5e   :  { %22001 = vmatmul.mubr.f32.vlgmr.msra.gmra.mrb[36].mxu1 %v6666_v17 }
0x1e5f   :  { %24096 = vmatpush3.bf16.msra.mxu1 %v26626_v13  ;;  %22011 = vmatprep.mubr.msk.f32.mxu1 %vm25832_vm0, %v25833_v1 }
0x1e60   :  { %24097 = vmatprep.subr.bf16.mxu1 %v25831_v0 }
0x1e63   :  { %24099 = vmatpush3.bf16.msra.mxu1 %v26635_v18 }
0x1e64   :  { %24100 = vmatprep.subr.bf16.mxu1 %v25831_v0 }
0x1e66   :  { %22012 = vmatmul.mubr.f32.vlgmr.msra.gmra.mrb[36].mxu1 %v6667_v19 }
0x1e67   :  { %24102 = vmatpush3.bf16.msra.mxu1 %v26656_v31  ;;  %22022 = vmatprep.mubr.msk.f32.mxu1 %vm25832_vm0, %v25833_v1 }
0x1e68   :  { %24103 = vmatprep.subr.bf16.mxu1 %v25831_v0 }
0x1e6b   :  { %24105 = vmatpush3.bf16.msra.mxu1 %v26661_v34 }
0x1e6c   :  { %24106 = vmatprep.subr.bf16.mxu1 %v25831_v0 }
0x1e6e   :  { %22023 = vmatmul.mubr.f32.vlgmr.msra.gmra.mrb[36].mxu1 %v6665_v16 }
0x1e6f   :  { %24108 = vmatpush3.bf16.msra.mxu1 %v26626_v13  ;;  %22033 = vmatprep.mubr.msk.f32.mxu1 %vm25832_vm0, %v25833_v1 }
0x1e70   :  { %24109 = vmatprep.subr.bf16.mxu1 %v25831_v0 }
0x1e73   :  { %24111 = vmatpush3.bf16.msra.mxu1 %v26635_v18 }
0x1e74   :  { %24148 = vmatprep.subr.bf16.mxu1 %v25831_v0 }
0x1e76   :  { %22034 = vmatmul.mubr.f32.vlgmr.msra.gmra.mrb[36].mxu1 %v6665_v16 }
0x1e77   :  { %24150 = vmatpush3.bf16.msra.mxu1 %v26626_v13  ;;  %22110 = vmatprep.mubr.msk.f32.mxu1 %vm25832_vm0, %v25833_v1 }
0x1e78   :  { %24151 = vmatprep.subr.bf16.mxu1 %v25831_v0 }
0x1e7b   :  { %24153 = vmatpush3.bf16.msra.mxu1 %v26635_v18 }
0x1e7c   :  { %24154 = vmatprep.subr.bf16.mxu1 %v25831_v0 }
0x1f49   :  { %v7077_v36 = vpop.f32.mrb[36].mxu1 }
0x1f4a   :  { %v7082_v33 = vrot.slane %v7077_v36, 4  ;;  %v22035_v38 = vpop.f32.mrb[37].mxu1 }
0x1f4c   :  { %v7084_v41 = vadd.f32 %v26739_v27, %v7082_v33 }
0x1f4e   :  { %25412 = vtanh.f32 %v7084_v41  ;;  %v20013_v43 = vmul.f32 -1.442695, %v7084_v41 }
0x1f50   :  { %25414 = vpow2.f32 %v20013_v43 }
0x1f58   :  { %v25413_v42 = vpop.eup %25412 }
0x1f59   :  { %7097 = vrot.lane.b32.xlu1 %v25413_v42, %s25835_s3 }
0x1f5a   :  { %v25415_v51 = vpop.eup %25414 }
0x1f5b   :  { %v7088_v52 = vadd.f32 1.0, %v25415_v51 }
0x1f5d   :  { %25416 = vrcp.f32 %v7088_v52 }
0x1f67   :  { %v25417_v53 = vpop.eup %25416 }
0x1f68   :  { %v7095_v24 = vmul.f32 %v25417_v53, %v7093_v60 }
0x1fcb   :  { %v7098_v56 = vpop.permute.xlu1 %7097 }
0x1fcc   :  { %v7100_v58 = vmul.f32 %v25417_v53, %v7098_v56 }
0x1fce   :  { %7102 = vrot.lane.b32.xlu0 %v7100_v58, %s25822_s20 }
0x2040   :  { %v7103_v35 = vpop.permute.xlu0 %7102 }
0x2041   :  { %v26840_v37 = vadd.f32 %v7103_v35, %v7095_v24 }
0x2043   :  { %25418 = vtanh.f32 %v26840_v37  ;;  %v7620_v50 = vrot.slane %v26840_v37, 6 }
0x204d   :  { %v25419_v39 = vpop.eup %25418 }
0x204e   :  { %7108 = vrot.lane.b32.xlu1 %v25419_v39, %s25835_s3 }
0x20c0   :  { %v7109_v40 = vpop.permute.xlu1 %7108 }
0x20c1   :  { %v26844_v44 = vmul.f32 %v25417_v53, %v7109_v40 }
0x20c3   :  { %v7118_v10 = vrot.slane %v26844_v44, 4 }
0x20c5   :  { %7119 = vrot.lane.b32.xlu0 %v7118_v10, %s25822_s20 }
0x2137   :  { %v7120_v55 = vpop.permute.xlu0 %7119 }
0x2138   :  { %v7121_v61 = vsel %vm209_vm1, %v7120_v55, 0 }
0x2139   :  { %v7192_v63 = vand.u32 4294901760, %v7121_v61 }
0x213b   :  { %v7193_v2 = vsub.f32 %v7121_v61, %v7192_v63 }
0x213d   :  { %v7194_v3 = vand.u32 4294901760, %v7193_v2 }
0x213f   :  { %v7195_v8 = vsub.f32 %v7193_v2, %v7194_v3 }
0x2141   :  { %v7196_v4 = vand.u32 4294901760, %v7195_v8 }
0x2143   :  { %22045 = vmatmul.mubr.f32.vlgmr.msra.gmra.mrb[18].mxu0 %v7196_v4 }
0x2144   :  { %24120 = vmatpush3.bf16.msra.mxu0 %v26639_v54  ;;  %22055 = vmatprep.mubr.msk.f32.mxu0 %vm25832_vm0, %v25833_v1 }
0x2145   :  { %24121 = vmatprep.subr.bf16.mxu0 %v25831_v0 }
0x2148   :  { %24123 = vmatpush3.bf16.msra.mxu0 %v26647_v25 }
0x2149   :  { %24124 = vmatprep.subr.bf16.mxu0 %v25831_v0 }
0x214b   :  { %22056 = vmatmul.mubr.f32.vlgmr.msra.gmra.mrb[18].mxu0 %v7192_v63 }
0x214c   :  { %24126 = vmatpush3.bf16.msra.mxu0 %v26645_v57  ;;  %22066 = vmatprep.mubr.msk.f32.mxu0 %vm25832_vm0, %v25833_v1 }
0x214d   :  { %24127 = vmatprep.subr.bf16.mxu0 %v25831_v0 }
0x2150   :  { %24129 = vmatpush3.bf16.msra.mxu0 %v26650_v30 }
0x2151   :  { %24130 = vmatprep.subr.bf16.mxu0 %v25831_v0 }
0x2153   :  { %22067 = vmatmul.mubr.f32.vlgmr.msra.gmra.mrb[18].mxu0 %v7193_v2 }
0x2154   :  { %24132 = vmatpush3.bf16.msra.mxu0 %v26626_v13  ;;  %22077 = vmatprep.mubr.msk.f32.mxu0 %vm25832_vm0, %v25833_v1 }
0x2155   :  { %24133 = vmatprep.subr.bf16.mxu0 %v25831_v0 }
0x2158   :  { %24135 = vmatpush3.bf16.msra.mxu0 %v26635_v18 }
0x2159   :  { %24136 = vmatprep.subr.bf16.mxu0 %v25831_v0 }
0x215b   :  { %22078 = vmatmul.mubr.f32.vlgmr.msra.gmra.mrb[18].mxu0 %v7194_v3 }
0x215c   :  { %24138 = vmatpush3.bf16.msra.mxu0 %v26656_v31  ;;  %22088 = vmatprep.mubr.msk.f32.mxu0 %vm25832_vm0, %v25833_v1 }
0x215d   :  { %24139 = vmatprep.subr.bf16.mxu0 %v25831_v0 }
0x2160   :  { %24141 = vmatpush3.bf16.msra.mxu0 %v26661_v34 }
0x2161   :  { %24142 = vmatprep.subr.bf16.mxu0 %v25831_v0 }
0x2163   :  { %22089 = vmatmul.mubr.f32.vlgmr.msra.gmra.mrb[18].mxu0 %v7192_v63 }
0x2164   :  { %24144 = vmatpush3.bf16.msra.mxu0 %v26626_v13  ;;  %22099 = vmatprep.mubr.msk.f32.mxu0 %vm25832_vm0, %v25833_v1 }
0x2165   :  { %24145 = vmatprep.subr.bf16.mxu0 %v25831_v0 }
0x2168   :  { %24147 = vmatpush3.bf16.msra.mxu0 %v26635_v18 }
0x2169   :  { %24184 = vmatprep.subr.bf16.mxu0 %v25831_v0 }
0x216b   :  { %22100 = vmatmul.mubr.f32.vlgmr.msra.gmra.mrb[18].mxu0 %v7192_v63 }
0x216c   :  { %24186 = vmatpush3.bf16.msra.mxu0 %v26626_v13  ;;  %22176 = vmatprep.mubr.msk.f32.mxu0 %vm25832_vm0, %v25833_v1 }
0x216d   :  { %24187 = vmatprep.subr.bf16.mxu0 %v25831_v0 }
0x2170   :  { %24189 = vmatpush3.bf16.msra.mxu0 %v26635_v18 }
0x2171   :  { %24190 = vmatprep.subr.bf16.mxu0 %v25831_v0 }
0x223e   :  { %v7604_v5 = vpop.f32.mrb[18].mxu0 }
0x223f   :  { %v7609_v7 = vrot.slane %v7604_v5, 2  ;;  %v22101_v9 = vpop.f32.mrb[19].mxu0 }
0x2241   :  { %v7611_v46 = vadd.f32 %v26739_v27, %v7609_v7 }
0x2243   :  { %25420 = vtanh.f32 %v7611_v46  ;;  %v20014_v32 = vmul.f32 -1.442695, %v7611_v46 }
0x2245   :  { %25422 = vpow2.f32 %v20014_v32 }
0x224d   :  { %v25421_v20 = vpop.eup %25420 }
0x224e   :  { %7624 = vrot.lane.b32.xlu1 %v25421_v20, %s25835_s3 }
0x224f   :  { %v25423_v49 = vpop.eup %25422 }
0x2250   :  { %v7615_v45 = vadd.f32 1.0, %v25423_v49 }
0x2252   :  { %25424 = vrcp.f32 %v7615_v45 }
0x225c   :  { %v25425_v62 = vpop.eup %25424 }
0x225d   :  { %v7622_v59 = vmul.f32 %v25425_v62, %v7620_v50 }
0x22c0   :  { %v7625_v11 = vpop.permute.xlu1 %7624 }
0x22c1   :  { %v7627_v26 = vmul.f32 %v25425_v62, %v7625_v11 }
0x22c3   :  { %7629 = vrot.lane.b32.xlu0 %v7627_v26, %s25822_s20 }
0x2335   :  { %v7630_v29 = vpop.permute.xlu0 %7629 }
0x2336   :  { %v26889_v12 = vadd.f32 %v7630_v29, %v7622_v59 }
0x2338   :  { %25426 = vtanh.f32 %v26889_v12  ;;  %v8144_v46 = vrot.slane %v26889_v12, 6 }
0x2342   :  { %v25427_v27 = vpop.eup %25426 }
0x2343   :  { %7635 = vrot.lane.b32.xlu1 %v25427_v27, %s25835_s3 }
0x23b5   :  { %v7636_v14 = vpop.permute.xlu1 %7635 }
0x23b6   :  { %v26893_v15 = vmul.f32 %v25425_v62, %v7636_v14 }
0x23b8   :  { %v7645_v16 = vrot.slane %v26893_v15, 6 }
0x23ba   :  { %7646 = vrot.lane.b32.xlu0 %v7645_v16, %s25822_s20 }
0x242c   :  { %v7647_v17 = vpop.permute.xlu0 %7646 }
0x242d   :  { %v7648_v19 = vsel %vm209_vm1, %v7647_v17, 0 }
0x242e   :  { %v7719_v23 = vand.u32 4294901760, %v7648_v19 }
0x2430   :  { %v7720_v28 = vsub.f32 %v7648_v19, %v7719_v23 }
0x2432   :  { %v7721_v36 = vand.u32 4294901760, %v7720_v28 }
0x2434   :  { %v7722_v33 = vsub.f32 %v7720_v28, %v7721_v36 }
0x2436   :  { %v7723_v38 = vand.u32 4294901760, %v7722_v33 }
0x2438   :  { %22111 = vmatmul.mubr.f32.vlgmr.msra.gmra.mrb[38].mxu1 %v7723_v38 }
0x2439   :  { %24156 = vmatpush3.bf16.msra.mxu1 %v26639_v54  ;;  %22121 = vmatprep.mubr.msk.f32.mxu1 %vm25832_vm0, %v25833_v1 }
0x243a   :  { %24157 = vmatprep.subr.bf16.mxu1 %v25831_v0 }
0x243d   :  { %24159 = vmatpush3.bf16.msra.mxu1 %v26647_v25 }
0x243e   :  { %24160 = vmatprep.subr.bf16.mxu1 %v25831_v0 }
0x2440   :  { %22122 = vmatmul.mubr.f32.vlgmr.msra.gmra.mrb[40].mxu1 %v7719_v23 }
0x2441   :  { %24162 = vmatpush3.bf16.msra.mxu1 %v26645_v57  ;;  %22132 = vmatprep.mubr.msk.f32.mxu1 %vm25832_vm0, %v25833_v1 }
0x2442   :  { %24163 = vmatprep.subr.bf16.mxu1 %v25831_v0 }
0x2445   :  { %24165 = vmatpush3.bf16.msra.mxu1 %v26650_v30 }
0x2446   :  { %24166 = vmatprep.subr.bf16.mxu1 %v25831_v0 }
0x2448   :  { %22133 = vmatmul.mubr.f32.vlgmr.msra.gmra.mrb[42].mxu1 %v7720_v28 }
0x2449   :  { %24168 = vmatpush3.bf16.msra.mxu1 %v26626_v13  ;;  %22143 = vmatprep.mubr.msk.f32.mxu1 %vm25832_vm0, %v25833_v1 }
0x244a   :  { %24169 = vmatprep.subr.bf16.mxu1 %v25831_v0 }
0x244d   :  { %24171 = vmatpush3.bf16.msra.mxu1 %v26635_v18 }
0x244e   :  { %24172 = vmatprep.subr.bf16.mxu1 %v25831_v0 }
0x2450   :  { %22144 = vmatmul.mubr.f32.vlgmr.msra.gmra.mrb[44].mxu1 %v7721_v36 }
0x2451   :  { %24174 = vmatpush3.bf16.msra.mxu1 %v26656_v31  ;;  %22154 = vmatprep.mubr.msk.f32.mxu1 %vm25832_vm0, %v25833_v1 }
0x2452   :  { %24175 = vmatprep.subr.bf16.mxu1 %v25831_v0 }
0x2455   :  { %24177 = vmatpush3.bf16.msra.mxu1 %v26661_v34 }
0x2456   :  { %24178 = vmatprep.subr.bf16.mxu1 %v25831_v0 }
0x2458   :  { %22155 = vmatmul.mubr.f32.vlgmr.msra.gmra.mrb[46].mxu1 %v7719_v23 }
0x2459   :  { %24180 = vmatpush3.bf16.msra.mxu1 %v26626_v13  ;;  %22165 = vmatprep.mubr.msk.f32.mxu1 %vm25832_vm0, %v25833_v1 }
0x245a   :  { %24181 = vmatprep.subr.bf16.mxu1 %v25831_v0 }
0x245d   :  { %24183 = vmatpush3.bf16.msra.mxu1 %v26635_v18 }
0x245e   :  { %24220 = vmatprep.subr.bf16.mxu1 %v25831_v0 }
0x2460   :  { %22166 = vmatmul.mubr.f32.vlgmr.msra.gmra.mrb[48].mxu1 %v7719_v23 }
0x2461   :  { %24222 = vmatpush3.bf16.msra.mxu1 %v26626_v13  ;;  %22242 = vmatprep.mubr.msk.f32.mxu1 %vm25832_vm0, %v25833_v1 }
0x2462   :  { %24223 = vmatprep.subr.bf16.mxu1 %v25831_v0 }
0x2465   :  { %24225 = vmatpush3.bf16.msra.mxu1 %v26635_v18 }
0x2466   :  { %24226 = vmatprep.subr.bf16.mxu1 %v25831_v0 }
0x250b   :  { %v7725_v41 = vpop.f32.mrb[38].mxu1 }
0x250c   :  { %v22112_v42 = vpop.f32.mrb[39].mxu1 }
0x2513   :  { %v7816_v43 = vpop.f32.mrb[40].mxu1 }
0x2514   :  { %v7817_v51 = vadd.f32 %v7816_v43, %v7725_v41  ;;  %v22123_v52 = vpop.f32.mrb[41].mxu1 }
0x251b   :  { %v7896_v53 = vpop.f32.mrb[42].mxu1 }
0x251c   :  { %v7897_v56 = vadd.f32 %v7896_v53, %v7817_v51  ;;  %v22134_v58 = vpop.f32.mrb[43].mxu1 }
0x2523   :  { %v7973_v60 = vpop.f32.mrb[44].mxu1 }
0x2524   :  { %v7974_v24 = vadd.f32 %v7973_v60, %v7897_v56  ;;  %v22145_v35 = vpop.f32.mrb[45].mxu1 }
0x252b   :  { %v8056_v37 = vpop.f32.mrb[46].mxu1 }
0x252c   :  { %v8057_v39 = vadd.f32 %v8056_v37, %v7974_v24  ;;  %v22156_v40 = vpop.f32.mrb[47].mxu1 }
0x2533   :  { %v8131_v10 = vpop.f32.mrb[48].mxu1 }
0x2534   :  { %v8132_v55 = vadd.f32 %v8131_v10, %v8057_v39  ;;  %v22167_v61 = vpop.f32.mrb[49].mxu1 }
0x2536   :  { %v8135_v63 = vadd.f32 %v26737_v22, %v8132_v55 }
0x2538   :  { %25428 = vtanh.f32 %v8135_v63  ;;  %v20015_v3 = vmul.f32 -1.442695, %v8135_v63 }
0x253a   :  { %25430 = vpow2.f32 %v20015_v3 }
0x2542   :  { %v25429_v2 = vpop.eup %25428 }
0x2543   :  { %8148 = vrot.lane.b32.xlu1 %v25429_v2, %s25835_s3 }
0x2544   :  { %v25431_v8 = vpop.eup %25430 }
0x2545   :  { %v8139_v4 = vadd.f32 1.0, %v25431_v8 }
0x2547   :  { %25432 = vrcp.f32 %v8139_v4 }
0x2551   :  { %v25433_v5 = vpop.eup %25432 }
0x2552   :  { %v8146_v20 = vmul.f32 %v25433_v5, %v8144_v46 }
0x25b5   :  { %v8149_v7 = vpop.permute.xlu1 %8148 }
0x25b6   :  { %v8151_v9 = vmul.f32 %v25433_v5, %v8149_v7 }
0x25b8   :  { %8153 = vrot.lane.b32.xlu0 %v8151_v9, %s25822_s20 }
0x262a   :  { %v8154_v32 = vpop.permute.xlu0 %8153 }
0x262b   :  { %v26938_v49 = vadd.f32 %v8154_v32, %v8146_v20 }
0x262d   :  { %25434 = vtanh.f32 %v26938_v49  ;;  %v8668_v51 = vrot.slane %v26938_v49, 6 }
0x2637   :  { %v25435_v45 = vpop.eup %25434 }
0x2638   :  { %8159 = vrot.lane.b32.xlu1 %v25435_v45, %s25835_s3 }
0x26aa   :  { %v8160_v62 = vpop.permute.xlu1 %8159 }
0x26ab   :  { %v8162_v11 = vmul.f32 %v25433_v5, %v8160_v62 }
0x26ad   :  { %8164 = vrot.lane.b32.xlu0 %v8162_v11, %s25822_s20 }
0x271f   :  { %v8165_v26 = vpop.permute.xlu0 %8164 }
0x2720   :  { %8168 = vst.msk [vmem:[#allocation3 + $0x8] sm:$0x3] %vm1263_vm2, %v8165_v26  ;;  %v8169_v50 = vsel %vm209_vm1, %v8165_v26, 0 }
0x2721   :  { %v8240_v59 = vand.u32 4294901760, %v8169_v50 }
0x2723   :  { %v8241_v29 = vsub.f32 %v8169_v50, %v8240_v59 }
0x2725   :  { %v8242_v12 = vand.u32 4294901760, %v8241_v29 }
0x2727   :  { %v8243_v27 = vsub.f32 %v8241_v29, %v8242_v12 }
0x2729   :  { %v8244_v14 = vand.u32 4294901760, %v8243_v27 }
0x272b   :  { %22177 = vmatmul.mubr.f32.vlgmr.msra.gmra.mrb[20].mxu0 %v8244_v14 }
0x272c   :  { %24192 = vmatpush3.bf16.msra.mxu0 %v26639_v54  ;;  %22187 = vmatprep.mubr.msk.f32.mxu0 %vm25832_vm0, %v25833_v1 }
0x272d   :  { %24193 = vmatprep.subr.bf16.mxu0 %v25831_v0 }
0x2730   :  { %24195 = vmatpush3.bf16.msra.mxu0 %v26647_v25 }
0x2731   :  { %24196 = vmatprep.subr.bf16.mxu0 %v25831_v0 }
0x2733   :  { %22188 = vmatmul.mubr.f32.vlgmr.msra.gmra.mrb[20].mxu0 %v8240_v59 }
0x2734   :  { %24198 = vmatpush3.bf16.msra.mxu0 %v26645_v57  ;;  %22198 = vmatprep.mubr.msk.f32.mxu0 %vm25832_vm0, %v25833_v1 }
0x2735   :  { %24199 = vmatprep.subr.bf16.mxu0 %v25831_v0 }
0x2738   :  { %24201 = vmatpush3.bf16.msra.mxu0 %v26650_v30 }
0x2739   :  { %24202 = vmatprep.subr.bf16.mxu0 %v25831_v0 }
0x273b   :  { %22199 = vmatmul.mubr.f32.vlgmr.msra.gmra.mrb[20].mxu0 %v8241_v29 }
0x273c   :  { %24204 = vmatpush3.bf16.msra.mxu0 %v26626_v13  ;;  %22209 = vmatprep.mubr.msk.f32.mxu0 %vm25832_vm0, %v25833_v1 }
0x273d   :  { %24205 = vmatprep.subr.bf16.mxu0 %v25831_v0 }
0x2740   :  { %24207 = vmatpush3.bf16.msra.mxu0 %v26635_v18 }
0x2741   :  { %24208 = vmatprep.subr.bf16.mxu0 %v25831_v0 }
0x2743   :  { %22210 = vmatmul.mubr.f32.vlgmr.msra.gmra.mrb[20].mxu0 %v8242_v12 }
0x2744   :  { %24210 = vmatpush3.bf16.msra.mxu0 %v26656_v31  ;;  %22220 = vmatprep.mubr.msk.f32.mxu0 %vm25832_vm0, %v25833_v1 }
0x2745   :  { %24211 = vmatprep.subr.bf16.mxu0 %v25831_v0 }
0x2748   :  { %24213 = vmatpush3.bf16.msra.mxu0 %v26661_v34 }
0x2749   :  { %24214 = vmatprep.subr.bf16.mxu0 %v25831_v0 }
0x274b   :  { %22221 = vmatmul.mubr.f32.vlgmr.msra.gmra.mrb[20].mxu0 %v8240_v59 }
0x274c   :  { %24216 = vmatpush3.bf16.msra.mxu0 %v26626_v13  ;;  %22231 = vmatprep.mubr.msk.f32.mxu0 %vm25832_vm0, %v25833_v1 }
0x274d   :  { %24217 = vmatprep.subr.bf16.mxu0 %v25831_v0 }
0x2750   :  { %24219 = vmatpush3.bf16.msra.mxu0 %v26635_v18 }
0x2751   :  { %24256 = vmatprep.subr.bf16.mxu0 %v25831_v0 }
0x2753   :  { %22232 = vmatmul.mubr.f32.vlgmr.msra.gmra.mrb[20].mxu0 %v8240_v59 }
0x2754   :  { %24258 = vmatpush3.bf16.msra.mxu0 %v26626_v13  ;;  %22308 = vmatprep.mubr.msk.f32.mxu0 %vm25832_vm0, %v25833_v1 }
0x2755   :  { %24259 = vmatprep.subr.bf16.mxu0 %v25831_v0 }
0x2758   :  { %24261 = vmatpush3.bf16.msra.mxu0 %v26635_v18 }
0x2759   :  { %24262 = vmatprep.subr.bf16.mxu0 %v25831_v0 }
0x2826   :  { %v8652_v16 = vpop.f32.mrb[20].mxu0 }
0x2827   :  { %v8657_v17 = vrot.slane %v8652_v16, 6  ;;  %v22233_v19 = vpop.f32.mrb[21].mxu0 }
0x2829   :  { %v8659_v23 = vadd.f32 %v26737_v22, %v8657_v17 }
0x282b   :  { %25436 = vtanh.f32 %v8659_v23  ;;  %v20016_v36 = vmul.f32 -1.442695, %v8659_v23 }
0x282d   :  { %25438 = vpow2.f32 %v20016_v36 }
0x2835   :  { %v25437_v28 = vpop.eup %25436 }
0x2836   :  { %8672 = vrot.lane.b32.xlu1 %v25437_v28, %s25835_s3 }
0x2837   :  { %v25439_v33 = vpop.eup %25438 }
0x2838   :  { %v8663_v38 = vadd.f32 1.0, %v25439_v33 }
0x283a   :  { %25440 = vrcp.f32 %v8663_v38 }
0x2844   :  { %v25441_v41 = vpop.eup %25440 }
0x2845   :  { %v8670_v52 = vmul.f32 %v25441_v41, %v8668_v51 }
0x28a8   :  { %v8673_v42 = vpop.permute.xlu1 %8672 }
0x28a9   :  { %v8675_v43 = vmul.f32 %v25441_v41, %v8673_v42  ;;  %v9760_v42 = vld [vmem:[#allocation12 + $0x8] sm:$0xff] }
0x28ab   :  { %8677 = vrot.lane.b32.xlu0 %v8675_v43, %s25822_s20 }
0x291d   :  { %v8678_v53 = vpop.permute.xlu0 %8677 }
0x291e   :  { %v26985_v56 = vadd.f32 %v8678_v53, %v8670_v52  ;;  %v9761_v52 = vld [vmem:[#allocation12 + $0x10] sm:$0xff]  ;;  %v9762_v53 = vld [vmem:[#allocation12 + $0x18] sm:$0xff] }
0x2920   :  { %25442 = vtanh.f32 %v26985_v56  ;;  %v9195_v45 = vrot.slane %v26985_v56, 6  ;;  %v10356_v56 = vand.u32 4294901760, %v9761_v52 }
0x292a   :  { %v25443_v58 = vpop.eup %25442 }
0x292b   :  { %8683 = vrot.lane.b32.xlu1 %v25443_v58, %s25835_s3  ;;  %v10359_v58 = vand.u32 4294901760, %v9762_v53 }
0x299d   :  { %v8684_v60 = vpop.permute.xlu1 %8683 }
0x299e   :  { %v26989_v24 = vmul.f32 %v25441_v41, %v8684_v60  ;;  %v9759_v41 = vld [vmem:[#allocation12] sm:$0xff]  ;;  %v27082_v60 = vpack.c.bf16 %v10359_v58, %v10356_v56 }
0x299f   :  { %v10350_v43 = vand.u32 4294901760, %v9759_v41 }
0x29a0   :  { %v8693_v35 = vrot.slane %v26989_v24, 2 }
0x29a2   :  { %8694 = vrot.lane.b32.xlu0 %v8693_v35, %s25822_s20  ;;  %v27085_v35 = vsub.f32 %v9759_v41, %v10350_v43 }
0x2a14   :  { %v8695_v37 = vpop.permute.xlu0 %8694 }
0x2a15   :  { %v8696_v39 = vsel %vm209_vm1, %v8695_v37, 0  ;;  %v10344_v37 = vrot.slane %v26594_v48, 6 }
0x2a16   :  { %v8767_v40 = vand.u32 4294901760, %v8696_v39 }
0x2a18   :  { %v8768_v10 = vsub.f32 %v8696_v39, %v8767_v40  ;;  %v27093_v39 = vsub.f32 %v9761_v52, %v10356_v56 }
0x2a1a   :  { %v8769_v55 = vand.u32 4294901760, %v8768_v10 }
0x2a1c   :  { %v8770_v61 = vsub.f32 %v8768_v10, %v8769_v55 }
0x2a1e   :  { %v8771_v63 = vand.u32 4294901760, %v8770_v61 }
0x2a20   :  { %22243 = vmatmul.mubr.f32.vlgmr.msra.gmra.mrb[50].mxu1 %v8771_v63 }
0x2a21   :  { %24228 = vmatpush3.bf16.msra.mxu1 %v26639_v54  ;;  %22253 = vmatprep.mubr.msk.f32.mxu1 %vm25832_vm0, %v25833_v1 }
0x2a22   :  { %24229 = vmatprep.subr.bf16.mxu1 %v25831_v0 }
0x2a25   :  { %24231 = vmatpush3.bf16.msra.mxu1 %v26647_v25 }
0x2a26   :  { %24232 = vmatprep.subr.bf16.mxu1 %v25831_v0 }
0x2a28   :  { %22254 = vmatmul.mubr.f32.vlgmr.msra.gmra.mrb[50].mxu1 %v8767_v40 }
0x2a29   :  { %24234 = vmatpush3.bf16.msra.mxu1 %v26645_v57  ;;  %22264 = vmatprep.mubr.msk.f32.mxu1 %vm25832_vm0, %v25833_v1 }
0x2a2a   :  { %24235 = vmatprep.subr.bf16.mxu1 %v25831_v0 }
0x2a2d   :  { %24237 = vmatpush3.bf16.msra.mxu1 %v26650_v30 }
0x2a2e   :  { %24238 = vmatprep.subr.bf16.mxu1 %v25831_v0 }
0x2a30   :  { %22265 = vmatmul.mubr.f32.vlgmr.msra.gmra.mrb[50].mxu1 %v8768_v10 }
0x2a31   :  { %24240 = vmatpush3.bf16.msra.mxu1 %v26626_v13  ;;  %22275 = vmatprep.mubr.msk.f32.mxu1 %vm25832_vm0, %v25833_v1 }
0x2a32   :  { %24241 = vmatprep.subr.bf16.mxu1 %v25831_v0 }
0x2a35   :  { %24243 = vmatpush3.bf16.msra.mxu1 %v26635_v18 }
0x2a36   :  { %24244 = vmatprep.subr.bf16.mxu1 %v25831_v0 }
0x2a38   :  { %22276 = vmatmul.mubr.f32.vlgmr.msra.gmra.mrb[50].mxu1 %v8769_v55 }
0x2a39   :  { %24246 = vmatpush3.bf16.msra.mxu1 %v26656_v31  ;;  %22286 = vmatprep.mubr.msk.f32.mxu1 %vm25832_vm0, %v25833_v1 }
0x2a3a   :  { %24247 = vmatprep.subr.bf16.mxu1 %v25831_v0 }
0x2a3d   :  { %24249 = vmatpush3.bf16.msra.mxu1 %v26661_v34 }
0x2a3e   :  { %24250 = vmatprep.subr.bf16.mxu1 %v25831_v0 }
0x2a40   :  { %22287 = vmatmul.mubr.f32.vlgmr.msra.gmra.mrb[50].mxu1 %v8767_v40 }
0x2a41   :  { %24252 = vmatpush3.bf16.msra.mxu1 %v26626_v13  ;;  %22297 = vmatprep.mubr.msk.f32.mxu1 %vm25832_vm0, %v25833_v1 }
0x2a42   :  { %24253 = vmatprep.subr.bf16.mxu1 %v25831_v0 }
0x2a45   :  { %24255 = vmatpush3.bf16.msra.mxu1 %v26635_v18 }
0x2a48   :  { %22298 = vmatmul.mubr.f32.vlgmr.msra.gmra.mrb[50].mxu1 %v8767_v40  ;;  %v27095_v40 = vsub.f32 %v9762_v53, %v10359_v58 }
0x2b1b   :  { %v9179_v2 = vpop.f32.mrb[50].mxu1 }
0x2b1c   :  { %v9184_v3 = vrot.slane %v9179_v2, 4  ;;  %v22299_v8 = vpop.f32.mrb[51].mxu1 }
0x2b1e   :  { %v9186_v4 = vadd.f32 %v26737_v22, %v9184_v3 }
0x2b20   :  { %25444 = vtanh.f32 %v9186_v4  ;;  %v20017_v7 = vmul.f32 -1.442695, %v9186_v4 }
0x2b22   :  { %25446 = vpow2.f32 %v20017_v7 }
0x2b2a   :  { %v25445_v5 = vpop.eup %25444 }
0x2b2b   :  { %9199 = vrot.lane.b32.xlu1 %v25445_v5, %s25835_s3 }
0x2b2c   :  { %v25447_v9 = vpop.eup %25446 }
0x2b2d   :  { %v9190_v46 = vadd.f32 1.0, %v25447_v9 }
0x2b2f   :  { %25448 = vrcp.f32 %v9190_v46 }
0x2b39   :  { %v25449_v20 = vpop.eup %25448 }
0x2b3a   :  { %v9197_v62 = vmul.f32 %v25449_v20, %v9195_v45 }
0x2b9d   :  { %v9200_v32 = vpop.permute.xlu1 %9199 }
0x2b9e   :  { %v9202_v49 = vmul.f32 %v25449_v20, %v9200_v32 }
0x2ba0   :  { %9204 = vrot.lane.b32.xlu0 %v9202_v49, %s25822_s20 }
0x2c12   :  { %v9205_v11 = vpop.permute.xlu0 %9204 }
0x2c13   :  { %v27027_v26 = vadd.f32 %v9205_v11, %v9197_v62  ;;  %v10445_v62 = vand.u32 4294901760, %v27093_v39  ;;  %v10452_v11 = vand.u32 4294901760, %v27095_v40 }
0x2c15   :  { %25450 = vtanh.f32 %v27027_v26 }
0x2c1f   :  { %v25451_v50 = vpop.eup %25450 }
0x2c20   :  { %9210 = vrot.lane.b32.xlu1 %v25451_v50, %s25835_s3 }
0x2c92   :  { %v9211_v59 = vpop.permute.xlu1 %9210 }
0x2c93   :  { %v27031_v29 = vmul.f32 %v25449_v20, %v9211_v59  ;;  %v9755_v59 = vld [vmem:[#allocation10] sm:$0xff] }
0x2c95   :  { %v9220_v12 = vrot.slane %v27031_v29, 4 }
0x2c97   :  { %9221 = vrot.lane.b32.xlu0 %v9220_v12, %s25822_s20  ;;  %v9757_v12 = vld [vmem:[#allocation10 + $0x10] sm:$0xff] }
0x2d09   :  { %v9222_v27 = vpop.permute.xlu0 %9221 }
0x2d0a   :  { %v9223_v14 = vsel %vm209_vm1, %v9222_v27, 0 }
0x2d0b   :  { %v9294_v16 = vand.u32 4294901760, %v9223_v14 }
0x2d0d   :  { %v9295_v17 = vsub.f32 %v9223_v14, %v9294_v16  ;;  %v9817_v14 = vand.u32 4294901760, %v9755_v59 }
0x2d0f   :  { %v9296_v19 = vand.u32 4294901760, %v9295_v17 }
0x2d11   :  { %v9297_v23 = vsub.f32 %v9295_v17, %v9296_v19 }
0x2d13   :  { %v9298_v28 = vand.u32 4294901760, %v9297_v23 }
0x2d15   :  { %22309 = vmatmul.mubr.f32.vlgmr.msra.gmra.mrb[22].mxu0 %v9298_v28 }
0x2d16   :  { %24264 = vmatpush3.bf16.msra.mxu0 %v26639_v54  ;;  %22319 = vmatprep.mubr.msk.f32.mxu0 %vm25832_vm0, %v25833_v1 }
0x2d17   :  { %24265 = vmatprep.subr.bf16.mxu0 %v25831_v0 }
0x2d1a   :  { %24267 = vmatpush3.bf16.msra.mxu0 %v26647_v25 }
0x2d1b   :  { %24268 = vmatprep.subr.bf16.mxu0 %v25831_v0 }
0x2d1d   :  { %22320 = vmatmul.mubr.f32.vlgmr.msra.gmra.mrb[22].mxu0 %v9294_v16 }
0x2d1e   :  { %24270 = vmatpush3.bf16.msra.mxu0 %v26645_v57  ;;  %22330 = vmatprep.mubr.msk.f32.mxu0 %vm25832_vm0, %v25833_v1 }
0x2d1f   :  { %24271 = vmatprep.subr.bf16.mxu0 %v25831_v0 }
0x2d22   :  { %24273 = vmatpush3.bf16.msra.mxu0 %v26650_v30 }
0x2d23   :  { %24274 = vmatprep.subr.bf16.mxu0 %v25831_v0 }
0x2d25   :  { %22331 = vmatmul.mubr.f32.vlgmr.msra.gmra.mrb[22].mxu0 %v9295_v17  ;;  %v9758_v17 = vld [vmem:[#allocation10 + $0x18] sm:$0xff] }
0x2d26   :  { %24276 = vmatpush3.bf16.msra.mxu0 %v26626_v13  ;;  %22341 = vmatprep.mubr.msk.f32.mxu0 %vm25832_vm0, %v25833_v1  ;;  %v9826_v23 = vand.u32 4294901760, %v9758_v17 }
0x2d27   :  { %24277 = vmatprep.subr.bf16.mxu0 %v25831_v0 }
0x2d2a   :  { %24279 = vmatpush3.bf16.msra.mxu0 %v26635_v18 }
0x2d2b   :  { %24280 = vmatprep.subr.bf16.mxu0 %v25831_v0 }
0x2d2d   :  { %22342 = vmatmul.mubr.f32.vlgmr.msra.gmra.mrb[22].mxu0 %v9296_v19  ;;  %v9823_v19 = vand.u32 4294901760, %v9757_v12 }
0x2d2e   :  { %24282 = vmatpush3.bf16.msra.mxu0 %v26656_v31  ;;  %22352 = vmatprep.mubr.msk.f32.mxu0 %vm25832_vm0, %v25833_v1 }
0x2d2f   :  { %24283 = vmatprep.subr.bf16.mxu0 %v25831_v0 }
0x2d32   :  { %24285 = vmatpush3.bf16.msra.mxu0 %v26661_v34 }
0x2d33   :  { %24286 = vmatprep.subr.bf16.mxu0 %v25831_v0 }
0x2d35   :  { %22353 = vmatmul.mubr.f32.vlgmr.msra.gmra.mrb[22].mxu0 %v9294_v16 }
0x2d36   :  { %24288 = vmatpush3.bf16.msra.mxu0 %v26626_v13  ;;  %22363 = vmatprep.mubr.msk.f32.mxu0 %vm25832_vm0, %v25833_v1 }
0x2d37   :  { %24289 = vmatprep.subr.bf16.mxu0 %v25831_v0 }
0x2d3a   :  { %24291 = vmatpush3.bf16.msra.mxu0 %v26635_v18 }
0x2d3b   :  { %24340 = vmatprep.subr.bf16.mxu0 %v25831_v0 }
0x2d3d   :  { %22364 = vmatmul.mubr.f32.vlgmr.msra.gmra.mrb[22].mxu0 %v9294_v16 }
0x2d3e   :  { %22440 = vmatprep.mubr.msk.f32.mxu0 %vm25832_vm0, %v25833_v1 }
0x2e10   :  { %v9706_v54 = vpop.f32.mrb[22].mxu0 }
0x2e11   :  { %v9711_v57 = vrot.slane %v9706_v54, 2  ;;  %v22365_v25 = vpop.f32.mrb[23].mxu0  ;;  %v9907_v54 = vsub.f32 %v9755_v59, %v9817_v14 }
0x2e13   :  { %v9713_v30 = vadd.f32 %v26737_v22, %v9711_v57  ;;  %v10353_v22 = vand.u32 4294901760, %v9760_v42 }
0x2e15   :  { %25452 = vtanh.f32 %v9713_v30  ;;  %v20018_v31 = vmul.f32 -1.442695, %v9713_v30  ;;  %v27076_v51 = vpack.c.bf16 %v10353_v22, %v10350_v43  ;;  %v27172_v30 = vpack.c.bf16 %v9826_v23, %v9823_v19 }
0x2e16   :  { %v9928_v43 = vsub.f32 %v9758_v17, %v9826_v23 }
0x2e17   :  { %25454 = vpow2.f32 %v20018_v31  ;;  %24342 = vmatpush3.bf16.msra.mxu0 %v27076_v51 }
0x2e18   :  { %24343 = vmatprep.subr.bf16.mxu0 %v25831_v0  ;;  %v9929_v58 = vand.u32 4294901760, %v9928_v43 }
0x2e1b   :  { %24345 = vmatpush3.bf16.msra.mxu0 %v27082_v60 }
0x2e1c   :  { %24352 = vmatprep.subr.bf16.mxu0 %v25831_v0 }
0x2e1f   :  { %v25453_v13 = vpop.eup %25452 }
0x2e20   :  { %9726 = vrot.lane.b32.xlu1 %v25453_v13, %s25835_s3  ;;  %v9908_v13 = vand.u32 4294901760, %v9907_v54 }
0x2e21   :  { %v25455_v34 = vpop.eup %25454 }
0x2e22   :  { %v9717_v36 = vadd.f32 1.0, %v25455_v34  ;;  %v9909_v34 = vsub.f32 %v9907_v54, %v9908_v13 }
0x2e24   :  { %25456 = vrcp.f32 %v9717_v36 }
0x2e2e   :  { %v27070_v18 = vpop.eup %25456 }
0x2e92   :  { %v9727_v33 = vpop.permute.xlu1 %9726 }
0x2e93   :  { %v9729_v38 = vmul.f32 %v27070_v18, %v9727_v33 }
0x2e95   :  { %9731 = vrot.lane.b32.xlu0 %v9729_v38, %s25822_s20  ;;  %v9910_v38 = vand.u32 4294901760, %v9909_v34 }
0x2e99   :  { %6586 = vrot.lane.b32.xlu0 %v26795_v47, %s25822_s20  ;;  %v27087_v47 = vsub.f32 %v9760_v42, %v10353_v22  ;;  %v9921_v42 = vsub.f32 %v9757_v12, %v9823_v19  ;;  %v9747_v22 = vld [vmem:[#allocation3] sm:$0x3] }
0x2e9b   :  { %v27123_v20 = vpack.c.bf16 %v27087_v47, %v27085_v35  ;;  %v10438_v49 = vand.u32 4294901760, %v27087_v47  ;;  %v9922_v56 = vand.u32 4294901760, %v9921_v42 }
0x2e9d   :  { %7640 = vrot.lane.b32.xlu0 %v26893_v15, %s25822_s20  ;;  %v9722_v15 = vrot.slane %v27027_v26, 6  ;;  %v27151_v26 = vpack.c.bf16 %v10452_v11, %v10445_v62  ;;  %v24328_v23 = vpack.c.bf16 %v9929_v58, %v9922_v56 }
0x2e9f   :  { %v9724_v10 = vmul.f32 %v27070_v18, %v9722_v15 }
0x2ea1   :  { %9215 = vrot.lane.b32.xlu0 %v27031_v29, %s25822_s20  ;;  %v9756_v29 = vld [vmem:[#allocation10 + $0x8] sm:$0xff] }
0x2ea2   :  { %v9820_v16 = vand.u32 4294901760, %v9756_v29 }
0x2ea4   :  { %v27170_v28 = vpack.c.bf16 %v9820_v16, %v9817_v14  ;;  %v9914_v57 = vsub.f32 %v9756_v29, %v9820_v16  ;;  %v24312_v14 = vpack.c.bf16 %v9928_v43, %v9921_v42 }
0x2ea5   :  { %10345 = vrot.lane.b32.xlu0 %v10344_v37, %s25822_s20 }
0x2ea6   :  { %24293 = vmatprep.subr.bf16.mxu1 %v27170_v28  ;;  %v9915_v31 = vand.u32 4294901760, %v9914_v57  ;;  %v24308_v59 = vpack.c.bf16 %v9914_v57, %v9907_v54 }
0x2ea7   :  { %24295 = vmatpush3.bf16.msra.mxu1 %v27170_v28 }
0x2ea8   :  { %24297 = vmatprep.subr.bf16.mxu1 %v27172_v30  ;;  %v9916_v36 = vsub.f32 %v9914_v57, %v9915_v31  ;;  %v24324_v19 = vpack.c.bf16 %v9915_v31, %v9908_v13 }
0x2eaa   :  { %v9917_v41 = vand.u32 4294901760, %v9916_v36 }
0x2eab   :  { %24299 = vmatpush3.bf16.msra.mxu1 %v27172_v30 }
0x2eac   :  { %v24300_v53 = vpack.c.bf16 %v9917_v41, %v9910_v38  ;;  %v9751_v41 = vld [vmem:[#allocation3 + $0x8] sm:$0x3] }
0x2eae   :  { %24301 = vmatprep.subr.bf16.mxu1 %v24300_v53 }
0x2f07   :  { %v9732_v55 = vpop.permute.xlu0 %9731 }
0x2f08   :  { %v27100_v61 = vadd.f32 %v9732_v55, %v9724_v10  ;;  %v9923_v55 = vsub.f32 %v9921_v42, %v9922_v56 }
0x2f0a   :  { %25458 = vtanh.f32 %v27100_v61 }
0x2f0b   :  { %v6587_v63 = vpop.permute.xlu0 %6586 }
0x2f0c   :  { %6590 = vst.msk [vmem:[#allocation3] sm:$0xc] %vm1788_vm3, %v6587_v63  ;;  %v9930_v63 = vsub.f32 %v9928_v43, %v9929_v58 }
0x2f0f   :  { %v7641_v2 = vpop.permute.xlu0 %7640 }
0x2f10   :  { %7644 = vst.msk [vmem:[#allocation3] sm:$0xc0] %vm2844_vm4, %v7641_v2 }
0x2f13   :  { %v9216_v48 = vpop.permute.xlu0 %9215  ;;  %v9748_v33 = vld [vmem:[#allocation3 + $0x2] sm:$0x3] }
0x2f14   :  { %v25459_v3 = vpop.eup %25458  ;;  %9219 = vst.msk [vmem:[#allocation3 + $0x8] sm:$0x30] %vm2316_vm5, %v9216_v48  ;;  %v9778_v52 = vcombine.low %v9747_v22, %v9748_v33 }
0x2f15   :  { %9737 = vrot.lane.b32.xlu1 %v25459_v3, %s25835_s3  ;;  %v9924_v3 = vand.u32 4294901760, %v9923_v55 }
0x2f16   :  { %v9786_v2 = vrot.slane %v9778_v52, %v26041_v21 }
0x2f17   :  { %v10346_v8 = vpop.permute.xlu0 %10345  ;;  %v9750_v15 = vld [vmem:[#allocation3 + $0x6] sm:$0x3] }
0x2f18   :  { %v10347_v4 = vsel %vm209_vm1, %v10346_v8, 0  ;;  %v9931_v8 = vand.u32 4294901760, %v9930_v63 }
0x2f19   :  { %v27108_v5 = vand.u32 4294901760, %v10347_v4  ;;  %7113 = vrot.lane.b32.xlu1 %v26844_v44, %s25822_s20  ;;  %v27128_v44 = vpack.c.bf16 %v27095_v40, %v27093_v39 }
0x2f1b   :  { %v27113_v7 = vsub.f32 %v10347_v4, %v27108_v5  ;;  %v9753_v57 = vld [vmem:[#allocation3 + $0xc] sm:$0x3] }
0x2f1d   :  { %v10420_v9 = vand.u32 4294901760, %v27113_v7  ;;  %8688 = vrot.lane.b32.xlu1 %v26989_v24, %s25822_s20  ;;  %v10431_v24 = vand.u32 4294901760, %v27085_v35 }
0x2f1f   :  { %v10421_v46 = vsub.f32 %v27113_v7, %v10420_v9  ;;  %v27140_v45 = vpack.c.bf16 %v10438_v49, %v10431_v24 }
0x2f21   :  { %v10422_v32 = vand.u32 4294901760, %v10421_v46  ;;  %v24304_v46 = vpack.c.bf16 %v9931_v8, %v9924_v3  ;;  %v10446_v8 = vsub.f32 %v27093_v39, %v10445_v62  ;;  %v20019_v39 = vld [vmem:[%s28206_s5] ss:$0 sm:$0xff] }
0x2f23   :  { %22441 = vmatmul.mubr.f32.vlgmr.msra.gmra.mrb[24].mxu0 %v10422_v32 }
0x2f24   :  { %24354 = vmatpush3.bf16.msra.mxu0 %v27123_v20  ;;  %22462 = vmatprep.mubr.msk.f32.mxu0 %vm25832_vm0, %v25833_v1 }
0x2f25   :  { %24355 = vmatprep.subr.bf16.mxu0 %v25831_v0 }
0x2f28   :  { %24357 = vmatpush3.bf16.msra.mxu0 %v27128_v44 }
0x2f29   :  { %24364 = vmatprep.subr.bf16.mxu0 %v25831_v0 }
0x2f2b   :  { %22463 = vmatmul.mubr.f32.vlgmr.msra.gmra.mrb[26].mxu0 %v27113_v7 }
0x2f2c   :  { %24366 = vmatpush3.bf16.msra.mxu0 %v27140_v45  ;;  %22484 = vmatprep.mubr.msk.f32.mxu0 %vm25832_vm0, %v25833_v1 }
0x2f2d   :  { %24367 = vmatprep.subr.bf16.mxu0 %v25831_v0 }
0x2f30   :  { %24369 = vmatpush3.bf16.msra.mxu0 %v27151_v26 }
0x2f31   :  { %24376 = vmatprep.subr.bf16.mxu0 %v25831_v0 }
0x2f33   :  { %22485 = vmatmul.mubr.f32.vlgmr.msra.gmra.mrb[28].mxu0 %v27108_v5 }
0x2f34   :  { %24378 = vmatpush3.bf16.msra.mxu0 %v27076_v51  ;;  %22506 = vmatprep.mubr.msk.f32.mxu0 %vm25832_vm0, %v25833_v1 }
0x2f35   :  { %24379 = vmatprep.subr.bf16.mxu0 %v25831_v0 }
0x2f38   :  { %24381 = vmatpush3.bf16.msra.mxu0 %v27082_v60 }
0x2f39   :  { %24382 = vmatprep.subr.bf16.mxu0 %v25831_v0 }
0x2f87   :  { %v9738_v50 = vpop.permute.xlu1 %9737 }
0x2f88   :  { %v27166_v27 = vmul.f32 %v27070_v18, %v9738_v50 }
0x2f8a   :  { %9742 = vrot.lane.b32.xlu1 %v27166_v27, %s25822_s20 }
0x2f8b   :  { %v7114_v25 = vpop.permute.xlu1 %7113 }
0x2f8c   :  { %7117 = vst.msk [vmem:[#allocation3] sm:$0x30] %vm2316_vm5, %v7114_v25 }
0x2f8f   :  { %v8689_v18 = vpop.permute.xlu1 %8688 }
0x2f90   :  { %8692 = vst.msk [vmem:[#allocation3 + $0x8] sm:$0xc] %vm1788_vm3, %v8689_v18 }
0x2f93   :  { %v9749_v37 = vld [vmem:[#allocation3 + $0x4] sm:$0x3] }
0x2f94   :  { %v9779_v10 = vcombine.low %v9749_v37, %v9750_v15 }
0x2f96   :  { %v9793_v48 = vrot.slane %v9779_v10, %v26041_v21 }
0x2f97   :  { %v9752_v38 = vld [vmem:[#allocation3 + $0xa] sm:$0x3] }
0x2f98   :  { %v9794_v4 = vcombine.low %v9786_v2, %v9793_v48  ;;  %v9795_v54 = vcombine.low %v9751_v41, %v9752_v38  ;;  %v10439_v2 = vsub.f32 %v27087_v47, %v10438_v49 }
0x2f9a   :  { %v9812_v32 = vsel %vm209_vm1, %v9794_v4, 0  ;;  %v9803_v13 = vrot.slane %v9795_v54, %v26041_v21  ;;  %v10440_v3 = vand.u32 4294901760, %v10439_v2 }
0x2f9b   :  { %v9885_v50 = vand.u32 4294901760, %v9812_v32 }
0x2f9d   :  { %v9886_v29 = vsub.f32 %v9812_v32, %v9885_v50 }
0x2f9f   :  { %v9887_v12 = vand.u32 4294901760, %v9886_v29 }
0x2fa1   :  { %v9888_v16 = vsub.f32 %v9886_v29, %v9887_v12 }
0x2fa3   :  { %v9889_v17 = vand.u32 4294901760, %v9888_v16 }
0x2fa5   :  { %22374 = vmatprep.mubr.f32.mxu1 %v9889_v17 }
0x2ff6   :  { %v27183_v25 = vpop.f32.mrb[24].mxu0 }
0x2ff7   :  { %v22442_v34 = vpop.f32.mrb[25].mxu0 }
0x2ffc   :  { %v9743_v36 = vpop.permute.xlu1 %9742 }
0x2ffd   :  { %9746 = vst.msk [vmem:[#allocation3 + $0x8] sm:$0xc0] %vm2844_vm4, %v9743_v36 }
0x2ffe   :  { %v27186_v18 = vpop.f32.mrb[26].mxu0 }
0x2fff   :  { %v22464_v33 = vpop.f32.mrb[27].mxu0 }
0x3000   :  { %v10843_v33 = vrot.slane %v26575_v6, 6 }
0x3004   :  { %v9754_v22 = vld [vmem:[#allocation3 + $0xe] sm:$0x3] }
0x3005   :  { %v9796_v42 = vcombine.low %v9753_v57, %v9754_v22 }
0x3006   :  { %v27188_v43 = vpop.f32.mrb[28].mxu0 }
0x3007   :  { %v22486_v52 = vpop.f32.mrb[29].mxu0  ;;  %v9810_v31 = vrot.slane %v9796_v42, %v26041_v21 }
0x3009   :  { %v9811_v56 = vcombine.low %v9803_v13, %v9810_v31 }
0x300b   :  { %v9814_v58 = vsel %vm209_vm1, %v9811_v56, 0 }
0x300c   :  { %v9895_v37 = vand.u32 4294901760, %v9814_v58 }
0x300e   :  { %v9896_v15 = vsub.f32 %v9814_v58, %v9895_v37 }
0x3010   :  { %v9897_v10 = vand.u32 4294901760, %v9896_v15 }
0x3012   :  { %v9898_v55 = vsub.f32 %v9896_v15, %v9897_v10 }
0x3014   :  { %v9899_v63 = vand.u32 4294901760, %v9898_v55 }
0x3016   :  { %22375 = vmatmul.mubr.f32.vlgmr.msra.gmra.mrb[52].mxu1 %v9899_v63 }
0x3017   :  { %24303 = vmatpush3.bf16.msra.mxu1 %v24300_v53  ;;  %22385 = vmatprep.mubr.f32.mxu1 %v9885_v50  ;;  %v10432_v53 = vsub.f32 %v27085_v35, %v10431_v24  ;;  %v10453_v35 = vsub.f32 %v27095_v40, %v10452_v11  ;;  %v10447_v24 = vand.u32 4294901760, %v10446_v8 }
0x3018   :  { %24305 = vmatprep.subr.bf16.mxu1 %v24304_v46 }
0x3019   :  { %v10433_v48 = vand.u32 4294901760, %v10432_v53  ;;  %v10454_v49 = vand.u32 4294901760, %v10453_v35 }
0x301b   :  { %24307 = vmatpush3.bf16.msra.mxu1 %v24304_v46  ;;  %v27213_v47 = vpack.c.bf16 %v10440_v3, %v10433_v48 }
0x301c   :  { %24309 = vmatprep.subr.bf16.mxu1 %v24308_v59 }
0x301e   :  { %22386 = vmatmul.mubr.f32.vlgmr.msra.gmra.mrb[52].mxu1 %v9895_v37 }
0x301f   :  { %24311 = vmatpush3.bf16.msra.mxu1 %v24308_v59  ;;  %22396 = vmatprep.mubr.f32.mxu1 %v9886_v29 }
0x3020   :  { %24313 = vmatprep.subr.bf16.mxu1 %v24312_v14 }
0x3023   :  { %24315 = vmatpush3.bf16.msra.mxu1 %v24312_v14 }
0x3024   :  { %24317 = vmatprep.subr.bf16.mxu1 %v27170_v28 }
0x3026   :  { %22397 = vmatmul.mubr.f32.vlgmr.msra.gmra.mrb[52].mxu1 %v9896_v15 }
0x3027   :  { %24319 = vmatpush3.bf16.msra.mxu1 %v27170_v28  ;;  %22407 = vmatprep.mubr.f32.mxu1 %v9887_v12 }
0x3028   :  { %24321 = vmatprep.subr.bf16.mxu1 %v27172_v30 }
0x302b   :  { %24323 = vmatpush3.bf16.msra.mxu1 %v27172_v30 }
0x302c   :  { %24325 = vmatprep.subr.bf16.mxu1 %v24324_v19 }
0x302e   :  { %22408 = vmatmul.mubr.f32.vlgmr.msra.gmra.mrb[52].mxu1 %v9897_v10 }
0x302f   :  { %24327 = vmatpush3.bf16.msra.mxu1 %v24324_v19  ;;  %22418 = vmatprep.mubr.f32.mxu1 %v9885_v50 }
0x3030   :  { %24329 = vmatprep.subr.bf16.mxu1 %v24328_v23 }
0x3033   :  { %24331 = vmatpush3.bf16.msra.mxu1 %v24328_v23 }
0x3034   :  { %24333 = vmatprep.subr.bf16.mxu1 %v27170_v28 }
0x3036   :  { %22419 = vmatmul.mubr.f32.vlgmr.msra.gmra.mrb[52].mxu1 %v9895_v37 }
0x3037   :  { %24335 = vmatpush3.bf16.msra.mxu1 %v27170_v28  ;;  %22429 = vmatprep.mubr.f32.mxu1 %v9885_v50  ;;  %v27217_v28 = vpack.c.bf16 %v10454_v49, %v10447_v24 }
0x3038   :  { %24337 = vmatprep.subr.bf16.mxu1 %v27172_v30 }
0x303b   :  { %24339 = vmatpush3.bf16.msra.mxu1 %v27172_v30 }
0x303c   :  { %24346 = vmatprep.subr.bf16.mxu1 %v25831_v0 }
0x303e   :  { %22430 = vmatmul.mubr.f32.vlgmr.msra.gmra.mrb[52].mxu1 %v9895_v37 }
0x303f   :  { %24348 = vmatpush3.bf16.msra.mxu1 %v27213_v47  ;;  %22451 = vmatprep.mubr.msk.f32.mxu1 %vm25832_vm0, %v25833_v1 }
0x3040   :  { %24349 = vmatprep.subr.bf16.mxu1 %v25831_v0 }
0x3043   :  { %24351 = vmatpush3.bf16.msra.mxu1 %v27217_v28 }
0x3044   :  { %24358 = vmatprep.subr.bf16.mxu1 %v25831_v0 }
0x3046   :  { %22452 = vmatmul.mubr.f32.vlgmr.msra.gmra.mrb[54].mxu1 %v27108_v5 }
0x3047   :  { %24360 = vmatpush3.bf16.msra.mxu1 %v27076_v51  ;;  %22473 = vmatprep.mubr.msk.f32.mxu1 %vm25832_vm0, %v25833_v1 }
0x3048   :  { %24361 = vmatprep.subr.bf16.mxu1 %v25831_v0 }
0x304b   :  { %24363 = vmatpush3.bf16.msra.mxu1 %v27082_v60 }
0x304c   :  { %24370 = vmatprep.subr.bf16.mxu1 %v25831_v0 }
0x304e   :  { %22474 = vmatmul.mubr.f32.vlgmr.msra.gmra.mrb[56].mxu1 %v10420_v9 }
0x304f   :  { %24372 = vmatpush3.bf16.msra.mxu1 %v27076_v51  ;;  %22495 = vmatprep.mubr.msk.f32.mxu1 %vm25832_vm0, %v25833_v1 }
0x3050   :  { %24373 = vmatprep.subr.bf16.mxu1 %v25831_v0 }
0x3053   :  { %24375 = vmatpush3.bf16.msra.mxu1 %v27082_v60 }
0x3054   :  { %24412 = vmatprep.subr.bf16.mxu1 %v25831_v0 }
0x3056   :  { %22496 = vmatmul.mubr.f32.vlgmr.msra.gmra.mrb[58].mxu1 %v27108_v5 }
0x3057   :  { %24414 = vmatpush3.bf16.msra.mxu1 %v27076_v51  ;;  %22572 = vmatprep.mubr.msk.f32.mxu1 %vm25832_vm0, %v25833_v1 }
0x3058   :  { %24415 = vmatprep.subr.bf16.mxu1 %v25831_v0 }
0x305b   :  { %24417 = vmatpush3.bf16.msra.mxu1 %v27082_v60 }
0x305c   :  { %24418 = vmatprep.subr.bf16.mxu1 %v25831_v0 }
0x3111   :  { %v22431_v40 = vpop.f32.mrb[52].mxu1 }
0x3112   :  { %v27249_v7 = vadd.f32 %v22431_v40, %v20019_v39  ;;  %v10334_v9 = vpop.f32.mrb[53].mxu1 }
0x3113   :  { %v27254_v29 = vadd.f32 %v20019_v39, %v10334_v9 }
0x3119   :  { %v10515_v5 = vpop.f32.mrb[54].mxu1 }
0x311a   :  { %v10516_v62 = vadd.f32 %v10515_v5, %v27183_v25  ;;  %v22453_v11 = vpop.f32.mrb[55].mxu1 }
0x311c   :  { %v10596_v30 = vadd.f32 %v27186_v18, %v10516_v62 }
0x3121   :  { %v10672_v4 = vpop.f32.mrb[56].mxu1 }
0x3122   :  { %v10673_v46 = vadd.f32 %v10672_v4, %v10596_v30  ;;  %v22475_v32 = vpop.f32.mrb[57].mxu1 }
0x3124   :  { %v10756_v50 = vadd.f32 %v27188_v43, %v10673_v46 }
0x3129   :  { %v10830_v59 = vpop.f32.mrb[58].mxu1 }
0x312a   :  { %v10831_v12 = vadd.f32 %v10830_v59, %v10756_v50  ;;  %v22497_v14 = vpop.f32.mrb[59].mxu1 }
0x312c   :  { %v10834_v16 = vadd.f32 %v27254_v29, %v10831_v12 }
0x312e   :  { %25460 = vtanh.f32 %v10834_v16  ;;  %v20020_v19 = vmul.f32 -1.442695, %v10834_v16 }
0x3130   :  { %25462 = vpow2.f32 %v20020_v19 }
0x3138   :  { %v25461_v17 = vpop.eup %25460 }
0x3139   :  { %10847 = vrot.lane.b32.xlu1 %v25461_v17, %s25835_s3 }
0x313a   :  { %v25463_v23 = vpop.eup %25462 }
0x313b   :  { %v10838_v25 = vadd.f32 1.0, %v25463_v23 }
0x313d   :  { %25464 = vrcp.f32 %v10838_v25 }
0x3147   :  { %v25465_v34 = vpop.eup %25464 }
0x3148   :  { %v10845_v38 = vmul.f32 %v25465_v34, %v10843_v33 }
0x31ab   :  { %v10848_v36 = vpop.permute.xlu1 %10847 }
0x31ac   :  { %v10850_v18 = vmul.f32 %v25465_v34, %v10848_v36 }
0x31ae   :  { %10852 = vrot.lane.b32.xlu0 %v10850_v18, %s25822_s20 }
0x3220   :  { %v10853_v41 = vpop.permute.xlu0 %10852 }
0x3221   :  { %v27260_v54 = vadd.f32 %v10853_v41, %v10845_v38 }
0x3223   :  { %25466 = vtanh.f32 %v27260_v54  ;;  %v11366_v24 = vrot.slane %v27260_v54, 6 }
0x322d   :  { %v25467_v57 = vpop.eup %25466 }
0x322e   :  { %10858 = vrot.lane.b32.xlu1 %v25467_v57, %s25835_s3 }
0x32a0   :  { %v10859_v22 = vpop.permute.xlu1 %10858 }
0x32a1   :  { %v10861_v42 = vmul.f32 %v25465_v34, %v10859_v22 }
0x32a3   :  { %10863 = vrot.lane.b32.xlu0 %v10861_v42, %s25822_s20 }
0x3315   :  { %v10864_v43 = vpop.permute.xlu0 %10863 }
0x3316   :  { %10866 = vst.msk [vmem:[#allocation2] sm:$0x3] %vm1263_vm2, %v10864_v43  ;;  %v10867_v52 = vsel %vm209_vm1, %v10864_v43, 0 }
0x3317   :  { %v10938_v13 = vand.u32 4294901760, %v10867_v52 }
0x3319   :  { %v10939_v6 = vsub.f32 %v10867_v52, %v10938_v13 }
0x331b   :  { %v10940_v31 = vand.u32 4294901760, %v10939_v6 }
0x331d   :  { %v10941_v56 = vsub.f32 %v10939_v6, %v10940_v31 }
0x331f   :  { %v10942_v58 = vand.u32 4294901760, %v10941_v56 }
0x3321   :  { %22507 = vmatmul.mubr.f32.vlgmr.msra.gmra.mrb[30].mxu0 %v10942_v58 }
0x3322   :  { %24384 = vmatpush3.bf16.msra.mxu0 %v27213_v47  ;;  %22517 = vmatprep.mubr.msk.f32.mxu0 %vm25832_vm0, %v25833_v1 }
0x3323   :  { %24385 = vmatprep.subr.bf16.mxu0 %v25831_v0 }
0x3326   :  { %24387 = vmatpush3.bf16.msra.mxu0 %v27217_v28 }
0x3327   :  { %24388 = vmatprep.subr.bf16.mxu0 %v25831_v0 }
0x3329   :  { %22518 = vmatmul.mubr.f32.vlgmr.msra.gmra.mrb[30].mxu0 %v10938_v13 }
0x332a   :  { %24390 = vmatpush3.bf16.msra.mxu0 %v27123_v20  ;;  %22528 = vmatprep.mubr.msk.f32.mxu0 %vm25832_vm0, %v25833_v1 }
0x332b   :  { %24391 = vmatprep.subr.bf16.mxu0 %v25831_v0 }
0x332e   :  { %24393 = vmatpush3.bf16.msra.mxu0 %v27128_v44 }
0x332f   :  { %24394 = vmatprep.subr.bf16.mxu0 %v25831_v0 }
0x3331   :  { %22529 = vmatmul.mubr.f32.vlgmr.msra.gmra.mrb[30].mxu0 %v10939_v6 }
0x3332   :  { %24396 = vmatpush3.bf16.msra.mxu0 %v27076_v51  ;;  %22539 = vmatprep.mubr.msk.f32.mxu0 %vm25832_vm0, %v25833_v1 }
0x3333   :  { %24397 = vmatprep.subr.bf16.mxu0 %v25831_v0 }
0x3336   :  { %24399 = vmatpush3.bf16.msra.mxu0 %v27082_v60 }
0x3337   :  { %24400 = vmatprep.subr.bf16.mxu0 %v25831_v0 }
0x3339   :  { %22540 = vmatmul.mubr.f32.vlgmr.msra.gmra.mrb[30].mxu0 %v10940_v31 }
0x333a   :  { %24402 = vmatpush3.bf16.msra.mxu0 %v27140_v45  ;;  %22550 = vmatprep.mubr.msk.f32.mxu0 %vm25832_vm0, %v25833_v1 }
0x333b   :  { %24403 = vmatprep.subr.bf16.mxu0 %v25831_v0 }
0x333e   :  { %24405 = vmatpush3.bf16.msra.mxu0 %v27151_v26 }
0x333f   :  { %24406 = vmatprep.subr.bf16.mxu0 %v25831_v0 }
0x3341   :  { %22551 = vmatmul.mubr.f32.vlgmr.msra.gmra.mrb[30].mxu0 %v10938_v13 }
0x3342   :  { %24408 = vmatpush3.bf16.msra.mxu0 %v27076_v51  ;;  %22561 = vmatprep.mubr.msk.f32.mxu0 %vm25832_vm0, %v25833_v1 }
0x3343   :  { %24409 = vmatprep.subr.bf16.mxu0 %v25831_v0 }
0x3346   :  { %24411 = vmatpush3.bf16.msra.mxu0 %v27082_v60 }
0x3347   :  { %24448 = vmatprep.subr.bf16.mxu0 %v25831_v0 }
0x3349   :  { %22562 = vmatmul.mubr.f32.vlgmr.msra.gmra.mrb[30].mxu0 %v10938_v13 }
0x334a   :  { %24450 = vmatpush3.bf16.msra.mxu0 %v27076_v51  ;;  %22638 = vmatprep.mubr.msk.f32.mxu0 %vm25832_vm0, %v25833_v1 }
0x334b   :  { %24451 = vmatprep.subr.bf16.mxu0 %v25831_v0 }
0x334e   :  { %24453 = vmatpush3.bf16.msra.mxu0 %v27082_v60 }
0x334f   :  { %24454 = vmatprep.subr.bf16.mxu0 %v25831_v0 }
0x341c   :  { %v11350_v37 = vpop.f32.mrb[30].mxu0 }
0x341d   :  { %v11355_v15 = vrot.slane %v11350_v37, 6  ;;  %v22563_v10 = vpop.f32.mrb[31].mxu0 }
0x341f   :  { %v11357_v55 = vadd.f32 %v27254_v29, %v11355_v15 }
0x3421   :  { %25468 = vtanh.f32 %v11357_v55  ;;  %v20021_v53 = vmul.f32 -1.442695, %v11357_v55 }
0x3423   :  { %25470 = vpow2.f32 %v20021_v53 }
0x342b   :  { %v25469_v63 = vpop.eup %25468 }
0x342c   :  { %11370 = vrot.lane.b32.xlu1 %v25469_v63, %s25835_s3 }
0x342d   :  { %v25471_v2 = vpop.eup %25470 }
0x342e   :  { %v11361_v48 = vadd.f32 1.0, %v25471_v2 }
0x3430   :  { %25472 = vrcp.f32 %v11361_v48 }
0x343a   :  { %v25473_v3 = vpop.eup %25472 }
0x343b   :  { %v11368_v49 = vmul.f32 %v25473_v3, %v11366_v24 }
0x349e   :  { %v11371_v8 = vpop.permute.xlu1 %11370 }
0x349f   :  { %v11373_v35 = vmul.f32 %v25473_v3, %v11371_v8 }
0x34a1   :  { %11375 = vrot.lane.b32.xlu0 %v11373_v35, %s25822_s20 }
0x3513   :  { %v11376_v39 = vpop.permute.xlu0 %11375 }
0x3514   :  { %v27307_v40 = vadd.f32 %v11376_v39, %v11368_v49 }
0x3516   :  { %25474 = vtanh.f32 %v27307_v40  ;;  %v11892_v41 = vrot.slane %v27307_v40, 6 }
0x3520   :  { %v25475_v9 = vpop.eup %25474 }
0x3521   :  { %11381 = vrot.lane.b32.xlu1 %v25475_v9, %s25835_s3 }
0x3593   :  { %v11382_v5 = vpop.permute.xlu1 %11381 }
0x3594   :  { %v27311_v62 = vmul.f32 %v25473_v3, %v11382_v5 }
0x3596   :  { %v11390_v11 = vrot.slane %v27311_v62, 2 }
0x3598   :  { %11391 = vrot.lane.b32.xlu0 %v11390_v11, %s25822_s20 }
0x360a   :  { %v11392_v30 = vpop.permute.xlu0 %11391 }
0x360b   :  { %v11393_v4 = vsel %vm209_vm1, %v11392_v30, 0 }
0x360c   :  { %v11464_v46 = vand.u32 4294901760, %v11393_v4 }
0x360e   :  { %v11465_v32 = vsub.f32 %v11393_v4, %v11464_v46 }
0x3610   :  { %v11466_v50 = vand.u32 4294901760, %v11465_v32 }
0x3612   :  { %v11467_v59 = vsub.f32 %v11465_v32, %v11466_v50 }
0x3614   :  { %v11468_v12 = vand.u32 4294901760, %v11467_v59 }
0x3616   :  { %22573 = vmatmul.mubr.f32.vlgmr.msra.gmra.mrb[60].mxu1 %v11468_v12 }
0x3617   :  { %24420 = vmatpush3.bf16.msra.mxu1 %v27213_v47  ;;  %22583 = vmatprep.mubr.msk.f32.mxu1 %vm25832_vm0, %v25833_v1 }
0x3618   :  { %24421 = vmatprep.subr.bf16.mxu1 %v25831_v0 }
0x361b   :  { %24423 = vmatpush3.bf16.msra.mxu1 %v27217_v28 }
0x361c   :  { %24424 = vmatprep.subr.bf16.mxu1 %v25831_v0 }
0x361e   :  { %22584 = vmatmul.mubr.f32.vlgmr.msra.gmra.mrb[60].mxu1 %v11464_v46 }
0x361f   :  { %24426 = vmatpush3.bf16.msra.mxu1 %v27123_v20  ;;  %22594 = vmatprep.mubr.msk.f32.mxu1 %vm25832_vm0, %v25833_v1 }
0x3620   :  { %24427 = vmatprep.subr.bf16.mxu1 %v25831_v0 }
0x3623   :  { %24429 = vmatpush3.bf16.msra.mxu1 %v27128_v44 }
0x3624   :  { %24430 = vmatprep.subr.bf16.mxu1 %v25831_v0 }
0x3626   :  { %22595 = vmatmul.mubr.f32.vlgmr.msra.gmra.mrb[60].mxu1 %v11465_v32 }
0x3627   :  { %24432 = vmatpush3.bf16.msra.mxu1 %v27076_v51  ;;  %22605 = vmatprep.mubr.msk.f32.mxu1 %vm25832_vm0, %v25833_v1 }
0x3628   :  { %24433 = vmatprep.subr.bf16.mxu1 %v25831_v0 }
0x362b   :  { %24435 = vmatpush3.bf16.msra.mxu1 %v27082_v60 }
0x362c   :  { %24436 = vmatprep.subr.bf16.mxu1 %v25831_v0 }
0x362e   :  { %22606 = vmatmul.mubr.f32.vlgmr.msra.gmra.mrb[60].mxu1 %v11466_v50 }
0x362f   :  { %24438 = vmatpush3.bf16.msra.mxu1 %v27140_v45  ;;  %22616 = vmatprep.mubr.msk.f32.mxu1 %vm25832_vm0, %v25833_v1 }
0x3630   :  { %24439 = vmatprep.subr.bf16.mxu1 %v25831_v0 }
0x3633   :  { %24441 = vmatpush3.bf16.msra.mxu1 %v27151_v26 }
0x3634   :  { %24442 = vmatprep.subr.bf16.mxu1 %v25831_v0 }
0x3636   :  { %22617 = vmatmul.mubr.f32.vlgmr.msra.gmra.mrb[60].mxu1 %v11464_v46 }
0x3637   :  { %24444 = vmatpush3.bf16.msra.mxu1 %v27076_v51  ;;  %22627 = vmatprep.mubr.msk.f32.mxu1 %vm25832_vm0, %v25833_v1 }
0x3638   :  { %24445 = vmatprep.subr.bf16.mxu1 %v25831_v0 }
0x363b   :  { %24447 = vmatpush3.bf16.msra.mxu1 %v27082_v60 }
0x363c   :  { %24484 = vmatprep.subr.bf16.mxu1 %v25831_v0 }
0x363e   :  { %22628 = vmatmul.mubr.f32.vlgmr.msra.gmra.mrb[60].mxu1 %v11464_v46 }
0x363f   :  { %24486 = vmatpush3.bf16.msra.mxu1 %v27076_v51  ;;  %22704 = vmatprep.mubr.msk.f32.mxu1 %vm25832_vm0, %v25833_v1 }
0x3640   :  { %24487 = vmatprep.subr.bf16.mxu1 %v25831_v0 }
0x3643   :  { %24489 = vmatpush3.bf16.msra.mxu1 %v27082_v60 }
0x3644   :  { %24490 = vmatprep.subr.bf16.mxu1 %v25831_v0 }
0x3711   :  { %v11876_v14 = vpop.f32.mrb[60].mxu1 }
0x3712   :  { %v11881_v16 = vrot.slane %v11876_v14, 4  ;;  %v22629_v17 = vpop.f32.mrb[61].mxu1 }
0x3714   :  { %v11883_v19 = vadd.f32 %v27254_v29, %v11881_v16 }
0x3716   :  { %25476 = vtanh.f32 %v11883_v19  ;;  %v20022_v25 = vmul.f32 -1.442695, %v11883_v19 }
0x3718   :  { %25478 = vpow2.f32 %v20022_v25 }
0x3720   :  { %v25477_v23 = vpop.eup %25476 }
0x3721   :  { %11896 = vrot.lane.b32.xlu1 %v25477_v23, %s25835_s3 }
0x3722   :  { %v25479_v34 = vpop.eup %25478 }
0x3723   :  { %v11887_v36 = vadd.f32 1.0, %v25479_v34 }
0x3725   :  { %25480 = vrcp.f32 %v11887_v36 }
0x372f   :  { %v25481_v18 = vpop.eup %25480 }
0x3730   :  { %v11894_v54 = vmul.f32 %v25481_v18, %v11892_v41 }
0x3793   :  { %v11897_v33 = vpop.permute.xlu1 %11896 }
0x3794   :  { %v11899_v38 = vmul.f32 %v25481_v18, %v11897_v33 }
0x3796   :  { %11901 = vrot.lane.b32.xlu0 %v11899_v38, %s25822_s20 }
0x3808   :  { %v11902_v57 = vpop.permute.xlu0 %11901 }
0x3809   :  { %v27356_v22 = vadd.f32 %v11902_v57, %v11894_v54 }
0x380b   :  { %25482 = vtanh.f32 %v27356_v22  ;;  %v12418_v40 = vrot.slane %v27356_v22, 6 }
0x3815   :  { %v25483_v42 = vpop.eup %25482 }
0x3816   :  { %11907 = vrot.lane.b32.xlu1 %v25483_v42, %s25835_s3 }
0x3888   :  { %v11908_v43 = vpop.permute.xlu1 %11907 }
0x3889   :  { %v27360_v52 = vmul.f32 %v25481_v18, %v11908_v43 }
0x388b   :  { %v11916_v13 = vrot.slane %v27360_v52, 4 }
0x388d   :  { %11917 = vrot.lane.b32.xlu0 %v11916_v13, %s25822_s20 }
0x38ff   :  { %v11918_v6 = vpop.permute.xlu0 %11917 }
0x3900   :  { %v11919_v31 = vsel %vm209_vm1, %v11918_v6, 0 }
0x3901   :  { %v11990_v56 = vand.u32 4294901760, %v11919_v31 }
0x3903   :  { %v11991_v58 = vsub.f32 %v11919_v31, %v11990_v56 }
0x3905   :  { %v11992_v37 = vand.u32 4294901760, %v11991_v58 }
0x3907   :  { %v11993_v15 = vsub.f32 %v11991_v58, %v11992_v37 }
0x3909   :  { %v11994_v10 = vand.u32 4294901760, %v11993_v15 }
0x390b   :  { %22639 = vmatmul.mubr.f32.vlgmr.msra.gmra.mrb[32].mxu0 %v11994_v10 }
0x390c   :  { %24456 = vmatpush3.bf16.msra.mxu0 %v27213_v47  ;;  %22649 = vmatprep.mubr.msk.f32.mxu0 %vm25832_vm0, %v25833_v1 }
0x390d   :  { %24457 = vmatprep.subr.bf16.mxu0 %v25831_v0 }
0x3910   :  { %24459 = vmatpush3.bf16.msra.mxu0 %v27217_v28 }
0x3911   :  { %24460 = vmatprep.subr.bf16.mxu0 %v25831_v0 }
0x3913   :  { %22650 = vmatmul.mubr.f32.vlgmr.msra.gmra.mrb[32].mxu0 %v11990_v56 }
0x3914   :  { %24462 = vmatpush3.bf16.msra.mxu0 %v27123_v20  ;;  %22660 = vmatprep.mubr.msk.f32.mxu0 %vm25832_vm0, %v25833_v1 }
0x3915   :  { %24463 = vmatprep.subr.bf16.mxu0 %v25831_v0 }
0x3918   :  { %24465 = vmatpush3.bf16.msra.mxu0 %v27128_v44 }
0x3919   :  { %24466 = vmatprep.subr.bf16.mxu0 %v25831_v0 }
0x391b   :  { %22661 = vmatmul.mubr.f32.vlgmr.msra.gmra.mrb[32].mxu0 %v11991_v58 }
0x391c   :  { %24468 = vmatpush3.bf16.msra.mxu0 %v27076_v51  ;;  %22671 = vmatprep.mubr.msk.f32.mxu0 %vm25832_vm0, %v25833_v1 }
0x391d   :  { %24469 = vmatprep.subr.bf16.mxu0 %v25831_v0 }
0x3920   :  { %24471 = vmatpush3.bf16.msra.mxu0 %v27082_v60 }
0x3921   :  { %24472 = vmatprep.subr.bf16.mxu0 %v25831_v0 }
0x3923   :  { %22672 = vmatmul.mubr.f32.vlgmr.msra.gmra.mrb[32].mxu0 %v11992_v37 }
0x3924   :  { %24474 = vmatpush3.bf16.msra.mxu0 %v27140_v45  ;;  %22682 = vmatprep.mubr.msk.f32.mxu0 %vm25832_vm0, %v25833_v1 }
0x3925   :  { %24475 = vmatprep.subr.bf16.mxu0 %v25831_v0 }
0x3928   :  { %24477 = vmatpush3.bf16.msra.mxu0 %v27151_v26 }
0x3929   :  { %24478 = vmatprep.subr.bf16.mxu0 %v25831_v0 }
0x392b   :  { %22683 = vmatmul.mubr.f32.vlgmr.msra.gmra.mrb[32].mxu0 %v11990_v56 }
0x392c   :  { %24480 = vmatpush3.bf16.msra.mxu0 %v27076_v51  ;;  %22693 = vmatprep.mubr.msk.f32.mxu0 %vm25832_vm0, %v25833_v1 }
0x392d   :  { %24481 = vmatprep.subr.bf16.mxu0 %v25831_v0 }
0x3930   :  { %24483 = vmatpush3.bf16.msra.mxu0 %v27082_v60 }
0x3931   :  { %24520 = vmatprep.subr.bf16.mxu0 %v25831_v0 }
0x3933   :  { %22694 = vmatmul.mubr.f32.vlgmr.msra.gmra.mrb[32].mxu0 %v11990_v56 }
0x3934   :  { %24522 = vmatpush3.bf16.msra.mxu0 %v27076_v51  ;;  %22770 = vmatprep.mubr.msk.f32.mxu0 %vm25832_vm0, %v25833_v1 }
0x3935   :  { %24523 = vmatprep.subr.bf16.mxu0 %v25831_v0 }
0x3938   :  { %24525 = vmatpush3.bf16.msra.mxu0 %v27082_v60 }
0x3939   :  { %24526 = vmatprep.subr.bf16.mxu0 %v25831_v0 }
0x3a06   :  { %v12402_v55 = vpop.f32.mrb[32].mxu0 }
0x3a07   :  { %v12407_v63 = vrot.slane %v12402_v55, 2  ;;  %v22695_v53 = vpop.f32.mrb[33].mxu0 }
0x3a09   :  { %v12409_v2 = vadd.f32 %v27254_v29, %v12407_v63 }
0x3a0b   :  { %25484 = vtanh.f32 %v12409_v2  ;;  %v20023_v3 = vmul.f32 -1.442695, %v12409_v2 }
0x3a0d   :  { %25486 = vpow2.f32 %v20023_v3 }
0x3a15   :  { %v25485_v48 = vpop.eup %25484 }
0x3a16   :  { %12422 = vrot.lane.b32.xlu1 %v25485_v48, %s25835_s3 }
0x3a17   :  { %v25487_v8 = vpop.eup %25486 }
0x3a18   :  { %v12413_v35 = vadd.f32 1.0, %v25487_v8 }
0x3a1a   :  { %25488 = vrcp.f32 %v12413_v35 }
0x3a24   :  { %v25489_v24 = vpop.eup %25488 }
0x3a25   :  { %v12420_v9 = vmul.f32 %v25489_v24, %v12418_v40 }
0x3a88   :  { %v12423_v49 = vpop.permute.xlu1 %12422 }
0x3a89   :  { %v12425_v39 = vmul.f32 %v25489_v24, %v12423_v49 }
0x3a8b   :  { %12427 = vrot.lane.b32.xlu0 %v12425_v39, %s25822_s20 }
0x3afd   :  { %v12428_v5 = vpop.permute.xlu0 %12427 }
0x3afe   :  { %v27405_v11 = vadd.f32 %v12428_v5, %v12420_v9 }
0x3b00   :  { %25490 = vtanh.f32 %v27405_v11  ;;  %v12941_v2 = vrot.slane %v27405_v11, 6 }
0x3b0a   :  { %v25491_v29 = vpop.eup %25490 }
0x3b0b   :  { %12433 = vrot.lane.b32.xlu1 %v25491_v29, %s25835_s3 }
0x3b7d   :  { %v12434_v30 = vpop.permute.xlu1 %12433 }
0x3b7e   :  { %v27409_v4 = vmul.f32 %v25489_v24, %v12434_v30 }
0x3b80   :  { %v12442_v46 = vrot.slane %v27409_v4, 6 }
0x3b82   :  { %12443 = vrot.lane.b32.xlu0 %v12442_v46, %s25822_s20 }
0x3bf4   :  { %v12444_v32 = vpop.permute.xlu0 %12443 }
0x3bf5   :  { %v12445_v50 = vsel %vm209_vm1, %v12444_v32, 0 }
0x3bf6   :  { %v12516_v59 = vand.u32 4294901760, %v12445_v50 }
0x3bf8   :  { %v12517_v12 = vsub.f32 %v12445_v50, %v12516_v59 }
0x3bfa   :  { %v12518_v14 = vand.u32 4294901760, %v12517_v12 }
0x3bfc   :  { %v12519_v16 = vsub.f32 %v12517_v12, %v12518_v14 }
0x3bfe   :  { %v12520_v17 = vand.u32 4294901760, %v12519_v16 }
0x3c00   :  { %22705 = vmatmul.mubr.f32.vlgmr.msra.gmra.mrb[62].mxu1 %v12520_v17 }
0x3c01   :  { %24492 = vmatpush3.bf16.msra.mxu1 %v27213_v47  ;;  %22715 = vmatprep.mubr.msk.f32.mxu1 %vm25832_vm0, %v25833_v1 }
0x3c02   :  { %24493 = vmatprep.subr.bf16.mxu1 %v25831_v0 }
0x3c05   :  { %24495 = vmatpush3.bf16.msra.mxu1 %v27217_v28 }
0x3c06   :  { %24496 = vmatprep.subr.bf16.mxu1 %v25831_v0 }
0x3c08   :  { %22716 = vmatmul.mubr.f32.vlgmr.msra.gmra.mrb[64].mxu1 %v12516_v59 }
0x3c09   :  { %24498 = vmatpush3.bf16.msra.mxu1 %v27123_v20  ;;  %22726 = vmatprep.mubr.msk.f32.mxu1 %vm25832_vm0, %v25833_v1 }
0x3c0a   :  { %24499 = vmatprep.subr.bf16.mxu1 %v25831_v0 }
0x3c0d   :  { %24501 = vmatpush3.bf16.msra.mxu1 %v27128_v44 }
0x3c0e   :  { %24502 = vmatprep.subr.bf16.mxu1 %v25831_v0 }
0x3c10   :  { %22727 = vmatmul.mubr.f32.vlgmr.msra.gmra.mrb[66].mxu1 %v12517_v12 }
0x3c11   :  { %24504 = vmatpush3.bf16.msra.mxu1 %v27076_v51  ;;  %22737 = vmatprep.mubr.msk.f32.mxu1 %vm25832_vm0, %v25833_v1 }
0x3c12   :  { %24505 = vmatprep.subr.bf16.mxu1 %v25831_v0 }
0x3c15   :  { %24507 = vmatpush3.bf16.msra.mxu1 %v27082_v60 }
0x3c16   :  { %24508 = vmatprep.subr.bf16.mxu1 %v25831_v0 }
0x3c18   :  { %22738 = vmatmul.mubr.f32.vlgmr.msra.gmra.mrb[68].mxu1 %v12518_v14 }
0x3c19   :  { %24510 = vmatpush3.bf16.msra.mxu1 %v27140_v45  ;;  %22748 = vmatprep.mubr.msk.f32.mxu1 %vm25832_vm0, %v25833_v1 }
0x3c1a   :  { %24511 = vmatprep.subr.bf16.mxu1 %v25831_v0 }
0x3c1d   :  { %24513 = vmatpush3.bf16.msra.mxu1 %v27151_v26 }
0x3c1e   :  { %24514 = vmatprep.subr.bf16.mxu1 %v25831_v0 }
0x3c20   :  { %22749 = vmatmul.mubr.f32.vlgmr.msra.gmra.mrb[70].mxu1 %v12516_v59 }
0x3c21   :  { %24516 = vmatpush3.bf16.msra.mxu1 %v27076_v51  ;;  %22759 = vmatprep.mubr.msk.f32.mxu1 %vm25832_vm0, %v25833_v1 }
0x3c22   :  { %24517 = vmatprep.subr.bf16.mxu1 %v25831_v0 }
0x3c25   :  { %24519 = vmatpush3.bf16.msra.mxu1 %v27082_v60 }
0x3c26   :  { %24556 = vmatprep.subr.bf16.mxu1 %v25831_v0 }
0x3c28   :  { %22760 = vmatmul.mubr.f32.vlgmr.msra.gmra.mrb[72].mxu1 %v12516_v59 }
0x3c29   :  { %24558 = vmatpush3.bf16.msra.mxu1 %v27076_v51  ;;  %22836 = vmatprep.mubr.msk.f32.mxu1 %vm25832_vm0, %v25833_v1 }
0x3c2a   :  { %24559 = vmatprep.subr.bf16.mxu1 %v25831_v0 }
0x3c2d   :  { %24561 = vmatpush3.bf16.msra.mxu1 %v27082_v60 }
0x3c2e   :  { %24562 = vmatprep.subr.bf16.mxu1 %v25831_v0 }
0x3cd3   :  { %v12522_v19 = vpop.f32.mrb[62].mxu1 }
0x3cd4   :  { %v22706_v23 = vpop.f32.mrb[63].mxu1 }
0x3cdb   :  { %v12613_v25 = vpop.f32.mrb[64].mxu1 }
0x3cdc   :  { %v12614_v34 = vadd.f32 %v12613_v25, %v12522_v19  ;;  %v22717_v36 = vpop.f32.mrb[65].mxu1 }
0x3ce3   :  { %v12693_v18 = vpop.f32.mrb[66].mxu1 }
0x3ce4   :  { %v12694_v33 = vadd.f32 %v12693_v18, %v12614_v34  ;;  %v22728_v38 = vpop.f32.mrb[67].mxu1 }
0x3ceb   :  { %v12770_v41 = vpop.f32.mrb[68].mxu1 }
0x3cec   :  { %v12771_v54 = vadd.f32 %v12770_v41, %v12694_v33  ;;  %v22739_v57 = vpop.f32.mrb[69].mxu1 }
0x3cf3   :  { %v12853_v22 = vpop.f32.mrb[70].mxu1 }
0x3cf4   :  { %v12854_v42 = vadd.f32 %v12853_v22, %v12771_v54  ;;  %v22750_v43 = vpop.f32.mrb[71].mxu1 }
0x3cfb   :  { %v12928_v13 = vpop.f32.mrb[72].mxu1 }
0x3cfc   :  { %v12929_v6 = vadd.f32 %v12928_v13, %v12854_v42  ;;  %v22761_v31 = vpop.f32.mrb[73].mxu1 }
0x3cfe   :  { %v12932_v56 = vadd.f32 %v27249_v7, %v12929_v6 }
0x3d00   :  { %25492 = vtanh.f32 %v12932_v56  ;;  %v20024_v37 = vmul.f32 -1.442695, %v12932_v56 }
0x3d02   :  { %25494 = vpow2.f32 %v20024_v37 }
0x3d0a   :  { %v25493_v58 = vpop.eup %25492 }
0x3d0b   :  { %12945 = vrot.lane.b32.xlu1 %v25493_v58, %s25835_s3 }
0x3d0c   :  { %v25495_v15 = vpop.eup %25494 }
0x3d0d   :  { %v12936_v10 = vadd.f32 1.0, %v25495_v15 }
0x3d0f   :  { %25496 = vrcp.f32 %v12936_v10 }
0x3d19   :  { %v25497_v55 = vpop.eup %25496 }
0x3d1a   :  { %v12943_v48 = vmul.f32 %v25497_v55, %v12941_v2 }
0x3d7d   :  { %v12946_v63 = vpop.permute.xlu1 %12945 }
0x3d7e   :  { %v12948_v53 = vmul.f32 %v25497_v55, %v12946_v63 }
0x3d80   :  { %12950 = vrot.lane.b32.xlu0 %v12948_v53, %s25822_s20 }
0x3df2   :  { %v12951_v3 = vpop.permute.xlu0 %12950 }
0x3df3   :  { %v27454_v8 = vadd.f32 %v12951_v3, %v12943_v48 }
0x3df5   :  { %25498 = vtanh.f32 %v27454_v8  ;;  %v13464_v34 = vrot.slane %v27454_v8, 6 }
0x3dff   :  { %v25499_v35 = vpop.eup %25498 }
0x3e00   :  { %12956 = vrot.lane.b32.xlu1 %v25499_v35, %s25835_s3 }
0x3e72   :  { %v12957_v24 = vpop.permute.xlu1 %12956 }
0x3e73   :  { %v12959_v49 = vmul.f32 %v25497_v55, %v12957_v24 }
0x3e75   :  { %12961 = vrot.lane.b32.xlu0 %v12959_v49, %s25822_s20 }
0x3ee7   :  { %v12962_v39 = vpop.permute.xlu0 %12961 }
0x3ee8   :  { %12964 = vst.msk [vmem:[#allocation2 + $0x8] sm:$0x3] %vm1263_vm2, %v12962_v39  ;;  %v12965_v40 = vsel %vm209_vm1, %v12962_v39, 0 }
0x3ee9   :  { %v13036_v9 = vand.u32 4294901760, %v12965_v40 }
0x3eeb   :  { %v13037_v5 = vsub.f32 %v12965_v40, %v13036_v9 }
0x3eed   :  { %v13038_v11 = vand.u32 4294901760, %v13037_v5 }
0x3eef   :  { %v13039_v29 = vsub.f32 %v13037_v5, %v13038_v11 }
0x3ef1   :  { %v13040_v30 = vand.u32 4294901760, %v13039_v29 }
0x3ef3   :  { %22771 = vmatmul.mubr.f32.vlgmr.msra.gmra.mrb[34].mxu0 %v13040_v30 }
0x3ef4   :  { %24528 = vmatpush3.bf16.msra.mxu0 %v27213_v47  ;;  %22781 = vmatprep.mubr.msk.f32.mxu0 %vm25832_vm0, %v25833_v1 }
0x3ef5   :  { %24529 = vmatprep.subr.bf16.mxu0 %v25831_v0 }
0x3ef8   :  { %24531 = vmatpush3.bf16.msra.mxu0 %v27217_v28 }
0x3ef9   :  { %24532 = vmatprep.subr.bf16.mxu0 %v25831_v0 }
0x3efb   :  { %22782 = vmatmul.mubr.f32.vlgmr.msra.gmra.mrb[34].mxu0 %v13036_v9 }
0x3efc   :  { %24534 = vmatpush3.bf16.msra.mxu0 %v27123_v20  ;;  %22792 = vmatprep.mubr.msk.f32.mxu0 %vm25832_vm0, %v25833_v1 }
0x3efd   :  { %24535 = vmatprep.subr.bf16.mxu0 %v25831_v0 }
0x3f00   :  { %24537 = vmatpush3.bf16.msra.mxu0 %v27128_v44 }
0x3f01   :  { %24538 = vmatprep.subr.bf16.mxu0 %v25831_v0 }
0x3f03   :  { %22793 = vmatmul.mubr.f32.vlgmr.msra.gmra.mrb[34].mxu0 %v13037_v5 }
0x3f04   :  { %24540 = vmatpush3.bf16.msra.mxu0 %v27076_v51  ;;  %22803 = vmatprep.mubr.msk.f32.mxu0 %vm25832_vm0, %v25833_v1 }
0x3f05   :  { %24541 = vmatprep.subr.bf16.mxu0 %v25831_v0 }
0x3f08   :  { %24543 = vmatpush3.bf16.msra.mxu0 %v27082_v60 }
0x3f09   :  { %24544 = vmatprep.subr.bf16.mxu0 %v25831_v0 }
0x3f0b   :  { %22804 = vmatmul.mubr.f32.vlgmr.msra.gmra.mrb[34].mxu0 %v13038_v11 }
0x3f0c   :  { %24546 = vmatpush3.bf16.msra.mxu0 %v27140_v45  ;;  %22814 = vmatprep.mubr.msk.f32.mxu0 %vm25832_vm0, %v25833_v1 }
0x3f0d   :  { %24547 = vmatprep.subr.bf16.mxu0 %v25831_v0 }
0x3f10   :  { %24549 = vmatpush3.bf16.msra.mxu0 %v27151_v26 }
0x3f11   :  { %24550 = vmatprep.subr.bf16.mxu0 %v25831_v0 }
0x3f13   :  { %22815 = vmatmul.mubr.f32.vlgmr.msra.gmra.mrb[34].mxu0 %v13036_v9 }
0x3f14   :  { %24552 = vmatpush3.bf16.msra.mxu0 %v27076_v51  ;;  %22825 = vmatprep.mubr.msk.f32.mxu0 %vm25832_vm0, %v25833_v1 }
0x3f15   :  { %24553 = vmatprep.subr.bf16.mxu0 %v25831_v0 }
0x3f18   :  { %24555 = vmatpush3.bf16.msra.mxu0 %v27082_v60 }
0x3f19   :  { %24592 = vmatprep.subr.bf16.mxu0 %v25831_v0 }
0x3f1b   :  { %22826 = vmatmul.mubr.f32.vlgmr.msra.gmra.mrb[34].mxu0 %v13036_v9 }
0x3f1c   :  { %24594 = vmatpush3.bf16.msra.mxu0 %v27076_v51  ;;  %22902 = vmatprep.mubr.msk.f32.mxu0 %vm25832_vm0, %v25833_v1 }
0x3f1d   :  { %24595 = vmatprep.subr.bf16.mxu0 %v25831_v0 }
0x3f20   :  { %24597 = vmatpush3.bf16.msra.mxu0 %v27082_v60 }
0x3f21   :  { %24598 = vmatprep.subr.bf16.mxu0 %v25831_v0 }
0x3fee   :  { %v13448_v46 = vpop.f32.mrb[34].mxu0 }
0x3fef   :  { %v13453_v32 = vrot.slane %v13448_v46, 6  ;;  %v22827_v50 = vpop.f32.mrb[35].mxu0 }
0x3ff1   :  { %v13455_v59 = vadd.f32 %v27249_v7, %v13453_v32 }
0x3ff3   :  { %25500 = vtanh.f32 %v13455_v59  ;;  %v20025_v14 = vmul.f32 -1.442695, %v13455_v59 }
0x3ff5   :  { %25502 = vpow2.f32 %v20025_v14 }
0x3ffd   :  { %v25501_v12 = vpop.eup %25500 }
0x3ffe   :  { %13468 = vrot.lane.b32.xlu1 %v25501_v12, %s25835_s3 }
0x3fff   :  { %v25503_v16 = vpop.eup %25502 }
0x4000   :  { %v13459_v17 = vadd.f32 1.0, %v25503_v16 }
0x4002   :  { %25504 = vrcp.f32 %v13459_v17 }
0x400c   :  { %v25505_v19 = vpop.eup %25504 }
0x400d   :  { %v13466_v36 = vmul.f32 %v25505_v19, %v13464_v34 }
0x4070   :  { %v13469_v23 = vpop.permute.xlu1 %13468 }
0x4071   :  { %v13471_v25 = vmul.f32 %v25505_v19, %v13469_v23  ;;  %v14553_v23 = vld [vmem:[#allocation15 + $0x8] sm:$0xff] }
0x4073   :  { %13473 = vrot.lane.b32.xlu0 %v13471_v25, %s25822_s20 }
0x40e5   :  { %v13474_v18 = vpop.permute.xlu0 %13473 }
0x40e6   :  { %v27501_v33 = vadd.f32 %v13474_v18, %v13466_v36  ;;  %v14554_v36 = vld [vmem:[#allocation15 + $0x10] sm:$0xff]  ;;  %v14555_v18 = vld [vmem:[#allocation15 + $0x18] sm:$0xff] }
0x40e8   :  { %25506 = vtanh.f32 %v27501_v33  ;;  %v13990_v35 = vrot.slane %v27501_v33, 6  ;;  %v15149_v33 = vand.u32 4294901760, %v14554_v36 }
0x40f2   :  { %v25507_v38 = vpop.eup %25506 }
0x40f3   :  { %13479 = vrot.lane.b32.xlu1 %v25507_v38, %s25835_s3  ;;  %v15152_v38 = vand.u32 4294901760, %v14555_v18 }
0x4165   :  { %v13480_v41 = vpop.permute.xlu1 %13479 }
0x4166   :  { %v27505_v54 = vmul.f32 %v25505_v19, %v13480_v41  ;;  %v14552_v19 = vld [vmem:[#allocation15] sm:$0xff]  ;;  %v27598_v41 = vpack.c.bf16 %v15152_v38, %v15149_v33 }
0x4167   :  { %v15143_v25 = vand.u32 4294901760, %v14552_v19 }
0x4168   :  { %v13488_v57 = vrot.slane %v27505_v54, 2 }
0x416a   :  { %13489 = vrot.lane.b32.xlu0 %v13488_v57, %s25822_s20  ;;  %v27601_v57 = vsub.f32 %v14552_v19, %v15143_v25 }
0x41dc   :  { %v13490_v22 = vpop.permute.xlu0 %13489 }
0x41dd   :  { %v13491_v42 = vsel %vm209_vm1, %v13490_v22, 0  ;;  %v15137_v22 = vrot.slane %v27166_v27, 6 }
0x41de   :  { %v13562_v43 = vand.u32 4294901760, %v13491_v42 }
0x41e0   :  { %v13563_v13 = vsub.f32 %v13491_v42, %v13562_v43  ;;  %v27609_v42 = vsub.f32 %v14554_v36, %v15149_v33 }
0x41e2   :  { %v13564_v6 = vand.u32 4294901760, %v13563_v13 }
0x41e4   :  { %v13565_v31 = vsub.f32 %v13563_v13, %v13564_v6 }
0x41e6   :  { %v13566_v56 = vand.u32 4294901760, %v13565_v31 }
0x41e8   :  { %22837 = vmatmul.mubr.f32.vlgmr.msra.gmra.mrb[74].mxu1 %v13566_v56 }
0x41e9   :  { %24564 = vmatpush3.bf16.msra.mxu1 %v27213_v47  ;;  %22847 = vmatprep.mubr.msk.f32.mxu1 %vm25832_vm0, %v25833_v1 }
0x41ea   :  { %24565 = vmatprep.subr.bf16.mxu1 %v25831_v0 }
0x41ed   :  { %24567 = vmatpush3.bf16.msra.mxu1 %v27217_v28 }
0x41ee   :  { %24568 = vmatprep.subr.bf16.mxu1 %v25831_v0 }
0x41f0   :  { %22848 = vmatmul.mubr.f32.vlgmr.msra.gmra.mrb[74].mxu1 %v13562_v43 }
0x41f1   :  { %24570 = vmatpush3.bf16.msra.mxu1 %v27123_v20  ;;  %22858 = vmatprep.mubr.msk.f32.mxu1 %vm25832_vm0, %v25833_v1 }
0x41f2   :  { %24571 = vmatprep.subr.bf16.mxu1 %v25831_v0 }
0x41f5   :  { %24573 = vmatpush3.bf16.msra.mxu1 %v27128_v44 }
0x41f6   :  { %24574 = vmatprep.subr.bf16.mxu1 %v25831_v0 }
0x41f8   :  { %22859 = vmatmul.mubr.f32.vlgmr.msra.gmra.mrb[74].mxu1 %v13563_v13 }
0x41f9   :  { %24576 = vmatpush3.bf16.msra.mxu1 %v27076_v51  ;;  %22869 = vmatprep.mubr.msk.f32.mxu1 %vm25832_vm0, %v25833_v1 }
0x41fa   :  { %24577 = vmatprep.subr.bf16.mxu1 %v25831_v0 }
0x41fd   :  { %24579 = vmatpush3.bf16.msra.mxu1 %v27082_v60 }
0x41fe   :  { %24580 = vmatprep.subr.bf16.mxu1 %v25831_v0 }
0x4200   :  { %22870 = vmatmul.mubr.f32.vlgmr.msra.gmra.mrb[74].mxu1 %v13564_v6 }
0x4201   :  { %24582 = vmatpush3.bf16.msra.mxu1 %v27140_v45  ;;  %22880 = vmatprep.mubr.msk.f32.mxu1 %vm25832_vm0, %v25833_v1 }
0x4202   :  { %24583 = vmatprep.subr.bf16.mxu1 %v25831_v0 }
0x4205   :  { %24585 = vmatpush3.bf16.msra.mxu1 %v27151_v26 }
0x4206   :  { %24586 = vmatprep.subr.bf16.mxu1 %v25831_v0 }
0x4208   :  { %22881 = vmatmul.mubr.f32.vlgmr.msra.gmra.mrb[74].mxu1 %v13562_v43 }
0x4209   :  { %24588 = vmatpush3.bf16.msra.mxu1 %v27076_v51  ;;  %22891 = vmatprep.mubr.msk.f32.mxu1 %vm25832_vm0, %v25833_v1 }
0x420a   :  { %24589 = vmatprep.subr.bf16.mxu1 %v25831_v0 }
0x420d   :  { %24591 = vmatpush3.bf16.msra.mxu1 %v27082_v60 }
0x4210   :  { %22892 = vmatmul.mubr.f32.vlgmr.msra.gmra.mrb[74].mxu1 %v13562_v43  ;;  %v27611_v43 = vsub.f32 %v14555_v18, %v15152_v38 }
0x42e3   :  { %v13974_v58 = vpop.f32.mrb[74].mxu1 }
0x42e4   :  { %v13979_v37 = vrot.slane %v13974_v58, 4  ;;  %v22893_v15 = vpop.f32.mrb[75].mxu1 }
0x42e6   :  { %v13981_v10 = vadd.f32 %v27249_v7, %v13979_v37 }
0x42e8   :  { %25508 = vtanh.f32 %v13981_v10  ;;  %v20026_v63 = vmul.f32 -1.442695, %v13981_v10 }
0x42ea   :  { %25510 = vpow2.f32 %v20026_v63 }
0x42f2   :  { %v25509_v55 = vpop.eup %25508 }
0x42f3   :  { %13994 = vrot.lane.b32.xlu1 %v25509_v55, %s25835_s3 }
0x42f4   :  { %v25511_v53 = vpop.eup %25510 }
0x42f5   :  { %v13985_v2 = vadd.f32 1.0, %v25511_v53 }
0x42f7   :  { %25512 = vrcp.f32 %v13985_v2 }
0x4301   :  { %v25513_v48 = vpop.eup %25512 }
0x4302   :  { %v13992_v24 = vmul.f32 %v25513_v48, %v13990_v35 }
0x4365   :  { %v13995_v3 = vpop.permute.xlu1 %13994 }
0x4366   :  { %v13997_v8 = vmul.f32 %v25513_v48, %v13995_v3 }
0x4368   :  { %13999 = vrot.lane.b32.xlu0 %v13997_v8, %s25822_s20 }
0x43da   :  { %v14000_v49 = vpop.permute.xlu0 %13999 }
0x43db   :  { %v27543_v39 = vadd.f32 %v14000_v49, %v13992_v24  ;;  %v15238_v24 = vand.u32 4294901760, %v27609_v42  ;;  %v15245_v49 = vand.u32 4294901760, %v27611_v43 }
0x43dd   :  { %25514 = vtanh.f32 %v27543_v39 }
0x43e7   :  { %v25515_v40 = vpop.eup %25514 }
0x43e8   :  { %14005 = vrot.lane.b32.xlu1 %v25515_v40, %s25835_s3 }
0x445a   :  { %v14006_v9 = vpop.permute.xlu1 %14005 }
0x445b   :  { %v27547_v5 = vmul.f32 %v25513_v48, %v14006_v9  ;;  %v14548_v9 = vld [vmem:[#allocation13] sm:$0xff] }
0x445d   :  { %v14014_v11 = vrot.slane %v27547_v5, 4 }
0x445f   :  { %14015 = vrot.lane.b32.xlu0 %v14014_v11, %s25822_s20  ;;  %v14550_v11 = vld [vmem:[#allocation13 + $0x10] sm:$0xff] }
0x44d1   :  { %v14016_v29 = vpop.permute.xlu0 %14015 }
0x44d2   :  { %v14017_v30 = vsel %vm209_vm1, %v14016_v29, 0 }
0x44d3   :  { %v14088_v46 = vand.u32 4294901760, %v14017_v30 }
0x44d5   :  { %v14089_v32 = vsub.f32 %v14017_v30, %v14088_v46  ;;  %v14610_v30 = vand.u32 4294901760, %v14548_v9 }
0x44d7   :  { %v14090_v50 = vand.u32 4294901760, %v14089_v32 }
0x44d9   :  { %v14091_v59 = vsub.f32 %v14089_v32, %v14090_v50 }
0x44db   :  { %v14092_v12 = vand.u32 4294901760, %v14091_v59 }
0x44dd   :  { %22903 = vmatmul.mubr.f32.vlgmr.msra.gmra.mrb[36].mxu0 %v14092_v12 }
0x44de   :  { %24600 = vmatpush3.bf16.msra.mxu0 %v27213_v47  ;;  %22913 = vmatprep.mubr.msk.f32.mxu0 %vm25832_vm0, %v25833_v1 }
0x44df   :  { %24601 = vmatprep.subr.bf16.mxu0 %v25831_v0 }
0x44e2   :  { %24603 = vmatpush3.bf16.msra.mxu0 %v27217_v28 }
0x44e3   :  { %24604 = vmatprep.subr.bf16.mxu0 %v25831_v0 }
0x44e5   :  { %22914 = vmatmul.mubr.f32.vlgmr.msra.gmra.mrb[36].mxu0 %v14088_v46 }
0x44e6   :  { %24606 = vmatpush3.bf16.msra.mxu0 %v27123_v20  ;;  %22924 = vmatprep.mubr.msk.f32.mxu0 %vm25832_vm0, %v25833_v1 }
0x44e7   :  { %24607 = vmatprep.subr.bf16.mxu0 %v25831_v0 }
0x44ea   :  { %24609 = vmatpush3.bf16.msra.mxu0 %v27128_v44 }
0x44eb   :  { %24610 = vmatprep.subr.bf16.mxu0 %v25831_v0 }
0x44ed   :  { %22925 = vmatmul.mubr.f32.vlgmr.msra.gmra.mrb[36].mxu0 %v14089_v32  ;;  %v14551_v32 = vld [vmem:[#allocation13 + $0x18] sm:$0xff] }
0x44ee   :  { %24612 = vmatpush3.bf16.msra.mxu0 %v27076_v51  ;;  %22935 = vmatprep.mubr.msk.f32.mxu0 %vm25832_vm0, %v25833_v1  ;;  %v14619_v59 = vand.u32 4294901760, %v14551_v32 }
0x44ef   :  { %24613 = vmatprep.subr.bf16.mxu0 %v25831_v0 }
0x44f2   :  { %24615 = vmatpush3.bf16.msra.mxu0 %v27082_v60 }
0x44f3   :  { %24616 = vmatprep.subr.bf16.mxu0 %v25831_v0 }
0x44f5   :  { %22936 = vmatmul.mubr.f32.vlgmr.msra.gmra.mrb[36].mxu0 %v14090_v50  ;;  %v14616_v50 = vand.u32 4294901760, %v14550_v11 }
0x44f6   :  { %24618 = vmatpush3.bf16.msra.mxu0 %v27140_v45  ;;  %22946 = vmatprep.mubr.msk.f32.mxu0 %vm25832_vm0, %v25833_v1 }
0x44f7   :  { %24619 = vmatprep.subr.bf16.mxu0 %v25831_v0 }
0x44fa   :  { %24621 = vmatpush3.bf16.msra.mxu0 %v27151_v26 }
0x44fb   :  { %24622 = vmatprep.subr.bf16.mxu0 %v25831_v0 }
0x44fd   :  { %22947 = vmatmul.mubr.f32.vlgmr.msra.gmra.mrb[36].mxu0 %v14088_v46 }
0x44fe   :  { %24624 = vmatpush3.bf16.msra.mxu0 %v27076_v51  ;;  %22957 = vmatprep.mubr.msk.f32.mxu0 %vm25832_vm0, %v25833_v1 }
0x44ff   :  { %24625 = vmatprep.subr.bf16.mxu0 %v25831_v0 }
0x4502   :  { %24627 = vmatpush3.bf16.msra.mxu0 %v27082_v60 }
0x4503   :  { %24676 = vmatprep.subr.bf16.mxu0 %v25831_v0 }
0x4505   :  { %22958 = vmatmul.mubr.f32.vlgmr.msra.gmra.mrb[36].mxu0 %v14088_v46 }
0x4506   :  { %23034 = vmatprep.mubr.msk.f32.mxu0 %vm25832_vm0, %v25833_v1 }
0x45d8   :  { %v14500_v20 = vpop.f32.mrb[36].mxu0 }
0x45d9   :  { %v14505_v44 = vrot.slane %v14500_v20, 2  ;;  %v22959_v45 = vpop.f32.mrb[37].mxu0  ;;  %v14700_v20 = vsub.f32 %v14548_v9, %v14610_v30 }
0x45db   :  { %v14507_v26 = vadd.f32 %v27249_v7, %v14505_v44  ;;  %v15146_v7 = vand.u32 4294901760, %v14553_v23 }
0x45dd   :  { %25516 = vtanh.f32 %v14507_v26  ;;  %v20027_v47 = vmul.f32 -1.442695, %v14507_v26  ;;  %v27592_v34 = vpack.c.bf16 %v15146_v7, %v15143_v25  ;;  %v27685_v26 = vpack.c.bf16 %v14619_v59, %v14616_v50 }
0x45de   :  { %v14721_v25 = vsub.f32 %v14551_v32, %v14619_v59 }
0x45df   :  { %25518 = vpow2.f32 %v20027_v47  ;;  %24678 = vmatpush3.bf16.msra.mxu0 %v27592_v34 }
0x45e0   :  { %24679 = vmatprep.subr.bf16.mxu0 %v25831_v0  ;;  %v14722_v38 = vand.u32 4294901760, %v14721_v25 }
0x45e3   :  { %24681 = vmatpush3.bf16.msra.mxu0 %v27598_v41 }
0x45e4   :  { %24688 = vmatprep.subr.bf16.mxu0 %v25831_v0 }
0x45e7   :  { %v25517_v51 = vpop.eup %25516 }
0x45e8   :  { %14520 = vrot.lane.b32.xlu1 %v25517_v51, %s25835_s3  ;;  %v14701_v51 = vand.u32 4294901760, %v14700_v20 }
0x45e9   :  { %v25519_v28 = vpop.eup %25518 }
0x45ea   :  { %v14511_v14 = vadd.f32 1.0, %v25519_v28  ;;  %v14702_v28 = vsub.f32 %v14700_v20, %v14701_v51 }
0x45ec   :  { %25520 = vrcp.f32 %v14511_v14 }
0x45f6   :  { %v27586_v60 = vpop.eup %25520 }
0x465a   :  { %v14521_v16 = vpop.permute.xlu1 %14520 }
0x465b   :  { %v14523_v17 = vmul.f32 %v27586_v60, %v14521_v16 }
0x465d   :  { %14525 = vrot.lane.b32.xlu0 %v14523_v17, %s25822_s20  ;;  %v14703_v17 = vand.u32 4294901760, %v14702_v28 }
0x4661   :  { %11386 = vrot.lane.b32.xlu0 %v27311_v62, %s25822_s20  ;;  %v27603_v62 = vsub.f32 %v14553_v23, %v15146_v7  ;;  %v14714_v23 = vsub.f32 %v14550_v11, %v14616_v50  ;;  %v14540_v7 = vld [vmem:[#allocation2] sm:$0x3] }
0x4663   :  { %v27639_v48 = vpack.c.bf16 %v27603_v62, %v27601_v57  ;;  %v15231_v8 = vand.u32 4294901760, %v27603_v62  ;;  %v14715_v33 = vand.u32 4294901760, %v14714_v23 }
0x4665   :  { %12438 = vrot.lane.b32.xlu0 %v27409_v4, %s25822_s20  ;;  %v14516_v4 = vrot.slane %v27543_v39, 6  ;;  %v27667_v39 = vpack.c.bf16 %v15245_v49, %v15238_v24  ;;  %v24664_v50 = vpack.c.bf16 %v14722_v38, %v14715_v33 }
0x4667   :  { %v14518_v13 = vmul.f32 %v27586_v60, %v14516_v4 }
0x4669   :  { %14010 = vrot.lane.b32.xlu0 %v27547_v5, %s25822_s20  ;;  %v14549_v5 = vld [vmem:[#allocation13 + $0x8] sm:$0xff] }
0x466a   :  { %v14613_v46 = vand.u32 4294901760, %v14549_v5 }
0x466c   :  { %v27683_v12 = vpack.c.bf16 %v14613_v46, %v14610_v30  ;;  %v14707_v44 = vsub.f32 %v14549_v5, %v14613_v46 }
0x466d   :  { %15138 = vrot.lane.b32.xlu0 %v15137_v22, %s25822_s20 }
0x466e   :  { %24629 = vmatprep.subr.bf16.mxu1 %v27683_v12  ;;  %v14708_v47 = vand.u32 4294901760, %v14707_v44  ;;  %v24644_v9 = vpack.c.bf16 %v14707_v44, %v14700_v20 }
0x466f   :  { %24631 = vmatpush3.bf16.msra.mxu1 %v27683_v12 }
0x4670   :  { %24633 = vmatprep.subr.bf16.mxu1 %v27685_v26  ;;  %v14709_v14 = vsub.f32 %v14707_v44, %v14708_v47  ;;  %v24660_v32 = vpack.c.bf16 %v14708_v47, %v14701_v51  ;;  %v14544_v44 = vld [vmem:[#allocation2 + $0x8] sm:$0x3] }
0x4672   :  { %v14710_v19 = vand.u32 4294901760, %v14709_v14 }
0x4673   :  { %24635 = vmatpush3.bf16.msra.mxu1 %v27685_v26 }
0x4674   :  { %v24636_v18 = vpack.c.bf16 %v14710_v19, %v14703_v17 }
0x4676   :  { %24637 = vmatprep.subr.bf16.mxu1 %v24636_v18 }
0x46cf   :  { %v14526_v6 = vpop.permute.xlu0 %14525 }
0x46d0   :  { %v27616_v31 = vadd.f32 %v14526_v6, %v14518_v13  ;;  %v14716_v6 = vsub.f32 %v14714_v23, %v14715_v33 }
0x46d2   :  { %25522 = vtanh.f32 %v27616_v31 }
0x46d3   :  { %v11387_v56 = vpop.permute.xlu0 %11386 }
0x46d4   :  { %11389 = vst.msk [vmem:[#allocation2] sm:$0xc] %vm1788_vm3, %v11387_v56  ;;  %v14723_v56 = vsub.f32 %v14721_v25, %v14722_v38 }
0x46d7   :  { %v12439_v58 = vpop.permute.xlu0 %12438 }
0x46d8   :  { %12441 = vst.msk [vmem:[#allocation2] sm:$0xc0] %vm2844_vm4, %v12439_v58 }
0x46db   :  { %v14011_v27 = vpop.permute.xlu0 %14010  ;;  %v14541_v16 = vld [vmem:[#allocation2 + $0x2] sm:$0x3] }
0x46dc   :  { %v25523_v37 = vpop.eup %25522  ;;  %14013 = vst.msk [vmem:[#allocation2 + $0x8] sm:$0x30] %vm2316_vm5, %v14011_v27  ;;  %v14571_v36 = vcombine.low %v14540_v7, %v14541_v16 }
0x46dd   :  { %14531 = vrot.lane.b32.xlu1 %v25523_v37, %s25835_s3  ;;  %v14717_v37 = vand.u32 4294901760, %v14716_v6 }
0x46de   :  { %v14579_v58 = vrot.slane %v14571_v36, %v26041_v21 }
0x46df   :  { %v15139_v15 = vpop.permute.xlu0 %15138  ;;  %v14543_v4 = vld [vmem:[#allocation2 + $0x6] sm:$0x3] }
0x46e0   :  { %v15140_v10 = vsel %vm209_vm1, %v15139_v15, 0  ;;  %v14724_v15 = vand.u32 4294901760, %v14723_v56  ;;  %v15232_v56 = vsub.f32 %v27603_v62, %v15231_v8 }
0x46e1   :  { %v27624_v55 = vand.u32 4294901760, %v15140_v10  ;;  %11912 = vrot.lane.b32.xlu1 %v27360_v52, %s25822_s20  ;;  %v27644_v52 = vpack.c.bf16 %v27611_v43, %v27609_v42 }
0x46e3   :  { %v27629_v63 = vsub.f32 %v15140_v10, %v27624_v55  ;;  %v14546_v17 = vld [vmem:[#allocation2 + $0xc] sm:$0x3] }
0x46e5   :  { %v15213_v53 = vand.u32 4294901760, %v27629_v63  ;;  %13484 = vrot.lane.b32.xlu1 %v27505_v54, %s25822_s20  ;;  %v15224_v54 = vand.u32 4294901760, %v27601_v57 }
0x46e7   :  { %v15214_v2 = vsub.f32 %v27629_v63, %v15213_v53  ;;  %v27656_v35 = vpack.c.bf16 %v15231_v8, %v15224_v54 }
0x46e9   :  { %v15215_v3 = vand.u32 4294901760, %v15214_v2  ;;  %v24640_v2 = vpack.c.bf16 %v14724_v15, %v14717_v37  ;;  %v15239_v37 = vsub.f32 %v27609_v42, %v15238_v24  ;;  %v20028_v42 = vld [vmem:[%s28209_s8] ss:$0 sm:$0xff]  ;;  %s25836_s8 = smov 96  }
0x46eb   :  { %23035 = vmatmul.mubr.f32.vlgmr.msra.gmra.mrb[38].mxu0 %v15215_v3 }
0x46ec   :  { %24690 = vmatpush3.bf16.msra.mxu0 %v27639_v48  ;;  %23056 = vmatprep.mubr.msk.f32.mxu0 %vm25832_vm0, %v25833_v1 }
0x46ed   :  { %24691 = vmatprep.subr.bf16.mxu0 %v25831_v0 }
0x46f0   :  { %24693 = vmatpush3.bf16.msra.mxu0 %v27644_v52 }
0x46f1   :  { %24700 = vmatprep.subr.bf16.mxu0 %v25831_v0 }
0x46f3   :  { %23057 = vmatmul.mubr.f32.vlgmr.msra.gmra.mrb[40].mxu0 %v27629_v63 }
0x46f4   :  { %24702 = vmatpush3.bf16.msra.mxu0 %v27656_v35  ;;  %23078 = vmatprep.mubr.msk.f32.mxu0 %vm25832_vm0, %v25833_v1 }
0x46f5   :  { %24703 = vmatprep.subr.bf16.mxu0 %v25831_v0 }
0x46f8   :  { %24705 = vmatpush3.bf16.msra.mxu0 %v27667_v39 }
0x46f9   :  { %24712 = vmatprep.subr.bf16.mxu0 %v25831_v0 }
0x46fb   :  { %23079 = vmatmul.mubr.f32.vlgmr.msra.gmra.mrb[42].mxu0 %v27624_v55 }
0x46fc   :  { %24714 = vmatpush3.bf16.msra.mxu0 %v27592_v34  ;;  %23100 = vmatprep.mubr.msk.f32.mxu0 %vm25832_vm0, %v25833_v1 }
0x46fd   :  { %24715 = vmatprep.subr.bf16.mxu0 %v25831_v0 }
0x4700   :  { %24717 = vmatpush3.bf16.msra.mxu0 %v27598_v41 }
0x4701   :  { %24718 = vmatprep.subr.bf16.mxu0 %v25831_v0 }
0x474f   :  { %v14532_v40 = vpop.permute.xlu1 %14531 }
0x4750   :  { %v14534_v29 = vmul.f32 %v27586_v60, %v14532_v40 }
0x4752   :  { %14536 = vrot.lane.b32.xlu1 %v14534_v29, %s25822_s20  ;;  %v24648_v29 = vpack.c.bf16 %v14721_v25, %v14714_v23 }
0x4753   :  { %v11913_v45 = vpop.permute.xlu1 %11912 }
0x4754   :  { %11915 = vst.msk [vmem:[#allocation2] sm:$0x30] %vm2316_vm5, %v11913_v45 }
0x4757   :  { %v13485_v60 = vpop.permute.xlu1 %13484 }
0x4758   :  { %13487 = vst.msk [vmem:[#allocation2 + $0x8] sm:$0xc] %vm1788_vm3, %v13485_v60 }
0x475b   :  { %v14542_v22 = vld [vmem:[#allocation2 + $0x4] sm:$0x3] }
0x475c   :  { %v14572_v13 = vcombine.low %v14542_v22, %v14543_v4 }
0x475e   :  { %v14586_v27 = vrot.slane %v14572_v13, %v26041_v21 }
0x475f   :  { %v14545_v20 = vld [vmem:[#allocation2 + $0xa] sm:$0x3] }
0x4760   :  { %v14587_v10 = vcombine.low %v14579_v58, %v14586_v27  ;;  %v14588_v16 = vcombine.low %v14544_v44, %v14545_v20  ;;  %v15233_v27 = vand.u32 4294901760, %v15232_v56 }
0x4762   :  { %v14605_v3 = vsel %vm209_vm1, %v14587_v10, 0  ;;  %v14596_v47 = vrot.slane %v14588_v16, %v26041_v21 }
0x4763   :  { %v14678_v40 = vand.u32 4294901760, %v14605_v3 }
0x4765   :  { %v14679_v5 = vsub.f32 %v14605_v3, %v14678_v40 }
0x4767   :  { %v14680_v11 = vand.u32 4294901760, %v14679_v5 }
0x4769   :  { %v14681_v30 = vsub.f32 %v14679_v5, %v14680_v11 }
0x476b   :  { %v14682_v46 = vand.u32 4294901760, %v14681_v30 }
0x476d   :  { %22968 = vmatprep.mubr.f32.mxu1 %v14682_v46 }
0x47be   :  { %v27696_v59 = vpop.f32.mrb[38].mxu0 }
0x47bf   :  { %v23036_v45 = vpop.f32.mrb[39].mxu0 }
0x47c4   :  { %v14537_v28 = vpop.permute.xlu1 %14536 }
0x47c5   :  { %14539 = vst.msk [vmem:[#allocation2 + $0x8] sm:$0xc0] %vm2844_vm4, %v14537_v28  ;;  %19936 = vst.msk [vmem:[#allocation17 - $0x6] sm:$0xc0] %vm2844_vm4, %v14537_v28 }
0x47c6   :  { %v27700_v14 = vpop.f32.mrb[40].mxu0 }
0x47c7   :  { %v23058_v60 = vpop.f32.mrb[41].mxu0 }
0x47cc   :  { %v14547_v19 = vld [vmem:[#allocation2 + $0xe] sm:$0x3] }
0x47cd   :  { %v14589_v23 = vcombine.low %v14546_v17, %v14547_v19 }
0x47ce   :  { %v27702_v25 = vpop.f32.mrb[42].mxu0 }
0x47cf   :  { %v23080_v51 = vpop.f32.mrb[43].mxu0  ;;  %v14603_v7 = vrot.slane %v14589_v23, %v26041_v21 }
0x47d1   :  { %v14604_v36 = vcombine.low %v14596_v47, %v14603_v7 }
0x47d3   :  { %v14607_v33 = vsel %vm209_vm1, %v14604_v36, 0 }
0x47d4   :  { %v14688_v38 = vand.u32 4294901760, %v14607_v33 }
0x47d6   :  { %v14689_v22 = vsub.f32 %v14607_v33, %v14688_v38 }
0x47d8   :  { %v14690_v4 = vand.u32 4294901760, %v14689_v22 }
0x47da   :  { %v14691_v13 = vsub.f32 %v14689_v22, %v14690_v4 }
0x47dc   :  { %v14692_v6 = vand.u32 4294901760, %v14691_v13 }
0x47de   :  { %22969 = vmatmul.mubr.f32.vlgmr.msra.gmra.mrb[76].mxu1 %v14692_v6 }
0x47df   :  { %24639 = vmatpush3.bf16.msra.mxu1 %v24636_v18  ;;  %22979 = vmatprep.mubr.f32.mxu1 %v14678_v40  ;;  %v15225_v18 = vsub.f32 %v27601_v57, %v15224_v54  ;;  %v15246_v57 = vsub.f32 %v27611_v43, %v15245_v49  ;;  %v15240_v54 = vand.u32 4294901760, %v15239_v37 }
0x47e0   :  { %24641 = vmatprep.subr.bf16.mxu1 %v24640_v2 }
0x47e1   :  { %v15226_v58 = vand.u32 4294901760, %v15225_v18  ;;  %v15247_v8 = vand.u32 4294901760, %v15246_v57 }
0x47e3   :  { %24643 = vmatpush3.bf16.msra.mxu1 %v24640_v2  ;;  %v27727_v62 = vpack.c.bf16 %v15233_v27, %v15226_v58 }
0x47e4   :  { %24645 = vmatprep.subr.bf16.mxu1 %v24644_v9 }
0x47e6   :  { %22980 = vmatmul.mubr.f32.vlgmr.msra.gmra.mrb[76].mxu1 %v14688_v38 }
0x47e7   :  { %24647 = vmatpush3.bf16.msra.mxu1 %v24644_v9  ;;  %22990 = vmatprep.mubr.f32.mxu1 %v14679_v5 }
0x47e8   :  { %24649 = vmatprep.subr.bf16.mxu1 %v24648_v29 }
0x47eb   :  { %24651 = vmatpush3.bf16.msra.mxu1 %v24648_v29 }
0x47ec   :  { %24653 = vmatprep.subr.bf16.mxu1 %v27683_v12 }
0x47ee   :  { %22991 = vmatmul.mubr.f32.vlgmr.msra.gmra.mrb[76].mxu1 %v14689_v22 }
0x47ef   :  { %24655 = vmatpush3.bf16.msra.mxu1 %v27683_v12  ;;  %23001 = vmatprep.mubr.f32.mxu1 %v14680_v11 }
0x47f0   :  { %24657 = vmatprep.subr.bf16.mxu1 %v27685_v26 }
0x47f3   :  { %24659 = vmatpush3.bf16.msra.mxu1 %v27685_v26 }
0x47f4   :  { %24661 = vmatprep.subr.bf16.mxu1 %v24660_v32 }
0x47f6   :  { %23002 = vmatmul.mubr.f32.vlgmr.msra.gmra.mrb[76].mxu1 %v14690_v4 }
0x47f7   :  { %24663 = vmatpush3.bf16.msra.mxu1 %v24660_v32  ;;  %23012 = vmatprep.mubr.f32.mxu1 %v14678_v40 }
0x47f8   :  { %24665 = vmatprep.subr.bf16.mxu1 %v24664_v50 }
0x47fb   :  { %24667 = vmatpush3.bf16.msra.mxu1 %v24664_v50 }
0x47fc   :  { %24669 = vmatprep.subr.bf16.mxu1 %v27683_v12 }
0x47fe   :  { %23013 = vmatmul.mubr.f32.vlgmr.msra.gmra.mrb[76].mxu1 %v14688_v38 }
0x47ff   :  { %24671 = vmatpush3.bf16.msra.mxu1 %v27683_v12  ;;  %23023 = vmatprep.mubr.f32.mxu1 %v14678_v40  ;;  %v27731_v12 = vpack.c.bf16 %v15247_v8, %v15240_v54 }
0x4800   :  { %24673 = vmatprep.subr.bf16.mxu1 %v27685_v26 }
0x4803   :  { %24675 = vmatpush3.bf16.msra.mxu1 %v27685_v26 }
0x4804   :  { %24682 = vmatprep.subr.bf16.mxu1 %v25831_v0 }
0x4806   :  { %23024 = vmatmul.mubr.f32.vlgmr.msra.gmra.mrb[76].mxu1 %v14688_v38 }
0x4807   :  { %24684 = vmatpush3.bf16.msra.mxu1 %v27727_v62  ;;  %23045 = vmatprep.mubr.msk.f32.mxu1 %vm25832_vm0, %v25833_v1 }
0x4808   :  { %24685 = vmatprep.subr.bf16.mxu1 %v25831_v0 }
0x480b   :  { %24687 = vmatpush3.bf16.msra.mxu1 %v27731_v12 }
0x480c   :  { %24694 = vmatprep.subr.bf16.mxu1 %v25831_v0 }
0x480e   :  { %23046 = vmatmul.mubr.f32.vlgmr.msra.gmra.mrb[78].mxu1 %v27624_v55 }
0x480f   :  { %24696 = vmatpush3.bf16.msra.mxu1 %v27592_v34  ;;  %23067 = vmatprep.mubr.msk.f32.mxu1 %vm25832_vm0, %v25833_v1 }
0x4810   :  { %24697 = vmatprep.subr.bf16.mxu1 %v25831_v0 }
0x4813   :  { %24699 = vmatpush3.bf16.msra.mxu1 %v27598_v41 }
0x4814   :  { %24706 = vmatprep.subr.bf16.mxu1 %v25831_v0 }
0x4816   :  { %23068 = vmatmul.mubr.f32.vlgmr.msra.gmra.mrb[80].mxu1 %v15213_v53 }
0x4817   :  { %24708 = vmatpush3.bf16.msra.mxu1 %v27592_v34  ;;  %23089 = vmatprep.mubr.msk.f32.mxu1 %vm25832_vm0, %v25833_v1 }
0x4818   :  { %24709 = vmatprep.subr.bf16.mxu1 %v25831_v0 }
0x481b   :  { %24711 = vmatpush3.bf16.msra.mxu1 %v27598_v41 }
0x481c   :  { %24748 = vmatprep.subr.bf16.mxu1 %v25831_v0 }
0x481e   :  { %23090 = vmatmul.mubr.f32.vlgmr.msra.gmra.mrb[82].mxu1 %v27624_v55 }
0x481f   :  { %24750 = vmatpush3.bf16.msra.mxu1 %v27592_v34  ;;  %23166 = vmatprep.mubr.msk.f32.mxu1 %vm25832_vm0, %v25833_v1 }
0x4820   :  { %24751 = vmatprep.subr.bf16.mxu1 %v25831_v0 }
0x4823   :  { %24753 = vmatpush3.bf16.msra.mxu1 %v27598_v41 }
0x4824   :  { %24754 = vmatprep.subr.bf16.mxu1 %v25831_v0 }
0x48d9   :  { %v23025_v43 = vpop.f32.mrb[76].mxu1 }
0x48da   :  { %v27763_v63 = vadd.f32 %v23025_v43, %v20028_v42  ;;  %v15127_v53 = vpop.f32.mrb[77].mxu1 }
0x48db   :  { %v27768_v9 = vadd.f32 %v20028_v42, %v15127_v53 }
0x48e1   :  { %v15308_v55 = vpop.f32.mrb[78].mxu1 }
0x48e2   :  { %v15309_v24 = vadd.f32 %v15308_v55, %v27696_v59  ;;  %v23047_v49 = vpop.f32.mrb[79].mxu1 }
0x48e4   :  { %v15389_v26 = vadd.f32 %v27700_v14, %v15309_v24  ;;  %v15636_v14 = vrot.slane %v27100_v61, 6 }
0x48e9   :  { %v15465_v15 = vpop.f32.mrb[80].mxu1 }
0x48ea   :  { %v15466_v10 = vadd.f32 %v15465_v15, %v15389_v26  ;;  %v23069_v2 = vpop.f32.mrb[81].mxu1 }
0x48ec   :  { %v15549_v3 = vadd.f32 %v27702_v25, %v15466_v10 }
0x48f1   :  { %v15623_v40 = vpop.f32.mrb[82].mxu1 }
0x48f2   :  { %v15624_v5 = vadd.f32 %v15623_v40, %v15549_v3  ;;  %v23091_v11 = vpop.f32.mrb[83].mxu1 }
0x48f4   :  { %v15627_v29 = vadd.f32 %v27768_v9, %v15624_v5 }
0x48f6   :  { %25524 = vtanh.f32 %v15627_v29  ;;  %v20029_v46 = vmul.f32 -1.442695, %v15627_v29 }
0x48f8   :  { %25526 = vpow2.f32 %v20029_v46 }
0x4900   :  { %v25525_v30 = vpop.eup %25524 }
0x4901   :  { %15640 = vrot.lane.b32.xlu1 %v25525_v30, %s25835_s3 }
0x4902   :  { %v25527_v32 = vpop.eup %25526 }
0x4903   :  { %v15631_v50 = vadd.f32 1.0, %v25527_v32 }
0x4905   :  { %25528 = vrcp.f32 %v15631_v50 }
0x490f   :  { %v25529_v59 = vpop.eup %25528 }
0x4910   :  { %v15638_v60 = vmul.f32 %v25529_v59, %v15636_v14 }
0x4973   :  { %v15641_v45 = vpop.permute.xlu1 %15640 }
0x4974   :  { %v15643_v28 = vmul.f32 %v25529_v59, %v15641_v45 }
0x4976   :  { %15645 = vrot.lane.b32.xlu0 %v15643_v28, %s25822_s20 }
0x49e8   :  { %v15646_v20 = vpop.permute.xlu0 %15645 }
0x49e9   :  { %v27774_v44 = vadd.f32 %v15646_v20, %v15638_v60 }
0x49eb   :  { %25530 = vtanh.f32 %v27774_v44  ;;  %v16159_v57 = vrot.slane %v27774_v44, 6 }
0x49f5   :  { %v25531_v16 = vpop.eup %25530 }
0x49f6   :  { %15651 = vrot.lane.b32.xlu1 %v25531_v16, %s25835_s3 }
0x4a68   :  { %v15652_v17 = vpop.permute.xlu1 %15651 }
0x4a69   :  { %v15654_v19 = vmul.f32 %v25529_v59, %v15652_v17 }
0x4a6b   :  { %15656 = vrot.lane.b32.xlu0 %v15654_v19, %s25822_s20 }
0x4add   :  { %v15657_v23 = vpop.permute.xlu0 %15656 }
0x4ade   :  { %15659 = vst.msk [vmem:[#allocation3] sm:$0x3] %vm1263_vm2, %v15657_v23  ;;  %v15660_v25 = vsel %vm209_vm1, %v15657_v23, 0 }
0x4adf   :  { %v15731_v51 = vand.u32 4294901760, %v15660_v25 }
0x4ae1   :  { %v15732_v61 = vsub.f32 %v15660_v25, %v15731_v51 }
0x4ae3   :  { %v15733_v47 = vand.u32 4294901760, %v15732_v61 }
0x4ae5   :  { %v15734_v7 = vsub.f32 %v15732_v61, %v15733_v47 }
0x4ae7   :  { %v15735_v36 = vand.u32 4294901760, %v15734_v7 }
0x4ae9   :  { %23101 = vmatmul.mubr.f32.vlgmr.msra.gmra.mrb[44].mxu0 %v15735_v36 }
0x4aea   :  { %24720 = vmatpush3.bf16.msra.mxu0 %v27727_v62  ;;  %23111 = vmatprep.mubr.msk.f32.mxu0 %vm25832_vm0, %v25833_v1 }
0x4aeb   :  { %24721 = vmatprep.subr.bf16.mxu0 %v25831_v0 }
0x4aee   :  { %24723 = vmatpush3.bf16.msra.mxu0 %v27731_v12 }
0x4aef   :  { %24724 = vmatprep.subr.bf16.mxu0 %v25831_v0 }
0x4af1   :  { %23112 = vmatmul.mubr.f32.vlgmr.msra.gmra.mrb[44].mxu0 %v15731_v51 }
0x4af2   :  { %24726 = vmatpush3.bf16.msra.mxu0 %v27639_v48  ;;  %23122 = vmatprep.mubr.msk.f32.mxu0 %vm25832_vm0, %v25833_v1 }
0x4af3   :  { %24727 = vmatprep.subr.bf16.mxu0 %v25831_v0 }
0x4af6   :  { %24729 = vmatpush3.bf16.msra.mxu0 %v27644_v52 }
0x4af7   :  { %24730 = vmatprep.subr.bf16.mxu0 %v25831_v0 }
0x4af9   :  { %23123 = vmatmul.mubr.f32.vlgmr.msra.gmra.mrb[44].mxu0 %v15732_v61 }
0x4afa   :  { %24732 = vmatpush3.bf16.msra.mxu0 %v27592_v34  ;;  %23133 = vmatprep.mubr.msk.f32.mxu0 %vm25832_vm0, %v25833_v1 }
0x4afb   :  { %24733 = vmatprep.subr.bf16.mxu0 %v25831_v0 }
0x4afe   :  { %24735 = vmatpush3.bf16.msra.mxu0 %v27598_v41 }
0x4aff   :  { %24736 = vmatprep.subr.bf16.mxu0 %v25831_v0 }
0x4b01   :  { %23134 = vmatmul.mubr.f32.vlgmr.msra.gmra.mrb[44].mxu0 %v15733_v47 }
0x4b02   :  { %24738 = vmatpush3.bf16.msra.mxu0 %v27656_v35  ;;  %23144 = vmatprep.mubr.msk.f32.mxu0 %vm25832_vm0, %v25833_v1 }
0x4b03   :  { %24739 = vmatprep.subr.bf16.mxu0 %v25831_v0 }
0x4b06   :  { %24741 = vmatpush3.bf16.msra.mxu0 %v27667_v39 }
0x4b07   :  { %24742 = vmatprep.subr.bf16.mxu0 %v25831_v0 }
0x4b09   :  { %23145 = vmatmul.mubr.f32.vlgmr.msra.gmra.mrb[44].mxu0 %v15731_v51 }
0x4b0a   :  { %24744 = vmatpush3.bf16.msra.mxu0 %v27592_v34  ;;  %23155 = vmatprep.mubr.msk.f32.mxu0 %vm25832_vm0, %v25833_v1 }
0x4b0b   :  { %24745 = vmatprep.subr.bf16.mxu0 %v25831_v0 }
0x4b0e   :  { %24747 = vmatpush3.bf16.msra.mxu0 %v27598_v41 }
0x4b0f   :  { %24784 = vmatprep.subr.bf16.mxu0 %v25831_v0 }
0x4b11   :  { %23156 = vmatmul.mubr.f32.vlgmr.msra.gmra.mrb[44].mxu0 %v15731_v51 }
0x4b12   :  { %24786 = vmatpush3.bf16.msra.mxu0 %v27592_v34  ;;  %23232 = vmatprep.mubr.msk.f32.mxu0 %vm25832_vm0, %v25833_v1 }
0x4b13   :  { %24787 = vmatprep.subr.bf16.mxu0 %v25831_v0 }
0x4b16   :  { %24789 = vmatpush3.bf16.msra.mxu0 %v27598_v41 }
0x4b17   :  { %24790 = vmatprep.subr.bf16.mxu0 %v25831_v0 }
0x4be4   :  { %v16143_v33 = vpop.f32.mrb[44].mxu0 }
0x4be5   :  { %v16148_v38 = vrot.slane %v16143_v33, 6  ;;  %v23157_v22 = vpop.f32.mrb[45].mxu0 }
0x4be7   :  { %v16150_v4 = vadd.f32 %v27768_v9, %v16148_v38 }
0x4be9   :  { %25532 = vtanh.f32 %v16150_v4  ;;  %v20030_v6 = vmul.f32 -1.442695, %v16150_v4 }
0x4beb   :  { %25534 = vpow2.f32 %v20030_v6 }
0x4bf3   :  { %v25533_v13 = vpop.eup %25532 }
0x4bf4   :  { %16163 = vrot.lane.b32.xlu1 %v25533_v13, %s25835_s3 }
0x4bf5   :  { %v25535_v18 = vpop.eup %25534 }
0x4bf6   :  { %v16154_v56 = vadd.f32 1.0, %v25535_v18 }
0x4bf8   :  { %25536 = vrcp.f32 %v16154_v56 }
0x4c02   :  { %v25537_v58 = vpop.eup %25536 }
0x4c03   :  { %v16161_v54 = vmul.f32 %v25537_v58, %v16159_v57 }
0x4c66   :  { %v16164_v27 = vpop.permute.xlu1 %16163 }
0x4c67   :  { %v16166_v37 = vmul.f32 %v25537_v58, %v16164_v27 }
0x4c69   :  { %16168 = vrot.lane.b32.xlu0 %v16166_v37, %s25822_s20 }
0x4cdb   :  { %v16169_v8 = vpop.permute.xlu0 %16168 }
0x4cdc   :  { %v27821_v42 = vadd.f32 %v16169_v8, %v16161_v54 }
0x4cde   :  { %25538 = vtanh.f32 %v27821_v42  ;;  %v16685_v60 = vrot.slane %v27821_v42, 6 }
0x4ce8   :  { %v25539_v43 = vpop.eup %25538 }
0x4ce9   :  { %16174 = vrot.lane.b32.xlu1 %v25539_v43, %s25835_s3 }
0x4d5b   :  { %v16175_v53 = vpop.permute.xlu1 %16174 }
0x4d5c   :  { %v27825_v55 = vmul.f32 %v25537_v58, %v16175_v53 }
0x4d5e   :  { %v16183_v24 = vrot.slane %v27825_v55, 2 }
0x4d60   :  { %16184 = vrot.lane.b32.xlu0 %v16183_v24, %s25822_s20 }
0x4dd2   :  { %v16185_v49 = vpop.permute.xlu0 %16184 }
0x4dd3   :  { %v16186_v26 = vsel %vm209_vm1, %v16185_v49, 0 }
0x4dd4   :  { %v16257_v15 = vand.u32 4294901760, %v16186_v26 }
0x4dd6   :  { %v16258_v10 = vsub.f32 %v16186_v26, %v16257_v15 }
0x4dd8   :  { %v16259_v2 = vand.u32 4294901760, %v16258_v10 }
0x4dda   :  { %v16260_v3 = vsub.f32 %v16258_v10, %v16259_v2 }
0x4ddc   :  { %v16261_v40 = vand.u32 4294901760, %v16260_v3 }
0x4dde   :  { %23167 = vmatmul.mubr.f32.vlgmr.msra.gmra.mrb[84].mxu1 %v16261_v40 }
0x4ddf   :  { %24756 = vmatpush3.bf16.msra.mxu1 %v27727_v62  ;;  %23177 = vmatprep.mubr.msk.f32.mxu1 %vm25832_vm0, %v25833_v1 }
0x4de0   :  { %24757 = vmatprep.subr.bf16.mxu1 %v25831_v0 }
0x4de3   :  { %24759 = vmatpush3.bf16.msra.mxu1 %v27731_v12 }
0x4de4   :  { %24760 = vmatprep.subr.bf16.mxu1 %v25831_v0 }
0x4de6   :  { %23178 = vmatmul.mubr.f32.vlgmr.msra.gmra.mrb[84].mxu1 %v16257_v15 }
0x4de7   :  { %24762 = vmatpush3.bf16.msra.mxu1 %v27639_v48  ;;  %23188 = vmatprep.mubr.msk.f32.mxu1 %vm25832_vm0, %v25833_v1 }
0x4de8   :  { %24763 = vmatprep.subr.bf16.mxu1 %v25831_v0 }
0x4deb   :  { %24765 = vmatpush3.bf16.msra.mxu1 %v27644_v52 }
0x4dec   :  { %24766 = vmatprep.subr.bf16.mxu1 %v25831_v0 }
0x4dee   :  { %23189 = vmatmul.mubr.f32.vlgmr.msra.gmra.mrb[84].mxu1 %v16258_v10 }
0x4def   :  { %24768 = vmatpush3.bf16.msra.mxu1 %v27592_v34  ;;  %23199 = vmatprep.mubr.msk.f32.mxu1 %vm25832_vm0, %v25833_v1 }
0x4df0   :  { %24769 = vmatprep.subr.bf16.mxu1 %v25831_v0 }
0x4df3   :  { %24771 = vmatpush3.bf16.msra.mxu1 %v27598_v41 }
0x4df4   :  { %24772 = vmatprep.subr.bf16.mxu1 %v25831_v0 }
0x4df6   :  { %23200 = vmatmul.mubr.f32.vlgmr.msra.gmra.mrb[84].mxu1 %v16259_v2 }
0x4df7   :  { %24774 = vmatpush3.bf16.msra.mxu1 %v27656_v35  ;;  %23210 = vmatprep.mubr.msk.f32.mxu1 %vm25832_vm0, %v25833_v1 }
0x4df8   :  { %24775 = vmatprep.subr.bf16.mxu1 %v25831_v0 }
0x4dfb   :  { %24777 = vmatpush3.bf16.msra.mxu1 %v27667_v39 }
0x4dfc   :  { %24778 = vmatprep.subr.bf16.mxu1 %v25831_v0 }
0x4dfe   :  { %23211 = vmatmul.mubr.f32.vlgmr.msra.gmra.mrb[84].mxu1 %v16257_v15 }
0x4dff   :  { %24780 = vmatpush3.bf16.msra.mxu1 %v27592_v34  ;;  %23221 = vmatprep.mubr.msk.f32.mxu1 %vm25832_vm0, %v25833_v1 }
0x4e00   :  { %24781 = vmatprep.subr.bf16.mxu1 %v25831_v0 }
0x4e03   :  { %24783 = vmatpush3.bf16.msra.mxu1 %v27598_v41 }
0x4e04   :  { %24820 = vmatprep.subr.bf16.mxu1 %v25831_v0 }
0x4e06   :  { %23222 = vmatmul.mubr.f32.vlgmr.msra.gmra.mrb[84].mxu1 %v16257_v15 }
0x4e07   :  { %24822 = vmatpush3.bf16.msra.mxu1 %v27592_v34  ;;  %23298 = vmatprep.mubr.msk.f32.mxu1 %vm25832_vm0, %v25833_v1 }
0x4e08   :  { %24823 = vmatprep.subr.bf16.mxu1 %v25831_v0 }
0x4e0b   :  { %24825 = vmatpush3.bf16.msra.mxu1 %v27598_v41 }
0x4e0c   :  { %24826 = vmatprep.subr.bf16.mxu1 %v25831_v0 }
0x4ed9   :  { %v16669_v5 = vpop.f32.mrb[84].mxu1 }
0x4eda   :  { %v16674_v11 = vrot.slane %v16669_v5, 4  ;;  %v23223_v29 = vpop.f32.mrb[85].mxu1 }
0x4edc   :  { %v16676_v30 = vadd.f32 %v27768_v9, %v16674_v11 }
0x4ede   :  { %25540 = vtanh.f32 %v16676_v30  ;;  %v20031_v32 = vmul.f32 -1.442695, %v16676_v30 }
0x4ee0   :  { %25542 = vpow2.f32 %v20031_v32 }
0x4ee8   :  { %v25541_v46 = vpop.eup %25540 }
0x4ee9   :  { %16689 = vrot.lane.b32.xlu1 %v25541_v46, %s25835_s3 }
0x4eea   :  { %v25543_v50 = vpop.eup %25542 }
0x4eeb   :  { %v16680_v59 = vadd.f32 1.0, %v25543_v50 }
0x4eed   :  { %25544 = vrcp.f32 %v16680_v59 }
0x4ef7   :  { %v25545_v45 = vpop.eup %25544 }
0x4ef8   :  { %v16687_v20 = vmul.f32 %v25545_v45, %v16685_v60 }
0x4f5b   :  { %v16690_v28 = vpop.permute.xlu1 %16689 }
0x4f5c   :  { %v16692_v14 = vmul.f32 %v25545_v45, %v16690_v28 }
0x4f5e   :  { %16694 = vrot.lane.b32.xlu0 %v16692_v14, %s25822_s20 }
0x4fd0   :  { %v16695_v44 = vpop.permute.xlu0 %16694 }
0x4fd1   :  { %v27870_v16 = vadd.f32 %v16695_v44, %v16687_v20 }
0x4fd3   :  { %25546 = vtanh.f32 %v27870_v16  ;;  %v17211_v8 = vrot.slane %v27870_v16, 6 }
0x4fdd   :  { %v25547_v17 = vpop.eup %25546 }
0x4fde   :  { %16700 = vrot.lane.b32.xlu1 %v25547_v17, %s25835_s3 }
0x5050   :  { %v16701_v19 = vpop.permute.xlu1 %16700 }
0x5051   :  { %v27874_v23 = vmul.f32 %v25545_v45, %v16701_v19 }
0x5053   :  { %v16709_v25 = vrot.slane %v27874_v23, 4 }
0x5055   :  { %16710 = vrot.lane.b32.xlu0 %v16709_v25, %s25822_s20 }
0x50c7   :  { %v16711_v51 = vpop.permute.xlu0 %16710 }
0x50c8   :  { %v16712_v61 = vsel %vm209_vm1, %v16711_v51, 0 }
0x50c9   :  { %v16783_v47 = vand.u32 4294901760, %v16712_v61 }
0x50cb   :  { %v16784_v7 = vsub.f32 %v16712_v61, %v16783_v47 }
0x50cd   :  { %v16785_v36 = vand.u32 4294901760, %v16784_v7 }
0x50cf   :  { %v16786_v33 = vsub.f32 %v16784_v7, %v16785_v36 }
0x50d1   :  { %v16787_v38 = vand.u32 4294901760, %v16786_v33 }
0x50d3   :  { %23233 = vmatmul.mubr.f32.vlgmr.msra.gmra.mrb[46].mxu0 %v16787_v38 }
0x50d4   :  { %24792 = vmatpush3.bf16.msra.mxu0 %v27727_v62  ;;  %23243 = vmatprep.mubr.msk.f32.mxu0 %vm25832_vm0, %v25833_v1 }
0x50d5   :  { %24793 = vmatprep.subr.bf16.mxu0 %v25831_v0 }
0x50d8   :  { %24795 = vmatpush3.bf16.msra.mxu0 %v27731_v12 }
0x50d9   :  { %24796 = vmatprep.subr.bf16.mxu0 %v25831_v0 }
0x50db   :  { %23244 = vmatmul.mubr.f32.vlgmr.msra.gmra.mrb[46].mxu0 %v16783_v47 }
0x50dc   :  { %24798 = vmatpush3.bf16.msra.mxu0 %v27639_v48  ;;  %23254 = vmatprep.mubr.msk.f32.mxu0 %vm25832_vm0, %v25833_v1 }
0x50dd   :  { %24799 = vmatprep.subr.bf16.mxu0 %v25831_v0 }
0x50e0   :  { %24801 = vmatpush3.bf16.msra.mxu0 %v27644_v52 }
0x50e1   :  { %24802 = vmatprep.subr.bf16.mxu0 %v25831_v0 }
0x50e3   :  { %23255 = vmatmul.mubr.f32.vlgmr.msra.gmra.mrb[46].mxu0 %v16784_v7 }
0x50e4   :  { %24804 = vmatpush3.bf16.msra.mxu0 %v27592_v34  ;;  %23265 = vmatprep.mubr.msk.f32.mxu0 %vm25832_vm0, %v25833_v1 }
0x50e5   :  { %24805 = vmatprep.subr.bf16.mxu0 %v25831_v0 }
0x50e8   :  { %24807 = vmatpush3.bf16.msra.mxu0 %v27598_v41 }
0x50e9   :  { %24808 = vmatprep.subr.bf16.mxu0 %v25831_v0 }
0x50eb   :  { %23266 = vmatmul.mubr.f32.vlgmr.msra.gmra.mrb[46].mxu0 %v16785_v36 }
0x50ec   :  { %24810 = vmatpush3.bf16.msra.mxu0 %v27656_v35  ;;  %23276 = vmatprep.mubr.msk.f32.mxu0 %vm25832_vm0, %v25833_v1 }
0x50ed   :  { %24811 = vmatprep.subr.bf16.mxu0 %v25831_v0 }
0x50f0   :  { %24813 = vmatpush3.bf16.msra.mxu0 %v27667_v39 }
0x50f1   :  { %24814 = vmatprep.subr.bf16.mxu0 %v25831_v0 }
0x50f3   :  { %23277 = vmatmul.mubr.f32.vlgmr.msra.gmra.mrb[46].mxu0 %v16783_v47 }
0x50f4   :  { %24816 = vmatpush3.bf16.msra.mxu0 %v27592_v34  ;;  %23287 = vmatprep.mubr.msk.f32.mxu0 %vm25832_vm0, %v25833_v1 }
0x50f5   :  { %24817 = vmatprep.subr.bf16.mxu0 %v25831_v0 }
0x50f8   :  { %24819 = vmatpush3.bf16.msra.mxu0 %v27598_v41 }
0x50f9   :  { %24856 = vmatprep.subr.bf16.mxu0 %v25831_v0 }
0x50fb   :  { %23288 = vmatmul.mubr.f32.vlgmr.msra.gmra.mrb[46].mxu0 %v16783_v47 }
0x50fc   :  { %24858 = vmatpush3.bf16.msra.mxu0 %v27592_v34  ;;  %23364 = vmatprep.mubr.msk.f32.mxu0 %vm25832_vm0, %v25833_v1 }
0x50fd   :  { %24859 = vmatprep.subr.bf16.mxu0 %v25831_v0 }
0x5100   :  { %24861 = vmatpush3.bf16.msra.mxu0 %v27598_v41 }
0x5101   :  { %24862 = vmatprep.subr.bf16.mxu0 %v25831_v0 }
0x51ce   :  { %v17195_v22 = vpop.f32.mrb[46].mxu0 }
0x51cf   :  { %v17200_v4 = vrot.slane %v17195_v22, 2  ;;  %v23289_v13 = vpop.f32.mrb[47].mxu0 }
0x51d1   :  { %v17202_v6 = vadd.f32 %v27768_v9, %v17200_v4 }
0x51d3   :  { %25548 = vtanh.f32 %v17202_v6  ;;  %v20032_v56 = vmul.f32 -1.442695, %v17202_v6 }
0x51d5   :  { %25550 = vpow2.f32 %v20032_v56 }
0x51dd   :  { %v25549_v18 = vpop.eup %25548 }
0x51de   :  { %17215 = vrot.lane.b32.xlu1 %v25549_v18, %s25835_s3 }
0x51df   :  { %v25551_v58 = vpop.eup %25550 }
0x51e0   :  { %v17206_v27 = vadd.f32 1.0, %v25551_v58 }
0x51e2   :  { %25552 = vrcp.f32 %v17206_v27 }
0x51ec   :  { %v25553_v37 = vpop.eup %25552 }
0x51ed   :  { %v17213_v42 = vmul.f32 %v25553_v37, %v17211_v8 }
0x5250   :  { %v17216_v57 = vpop.permute.xlu1 %17215 }
0x5251   :  { %v17218_v54 = vmul.f32 %v25553_v37, %v17216_v57 }
0x5253   :  { %17220 = vrot.lane.b32.xlu0 %v17218_v54, %s25822_s20 }
0x52c5   :  { %v17221_v43 = vpop.permute.xlu0 %17220 }
0x52c6   :  { %v27919_v53 = vadd.f32 %v17221_v43, %v17213_v42 }
0x52c8   :  { %25554 = vtanh.f32 %v27919_v53  ;;  %v17734_v13 = vrot.slane %v27919_v53, 6 }
0x52d2   :  { %v25555_v9 = vpop.eup %25554 }
0x52d3   :  { %17226 = vrot.lane.b32.xlu1 %v25555_v9, %s25835_s3 }
0x5345   :  { %v17227_v24 = vpop.permute.xlu1 %17226 }
0x5346   :  { %v27923_v49 = vmul.f32 %v25553_v37, %v17227_v24 }
0x5348   :  { %v17235_v26 = vrot.slane %v27923_v49, 6 }
0x534a   :  { %17236 = vrot.lane.b32.xlu0 %v17235_v26, %s25822_s20 }
0x53bc   :  { %v17237_v15 = vpop.permute.xlu0 %17236 }
0x53bd   :  { %v17238_v10 = vsel %vm209_vm1, %v17237_v15, 0 }
0x53be   :  { %v17309_v2 = vand.u32 4294901760, %v17238_v10 }
0x53c0   :  { %v17310_v3 = vsub.f32 %v17238_v10, %v17309_v2 }
0x53c2   :  { %v17311_v40 = vand.u32 4294901760, %v17310_v3 }
0x53c4   :  { %v17312_v5 = vsub.f32 %v17310_v3, %v17311_v40 }
0x53c6   :  { %v17313_v11 = vand.u32 4294901760, %v17312_v5 }
0x53c8   :  { %23299 = vmatmul.mubr.f32.vlgmr.msra.gmra.mrb[86].mxu1 %v17313_v11 }
0x53c9   :  { %24828 = vmatpush3.bf16.msra.mxu1 %v27727_v62  ;;  %23309 = vmatprep.mubr.msk.f32.mxu1 %vm25832_vm0, %v25833_v1 }
0x53ca   :  { %24829 = vmatprep.subr.bf16.mxu1 %v25831_v0 }
0x53cd   :  { %24831 = vmatpush3.bf16.msra.mxu1 %v27731_v12 }
0x53ce   :  { %24832 = vmatprep.subr.bf16.mxu1 %v25831_v0 }
0x53d0   :  { %23310 = vmatmul.mubr.f32.vlgmr.msra.gmra.mrb[88].mxu1 %v17309_v2 }
0x53d1   :  { %24834 = vmatpush3.bf16.msra.mxu1 %v27639_v48  ;;  %23320 = vmatprep.mubr.msk.f32.mxu1 %vm25832_vm0, %v25833_v1 }
0x53d2   :  { %24835 = vmatprep.subr.bf16.mxu1 %v25831_v0 }
0x53d5   :  { %24837 = vmatpush3.bf16.msra.mxu1 %v27644_v52 }
0x53d6   :  { %24838 = vmatprep.subr.bf16.mxu1 %v25831_v0 }
0x53d8   :  { %23321 = vmatmul.mubr.f32.vlgmr.msra.gmra.mrb[90].mxu1 %v17310_v3 }
0x53d9   :  { %24840 = vmatpush3.bf16.msra.mxu1 %v27592_v34  ;;  %23331 = vmatprep.mubr.msk.f32.mxu1 %vm25832_vm0, %v25833_v1 }
0x53da   :  { %24841 = vmatprep.subr.bf16.mxu1 %v25831_v0 }
0x53dd   :  { %24843 = vmatpush3.bf16.msra.mxu1 %v27598_v41 }
0x53de   :  { %24844 = vmatprep.subr.bf16.mxu1 %v25831_v0 }
0x53e0   :  { %23332 = vmatmul.mubr.f32.vlgmr.msra.gmra.mrb[92].mxu1 %v17311_v40 }
0x53e1   :  { %24846 = vmatpush3.bf16.msra.mxu1 %v27656_v35  ;;  %23342 = vmatprep.mubr.msk.f32.mxu1 %vm25832_vm0, %v25833_v1 }
0x53e2   :  { %24847 = vmatprep.subr.bf16.mxu1 %v25831_v0 }
0x53e5   :  { %24849 = vmatpush3.bf16.msra.mxu1 %v27667_v39 }
0x53e6   :  { %24850 = vmatprep.subr.bf16.mxu1 %v25831_v0 }
0x53e8   :  { %23343 = vmatmul.mubr.f32.vlgmr.msra.gmra.mrb[94].mxu1 %v17309_v2 }
0x53e9   :  { %24852 = vmatpush3.bf16.msra.mxu1 %v27592_v34  ;;  %23353 = vmatprep.mubr.msk.f32.mxu1 %vm25832_vm0, %v25833_v1 }
0x53ea   :  { %24853 = vmatprep.subr.bf16.mxu1 %v25831_v0 }
0x53ed   :  { %24855 = vmatpush3.bf16.msra.mxu1 %v27598_v41 }
0x53ee   :  { %24892 = vmatprep.subr.bf16.mxu1 %v25831_v0 }
0x53f0   :  { %23354 = vmatmul.mubr.f32.vlgmr.msra.gmra.mrb[96].mxu1 %v17309_v2 }
0x53f1   :  { %24894 = vmatpush3.bf16.msra.mxu1 %v27592_v34  ;;  %23430 = vmatprep.mubr.msk.f32.mxu1 %vm25832_vm0, %v25833_v1 }
0x53f2   :  { %24895 = vmatprep.subr.bf16.mxu1 %v25831_v0 }
0x53f5   :  { %24897 = vmatpush3.bf16.msra.mxu1 %v27598_v41 }
0x53f6   :  { %24898 = vmatprep.subr.bf16.mxu1 %v25831_v0 }
0x549b   :  { %v17315_v29 = vpop.f32.mrb[86].mxu1 }
0x549c   :  { %v23300_v30 = vpop.f32.mrb[87].mxu1 }
0x54a3   :  { %v17406_v46 = vpop.f32.mrb[88].mxu1 }
0x54a4   :  { %v17407_v32 = vadd.f32 %v17406_v46, %v17315_v29  ;;  %v23311_v50 = vpop.f32.mrb[89].mxu1 }
0x54ab   :  { %v17486_v59 = vpop.f32.mrb[90].mxu1 }
0x54ac   :  { %v17487_v45 = vadd.f32 %v17486_v59, %v17407_v32  ;;  %v23322_v28 = vpop.f32.mrb[91].mxu1 }
0x54b3   :  { %v17563_v14 = vpop.f32.mrb[92].mxu1 }
0x54b4   :  { %v17564_v60 = vadd.f32 %v17563_v14, %v17487_v45  ;;  %v23333_v20 = vpop.f32.mrb[93].mxu1 }
0x54bb   :  { %v17646_v44 = vpop.f32.mrb[94].mxu1 }
0x54bc   :  { %v17647_v16 = vadd.f32 %v17646_v44, %v17564_v60  ;;  %v23344_v17 = vpop.f32.mrb[95].mxu1 }
0x54c3   :  { %v17721_v19 = vpop.f32.mrb[96].mxu1 }
0x54c4   :  { %v17722_v25 = vadd.f32 %v17721_v19, %v17647_v16  ;;  %v23355_v51 = vpop.f32.mrb[97].mxu1 }
0x54c6   :  { %v17725_v61 = vadd.f32 %v27763_v63, %v17722_v25 }
0x54c8   :  { %25556 = vtanh.f32 %v17725_v61  ;;  %v20033_v7 = vmul.f32 -1.442695, %v17725_v61 }
0x54ca   :  { %25558 = vpow2.f32 %v20033_v7 }
0x54d2   :  { %v25557_v47 = vpop.eup %25556 }
0x54d3   :  { %17738 = vrot.lane.b32.xlu1 %v25557_v47, %s25835_s3 }
0x54d4   :  { %v25559_v36 = vpop.eup %25558 }
0x54d5   :  { %v17729_v33 = vadd.f32 1.0, %v25559_v36 }
0x54d7   :  { %25560 = vrcp.f32 %v17729_v33 }
0x54e1   :  { %v25561_v38 = vpop.eup %25560 }
0x54e2   :  { %v17736_v6 = vmul.f32 %v25561_v38, %v17734_v13 }
0x5545   :  { %v17739_v22 = vpop.permute.xlu1 %17738 }
0x5546   :  { %v17741_v4 = vmul.f32 %v25561_v38, %v17739_v22 }
0x5548   :  { %17743 = vrot.lane.b32.xlu0 %v17741_v4, %s25822_s20 }
0x55ba   :  { %v17744_v18 = vpop.permute.xlu0 %17743 }
0x55bb   :  { %v27968_v56 = vadd.f32 %v17744_v18, %v17736_v6 }
0x55bd   :  { %25562 = vtanh.f32 %v27968_v56  ;;  %v18257_v46 = vrot.slane %v27968_v56, 6 }
0x55c7   :  { %v25563_v58 = vpop.eup %25562 }
0x55c8   :  { %17749 = vrot.lane.b32.xlu1 %v25563_v58, %s25835_s3 }
0x563a   :  { %v17750_v27 = vpop.permute.xlu1 %17749 }
0x563b   :  { %v17752_v37 = vmul.f32 %v25561_v38, %v17750_v27 }
0x563d   :  { %17754 = vrot.lane.b32.xlu0 %v17752_v37, %s25822_s20 }
0x56af   :  { %v17755_v57 = vpop.permute.xlu0 %17754 }
0x56b0   :  { %17757 = vst.msk [vmem:[#allocation3 + $0x8] sm:$0x3] %vm1263_vm2, %v17755_v57  ;;  %v17758_v54 = vsel %vm209_vm1, %v17755_v57, 0 }
0x56b1   :  { %v17829_v8 = vand.u32 4294901760, %v17758_v54 }
0x56b3   :  { %v17830_v42 = vsub.f32 %v17758_v54, %v17829_v8 }
0x56b5   :  { %v17831_v43 = vand.u32 4294901760, %v17830_v42 }
0x56b7   :  { %v17832_v53 = vsub.f32 %v17830_v42, %v17831_v43 }
0x56b9   :  { %v17833_v9 = vand.u32 4294901760, %v17832_v53 }
0x56bb   :  { %23365 = vmatmul.mubr.f32.vlgmr.msra.gmra.mrb[48].mxu0 %v17833_v9 }
0x56bc   :  { %24864 = vmatpush3.bf16.msra.mxu0 %v27727_v62  ;;  %23375 = vmatprep.mubr.msk.f32.mxu0 %vm25832_vm0, %v25833_v1 }
0x56bd   :  { %24865 = vmatprep.subr.bf16.mxu0 %v25831_v0 }
0x56c0   :  { %24867 = vmatpush3.bf16.msra.mxu0 %v27731_v12 }
0x56c1   :  { %24868 = vmatprep.subr.bf16.mxu0 %v25831_v0 }
0x56c3   :  { %23376 = vmatmul.mubr.f32.vlgmr.msra.gmra.mrb[48].mxu0 %v17829_v8 }
0x56c4   :  { %24870 = vmatpush3.bf16.msra.mxu0 %v27639_v48  ;;  %23386 = vmatprep.mubr.msk.f32.mxu0 %vm25832_vm0, %v25833_v1 }
0x56c5   :  { %24871 = vmatprep.subr.bf16.mxu0 %v25831_v0 }
0x56c8   :  { %24873 = vmatpush3.bf16.msra.mxu0 %v27644_v52 }
0x56c9   :  { %24874 = vmatprep.subr.bf16.mxu0 %v25831_v0 }
0x56cb   :  { %23387 = vmatmul.mubr.f32.vlgmr.msra.gmra.mrb[48].mxu0 %v17830_v42 }
0x56cc   :  { %24876 = vmatpush3.bf16.msra.mxu0 %v27592_v34  ;;  %23397 = vmatprep.mubr.msk.f32.mxu0 %vm25832_vm0, %v25833_v1 }
0x56cd   :  { %24877 = vmatprep.subr.bf16.mxu0 %v25831_v0 }
0x56d0   :  { %24879 = vmatpush3.bf16.msra.mxu0 %v27598_v41 }
0x56d1   :  { %24880 = vmatprep.subr.bf16.mxu0 %v25831_v0 }
0x56d3   :  { %23398 = vmatmul.mubr.f32.vlgmr.msra.gmra.mrb[48].mxu0 %v17831_v43 }
0x56d4   :  { %24882 = vmatpush3.bf16.msra.mxu0 %v27656_v35  ;;  %23408 = vmatprep.mubr.msk.f32.mxu0 %vm25832_vm0, %v25833_v1 }
0x56d5   :  { %24883 = vmatprep.subr.bf16.mxu0 %v25831_v0 }
0x56d8   :  { %24885 = vmatpush3.bf16.msra.mxu0 %v27667_v39 }
0x56d9   :  { %24886 = vmatprep.subr.bf16.mxu0 %v25831_v0 }
0x56db   :  { %23409 = vmatmul.mubr.f32.vlgmr.msra.gmra.mrb[48].mxu0 %v17829_v8 }
0x56dc   :  { %24888 = vmatpush3.bf16.msra.mxu0 %v27592_v34  ;;  %23419 = vmatprep.mubr.msk.f32.mxu0 %vm25832_vm0, %v25833_v1 }
0x56dd   :  { %24889 = vmatprep.subr.bf16.mxu0 %v25831_v0 }
0x56e0   :  { %24891 = vmatpush3.bf16.msra.mxu0 %v27598_v41 }
0x56e1   :  { %24928 = vmatprep.subr.bf16.mxu0 %v25831_v0 }
0x56e3   :  { %23420 = vmatmul.mubr.f32.vlgmr.msra.gmra.mrb[48].mxu0 %v17829_v8 }
0x56e4   :  { %24930 = vmatpush3.bf16.msra.mxu0 %v27592_v34  ;;  %23496 = vmatprep.mubr.msk.f32.mxu0 %vm25832_vm0, %v25833_v1 }
0x56e5   :  { %24931 = vmatprep.subr.bf16.mxu0 %v25831_v0 }
0x56e8   :  { %24933 = vmatpush3.bf16.msra.mxu0 %v27598_v41 }
0x56e9   :  { %24934 = vmatprep.subr.bf16.mxu0 %v25831_v0 }
0x57b6   :  { %v18241_v24 = vpop.f32.mrb[48].mxu0 }
0x57b7   :  { %v18246_v26 = vrot.slane %v18241_v24, 6  ;;  %v23421_v15 = vpop.f32.mrb[49].mxu0 }
0x57b9   :  { %v18248_v10 = vadd.f32 %v27763_v63, %v18246_v26 }
0x57bb   :  { %25564 = vtanh.f32 %v18248_v10  ;;  %v20034_v3 = vmul.f32 -1.442695, %v18248_v10 }
0x57bd   :  { %25566 = vpow2.f32 %v20034_v3 }
0x57c5   :  { %v25565_v2 = vpop.eup %25564 }
0x57c6   :  { %18261 = vrot.lane.b32.xlu1 %v25565_v2, %s25835_s3 }
0x57c7   :  { %v25567_v40 = vpop.eup %25566 }
0x57c8   :  { %v18252_v5 = vadd.f32 1.0, %v25567_v40 }
0x57ca   :  { %25568 = vrcp.f32 %v18252_v5 }
0x57d4   :  { %v25569_v11 = vpop.eup %25568 }
0x57d5   :  { %v18259_v32 = vmul.f32 %v25569_v11, %v18257_v46  ;;  %v19350_v46 = vld [vmem:[%s28210_s9 + $0x8] sm:$0xff] }
0x5838   :  { %v18262_v29 = vpop.permute.xlu1 %18261 }
0x5839   :  { %v18264_v30 = vmul.f32 %v25569_v11, %v18262_v29 }
0x583b   :  { %18266 = vrot.lane.b32.xlu0 %v18264_v30, %s25822_s20 }
0x58ad   :  { %v18267_v50 = vpop.permute.xlu0 %18266 }
0x58ae   :  { %v28015_v59 = vadd.f32 %v18267_v50, %v18259_v32  ;;  %v19351_v32 = vld [vmem:[%s28210_s9 + $0x10] sm:$0xff] }
0x58b0   :  { %25570 = vtanh.f32 %v28015_v59  ;;  %v18783_v56 = vrot.slane %v28015_v59, 6  ;;  %v19410_v59 = vand.u32 4294901760, %v19350_v46 }
0x58ba   :  { %v25571_v45 = vpop.eup %25570 }
0x58bb   :  { %18272 = vrot.lane.b32.xlu1 %v25571_v45, %s25835_s3  ;;  %v19413_v45 = vand.u32 4294901760, %v19351_v32 }
0x592d   :  { %v18273_v28 = vpop.permute.xlu1 %18272 }
0x592e   :  { %v28019_v14 = vmul.f32 %v25569_v11, %v18273_v28 }
0x5930   :  { %v18281_v60 = vrot.slane %v28019_v14, 2 }
0x5932   :  { %18282 = vrot.lane.b32.xlu0 %v18281_v60, %s25822_s20 }
0x59a4   :  { %v18283_v20 = vpop.permute.xlu0 %18282 }
0x59a5   :  { %v18284_v44 = vsel %vm209_vm1, %v18283_v20, 0  ;;  %v19504_v20 = vsub.f32 %v19350_v46, %v19410_v59 }
0x59a6   :  { %v18355_v16 = vand.u32 4294901760, %v18284_v44 }
0x59a8   :  { %v18356_v17 = vsub.f32 %v18284_v44, %v18355_v16 }
0x59aa   :  { %v18357_v19 = vand.u32 4294901760, %v18356_v17 }
0x59ac   :  { %v18358_v25 = vsub.f32 %v18356_v17, %v18357_v19 }
0x59ae   :  { %v18359_v51 = vand.u32 4294901760, %v18358_v25 }
0x59b0   :  { %23431 = vmatmul.mubr.f32.vlgmr.msra.gmra.mrb[98].mxu1 %v18359_v51 }
0x59b1   :  { %24900 = vmatpush3.bf16.msra.mxu1 %v27727_v62  ;;  %23441 = vmatprep.mubr.msk.f32.mxu1 %vm25832_vm0, %v25833_v1 }
0x59b2   :  { %24901 = vmatprep.subr.bf16.mxu1 %v25831_v0 }
0x59b5   :  { %24903 = vmatpush3.bf16.msra.mxu1 %v27731_v12 }
0x59b6   :  { %24904 = vmatprep.subr.bf16.mxu1 %v25831_v0 }
0x59b8   :  { %23442 = vmatmul.mubr.f32.vlgmr.msra.gmra.mrb[98].mxu1 %v18355_v16 }
0x59b9   :  { %24906 = vmatpush3.bf16.msra.mxu1 %v27639_v48  ;;  %23452 = vmatprep.mubr.msk.f32.mxu1 %vm25832_vm0, %v25833_v1 }
0x59ba   :  { %24907 = vmatprep.subr.bf16.mxu1 %v25831_v0 }
0x59bd   :  { %24909 = vmatpush3.bf16.msra.mxu1 %v27644_v52 }
0x59be   :  { %24910 = vmatprep.subr.bf16.mxu1 %v25831_v0 }
0x59c0   :  { %23453 = vmatmul.mubr.f32.vlgmr.msra.gmra.mrb[98].mxu1 %v18356_v17  ;;  %v19505_v17 = vand.u32 4294901760, %v19504_v20 }
0x59c1   :  { %24912 = vmatpush3.bf16.msra.mxu1 %v27592_v34  ;;  %23463 = vmatprep.mubr.msk.f32.mxu1 %vm25832_vm0, %v25833_v1 }
0x59c2   :  { %24913 = vmatprep.subr.bf16.mxu1 %v25831_v0 }
0x59c5   :  { %24915 = vmatpush3.bf16.msra.mxu1 %v27598_v41 }
0x59c6   :  { %24916 = vmatprep.subr.bf16.mxu1 %v25831_v0 }
0x59c8   :  { %23464 = vmatmul.mubr.f32.vlgmr.msra.gmra.mrb[98].mxu1 %v18357_v19 }
0x59c9   :  { %24918 = vmatpush3.bf16.msra.mxu1 %v27656_v35  ;;  %23474 = vmatprep.mubr.msk.f32.mxu1 %vm25832_vm0, %v25833_v1 }
0x59ca   :  { %24919 = vmatprep.subr.bf16.mxu1 %v25831_v0 }
0x59cd   :  { %24921 = vmatpush3.bf16.msra.mxu1 %v27667_v39 }
0x59ce   :  { %24922 = vmatprep.subr.bf16.mxu1 %v25831_v0 }
0x59d0   :  { %23475 = vmatmul.mubr.f32.vlgmr.msra.gmra.mrb[98].mxu1 %v18355_v16 }
0x59d1   :  { %24924 = vmatpush3.bf16.msra.mxu1 %v27592_v34  ;;  %23485 = vmatprep.mubr.msk.f32.mxu1 %vm25832_vm0, %v25833_v1 }
0x59d2   :  { %24925 = vmatprep.subr.bf16.mxu1 %v25831_v0 }
0x59d5   :  { %24927 = vmatpush3.bf16.msra.mxu1 %v27598_v41 }
0x59d8   :  { %23486 = vmatmul.mubr.f32.vlgmr.msra.gmra.mrb[98].mxu1 %v18355_v16 }
0x5aab   :  { %v18767_v61 = vpop.f32.mrb[98].mxu1 }
0x5aac   :  { %v18772_v47 = vrot.slane %v18767_v61, 4  ;;  %v23487_v7 = vpop.f32.mrb[99].mxu1  ;;  %v19506_v61 = vsub.f32 %v19504_v20, %v19505_v17 }
0x5aae   :  { %v18774_v36 = vadd.f32 %v27763_v63, %v18772_v47  ;;  %v19507_v7 = vand.u32 4294901760, %v19506_v61 }
0x5ab0   :  { %25572 = vtanh.f32 %v18774_v36  ;;  %v20035_v38 = vmul.f32 -1.442695, %v18774_v36 }
0x5ab2   :  { %25574 = vpow2.f32 %v20035_v38 }
0x5aba   :  { %v25573_v33 = vpop.eup %25572 }
0x5abb   :  { %18787 = vrot.lane.b32.xlu1 %v25573_v33, %s25835_s3 }
0x5abc   :  { %v25575_v22 = vpop.eup %25574 }
0x5abd   :  { %v18778_v4 = vadd.f32 1.0, %v25575_v22  ;;  %v19333_v22 = vld [vmem:[#allocation3] sm:$0x3] }
0x5abf   :  { %25576 = vrcp.f32 %v18778_v4 }
0x5ac9   :  { %v25577_v13 = vpop.eup %25576 }
0x5aca   :  { %v18785_v58 = vmul.f32 %v25577_v13, %v18783_v56  ;;  %v19511_v56 = vsub.f32 %v19351_v32, %v19413_v45 }
0x5b2d   :  { %v18788_v6 = vpop.permute.xlu1 %18787 }
0x5b2e   :  { %v18790_v18 = vmul.f32 %v25577_v13, %v18788_v6 }
0x5b30   :  { %18792 = vrot.lane.b32.xlu0 %v18790_v18, %s25822_s20  ;;  %v19341_v18 = vmax.f32 %v19333_v22, 0.0 }
0x5ba2   :  { %v18793_v27 = vpop.permute.xlu0 %18792 }
0x5ba3   :  { %v28057_v37 = vadd.f32 %v18793_v27, %v18785_v58 }
0x5ba5   :  { %25578 = vtanh.f32 %v28057_v37 }
0x5baf   :  { %v25579_v57 = vpop.eup %25578 }
0x5bb0   :  { %18798 = vrot.lane.b32.xlu1 %v25579_v57, %s25835_s3 }
0x5c22   :  { %v18799_v54 = vpop.permute.xlu1 %18798 }
0x5c23   :  { %v18801_v8 = vmul.f32 %v25577_v13, %v18799_v54 }
0x5c25   :  { %v18807_v42 = vrot.slane %v18801_v8, 4 }
0x5c27   :  { %18808 = vrot.lane.b32.xlu0 %v18807_v42, %s25822_s20 }
0x5c99   :  { %v18809_v43 = vpop.permute.xlu0 %18808 }
0x5c9a   :  { %v18810_v53 = vsel %vm209_vm1, %v18809_v43, 0 }
0x5c9b   :  { %v18881_v9 = vand.u32 4294901760, %v18810_v53 }
0x5c9d   :  { %v18882_v24 = vsub.f32 %v18810_v53, %v18881_v9 }
0x5c9f   :  { %v18883_v26 = vand.u32 4294901760, %v18882_v24 }
0x5ca1   :  { %v18884_v15 = vsub.f32 %v18882_v24, %v18883_v26 }
0x5ca3   :  { %v18885_v10 = vand.u32 4294901760, %v18884_v15 }
0x5ca5   :  { %23497 = vmatmul.mubr.f32.vlgmr.msra.gmra.mrb[50].mxu0 %v18885_v10 }
0x5ca6   :  { %24936 = vmatpush3.bf16.msra.mxu0 %v27727_v62  ;;  %23507 = vmatprep.mubr.msk.f32.mxu0 %vm25832_vm0, %v25833_v1 }
0x5ca7   :  { %24937 = vmatprep.subr.bf16.mxu0 %v25831_v0 }
0x5caa   :  { %24939 = vmatpush3.bf16.msra.mxu0 %v27731_v12 }
0x5cab   :  { %24940 = vmatprep.subr.bf16.mxu0 %v25831_v0 }
0x5cad   :  { %23508 = vmatmul.mubr.f32.vlgmr.msra.gmra.mrb[50].mxu0 %v18881_v9 }
0x5cae   :  { %24942 = vmatpush3.bf16.msra.mxu0 %v27639_v48  ;;  %23518 = vmatprep.mubr.msk.f32.mxu0 %vm25832_vm0, %v25833_v1 }
0x5caf   :  { %24943 = vmatprep.subr.bf16.mxu0 %v25831_v0 }
0x5cb2   :  { %24945 = vmatpush3.bf16.msra.mxu0 %v27644_v52 }
0x5cb3   :  { %24946 = vmatprep.subr.bf16.mxu0 %v25831_v0 }
0x5cb5   :  { %23519 = vmatmul.mubr.f32.vlgmr.msra.gmra.mrb[50].mxu0 %v18882_v24 }
0x5cb6   :  { %24948 = vmatpush3.bf16.msra.mxu0 %v27592_v34  ;;  %23529 = vmatprep.mubr.msk.f32.mxu0 %vm25832_vm0, %v25833_v1 }
0x5cb7   :  { %24949 = vmatprep.subr.bf16.mxu0 %v25831_v0 }
0x5cba   :  { %24951 = vmatpush3.bf16.msra.mxu0 %v27598_v41 }
0x5cbb   :  { %24952 = vmatprep.subr.bf16.mxu0 %v25831_v0 }
0x5cbd   :  { %23530 = vmatmul.mubr.f32.vlgmr.msra.gmra.mrb[50].mxu0 %v18883_v26 }
0x5cbe   :  { %24954 = vmatpush3.bf16.msra.mxu0 %v27656_v35  ;;  %23540 = vmatprep.mubr.msk.f32.mxu0 %vm25832_vm0, %v25833_v1 }
0x5cbf   :  { %24955 = vmatprep.subr.bf16.mxu0 %v25831_v0 }
0x5cc2   :  { %24957 = vmatpush3.bf16.msra.mxu0 %v27667_v39 }
0x5cc3   :  { %24958 = vmatprep.subr.bf16.mxu0 %v25831_v0 }
0x5cc5   :  { %23541 = vmatmul.mubr.f32.vlgmr.msra.gmra.mrb[50].mxu0 %v18881_v9 }
0x5cc6   :  { %24960 = vmatpush3.bf16.msra.mxu0 %v27592_v34  ;;  %23551 = vmatprep.mubr.msk.f32.mxu0 %vm25832_vm0, %v25833_v1 }
0x5cc7   :  { %24961 = vmatprep.subr.bf16.mxu0 %v25831_v0 }
0x5cca   :  { %24963 = vmatpush3.bf16.msra.mxu0 %v27598_v41  ;;  %v19309_v41 = vrot.slane %v28057_v37, 6 }
0x5ccd   :  { %23552 = vmatmul.mubr.f32.vlgmr.msra.gmra.mrb[50].mxu0 %v18881_v9 }
0x5da0   :  { %v19293_v48 = vpop.f32.mrb[50].mxu0 }
0x5da1   :  { %v19298_v52 = vrot.slane %v19293_v48, 2  ;;  %v23553_v35 = vpop.f32.mrb[51].mxu0 }
0x5da3   :  { %v19300_v62 = vadd.f32 %v27763_v63, %v19298_v52 }
0x5da5   :  { %25580 = vtanh.f32 %v19300_v62  ;;  %v20036_v12 = vmul.f32 -1.442695, %v19300_v62 }
0x5da7   :  { %25582 = vpow2.f32 %v20036_v12 }
0x5daf   :  { %v25581_v39 = vpop.eup %25580 }
0x5db0   :  { %19313 = vrot.lane.b32.xlu1 %v25581_v39, %s25835_s3 }
0x5db1   :  { %v25583_v34 = vpop.eup %25582 }
0x5db2   :  { %v19304_v2 = vadd.f32 1.0, %v25583_v34 }
0x5db4   :  { %25584 = vrcp.f32 %v19304_v2 }
0x5dbe   :  { %v25585_v1 = vpop.eup %25584 }
0x5dbf   :  { %v19311_v63 = vmul.f32 %v25585_v1, %v19309_v41 }
0x5e22   :  { %v19314_v3 = vpop.permute.xlu1 %19313 }
0x5e23   :  { %v19316_v0 = vmul.f32 %v25585_v1, %v19314_v3 }
0x5e25   :  { %19318 = vrot.lane.b32.xlu0 %v19316_v0, %s25822_s20 }
0x5e29   :  { %16179 = vrot.lane.b32.xlu0 %v27825_v55, %s25822_s20 }
0x5e2d   :  { %17231 = vrot.lane.b32.xlu0 %v27923_v49, %s25822_s20 }
0x5e31   :  { %18803 = vrot.lane.b32.xlu0 %v18801_v8, %s25822_s20  ;;  %v19512_v8 = vand.u32 4294901760, %v19511_v56 }
0x5e33   :  { %v19513_v53 = vsub.f32 %v19511_v56, %v19512_v8 }
0x5e35   :  { %19938 = vrot.lane.b32.xlu0 %v27616_v31, %s25836_s8  ;;  %v19349_v31 = vld [vmem:[%s28210_s9] sm:$0xff]  ;;  %v19514_v15 = vand.u32 4294901760, %v19513_v53 }
0x5e36   :  { %v19407_v50 = vand.u32 4294901760, %v19349_v31 }
0x5e38   :  { %v19497_v60 = vsub.f32 %v19349_v31, %v19407_v50 }
0x5e3a   :  { %v19498_v16 = vand.u32 4294901760, %v19497_v60  ;;  %v24980_v39 = vpack.c.bf16 %v19504_v20, %v19497_v60 }
0x5e3c   :  { %v19499_v51 = vsub.f32 %v19497_v60, %v19498_v16  ;;  %v24996_v0 = vpack.c.bf16 %v19505_v17, %v19498_v16 }
0x5e3e   :  { %v19500_v47 = vand.u32 4294901760, %v19499_v51 }
0x5e40   :  { %v24972_v38 = vpack.c.bf16 %v19507_v7, %v19500_v47 }
0x5e97   :  { %v19319_v40 = vpop.permute.xlu0 %19318 }
0x5e98   :  { %v19321_v5 = vadd.f32 %v19319_v40, %v19311_v63 }
0x5e9a   :  { %25586 = vtanh.f32 %v19321_v5 }
0x5e9b   :  { %v16180_v11 = vpop.permute.xlu0 %16179 }
0x5e9c   :  { %16182 = vst.msk [vmem:[#allocation3] sm:$0xc] %vm1788_vm3, %v16180_v11  ;;  %v19337_v11 = vld [vmem:[#allocation3 + $0x8] sm:$0x3] }
0x5e9f   :  { %v17232_v29 = vpop.permute.xlu0 %17231 }
0x5ea0   :  { %17234 = vst.msk [vmem:[#allocation3] sm:$0xc0] %vm2844_vm4, %v17232_v29 }
0x5ea3   :  { %v18804_v55 = vpop.permute.xlu0 %18803  ;;  %v19334_v33 = vld [vmem:[#allocation3 + $0x2] sm:$0x3] }
0x5ea4   :  { %v25587_v49 = vpop.eup %25586  ;;  %18806 = vst.msk [vmem:[#allocation3 + $0x8] sm:$0x30] %vm2316_vm5, %v18804_v55  ;;  %v19342_v13 = vmax.f32 %v19334_v33, 0.0 }
0x5ea5   :  { %19324 = vrot.lane.b32.xlu1 %v25587_v49, %s25835_s3  ;;  %v19345_v49 = vmax.f32 %v19337_v11, 0.0 }
0x5ea6   :  { %v19368_v37 = vcombine.low %v19341_v18, %v19342_v13 }
0x5ea7   :  { %v19939_v30 = vpop.permute.xlu0 %19938  ;;  %v19336_v6 = vld [vmem:[#allocation3 + $0x6] sm:$0x3] }
0x5ea8   :  { %19941 = vst.msk [vmem:[#allocation19 - $0x6] sm:$0xc0] %vm2844_vm4, %v19939_v30  ;;  %v19344_v54 = vmax.f32 %v19336_v6, 0.0  ;;  %v19376_v24 = vrot.slane %v19368_v37, %v26041_v21 }
0x5ea9   :  { %16705 = vrot.lane.b32.xlu1 %v27874_v23, %s25822_s20  ;;  %v19352_v23 = vld [vmem:[%s28210_s9 + $0x18] sm:$0xff]  ;;  %s25837_s9 = smov [#allocation17]  }
0x5eaa   :  { %v19416_v28 = vand.u32 4294901760, %v19352_v23  ;;  %s19967_s6 = sshll.u32 %s25837_s9, 4  ;;  %s19968_s6 = int_to_ptr.vmem [resolvable:$true] %s19967_s6 }
0x5eab   :  { %v19339_v55 = vld [vmem:[#allocation3 + $0xc] sm:$0x3]  ;;  %s25742_s22 = scalar_lea.vmem %s19968_s6, 64  ;;  %p25747_p1 = scmp.lt.s32.totalorder %s19968_s6, %s19968_s6 }
0x5eac   :  { %v28126_v44 = vpack.c.bf16 %v19416_v28, %v19413_v45  ;;  %v19518_v58 = vsub.f32 %v19352_v23, %v19416_v28  ;;  %v19347_v31 = vmax.f32 %v19339_v55, 0.0  ;;  %p25743_p0 = scmp.ne.s32.totalorder %s19968_s6, %s25742_s22  ;;  %p25748_p2 = scmp.lt.s32.totalorder %s25742_s22, %s25742_s22 }
0x5ead   :  { %18277 = vrot.lane.b32.xlu1 %v28019_v14, %s25822_s20  ;;  %v28124_v14 = vpack.c.bf16 %v19410_v59, %v19407_v50 }
0x5eae   :  { %v19519_v42 = vand.u32 4294901760, %v19518_v58  ;;  %v24984_v2 = vpack.c.bf16 %v19518_v58, %v19511_v56  ;;  %p25749_p3 = por %p25748_p2, %p25747_p1 }
0x5eaf   :  { %24965 = vmatprep.subr.bf16.mxu1 %v28124_v14 }
0x5eb0   :  { %24967 = vmatpush3.bf16.msra.mxu1 %v28124_v14  ;;  %v19520_v9 = vsub.f32 %v19518_v58, %v19519_v42  ;;  %v25000_v41 = vpack.c.bf16 %v19519_v42, %v19512_v8  ;;  %p25750_p4 = pnand %p25749_p3, %p25743_p0 }
0x5eb1   :  { %24969 = vmatprep.subr.bf16.mxu1 %v28126_v44 }
0x5eb2   :  { %v19521_v10 = vand.u32 4294901760, %v19520_v9 }
0x5eb4   :  { %24971 = vmatpush3.bf16.msra.mxu1 %v28126_v44  ;;  %v24976_v52 = vpack.c.bf16 %v19521_v10, %v19514_v15 }
0x5eb5   :  { %24973 = vmatprep.subr.bf16.mxu1 %v24972_v38 }
0x5f17   :  { %v19325_v19 = vpop.permute.xlu1 %19324 }
0x5f18   :  { %v19327_v25 = vmul.f32 %v25585_v1, %v19325_v19 }
0x5f1a   :  { %19329 = vrot.lane.b32.xlu1 %v19327_v25, %s25822_s20 }
0x5f1b   :  { %v16706_v36 = vpop.permute.xlu1 %16705 }
0x5f1c   :  { %16708 = vst.msk [vmem:[#allocation3] sm:$0x30] %vm2316_vm5, %v16706_v36 }
0x5f1e   :  { %19945 = vrot.lane.b32.xlu1 %v19321_v5, %s25836_s8 }
0x5f1f   :  { %v18278_v4 = vpop.permute.xlu1 %18277 }
0x5f20   :  { %18280 = vst.msk [vmem:[#allocation3 + $0x8] sm:$0xc] %vm1788_vm3, %v18278_v4 }
0x5f23   :  { %v19335_v27 = vld [vmem:[#allocation3 + $0x4] sm:$0x3] }
0x5f24   :  { %v19343_v57 = vmax.f32 %v19335_v27, 0.0 }
0x5f26   :  { %v19369_v43 = vcombine.low %v19343_v57, %v19344_v54 }
0x5f27   :  { %v19338_v40 = vld [vmem:[#allocation3 + $0xa] sm:$0x3] }
0x5f28   :  { %v19383_v26 = vrot.slane %v19369_v43, %v26041_v21  ;;  %v19346_v29 = vmax.f32 %v19338_v40, 0.0 }
0x5f2a   :  { %v19384_v48 = vcombine.low %v19376_v24, %v19383_v26  ;;  %v19385_v32 = vcombine.low %v19345_v49, %v19346_v29 }
0x5f2c   :  { %v19402_v35 = vsel %vm209_vm1, %v19384_v48, 0  ;;  %v19393_v59 = vrot.slane %v19385_v32, %v26041_v21 }
0x5f2d   :  { %v19475_v62 = vand.u32 4294901760, %v19402_v35 }
0x5f2f   :  { %v19476_v12 = vsub.f32 %v19402_v35, %v19475_v62 }
0x5f31   :  { %v19477_v34 = vand.u32 4294901760, %v19476_v12 }
0x5f33   :  { %v19478_v1 = vsub.f32 %v19476_v12, %v19477_v34 }
0x5f35   :  { %v19479_v3 = vand.u32 4294901760, %v19478_v1 }
0x5f37   :  { %23562 = vmatprep.mubr.f32.mxu1 %v19479_v3 }
0x5f8c   :  { %v19330_v63 = vpop.permute.xlu1 %19329 }
0x5f8d   :  { %19332 = vst.msk [vmem:[#allocation3 + $0x8] sm:$0xc0] %vm2844_vm4, %v19330_v63  ;;  %19943 = vst.msk [vmem:[#allocation17 - $0x4] sm:$0xc0] %vm2844_vm4, %v19330_v63 }
0x5f90   :  { %v19946_v5 = vpop.permute.xlu1 %19945 }
0x5f91   :  { %19949 = vst.msk [vmem:[#allocation19 - $0x4] sm:$0xc0] %vm2844_vm4, %v19946_v5 }
0x5f94   :  { %v19340_v30 = vld [vmem:[#allocation3 + $0xe] sm:$0x3] }
0x5f95   :  { %v19348_v46 = vmax.f32 %v19340_v30, 0.0 }
0x5f97   :  { %v19386_v50 = vcombine.low %v19347_v31, %v19348_v46 }
0x5f99   :  { %v19400_v23 = vrot.slane %v19386_v50, %v26041_v21 }
0x5f9b   :  { %v19401_v45 = vcombine.low %v19393_v59, %v19400_v23 }
0x5f9d   :  { %v19404_v28 = vsel %vm209_vm1, %v19401_v45, 0 }
0x5f9e   :  { %v19485_v60 = vand.u32 4294901760, %v19404_v28 }
0x5fa0   :  { %v19486_v20 = vsub.f32 %v19404_v28, %v19485_v60 }
0x5fa2   :  { %v19487_v16 = vand.u32 4294901760, %v19486_v20 }
0x5fa4   :  { %v19488_v17 = vsub.f32 %v19486_v20, %v19487_v16 }
0x5fa6   :  { %v19489_v19 = vand.u32 4294901760, %v19488_v17 }
0x5fa8   :  { %23563 = vmatmul.mubr.f32.vlgmr.msra.gmra.mrb[100].mxu1 %v19489_v19 }
0x5fa9   :  { %24975 = vmatpush3.bf16.msra.mxu1 %v24972_v38  ;;  %23573 = vmatprep.mubr.f32.mxu1 %v19475_v62 }
0x5faa   :  { %24977 = vmatprep.subr.bf16.mxu1 %v24976_v52 }
0x5fad   :  { %24979 = vmatpush3.bf16.msra.mxu1 %v24976_v52 }
0x5fae   :  { %24981 = vmatprep.subr.bf16.mxu1 %v24980_v39 }
0x5fb0   :  { %23574 = vmatmul.mubr.f32.vlgmr.msra.gmra.mrb[100].mxu1 %v19485_v60 }
0x5fb1   :  { %24983 = vmatpush3.bf16.msra.mxu1 %v24980_v39  ;;  %23584 = vmatprep.mubr.f32.mxu1 %v19476_v12 }
0x5fb2   :  { %24985 = vmatprep.subr.bf16.mxu1 %v24984_v2 }
0x5fb5   :  { %24987 = vmatpush3.bf16.msra.mxu1 %v24984_v2 }
0x5fb6   :  { %24989 = vmatprep.subr.bf16.mxu1 %v28124_v14 }
0x5fb8   :  { %23585 = vmatmul.mubr.f32.vlgmr.msra.gmra.mrb[100].mxu1 %v19486_v20 }
0x5fb9   :  { %24991 = vmatpush3.bf16.msra.mxu1 %v28124_v14  ;;  %23595 = vmatprep.mubr.f32.mxu1 %v19477_v34 }
0x5fba   :  { %24993 = vmatprep.subr.bf16.mxu1 %v28126_v44 }
0x5fbd   :  { %24995 = vmatpush3.bf16.msra.mxu1 %v28126_v44 }
0x5fbe   :  { %24997 = vmatprep.subr.bf16.mxu1 %v24996_v0 }
0x5fc0   :  { %23596 = vmatmul.mubr.f32.vlgmr.msra.gmra.mrb[100].mxu1 %v19487_v16 }
0x5fc1   :  { %24999 = vmatpush3.bf16.msra.mxu1 %v24996_v0  ;;  %23606 = vmatprep.mubr.f32.mxu1 %v19475_v62 }
0x5fc2   :  { %25001 = vmatprep.subr.bf16.mxu1 %v25000_v41 }
0x5fc5   :  { %25003 = vmatpush3.bf16.msra.mxu1 %v25000_v41 }
0x5fc6   :  { %25005 = vmatprep.subr.bf16.mxu1 %v28124_v14 }
0x5fc8   :  { %23607 = vmatmul.mubr.f32.vlgmr.msra.gmra.mrb[100].mxu1 %v19485_v60 }
0x5fc9   :  { %25007 = vmatpush3.bf16.msra.mxu1 %v28124_v14  ;;  %23617 = vmatprep.mubr.f32.mxu1 %v19475_v62 }
0x5fca   :  { %25009 = vmatprep.subr.bf16.mxu1 %v28126_v44 }
0x5fcd   :  { %25011 = vmatpush3.bf16.msra.mxu1 %v28126_v44 }
0x5fd0   :  { %23618 = vmatmul.mubr.f32.vlgmr.msra.gmra.mrb[100].mxu1 %v19485_v60 }
0x5fd1   :  { %25753 = shalt.err (!%p25750_p4)
}
0x5fd2   :  { %s25754_s7 = scalar_lea.hbm %s28213_s12, 64 }
0x5fd3   :  { %p25755_p5 = scmp.ne.s32.totalorder %s28213_s12, %s25754_s7  ;;  %p25758_p6 = scmp.lt.u32.totalorder %s25754_s7, %s28213_s12 }
0x5fd5   :  { %p25760_p7 = pnand %p25758_p6, %p25755_p5 }
0x5fd7   :  { %25763 = shalt.err (!%p25760_p7)
}
0x5fd8   :  { %19973 = dma.vmem_to_hbm [thread:$0]  %s19968_s6, 64, %s28213_s12, [#allocation18], %s25822_s20, %s25822_s20, %s25823_s21  }
0x5fd9   :  { %s25838_s5 = smov [#allocation19]  }
0x5fda   :  { %s19979_s16 = sshll.u32 %s25838_s5, 4  ;;  %s19980_s16 = int_to_ptr.vmem [resolvable:$true] %s19979_s16 }
0x5fdb   :  { %s25764_s8 = scalar_lea.vmem %s19980_s16, 64  ;;  %p25769_p9 = scmp.lt.s32.totalorder %s19980_s16, %s19980_s16 }
0x5fdc   :  { %p25765_p8 = scmp.ne.s32.totalorder %s19980_s16, %s25764_s8  ;;  %p25770_p10 = scmp.lt.s32.totalorder %s25764_s8, %s25764_s8 }
0x5fde   :  { %p25771_p11 = por %p25770_p10, %p25769_p9 }
0x5fe0   :  { %p25772_p12 = pnand %p25771_p11, %p25765_p8 }
0x5fe2   :  { %25775 = shalt.err (!%p25772_p12)
}
0x5fe3   :  { %s25776_s27 = scalar_lea.hbm %s28214_s13, 64 }
0x5fe4   :  { %p25777_p13 = scmp.ne.s32.totalorder %s28214_s13, %s25776_s27  ;;  %p25780_p0 = scmp.lt.u32.totalorder %s25776_s27, %s28214_s13 }
0x5fe6   :  { %p25782_p1 = pnand %p25780_p0, %p25777_p13 }
0x5fe8   :  { %25785 = shalt.err (!%p25782_p1)
}
0x5fe9   :  { %19985 = dma.vmem_to_hbm [thread:$0]  %s19980_s16, 64, %s28214_s13, [#allocation18], %s25822_s20, %s25822_s20, %s25823_s21  }
0x5fea   :  { %v20037_v21 = vld [vmem:[%s28211_s10] ss:$0 sm:$0xff]  ;;  %s25839_s22 = smov [#allocation16]  }
0x5feb   :  { %s19955_s4 = sshll.u32 %s25839_s22, 4  ;;  %s19956_s4 = int_to_ptr.vmem [resolvable:$true] %s19955_s4 }
0x5fec   :  { %s25786_s28 = scalar_lea.vmem %s19956_s4, 256  ;;  %p25791_p3 = scmp.lt.s32.totalorder %s19956_s4, %s19956_s4 }
0x5fed   :  { %p25787_p2 = scmp.ne.s32.totalorder %s19956_s4, %s25786_s28  ;;  %p25792_p4 = scmp.lt.s32.totalorder %s25786_s28, %s25786_s28 }
0x5fef   :  { %p25793_p5 = por %p25792_p4, %p25791_p3 }
0x5ff1   :  { %p25794_p6 = pnand %p25793_p5, %p25787_p2 }
0x60a3   :  { %v23619_v14 = vpop.f32.mrb[100].mxu1 }
0x60a4   :  { %v25020_v44 = vadd.f32 %v23619_v14, %v20037_v21  ;;  %v19924_v25 = vpop.f32.mrb[101].mxu1 }
0x60a5   :  { %v25021_v51 = vadd.f32 %v20037_v21, %v19924_v25 }
0x60a6   :  { %19935 = vst [vmem:[#allocation16 + $0x8] sm:$0xff] %v25020_v44 }
0x60a7   :  { %19934 = vst [vmem:[#allocation16] sm:$0xff] %v25021_v51 }
0x60a8   :  { %25797 = shalt.err (!%p25794_p6)
}
0x60a9   :  { %s25798_s10 = scalar_lea.hbm %s28212_s11, 256 }
0x60aa   :  { %p25799_p7 = scmp.ne.s32.totalorder %s28212_s11, %s25798_s10  ;;  %p25802_p8 = scmp.lt.u32.totalorder %s25798_s10, %s28212_s11 }
0x60ac   :  { %p25804_p9 = pnand %p25802_p8, %p25799_p7 }
0x60ae   :  { %25807 = shalt.err (!%p25804_p9)
}
0x60af   :  { %19961 = dma.vmem_to_hbm [thread:$0]  %s19956_s4, 256, %s28212_s11, [#allocation6], %s25824_s1, %s25824_s1, %s25825_s26  }
0x60b0   :  { %25816 = dma.done.wait [#allocation6], 256  }
0x60b1   :  { %25817 = vsyncadd [#allocation6], 4294967040 }
0x60b2   :  { %25818 = dma.done.wait [#allocation18], 128  }
0x60b3   :  { %25819 = vsyncadd [#allocation18], 4294967168 }
0x60b4   :  { %19995 = vsyncpa [#allocation5], 1 }
0x60b5   :  { %19996 = vsyncpa [#allocation8], 1 }
0x60b6   :  { %19997 = vsyncpa [#allocation11], 1 }
0x60b7   :  { %19998 = vsyncpa [#allocation14], 1 }
0x60b8   :  { %19999 = vsyncpa [#allocation6], 1 }
0x60b9   :  { %20000 = vsyncpa [#allocation18], 1 }

</bundles_post_ra>
